<compile_context>
chip_gen: v7x
topology: tpu7x:2x2x1
jax: 0.10.0
libtpu: 0.0.40
codegen_flags: <defaults>
</compile_context>

<pallas_src>
import functools

import jax
import jax.numpy as jnp
from jax.experimental import pallas as pl
from jax.experimental.pallas import tpu as pltpu


# ---------------------------------------------------------------------------
# Fused Pallas kernel: seg_head + BoundaryRefinementModule, one image per step
# ---------------------------------------------------------------------------
def _fused_kernel(xp_ref, wseg_ref, bseg_ref, w1_ref, b1_ref,
                  w2_ref, b2_ref, w3_ref, b3_ref,
                  seg_out_ref, bnd_out_ref,
                  segpad_ref, h1pad_ref,
                  *, H, W, cin, c1, c2):
    HW = H * W
    xp = xp_ref[0]                                          # (H+2, W+2, cin)

    # ---- Stage A: seg-head stand-in, 3x3 conv cin -> 1, no activation (VPU) ----
    acc0 = jnp.zeros((H, W, cin), jnp.float32)
    for k in range(9):
        i, j = divmod(k, 3)
        acc0 = acc0 + xp[i:i + H, j:j + W, :] * wseg_ref[k]          # (H,W,cin)*(cin,)
    seg = jnp.sum(acc0, axis=-1, keepdims=True) + bseg_ref[0]        # (H, W, 1)
    seg_out_ref[0] = seg                                             # segmentation logits

    # ---- Stage B: br_conv1 3x3, 1 -> 64, ReLU (VPU broadcast-FMA over 9 taps) ----
    segpad_ref[...] = jnp.zeros_like(segpad_ref)
    segpad_ref[1:H + 1, 1:W + 1, :] = seg
    acc1 = jnp.zeros((H, W, c1), jnp.float32)
    for k in range(9):
        i, j = divmod(k, 3)
        acc1 = acc1 + segpad_ref[i:i + H, j:j + W, :] * w1_ref[k]    # (H,W,1)*(64,)
    h1 = jnp.maximum(acc1 + b1_ref[...], 0.0)                        # (H, W, 64)

    # ---- Stage C: br_conv2 3x3, 64 -> 128, ReLU (MXU: 9 accumulated matmuls) ----
    h1pad_ref[...] = jnp.zeros_like(h1pad_ref)
    h1pad_ref[1:H + 1, 1:W + 1, :] = h1
    acc2 = jnp.zeros((HW, c2), jnp.float32)
    for k in range(9):
        i, j = divmod(k, 3)
        sl = h1pad_ref[i:i + H, j:j + W, :].reshape(HW, c1)          # (HW, 64)
        acc2 = acc2 + jnp.dot(sl, w2_ref[k],
                              preferred_element_type=jnp.float32)    # (HW, 128)
    h2 = jnp.maximum(acc2 + b2_ref[...], 0.0)                        # (HW, 128)

    # ---- Stage D: br_conv3 1x1, 128 -> 1, sigmoid (VPU mul + lane reduce) ----
    r = jnp.sum(h2 * w3_ref[...], axis=-1, keepdims=True)            # (HW, 1)
    bnd_out_ref[0] = jax.nn.sigmoid(r + b3_ref[0])                   # refined boundary


# ---------------------------------------------------------------------------
# Parameter construction (deterministic, synthetic, PyTorch Conv2d layouts)
# ---------------------------------------------------------------------------
def _conv_params(key, cout, cin, kh, kw):
    kw_key, kb_key = jax.random.split(key)
    fan_in = cin * kh * kw
    scale = 1.0 / jnp.sqrt(jnp.float32(fan_in))
    w = jax.random.uniform(kw_key, (cout, cin, kh, kw), jnp.float32, -scale, scale)
    b = jax.random.uniform(kb_key, (cout,), jnp.float32, -scale, scale)
    return w, b


def init_params(key, in_ch=3):
    keys = jax.random.split(key, 4)
    return {
        # stand-in 1-channel seg head (see TODO at top of file)
        "seg_head": _conv_params(keys[0], 1, in_ch, 3, 3),
        # BoundaryRefinementModule (faithful shapes from the PyTorch __init__)
        "br_conv1": _conv_params(keys[1], 64, 1, 3, 3),
        "br_conv2": _conv_params(keys[2], 128, 64, 3, 3),
        "br_conv3": _conv_params(keys[3], 1, 128, 1, 1),
    }


# ---------------------------------------------------------------------------
# Forward pass mirroring BoundaryAwareSegmentation.forward
# ---------------------------------------------------------------------------
def boundary_aware_segmentation(params, x_nchw):
    N, cin, H, W = x_nchw.shape
    HW = H * W
    c1, c2 = 64, 128

    # Only HBM-side data prep: NCHW -> NHWC + 1-pixel zero pad (no im2col).
    x_nhwc = jnp.transpose(x_nchw, (0, 2, 3, 1))
    xp = jnp.pad(x_nhwc, ((0, 0), (1, 1), (1, 1), (0, 0)))           # (N, H+2, W+2, cin)

    wseg_pt, bseg = params["seg_head"]          # (1, cin, 3, 3), (1,)
    w1_pt, b1 = params["br_conv1"]              # (64, 1, 3, 3), (64,)
    w2_pt, b2 = params["br_conv2"]              # (128, 64, 3, 3), (128,)
    w3_pt, b3 = params["br_conv3"]              # (1, 128, 1, 1), (1,)

    # Repack PyTorch weights into kernel-friendly shapes (tap-major).
    wseg = jnp.transpose(wseg_pt[0], (1, 2, 0)).reshape(9, cin)       # (9, cin)
    w1 = jnp.transpose(w1_pt[:, 0], (1, 2, 0)).reshape(9, c1)         # (9, 64)
    w2 = jnp.transpose(w2_pt, (2, 3, 1, 0)).reshape(9, c1, c2)        # (9, 64, 128)
    w3 = w3_pt.reshape(1, c2)                                         # (1, 128)

    kern = functools.partial(_fused_kernel, H=H, W=W, cin=cin, c1=c1, c2=c2)

    seg_out, bnd_out = pl.pallas_call(
        kern,
        out_shape=(jax.ShapeDtypeStruct((N, H, W, 1), jnp.float32),
                   jax.ShapeDtypeStruct((N, HW, 1), jnp.float32)),
        grid_spec=pltpu.PrefetchScalarGridSpec(
            num_scalar_prefetch=0,
            grid=(N,),
            in_specs=[
                pl.BlockSpec((1, H + 2, W + 2, cin), lambda n: (n, 0, 0, 0)),  # padded x
                pl.BlockSpec((9, cin), lambda n: (0, 0)),                      # wseg
                pl.BlockSpec(memory_space=pltpu.MemorySpace.SMEM),             # bseg
                pl.BlockSpec((9, c1), lambda n: (0, 0)),                       # w1
                pl.BlockSpec((1, c1), lambda n: (0, 0)),                       # b1
                pl.BlockSpec((9, c1, c2), lambda n: (0, 0, 0)),                # w2
                pl.BlockSpec((1, c2), lambda n: (0, 0)),                       # b2
                pl.BlockSpec((1, c2), lambda n: (0, 0)),                       # w3
                pl.BlockSpec(memory_space=pltpu.MemorySpace.SMEM),             # b3
            ],
            out_specs=[
                pl.BlockSpec((1, H, W, 1), lambda n: (n, 0, 0, 0)),            # seg mask
                pl.BlockSpec((1, HW, 1), lambda n: (n, 0, 0)),                 # refined
            ],
            scratch_shapes=[
                pltpu.VMEM((H + 2, W + 2, 1), jnp.float32),    # zero-padded seg
                pltpu.VMEM((H + 2, W + 2, c1), jnp.float32),   # zero-padded h1
            ],
        ),
        compiler_params=pltpu.CompilerParams(
            dimension_semantics=("parallel",),
            vmem_limit_bytes=32 * 1024 * 1024,
        ),
    )(xp, wseg, bseg.astype(jnp.float32), w1, b1.reshape(1, c1),
      w2, b2.reshape(1, c2), w3, b3.astype(jnp.float32))

    # Back to the PyTorch NCHW convention (free metadata reshapes in XLA).
    seg_nchw = seg_out.reshape(N, 1, H, W)
    refined_nchw = bnd_out.reshape(N, 1, H, W)
    return seg_nchw, refined_nchw


if __name__ == "__main__":
    key = jax.random.PRNGKey(0)
    k_param, k_data = jax.random.split(key)

    params = init_params(k_param, in_ch=3)
    x = jax.random.normal(k_data, (2, 3, 16, 16), jnp.float32)   # NCHW input

    seg_mask, refined_boundary = jax.jit(boundary_aware_segmentation)(params, x)
    jax.block_until_ready((seg_mask, refined_boundary))

    assert seg_mask.shape == (2, 1, 16, 16)
    assert refined_boundary.shape == (2, 1, 16, 16)
    print("KERNEL_OK")
</pallas_src>

<mosaic_0001>
module attributes {stable_mosaic.version = 11 : i64} {
  func.func @_fused_kernel(%arg0: i32, %arg1: memref<1x18x18x3xf32, #tpu.memory_space<vmem>>, %arg2: memref<9x3xf32, #tpu.memory_space<vmem>>, %arg3: memref<1xf32, #tpu.memory_space<smem>>, %arg4: memref<9x64xf32, #tpu.memory_space<vmem>>, %arg5: memref<1x64xf32, #tpu.memory_space<vmem>>, %arg6: memref<9x64x128xf32, #tpu.memory_space<vmem>>, %arg7: memref<1x128xf32, #tpu.memory_space<vmem>>, %arg8: memref<1x128xf32, #tpu.memory_space<vmem>>, %arg9: memref<1xf32, #tpu.memory_space<smem>>, %arg10: memref<1x16x16x1xf32, #tpu.memory_space<vmem>>, %arg11: memref<1x256x1xf32, #tpu.memory_space<vmem>>, %arg12: memref<18x18x1xf32, #tpu.memory_space<vmem>>, %arg13: memref<18x18x64xf32, #tpu.memory_space<vmem>>) attributes {dimension_semantics = [#tpu.dimension_semantics<parallel>], iteration_bounds = array<i64: 2>, scalar_prefetch = 0 : i64, scratch_operands = 2 : i64, tpu.core_type = #tpu.core_type<tc>, window_params = [{transform_indices = @transform_0, window_bounds = array<i64: 1, 18, 18, 3>}, {pipeline_mode = #tpu.pipeline_mode<synchronous>, transform_indices = @transform_1, window_bounds = array<i64: 9, 3>}, {transform_indices = @transform_2, window_bounds = array<i64: 1>}, {pipeline_mode = #tpu.pipeline_mode<synchronous>, transform_indices = @transform_3, window_bounds = array<i64: 9, 64>}, {pipeline_mode = #tpu.pipeline_mode<synchronous>, transform_indices = @transform_4, window_bounds = array<i64: 1, 64>}, {pipeline_mode = #tpu.pipeline_mode<synchronous>, transform_indices = @transform_5, window_bounds = array<i64: 9, 64, 128>}, {pipeline_mode = #tpu.pipeline_mode<synchronous>, transform_indices = @transform_6, window_bounds = array<i64: 1, 128>}, {pipeline_mode = #tpu.pipeline_mode<synchronous>, transform_indices = @transform_7, window_bounds = array<i64: 1, 128>}, {transform_indices = @transform_8, window_bounds = array<i64: 1>}, {transform_indices = @transform_9, window_bounds = array<i64: 1, 16, 16, 1>}, {transform_indices = @transform_10, window_bounds = array<i64: 1, 256, 1>}]} {
    %c0 = arith.constant 0 : index
    %c0_0 = arith.constant 0 : index
    %c0_1 = arith.constant 0 : index
    %c0_2 = arith.constant 0 : index
    %0 = vector.load %arg1[%c0, %c0_0, %c0_1, %c0_2] : memref<1x18x18x3xf32, #tpu.memory_space<vmem>>, vector<1x18x18x3xf32>
    %1 = vector.shape_cast %0 : vector<1x18x18x3xf32> to vector<18x18x3xf32>
    %cst = arith.constant 0.000000e+00 : f32
    %2 = vector.broadcast %cst : f32 to vector<16x16x3xf32>
    %3 = vector.extract_strided_slice %1 {offsets = [0, 0, 0], sizes = [16, 16, 3], strides = [1, 1, 1]} : vector<18x18x3xf32> to vector<16x16x3xf32>
    %c0_3 = arith.constant 0 : index
    %c0_4 = arith.constant 0 : index
    %4 = vector.load %arg2[%c0_3, %c0_4] : memref<9x3xf32, #tpu.memory_space<vmem>>, vector<1x3xf32>
    %5 = vector.shape_cast %4 : vector<1x3xf32> to vector<3xf32>
    %6 = vector.shape_cast %5 : vector<3xf32> to vector<1x1x3xf32>
    %7 = vector.broadcast %6 : vector<1x1x3xf32> to vector<16x16x3xf32>
    %8 = arith.mulf %3, %7 : vector<16x16x3xf32>
    %9 = arith.addf %2, %8 : vector<16x16x3xf32>
    %10 = vector.extract_strided_slice %1 {offsets = [0, 1, 0], sizes = [16, 16, 3], strides = [1, 1, 1]} : vector<18x18x3xf32> to vector<16x16x3xf32>
    %c1 = arith.constant 1 : index
    %c0_5 = arith.constant 0 : index
    %11 = vector.load %arg2[%c1, %c0_5] : memref<9x3xf32, #tpu.memory_space<vmem>>, vector<1x3xf32>
    %12 = vector.shape_cast %11 : vector<1x3xf32> to vector<3xf32>
    %13 = vector.shape_cast %12 : vector<3xf32> to vector<1x1x3xf32>
    %14 = vector.broadcast %13 : vector<1x1x3xf32> to vector<16x16x3xf32>
    %15 = arith.mulf %10, %14 : vector<16x16x3xf32>
    %16 = arith.addf %9, %15 : vector<16x16x3xf32>
    %17 = vector.extract_strided_slice %1 {offsets = [0, 2, 0], sizes = [16, 16, 3], strides = [1, 1, 1]} : vector<18x18x3xf32> to vector<16x16x3xf32>
    %c2 = arith.constant 2 : index
    %c0_6 = arith.constant 0 : index
    %18 = vector.load %arg2[%c2, %c0_6] : memref<9x3xf32, #tpu.memory_space<vmem>>, vector<1x3xf32>
    %19 = vector.shape_cast %18 : vector<1x3xf32> to vector<3xf32>
    %20 = vector.shape_cast %19 : vector<3xf32> to vector<1x1x3xf32>
    %21 = vector.broadcast %20 : vector<1x1x3xf32> to vector<16x16x3xf32>
    %22 = arith.mulf %17, %21 : vector<16x16x3xf32>
    %23 = arith.addf %16, %22 : vector<16x16x3xf32>
    %24 = vector.extract_strided_slice %1 {offsets = [1, 0, 0], sizes = [16, 16, 3], strides = [1, 1, 1]} : vector<18x18x3xf32> to vector<16x16x3xf32>
    %c3 = arith.constant 3 : index
    %c0_7 = arith.constant 0 : index
    %25 = vector.load %arg2[%c3, %c0_7] : memref<9x3xf32, #tpu.memory_space<vmem>>, vector<1x3xf32>
    %26 = vector.shape_cast %25 : vector<1x3xf32> to vector<3xf32>
    %27 = vector.shape_cast %26 : vector<3xf32> to vector<1x1x3xf32>
    %28 = vector.broadcast %27 : vector<1x1x3xf32> to vector<16x16x3xf32>
    %29 = arith.mulf %24, %28 : vector<16x16x3xf32>
    %30 = arith.addf %23, %29 : vector<16x16x3xf32>
    %31 = vector.extract_strided_slice %1 {offsets = [1, 1, 0], sizes = [16, 16, 3], strides = [1, 1, 1]} : vector<18x18x3xf32> to vector<16x16x3xf32>
    %c4 = arith.constant 4 : index
    %c0_8 = arith.constant 0 : index
    %32 = vector.load %arg2[%c4, %c0_8] : memref<9x3xf32, #tpu.memory_space<vmem>>, vector<1x3xf32>
    %33 = vector.shape_cast %32 : vector<1x3xf32> to vector<3xf32>
    %34 = vector.shape_cast %33 : vector<3xf32> to vector<1x1x3xf32>
    %35 = vector.broadcast %34 : vector<1x1x3xf32> to vector<16x16x3xf32>
    %36 = arith.mulf %31, %35 : vector<16x16x3xf32>
    %37 = arith.addf %30, %36 : vector<16x16x3xf32>
    %38 = vector.extract_strided_slice %1 {offsets = [1, 2, 0], sizes = [16, 16, 3], strides = [1, 1, 1]} : vector<18x18x3xf32> to vector<16x16x3xf32>
    %c5 = arith.constant 5 : index
    %c0_9 = arith.constant 0 : index
    %39 = vector.load %arg2[%c5, %c0_9] : memref<9x3xf32, #tpu.memory_space<vmem>>, vector<1x3xf32>
    %40 = vector.shape_cast %39 : vector<1x3xf32> to vector<3xf32>
    %41 = vector.shape_cast %40 : vector<3xf32> to vector<1x1x3xf32>
    %42 = vector.broadcast %41 : vector<1x1x3xf32> to vector<16x16x3xf32>
    %43 = arith.mulf %38, %42 : vector<16x16x3xf32>
    %44 = arith.addf %37, %43 : vector<16x16x3xf32>
    %45 = vector.extract_strided_slice %1 {offsets = [2, 0, 0], sizes = [16, 16, 3], strides = [1, 1, 1]} : vector<18x18x3xf32> to vector<16x16x3xf32>
    %c6 = arith.constant 6 : index
    %c0_10 = arith.constant 0 : index
    %46 = vector.load %arg2[%c6, %c0_10] : memref<9x3xf32, #tpu.memory_space<vmem>>, vector<1x3xf32>
    %47 = vector.shape_cast %46 : vector<1x3xf32> to vector<3xf32>
    %48 = vector.shape_cast %47 : vector<3xf32> to vector<1x1x3xf32>
    %49 = vector.broadcast %48 : vector<1x1x3xf32> to vector<16x16x3xf32>
    %50 = arith.mulf %45, %49 : vector<16x16x3xf32>
    %51 = arith.addf %44, %50 : vector<16x16x3xf32>
    %52 = vector.extract_strided_slice %1 {offsets = [2, 1, 0], sizes = [16, 16, 3], strides = [1, 1, 1]} : vector<18x18x3xf32> to vector<16x16x3xf32>
    %c7 = arith.constant 7 : index
    %c0_11 = arith.constant 0 : index
    %53 = vector.load %arg2[%c7, %c0_11] : memref<9x3xf32, #tpu.memory_space<vmem>>, vector<1x3xf32>
    %54 = vector.shape_cast %53 : vector<1x3xf32> to vector<3xf32>
    %55 = vector.shape_cast %54 : vector<3xf32> to vector<1x1x3xf32>
    %56 = vector.broadcast %55 : vector<1x1x3xf32> to vector<16x16x3xf32>
    %57 = arith.mulf %52, %56 : vector<16x16x3xf32>
    %58 = arith.addf %51, %57 : vector<16x16x3xf32>
    %59 = vector.extract_strided_slice %1 {offsets = [2, 2, 0], sizes = [16, 16, 3], strides = [1, 1, 1]} : vector<18x18x3xf32> to vector<16x16x3xf32>
    %c8 = arith.constant 8 : index
    %c0_12 = arith.constant 0 : index
    %60 = vector.load %arg2[%c8, %c0_12] : memref<9x3xf32, #tpu.memory_space<vmem>>, vector<1x3xf32>
    %61 = vector.shape_cast %60 : vector<1x3xf32> to vector<3xf32>
    %62 = vector.shape_cast %61 : vector<3xf32> to vector<1x1x3xf32>
    %63 = vector.broadcast %62 : vector<1x1x3xf32> to vector<16x16x3xf32>
    %64 = arith.mulf %59, %63 : vector<16x16x3xf32>
    %65 = arith.addf %58, %64 : vector<16x16x3xf32>
    %cst_13 = arith.constant dense<0.000000e+00> : vector<16x16xf32>
    %66 = vector.multi_reduction <add>, %65, %cst_13 [2] : vector<16x16x3xf32> to vector<16x16xf32>
    %67 = vector.shape_cast %66 : vector<16x16xf32> to vector<16x16x1xf32>
    %c0_14 = arith.constant 0 : index
    %68 = memref.load %arg3[%c0_14] : memref<1xf32, #tpu.memory_space<smem>>
    %69 = vector.broadcast %68 : f32 to vector<16x16x1xf32>
    %70 = arith.addf %67, %69 : vector<16x16x1xf32>
    %c0_15 = arith.constant 0 : index
    %c0_16 = arith.constant 0 : index
    %c0_17 = arith.constant 0 : index
    %c0_18 = arith.constant 0 : index
    %71 = vector.load %arg10[%c0_15, %c0_16, %c0_17, %c0_18] : memref<1x16x16x1xf32, #tpu.memory_space<vmem>>, vector<1x16x16x1xf32>
    %72 = vector.shape_cast %71 : vector<1x16x16x1xf32> to vector<16x16x1xf32>
    %73 = vector.shape_cast %70 : vector<16x16x1xf32> to vector<1x16x16x1xf32>
    tpu.vector_store %arg10[%c0_15, %c0_16, %c0_17, %c0_18], %73 {strides = array<i32>} : memref<1x16x16x1xf32, #tpu.memory_space<vmem>>, vector<1x16x16x1xf32>,
    %cst_19 = arith.constant 0.000000e+00 : f32
    %74 = vector.broadcast %cst_19 : f32 to vector<18x18x1xf32>
    %c0_20 = arith.constant 0 : index
    %c0_21 = arith.constant 0 : index
    %c0_22 = arith.constant 0 : index
    %75 = vector.load %arg12[%c0_20, %c0_21, %c0_22] : memref<18x18x1xf32, #tpu.memory_space<vmem>>, vector<18x18x1xf32>
    tpu.vector_store %arg12[%c0_20, %c0_21, %c0_22], %74 {strides = array<i32>} : memref<18x18x1xf32, #tpu.memory_space<vmem>>, vector<18x18x1xf32>,
    %c1_23 = arith.constant 1 : index
    %c1_24 = arith.constant 1 : index
    %c0_25 = arith.constant 0 : index
    %76 = vector.load %arg12[%c1_23, %c1_24, %c0_25] : memref<18x18x1xf32, #tpu.memory_space<vmem>>, vector<16x16x1xf32>
    tpu.vector_store %arg12[%c1_23, %c1_24, %c0_25], %70 {strides = array<i32>} : memref<18x18x1xf32, #tpu.memory_space<vmem>>, vector<16x16x1xf32>,
    %cst_26 = arith.constant 0.000000e+00 : f32
    %77 = vector.broadcast %cst_26 : f32 to vector<16x16x64xf32>
    %c0_27 = arith.constant 0 : index
    %c0_28 = arith.constant 0 : index
    %c0_29 = arith.constant 0 : index
    %78 = vector.load %arg12[%c0_27, %c0_28, %c0_29] : memref<18x18x1xf32, #tpu.memory_space<vmem>>, vector<16x16x1xf32>
    %c0_30 = arith.constant 0 : index
    %c0_31 = arith.constant 0 : index
    %79 = vector.load %arg4[%c0_30, %c0_31] : memref<9x64xf32, #tpu.memory_space<vmem>>, vector<1x64xf32>
    %80 = vector.shape_cast %79 : vector<1x64xf32> to vector<64xf32>
    %81 = vector.shape_cast %80 : vector<64xf32> to vector<1x1x64xf32>
    %82 = vector.broadcast %78 : vector<16x16x1xf32> to vector<16x16x64xf32>
    %83 = vector.broadcast %81 : vector<1x1x64xf32> to vector<16x16x64xf32>
    %84 = arith.mulf %82, %83 : vector<16x16x64xf32>
    %85 = arith.addf %77, %84 : vector<16x16x64xf32>
    %c0_32 = arith.constant 0 : index
    %c1_33 = arith.constant 1 : index
    %c0_34 = arith.constant 0 : index
    %86 = vector.load %arg12[%c0_32, %c1_33, %c0_34] : memref<18x18x1xf32, #tpu.memory_space<vmem>>, vector<16x16x1xf32>
    %c1_35 = arith.constant 1 : index
    %c0_36 = arith.constant 0 : index
    %87 = vector.load %arg4[%c1_35, %c0_36] : memref<9x64xf32, #tpu.memory_space<vmem>>, vector<1x64xf32>
    %88 = vector.shape_cast %87 : vector<1x64xf32> to vector<64xf32>
    %89 = vector.shape_cast %88 : vector<64xf32> to vector<1x1x64xf32>
    %90 = vector.broadcast %86 : vector<16x16x1xf32> to vector<16x16x64xf32>
    %91 = vector.broadcast %89 : vector<1x1x64xf32> to vector<16x16x64xf32>
    %92 = arith.mulf %90, %91 : vector<16x16x64xf32>
    %93 = arith.addf %85, %92 : vector<16x16x64xf32>
    %c0_37 = arith.constant 0 : index
    %c2_38 = arith.constant 2 : index
    %c0_39 = arith.constant 0 : index
    %94 = vector.load %arg12[%c0_37, %c2_38, %c0_39] : memref<18x18x1xf32, #tpu.memory_space<vmem>>, vector<16x16x1xf32>
    %c2_40 = arith.constant 2 : index
    %c0_41 = arith.constant 0 : index
    %95 = vector.load %arg4[%c2_40, %c0_41] : memref<9x64xf32, #tpu.memory_space<vmem>>, vector<1x64xf32>
    %96 = vector.shape_cast %95 : vector<1x64xf32> to vector<64xf32>
    %97 = vector.shape_cast %96 : vector<64xf32> to vector<1x1x64xf32>
    %98 = vector.broadcast %94 : vector<16x16x1xf32> to vector<16x16x64xf32>
    %99 = vector.broadcast %97 : vector<1x1x64xf32> to vector<16x16x64xf32>
    %100 = arith.mulf %98, %99 : vector<16x16x64xf32>
    %101 = arith.addf %93, %100 : vector<16x16x64xf32>
    %c1_42 = arith.constant 1 : index
    %c0_43 = arith.constant 0 : index
    %c0_44 = arith.constant 0 : index
    %102 = vector.load %arg12[%c1_42, %c0_43, %c0_44] : memref<18x18x1xf32, #tpu.memory_space<vmem>>, vector<16x16x1xf32>
    %c3_45 = arith.constant 3 : index
    %c0_46 = arith.constant 0 : index
    %103 = vector.load %arg4[%c3_45, %c0_46] : memref<9x64xf32, #tpu.memory_space<vmem>>, vector<1x64xf32>
    %104 = vector.shape_cast %103 : vector<1x64xf32> to vector<64xf32>
    %105 = vector.shape_cast %104 : vector<64xf32> to vector<1x1x64xf32>
    %106 = vector.broadcast %102 : vector<16x16x1xf32> to vector<16x16x64xf32>
    %107 = vector.broadcast %105 : vector<1x1x64xf32> to vector<16x16x64xf32>
    %108 = arith.mulf %106, %107 : vector<16x16x64xf32>
    %109 = arith.addf %101, %108 : vector<16x16x64xf32>
    %c1_47 = arith.constant 1 : index
    %c1_48 = arith.constant 1 : index
    %c0_49 = arith.constant 0 : index
    %110 = vector.load %arg12[%c1_47, %c1_48, %c0_49] : memref<18x18x1xf32, #tpu.memory_space<vmem>>, vector<16x16x1xf32>
    %c4_50 = arith.constant 4 : index
    %c0_51 = arith.constant 0 : index
    %111 = vector.load %arg4[%c4_50, %c0_51] : memref<9x64xf32, #tpu.memory_space<vmem>>, vector<1x64xf32>
    %112 = vector.shape_cast %111 : vector<1x64xf32> to vector<64xf32>
    %113 = vector.shape_cast %112 : vector<64xf32> to vector<1x1x64xf32>
    %114 = vector.broadcast %110 : vector<16x16x1xf32> to vector<16x16x64xf32>
    %115 = vector.broadcast %113 : vector<1x1x64xf32> to vector<16x16x64xf32>
    %116 = arith.mulf %114, %115 : vector<16x16x64xf32>
    %117 = arith.addf %109, %116 : vector<16x16x64xf32>
    %c1_52 = arith.constant 1 : index
    %c2_53 = arith.constant 2 : index
    %c0_54 = arith.constant 0 : index
    %118 = vector.load %arg12[%c1_52, %c2_53, %c0_54] : memref<18x18x1xf32, #tpu.memory_space<vmem>>, vector<16x16x1xf32>
    %c5_55 = arith.constant 5 : index
    %c0_56 = arith.constant 0 : index
    %119 = vector.load %arg4[%c5_55, %c0_56] : memref<9x64xf32, #tpu.memory_space<vmem>>, vector<1x64xf32>
    %120 = vector.shape_cast %119 : vector<1x64xf32> to vector<64xf32>
    %121 = vector.shape_cast %120 : vector<64xf32> to vector<1x1x64xf32>
    %122 = vector.broadcast %118 : vector<16x16x1xf32> to vector<16x16x64xf32>
    %123 = vector.broadcast %121 : vector<1x1x64xf32> to vector<16x16x64xf32>
    %124 = arith.mulf %122, %123 : vector<16x16x64xf32>
    %125 = arith.addf %117, %124 : vector<16x16x64xf32>
    %c2_57 = arith.constant 2 : index
    %c0_58 = arith.constant 0 : index
    %c0_59 = arith.constant 0 : index
    %126 = vector.load %arg12[%c2_57, %c0_58, %c0_59] : memref<18x18x1xf32, #tpu.memory_space<vmem>>, vector<16x16x1xf32>
    %c6_60 = arith.constant 6 : index
    %c0_61 = arith.constant 0 : index
    %127 = vector.load %arg4[%c6_60, %c0_61] : memref<9x64xf32, #tpu.memory_space<vmem>>, vector<1x64xf32>
    %128 = vector.shape_cast %127 : vector<1x64xf32> to vector<64xf32>
    %129 = vector.shape_cast %128 : vector<64xf32> to vector<1x1x64xf32>
    %130 = vector.broadcast %126 : vector<16x16x1xf32> to vector<16x16x64xf32>
    %131 = vector.broadcast %129 : vector<1x1x64xf32> to vector<16x16x64xf32>
    %132 = arith.mulf %130, %131 : vector<16x16x64xf32>
    %133 = arith.addf %125, %132 : vector<16x16x64xf32>
    %c2_62 = arith.constant 2 : index
    %c1_63 = arith.constant 1 : index
    %c0_64 = arith.constant 0 : index
    %134 = vector.load %arg12[%c2_62, %c1_63, %c0_64] : memref<18x18x1xf32, #tpu.memory_space<vmem>>, vector<16x16x1xf32>
    %c7_65 = arith.constant 7 : index
    %c0_66 = arith.constant 0 : index
    %135 = vector.load %arg4[%c7_65, %c0_66] : memref<9x64xf32, #tpu.memory_space<vmem>>, vector<1x64xf32>
    %136 = vector.shape_cast %135 : vector<1x64xf32> to vector<64xf32>
    %137 = vector.shape_cast %136 : vector<64xf32> to vector<1x1x64xf32>
    %138 = vector.broadcast %134 : vector<16x16x1xf32> to vector<16x16x64xf32>
    %139 = vector.broadcast %137 : vector<1x1x64xf32> to vector<16x16x64xf32>
    %140 = arith.mulf %138, %139 : vector<16x16x64xf32>
    %141 = arith.addf %133, %140 : vector<16x16x64xf32>
    %c2_67 = arith.constant 2 : index
    %c2_68 = arith.constant 2 : index
    %c0_69 = arith.constant 0 : index
    %142 = vector.load %arg12[%c2_67, %c2_68, %c0_69] : memref<18x18x1xf32, #tpu.memory_space<vmem>>, vector<16x16x1xf32>
    %c8_70 = arith.constant 8 : index
    %c0_71 = arith.constant 0 : index
    %143 = vector.load %arg4[%c8_70, %c0_71] : memref<9x64xf32, #tpu.memory_space<vmem>>, vector<1x64xf32>
    %144 = vector.shape_cast %143 : vector<1x64xf32> to vector<64xf32>
    %145 = vector.shape_cast %144 : vector<64xf32> to vector<1x1x64xf32>
    %146 = vector.broadcast %142 : vector<16x16x1xf32> to vector<16x16x64xf32>
    %147 = vector.broadcast %145 : vector<1x1x64xf32> to vector<16x16x64xf32>
    %148 = arith.mulf %146, %147 : vector<16x16x64xf32>
    %149 = arith.addf %141, %148 : vector<16x16x64xf32>
    %c0_72 = arith.constant 0 : index
    %c0_73 = arith.constant 0 : index
    %150 = vector.load %arg5[%c0_72, %c0_73] : memref<1x64xf32, #tpu.memory_space<vmem>>, vector<1x64xf32>
    %151 = vector.shape_cast %150 : vector<1x64xf32> to vector<1x1x64xf32>
    %152 = vector.broadcast %151 : vector<1x1x64xf32> to vector<16x16x64xf32>
    %153 = arith.addf %149, %152 : vector<16x16x64xf32>
    %cst_74 = arith.constant 0.000000e+00 : f32
    %154 = vector.broadcast %cst_74 : f32 to vector<16x16x64xf32>
    %155 = arith.maximumf %153, %154 : vector<16x16x64xf32>
    %cst_75 = arith.constant 0.000000e+00 : f32
    %156 = vector.broadcast %cst_75 : f32 to vector<18x18x64xf32>
    %c0_76 = arith.constant 0 : index
    %c0_77 = arith.constant 0 : index
    %c0_78 = arith.constant 0 : index
    %157 = vector.load %arg13[%c0_76, %c0_77, %c0_78] : memref<18x18x64xf32, #tpu.memory_space<vmem>>, vector<18x18x64xf32>
    tpu.vector_store %arg13[%c0_76, %c0_77, %c0_78], %156 {strides = array<i32>} : memref<18x18x64xf32, #tpu.memory_space<vmem>>, vector<18x18x64xf32>,
    %c1_79 = arith.constant 1 : index
    %c1_80 = arith.constant 1 : index
    %c0_81 = arith.constant 0 : index
    %158 = vector.load %arg13[%c1_79, %c1_80, %c0_81] : memref<18x18x64xf32, #tpu.memory_space<vmem>>, vector<16x16x64xf32>
    tpu.vector_store %arg13[%c1_79, %c1_80, %c0_81], %155 {strides = array<i32>} : memref<18x18x64xf32, #tpu.memory_space<vmem>>, vector<16x16x64xf32>,
    %cst_82 = arith.constant 0.000000e+00 : f32
    %159 = vector.broadcast %cst_82 : f32 to vector<256x128xf32>
    %c0_83 = arith.constant 0 : index
    %c0_84 = arith.constant 0 : index
    %c0_85 = arith.constant 0 : index
    %160 = vector.load %arg13[%c0_83, %c0_84, %c0_85] : memref<18x18x64xf32, #tpu.memory_space<vmem>>, vector<16x16x64xf32>
    %161 = vector.shape_cast %160 : vector<16x16x64xf32> to vector<256x64xf32>
    %c0_86 = arith.constant 0 : index
    %c0_87 = arith.constant 0 : index
    %c0_88 = arith.constant 0 : index
    %162 = vector.load %arg6[%c0_86, %c0_87, %c0_88] : memref<9x64x128xf32, #tpu.memory_space<vmem>>, vector<1x64x128xf32>
    %163 = vector.shape_cast %162 : vector<1x64x128xf32> to vector<64x128xf32>
    %cst_89 = arith.constant dense<0.000000e+00> : vector<256x128xf32>
    %164 = tpu.matmul %161, %163, %cst_89 {dimension_numbers = #tpu.dot_dimension_numbers<[1], [0], [0], [1], [0, 0, 1, 1], [], []>} : vector<256x64xf32>, vector<64x128xf32>, vector<256x128xf32> -> vector<256x128xf32>
    %165 = arith.addf %159, %164 : vector<256x128xf32>
    %c0_90 = arith.constant 0 : index
    %c1_91 = arith.constant 1 : index
    %c0_92 = arith.constant 0 : index
    %166 = vector.load %arg13[%c0_90, %c1_91, %c0_92] : memref<18x18x64xf32, #tpu.memory_space<vmem>>, vector<16x16x64xf32>
    %167 = vector.shape_cast %166 : vector<16x16x64xf32> to vector<256x64xf32>
    %c1_93 = arith.constant 1 : index
    %c0_94 = arith.constant 0 : index
    %c0_95 = arith.constant 0 : index
    %168 = vector.load %arg6[%c1_93, %c0_94, %c0_95] : memref<9x64x128xf32, #tpu.memory_space<vmem>>, vector<1x64x128xf32>
    %169 = vector.shape_cast %168 : vector<1x64x128xf32> to vector<64x128xf32>
    %cst_96 = arith.constant dense<0.000000e+00> : vector<256x128xf32>
    %170 = tpu.matmul %167, %169, %cst_96 {dimension_numbers = #tpu.dot_dimension_numbers<[1], [0], [0], [1], [0, 0, 1, 1], [], []>} : vector<256x64xf32>, vector<64x128xf32>, vector<256x128xf32> -> vector<256x128xf32>
    %171 = arith.addf %165, %170 : vector<256x128xf32>
    %c0_97 = arith.constant 0 : index
    %c2_98 = arith.constant 2 : index
    %c0_99 = arith.constant 0 : index
    %172 = vector.load %arg13[%c0_97, %c2_98, %c0_99] : memref<18x18x64xf32, #tpu.memory_space<vmem>>, vector<16x16x64xf32>
    %173 = vector.shape_cast %172 : vector<16x16x64xf32> to vector<256x64xf32>
    %c2_100 = arith.constant 2 : index
    %c0_101 = arith.constant 0 : index
    %c0_102 = arith.constant 0 : index
    %174 = vector.load %arg6[%c2_100, %c0_101, %c0_102] : memref<9x64x128xf32, #tpu.memory_space<vmem>>, vector<1x64x128xf32>
    %175 = vector.shape_cast %174 : vector<1x64x128xf32> to vector<64x128xf32>
    %cst_103 = arith.constant dense<0.000000e+00> : vector<256x128xf32>
    %176 = tpu.matmul %173, %175, %cst_103 {dimension_numbers = #tpu.dot_dimension_numbers<[1], [0], [0], [1], [0, 0, 1, 1], [], []>} : vector<256x64xf32>, vector<64x128xf32>, vector<256x128xf32> -> vector<256x128xf32>
    %177 = arith.addf %171, %176 : vector<256x128xf32>
    %c1_104 = arith.constant 1 : index
    %c0_105 = arith.constant 0 : index
    %c0_106 = arith.constant 0 : index
    %178 = vector.load %arg13[%c1_104, %c0_105, %c0_106] : memref<18x18x64xf32, #tpu.memory_space<vmem>>, vector<16x16x64xf32>
    %179 = vector.shape_cast %178 : vector<16x16x64xf32> to vector<256x64xf32>
    %c3_107 = arith.constant 3 : index
    %c0_108 = arith.constant 0 : index
    %c0_109 = arith.constant 0 : index
    %180 = vector.load %arg6[%c3_107, %c0_108, %c0_109] : memref<9x64x128xf32, #tpu.memory_space<vmem>>, vector<1x64x128xf32>
    %181 = vector.shape_cast %180 : vector<1x64x128xf32> to vector<64x128xf32>
    %cst_110 = arith.constant dense<0.000000e+00> : vector<256x128xf32>
    %182 = tpu.matmul %179, %181, %cst_110 {dimension_numbers = #tpu.dot_dimension_numbers<[1], [0], [0], [1], [0, 0, 1, 1], [], []>} : vector<256x64xf32>, vector<64x128xf32>, vector<256x128xf32> -> vector<256x128xf32>
    %183 = arith.addf %177, %182 : vector<256x128xf32>
    %c1_111 = arith.constant 1 : index
    %c1_112 = arith.constant 1 : index
    %c0_113 = arith.constant 0 : index
    %184 = vector.load %arg13[%c1_111, %c1_112, %c0_113] : memref<18x18x64xf32, #tpu.memory_space<vmem>>, vector<16x16x64xf32>
    %185 = vector.shape_cast %184 : vector<16x16x64xf32> to vector<256x64xf32>
    %c4_114 = arith.constant 4 : index
    %c0_115 = arith.constant 0 : index
    %c0_116 = arith.constant 0 : index
    %186 = vector.load %arg6[%c4_114, %c0_115, %c0_116] : memref<9x64x128xf32, #tpu.memory_space<vmem>>, vector<1x64x128xf32>
    %187 = vector.shape_cast %186 : vector<1x64x128xf32> to vector<64x128xf32>
    %cst_117 = arith.constant dense<0.000000e+00> : vector<256x128xf32>
    %188 = tpu.matmul %185, %187, %cst_117 {dimension_numbers = #tpu.dot_dimension_numbers<[1], [0], [0], [1], [0, 0, 1, 1], [], []>} : vector<256x64xf32>, vector<64x128xf32>, vector<256x128xf32> -> vector<256x128xf32>
    %189 = arith.addf %183, %188 : vector<256x128xf32>
    %c1_118 = arith.constant 1 : index
    %c2_119 = arith.constant 2 : index
    %c0_120 = arith.constant 0 : index
    %190 = vector.load %arg13[%c1_118, %c2_119, %c0_120] : memref<18x18x64xf32, #tpu.memory_space<vmem>>, vector<16x16x64xf32>
    %191 = vector.shape_cast %190 : vector<16x16x64xf32> to vector<256x64xf32>
    %c5_121 = arith.constant 5 : index
    %c0_122 = arith.constant 0 : index
    %c0_123 = arith.constant 0 : index
    %192 = vector.load %arg6[%c5_121, %c0_122, %c0_123] : memref<9x64x128xf32, #tpu.memory_space<vmem>>, vector<1x64x128xf32>
    %193 = vector.shape_cast %192 : vector<1x64x128xf32> to vector<64x128xf32>
    %cst_124 = arith.constant dense<0.000000e+00> : vector<256x128xf32>
    %194 = tpu.matmul %191, %193, %cst_124 {dimension_numbers = #tpu.dot_dimension_numbers<[1], [0], [0], [1], [0, 0, 1, 1], [], []>} : vector<256x64xf32>, vector<64x128xf32>, vector<256x128xf32> -> vector<256x128xf32>
    %195 = arith.addf %189, %194 : vector<256x128xf32>
    %c2_125 = arith.constant 2 : index
    %c0_126 = arith.constant 0 : index
    %c0_127 = arith.constant 0 : index
    %196 = vector.load %arg13[%c2_125, %c0_126, %c0_127] : memref<18x18x64xf32, #tpu.memory_space<vmem>>, vector<16x16x64xf32>
    %197 = vector.shape_cast %196 : vector<16x16x64xf32> to vector<256x64xf32>
    %c6_128 = arith.constant 6 : index
    %c0_129 = arith.constant 0 : index
    %c0_130 = arith.constant 0 : index
    %198 = vector.load %arg6[%c6_128, %c0_129, %c0_130] : memref<9x64x128xf32, #tpu.memory_space<vmem>>, vector<1x64x128xf32>
    %199 = vector.shape_cast %198 : vector<1x64x128xf32> to vector<64x128xf32>
    %cst_131 = arith.constant dense<0.000000e+00> : vector<256x128xf32>
    %200 = tpu.matmul %197, %199, %cst_131 {dimension_numbers = #tpu.dot_dimension_numbers<[1], [0], [0], [1], [0, 0, 1, 1], [], []>} : vector<256x64xf32>, vector<64x128xf32>, vector<256x128xf32> -> vector<256x128xf32>
    %201 = arith.addf %195, %200 : vector<256x128xf32>
    %c2_132 = arith.constant 2 : index
    %c1_133 = arith.constant 1 : index
    %c0_134 = arith.constant 0 : index
    %202 = vector.load %arg13[%c2_132, %c1_133, %c0_134] : memref<18x18x64xf32, #tpu.memory_space<vmem>>, vector<16x16x64xf32>
    %203 = vector.shape_cast %202 : vector<16x16x64xf32> to vector<256x64xf32>
    %c7_135 = arith.constant 7 : index
    %c0_136 = arith.constant 0 : index
    %c0_137 = arith.constant 0 : index
    %204 = vector.load %arg6[%c7_135, %c0_136, %c0_137] : memref<9x64x128xf32, #tpu.memory_space<vmem>>, vector<1x64x128xf32>
    %205 = vector.shape_cast %204 : vector<1x64x128xf32> to vector<64x128xf32>
    %cst_138 = arith.constant dense<0.000000e+00> : vector<256x128xf32>
    %206 = tpu.matmul %203, %205, %cst_138 {dimension_numbers = #tpu.dot_dimension_numbers<[1], [0], [0], [1], [0, 0, 1, 1], [], []>} : vector<256x64xf32>, vector<64x128xf32>, vector<256x128xf32> -> vector<256x128xf32>
    %207 = arith.addf %201, %206 : vector<256x128xf32>
    %c2_139 = arith.constant 2 : index
    %c2_140 = arith.constant 2 : index
    %c0_141 = arith.constant 0 : index
    %208 = vector.load %arg13[%c2_139, %c2_140, %c0_141] : memref<18x18x64xf32, #tpu.memory_space<vmem>>, vector<16x16x64xf32>
    %209 = vector.shape_cast %208 : vector<16x16x64xf32> to vector<256x64xf32>
    %c8_142 = arith.constant 8 : index
    %c0_143 = arith.constant 0 : index
    %c0_144 = arith.constant 0 : index
    %210 = vector.load %arg6[%c8_142, %c0_143, %c0_144] : memref<9x64x128xf32, #tpu.memory_space<vmem>>, vector<1x64x128xf32>
    %211 = vector.shape_cast %210 : vector<1x64x128xf32> to vector<64x128xf32>
    %cst_145 = arith.constant dense<0.000000e+00> : vector<256x128xf32>
    %212 = tpu.matmul %209, %211, %cst_145 {dimension_numbers = #tpu.dot_dimension_numbers<[1], [0], [0], [1], [0, 0, 1, 1], [], []>} : vector<256x64xf32>, vector<64x128xf32>, vector<256x128xf32> -> vector<256x128xf32>
    %213 = arith.addf %207, %212 : vector<256x128xf32>
    %c0_146 = arith.constant 0 : index
    %c0_147 = arith.constant 0 : index
    %214 = vector.load %arg7[%c0_146, %c0_147] : memref<1x128xf32, #tpu.memory_space<vmem>>, vector<1x128xf32>
    %215 = vector.broadcast %214 : vector<1x128xf32> to vector<256x128xf32>
    %216 = arith.addf %213, %215 : vector<256x128xf32>
    %cst_148 = arith.constant 0.000000e+00 : f32
    %217 = vector.broadcast %cst_148 : f32 to vector<256x128xf32>
    %218 = arith.maximumf %216, %217 : vector<256x128xf32>
    %c0_149 = arith.constant 0 : index
    %c0_150 = arith.constant 0 : index
    %219 = vector.load %arg8[%c0_149, %c0_150] : memref<1x128xf32, #tpu.memory_space<vmem>>, vector<1x128xf32>
    %220 = vector.broadcast %219 : vector<1x128xf32> to vector<256x128xf32>
    %221 = arith.mulf %218, %220 : vector<256x128xf32>
    %cst_151 = arith.constant dense<0.000000e+00> : vector<256xf32>
    %222 = vector.multi_reduction <add>, %221, %cst_151 [1] : vector<256x128xf32> to vector<256xf32>
    %223 = vector.shape_cast %222 : vector<256xf32> to vector<256x1xf32>
    %c0_152 = arith.constant 0 : index
    %224 = memref.load %arg9[%c0_152] : memref<1xf32, #tpu.memory_space<smem>>
    %225 = vector.broadcast %224 : f32 to vector<256x1xf32>
    %226 = arith.addf %223, %225 : vector<256x1xf32>
    %227 = arith.negf %226 : vector<256x1xf32>
    %228 = math.exp %227 : vector<256x1xf32>
    %cst_153 = arith.constant 1.000000e+00 : f32
    %229 = vector.broadcast %cst_153 : f32 to vector<256x1xf32>
    %230 = arith.addf %229, %228 : vector<256x1xf32>
    %231 = arith.divf %229, %230 : vector<256x1xf32>
    %c0_154 = arith.constant 0 : index
    %c0_155 = arith.constant 0 : index
    %c0_156 = arith.constant 0 : index
    %232 = vector.load %arg11[%c0_154, %c0_155, %c0_156] : memref<1x256x1xf32, #tpu.memory_space<vmem>>, vector<1x256x1xf32>
    %233 = vector.shape_cast %232 : vector<1x256x1xf32> to vector<256x1xf32>
    %234 = vector.shape_cast %231 : vector<256x1xf32> to vector<1x256x1xf32>
    tpu.vector_store %arg11[%c0_154, %c0_155, %c0_156], %234 {strides = array<i32>} : memref<1x256x1xf32, #tpu.memory_space<vmem>>, vector<1x256x1xf32>,
    return
  }
  func.func @transform_0(%arg0: i32) -> (i32, i32, i32, i32) {
    %c0_i32 = arith.constant 0 : i32
    %c0_i32_0 = arith.constant 0 : i32
    %c0_i32_1 = arith.constant 0 : i32
    %c0_i32_2 = arith.constant 0 : i32
    return %arg0, %c0_i32, %c0_i32_0, %c0_i32_1 : i32, i32, i32, i32
  }
  func.func @transform_1(%arg0: i32) -> (i32, i32) {
    %c0_i32 = arith.constant 0 : i32
    %c0_i32_0 = arith.constant 0 : i32
    %c0_i32_1 = arith.constant 0 : i32
    return %c0_i32, %c0_i32_0 : i32, i32
  }
  func.func @transform_2(%arg0: i32) -> i32 {
    %c0_i32 = arith.constant 0 : i32
    %c0_i32_0 = arith.constant 0 : i32
    return %c0_i32 : i32
  }
  func.func @transform_3(%arg0: i32) -> (i32, i32) {
    %c0_i32 = arith.constant 0 : i32
    %c0_i32_0 = arith.constant 0 : i32
    %c0_i32_1 = arith.constant 0 : i32
    return %c0_i32, %c0_i32_0 : i32, i32
  }
  func.func @transform_4(%arg0: i32) -> (i32, i32) {
    %c0_i32 = arith.constant 0 : i32
    %c0_i32_0 = arith.constant 0 : i32
    %c0_i32_1 = arith.constant 0 : i32
    return %c0_i32, %c0_i32_0 : i32, i32
  }
  func.func @transform_5(%arg0: i32) -> (i32, i32, i32) {
    %c0_i32 = arith.constant 0 : i32
    %c0_i32_0 = arith.constant 0 : i32
    %c0_i32_1 = arith.constant 0 : i32
    %c0_i32_2 = arith.constant 0 : i32
    return %c0_i32, %c0_i32_0, %c0_i32_1 : i32, i32, i32
  }
  func.func @transform_6(%arg0: i32) -> (i32, i32) {
    %c0_i32 = arith.constant 0 : i32
    %c0_i32_0 = arith.constant 0 : i32
    %c0_i32_1 = arith.constant 0 : i32
    return %c0_i32, %c0_i32_0 : i32, i32
  }
  func.func @transform_7(%arg0: i32) -> (i32, i32) {
    %c0_i32 = arith.constant 0 : i32
    %c0_i32_0 = arith.constant 0 : i32
    %c0_i32_1 = arith.constant 0 : i32
    return %c0_i32, %c0_i32_0 : i32, i32
  }
  func.func @transform_8(%arg0: i32) -> i32 {
    %c0_i32 = arith.constant 0 : i32
    %c0_i32_0 = arith.constant 0 : i32
    return %c0_i32 : i32
  }
  func.func @transform_9(%arg0: i32) -> (i32, i32, i32, i32) {
    %c0_i32 = arith.constant 0 : i32
    %c0_i32_0 = arith.constant 0 : i32
    %c0_i32_1 = arith.constant 0 : i32
    %c0_i32_2 = arith.constant 0 : i32
    return %arg0, %c0_i32, %c0_i32_0, %c0_i32_1 : i32, i32, i32, i32
  }
  func.func @transform_10(%arg0: i32) -> (i32, i32, i32) {
    %c0_i32 = arith.constant 0 : i32
    %c0_i32_0 = arith.constant 0 : i32
    %c0_i32_1 = arith.constant 0 : i32
    return %arg0, %c0_i32, %c0_i32_0 : i32, i32, i32
  }
}

</mosaic_0001>

<bundles_post_ra>
// kernel: boundary_aware_segmentation.1
= control target key start
LH: loop header
LB: loop body
LE: loop exit
PB: predicated region body
PF: predicated region fallthrough
CT: control target
= control target key end

     0   :  { %s10871_s17 = smov 0   ;;  %s15185_s0 = inlined_call_operand.vmem [shape: f32[2,18,18,3], index: 0, kind: input, shape index: {}]   ;;  %s15186_s1 = inlined_call_operand.vmem [shape: f32[9,3], index: 1, kind: input, shape index: {}]   ;;  %s15187_s2 = inlined_call_operand.<no memory space> [shape: f32[1], index: 2, kind: input, shape index: {}]   ;;  %s15188_s3 = inlined_call_operand.vmem [shape: f32[9,64], index: 3, kind: input, shape index: {}]   ;;  %s15189_s4 = inlined_call_operand.vmem [shape: f32[1,64], index: 4, kind: input, shape index: {}]   ;;  %s15190_s5 = inlined_call_operand.vmem [shape: f32[9,64,128], index: 5, kind: input, shape index: {}]   ;;  %s15191_s6 = inlined_call_operand.vmem [shape: f32[1,128], index: 6, kind: input, shape index: {}]   ;;  %s15192_s7 = inlined_call_operand.vmem [shape: f32[1,128], index: 7, kind: input, shape index: {}]   ;;  %s15193_s8 = inlined_call_operand.<no memory space> [shape: f32[1], index: 8, kind: input, shape index: {}]   ;;  %s15194_s9 = inlined_call_operand.vmem [shape: f32[2,16,16,1], index: 9, kind: output, shape index: {0}]   ;;  %s15195_s10 = inlined_call_operand.vmem [shape: f32[2,256,1], index: 10, kind: output, shape index: {1}]  }
   0x1   :  { %16 = sst [smem:[#allocation4]] %s15187_s2 }
   0x2   :  { %17 = sst [smem:[#allocation5]] %s15193_s8 }
   0x3 LB: > { %s8872_s18 = sadd.s32 4294967295, %s10806_s17   ;;  %p8876_p0 = scmp.ge.s32.totalorder %s10806_s17, 1  ;;  %s10806_s17 = sphi %s10871_s17, %s23_s17  }
   0x4   : > { %p317_p1 = scmp.lt.s32.totalorder %s10806_s17, 3 }
   0x6   : > { %p318_p2 = pnand %p8876_p0, %p317_p1 }
   0x8   : > { %321 = sbr.rel (%p318_p2) target bundleno = 1706 (0x6aa), region = 56 }
   0xf   : > { %p360_p3 = scmp.lt.s32.totalorder %s8872_s18, 1  ;;  %v10885_v0 = vld [vmem:[%s15186_s1 + $0x1] ss:$0 sm:$0xff]  ;;  %v10890_v1 = vld [vmem:[%s15186_s1 + $0x2] ss:$0 sm:$0xff]  ;;  %vm599_vm0 = vcmask 1046528  }
  0x10   : > { %v10900_v2 = vld [vmem:[%s15186_s1] ss:$0 sm:$0xff]  ;;  %v10905_v3 = vld [vmem:[%s15186_s1 + $0x4] ss:$0 sm:$0xff]  ;;  %v10910_v4 = vld [vmem:[%s15186_s1 + $0x5] ss:$0 sm:$0xff] }
  0x11   : > { %s15391_s18 = smov (!%p360_p3, %s8872_s18), 1  ;;  %vm845_vm1 = vcmask 1045504   ;;  %v10944_v15 = vld [vmem:[%s15186_s1 + $0x3] ss:$0 sm:$0xff]  ;;  %v10955_v18 = vld [vmem:[%s15186_s1 + $0x7] ss:$0 sm:$0xff] }
  0x12   : > { %s10635_s2 = smul.u32 432, %s15391_s18  ;;  %v10963_v23 = vld [vmem:[%s15186_s1 + $0x6] ss:$0 sm:$0xff]  ;;  %v10977_v29 = vld [vmem:[%s15186_s1 + $0x8] ss:$0 sm:$0xff]  ;;  %vm2108_vm2 = vcmask 23552  }
  0x13   : > { %vm2239_vm3 = vcmask 7168   ;;  %vm2274_vm4 = vcmask 1024   ;;  %vm4781_vm5 = vcmask 523264   ;;  %vm4784_vm6 = vcmask 517120   ;;  %s8526_s11 = sld [smem:[#allocation5]] }
  0x14   : > { %s10895_s24 = scalar_lea.vmem %s15185_s0, %s10635_s2  ;;  %s12508_s2 = sld [smem:[#allocation4]] }
  0x15   : > { %v10913_v5 = vld [vmem:[%s10895_s24 + $0x18] sm:$0xff]  ;;  %v10916_v6 = vld [vmem:[%s10895_s24 + $0x20] sm:$0xff]  ;;  %v10919_v7 = vld [vmem:[%s10895_s24 + $0x30] sm:$0xff] }
  0x16   : > { %v10922_v8 = vld [vmem:[%s10895_s24 + $0x38] sm:$0xff]  ;;  %v506_v9 = vmul.f32 %v10885_v0, %v10913_v5  ;;  %v10928_v10 = vmul.f32 %v10885_v0, %v10916_v6  ;;  %v752_v11 = vmul.f32 %v10890_v1, %v10913_v5  ;;  %v10933_v12 = vld [vmem:[%s10895_s24 + $0x48] sm:$0xff]  ;;  %v436_v13 = vmul.f32 %v10900_v2, %v10913_v5  ;;  %v10966_v24 = vld [vmem:[%s10895_s24 + $0x50] sm:$0xff] }
  0x17   : > { %v10939_v14 = vmul.f32 %v10890_v1, %v10916_v6  ;;  %v1067_v16 = vmul.f32 %v10905_v3, %v10919_v7  ;;  %v10950_v17 = vmul.f32 %v10905_v3, %v10922_v8  ;;  %v1312_v22 = vmul.f32 %v10910_v4, %v10919_v7  ;;  %v375_v34 = vld [vmem:[%s10895_s24] sm:$0xff]  ;;  %v10994_v39 = vld [vmem:[%s10895_s24 + $0x8] sm:$0xff] }
  0x18   : > { %v605_v19 = vrot.slane %v506_v9, 1  ;;  %v606_v20 = vrot.slane %v10928_v10, 1  ;;  %v851_v21 = vrot.slane %v752_v11, 2  ;;  %v10972_v28 = vmul.f32 %v10910_v4, %v10922_v8 }
  0x19   : > { %v852_v25 = vrot.slane %v10939_v14, 2  ;;  %v1165_v26 = vrot.slane %v1067_v16, 1  ;;  %v1166_v27 = vrot.slane %v10950_v17, 1  ;;  %v997_v31 = vmul.f32 %v10944_v15, %v10919_v7 }
  0x1a   : > { %v607_v30 = vsel %vm599_vm0, %v605_v19, %v606_v20  ;;  %v1410_v32 = vrot.slane %v1312_v22, 2  ;;  %v1626_v33 = vmul.f32 %v10955_v18, %v10933_v12  ;;  %v1411_v37 = vrot.slane %v10972_v28, 2 }
  0x1b   : > { %v714_v35 = vadd.f32 %v607_v30, %v436_v13  ;;  %v853_v36 = vsel %vm845_vm1, %v851_v21, %v852_v25  ;;  %v1556_v38 = vmul.f32 %v10963_v23, %v10933_v12  ;;  %v10998_v40 = vmul.f32 %v10955_v18, %v10966_v24 }
  0x1c   : > { %v1724_v41 = vrot.slane %v1626_v33, 1  ;;  %v1871_v42 = vmul.f32 %v10977_v29, %v10933_v12  ;;  %v11004_v43 = vmul.f32 %v10977_v29, %v10966_v24  ;;  %v1167_v45 = vsel %vm599_vm0, %v1165_v26, %v1166_v27 }
  0x1d   : > { %v960_v44 = vadd.f32 %v853_v36, %v714_v35  ;;  %v1412_v46 = vsel %vm845_vm1, %v1410_v32, %v1411_v37  ;;  %v503_v47 = vmul.f32 %v10885_v0, %v375_v34  ;;  %v1725_v48 = vrot.slane %v10998_v40, 1 }
  0x1e   : > { %v1969_v49 = vrot.slane %v1871_v42, 2  ;;  %v434_v50 = vmul.f32 %v10900_v2, %v375_v34  ;;  %v11017_v51 = vmul.f32 %v10885_v0, %v10994_v39  ;;  %v749_v54 = vmul.f32 %v10890_v1, %v375_v34 }
  0x1f   : > { %v1029_v52 = vadd.f32 %v997_v31, %v960_v44  ;;  %v600_v53 = vrot.slane %v503_v47, 1  ;;  %v11022_v55 = vmul.f32 %v10890_v1, %v10994_v39  ;;  %v1726_v56 = vsel %vm599_vm0, %v1724_v41, %v1725_v48  ;;  %v380_v41 = vld [vmem:[%s10895_s24 + $0x28] sm:$0x3] }
  0x20   : > { %v1970_v57 = vrot.slane %v11004_v43, 2  ;;  %v601_v58 = vrot.slane %v11017_v51, 1  ;;  %v995_v59 = vmul.f32 %v10944_v15, %v10913_v5  ;;  %v846_v61 = vrot.slane %v749_v54, 2 }
  0x21   : > { %v1274_v60 = vadd.f32 %v1167_v45, %v1029_v52  ;;  %v847_v62 = vrot.slane %v11022_v55, 2  ;;  %v1064_v63 = vmul.f32 %v10905_v3, %v10913_v5  ;;  %v11039_v11 = vmul.f32 %v10905_v3, %v10916_v6 }
  0x22   : > { %v602_v9 = vsel %vm599_vm0, %v600_v53, %v601_v58  ;;  %v1309_v13 = vmul.f32 %v10910_v4, %v10913_v5  ;;  %v11045_v16 = vmul.f32 %v10910_v4, %v10916_v6  ;;  %v1971_v30 = vsel %vm845_vm1, %v1969_v49, %v1970_v57 }
  0x23   : > { %v1519_v19 = vadd.f32 %v1412_v46, %v1274_v60  ;;  %v712_v21 = vadd.f32 %v602_v9, %v434_v50  ;;  %v848_v22 = vsel %vm845_vm1, %v846_v61, %v847_v62  ;;  %v1160_v26 = vrot.slane %v1064_v63, 1  ;;  %v11080_v9 = vld [vmem:[%s10895_s24 + $0x40] sm:$0x3] }
  0x24   : > { %v1161_v31 = vrot.slane %v11039_v11, 1  ;;  %v1405_v32 = vrot.slane %v1309_v13, 2  ;;  %v1406_v5 = vrot.slane %v11045_v16, 2  ;;  %v1623_v35 = vmul.f32 %v10955_v18, %v10919_v7 }
  0x25   : > { %v1588_v33 = vadd.f32 %v1556_v38, %v1519_v19  ;;  %v958_v34 = vadd.f32 %v848_v22, %v712_v21  ;;  %v11059_v36 = vmul.f32 %v10955_v18, %v10922_v8  ;;  %v1554_v44 = vmul.f32 %v10963_v23, %v10919_v7 }
  0x26   : > { %v1162_v42 = vsel %vm599_vm0, %v1160_v26, %v1161_v31  ;;  %v1868_v38 = vmul.f32 %v10977_v29, %v10919_v7  ;;  %v11071_v45 = vmul.f32 %v10977_v29, %v10922_v8  ;;  %v1719_v49 = vrot.slane %v1623_v35, 1 }
  0x27   : > { %v1833_v46 = vadd.f32 %v1726_v56, %v1588_v33  ;;  %v1027_v47 = vadd.f32 %v995_v59, %v958_v34  ;;  %v1720_v50 = vrot.slane %v11059_v36, 1  ;;  %v1407_v52 = vsel %vm845_vm1, %v1405_v32, %v1406_v5  ;;  %v11095_v32 = vld [vmem:[%s10895_s24 + $0x58] sm:$0x3] }
  0x28   : > { %v1964_v53 = vrot.slane %v1868_v38, 2  ;;  %v1965_v54 = vrot.slane %v11071_v45, 2  ;;  %v508_v60 = vmul.f32 %v10885_v0, %v380_v41  ;;  %v437_v56 = vmul.f32 %v10900_v2, %v10916_v6 }
  0x29   : > { %v2078_v61 = vadd.f32 %v1971_v30, %v1833_v46  ;;  %v1272_v63 = vadd.f32 %v1162_v42, %v1027_v47  ;;  %v754_v59 = vmul.f32 %v10890_v1, %v380_v41  ;;  %v1721_v13 = vsel %vm599_vm0, %v1719_v49, %v1720_v50  ;;  %v377_v47 = vld [vmem:[%s10895_s24 + $0x10] sm:$0x3] }
  0x2a   : > { %v1966_v19 = vsel %vm845_vm1, %v1964_v53, %v1965_v54  ;;  %v608_v21 = vrot.slane %v508_v60, 1  ;;  %v1069_v22 = vmul.f32 %v10905_v3, %v11080_v9  ;;  %v1314_v34 = vmul.f32 %v10910_v4, %v11080_v9 }
  0x2b   : > { %v2115_v26 = vsel %vm2108_vm2, %v2078_v61, 0.0  ;;  %v1517_v30 = vadd.f32 %v1407_v52, %v1272_v63  ;;  %v854_v33 = vrot.slane %v754_v59, 2  ;;  %v998_v42 = vmul.f32 %v10944_v15, %v10922_v8 }
  0x2c   : > { %2116 = vadd.xlane.f32.xlu1 %v2115_v26  ;;  %v609_v35 = vsel %vm599_vm0, %v606_v20, %v608_v21  ;;  %v1168_v38 = vrot.slane %v1069_v22, 1  ;;  %v1628_v46 = vmul.f32 %v10955_v18, %v11095_v32  ;;  %v1413_v60 = vrot.slane %v1314_v34, 2 }
  0x2d   : > { %v1586_v49 = vadd.f32 %v1554_v44, %v1517_v30  ;;  %v715_v52 = vadd.f32 %v609_v35, %v437_v56  ;;  %v855_v53 = vsel %vm845_vm1, %v852_v25, %v854_v33  ;;  %v1557_v20 = vmul.f32 %v10963_v23, %v10966_v24 }
  0x2e   : > { %v1169_v10 = vsel %vm599_vm0, %v1166_v27, %v1168_v38  ;;  %v1727_v61 = vrot.slane %v1628_v46, 1  ;;  %v1873_v63 = vmul.f32 %v10977_v29, %v11095_v32  ;;  %v435_v44 = vmul.f32 %v10900_v2, %v10994_v39 }
  0x2f   : > { %v1831_v59 = vadd.f32 %v1721_v13, %v1586_v49  ;;  %v961_v21 = vadd.f32 %v855_v53, %v715_v52  ;;  %v505_v14 = vmul.f32 %v10885_v0, %v377_v47  ;;  %v1414_v17 = vsel %vm845_vm1, %v1411_v37, %v1413_v60 }
  0x30   : > { %v1728_v25 = vsel %vm599_vm0, %v1725_v48, %v1727_v61  ;;  %v1972_v27 = vrot.slane %v1873_v63, 2  ;;  %v751_v56 = vmul.f32 %v10890_v1, %v377_v47  ;;  %v1066_v30 = vmul.f32 %v10905_v3, %v380_v41 }
  0x31   : > { %v2076_v22 = vadd.f32 %v1966_v19, %v1831_v59  ;;  %v1030_v26 = vadd.f32 %v998_v42, %v961_v21  ;;  %v603_v13 = vrot.slane %v505_v14, 1  ;;  %v996_v28 = vmul.f32 %v10944_v15, %v10916_v6 }
  0x32   : > { %v1973_v39 = vsel %vm845_vm1, %v1970_v57, %v1972_v27  ;;  %v849_v33 = vrot.slane %v751_v56, 2  ;;  %v1311_v37 = vmul.f32 %v10910_v4, %v380_v41  ;;  %v1163_v34 = vrot.slane %v1066_v30, 1 }
  0x33   : > { %v2109_v40 = vsel %vm2108_vm2, %v2076_v22, 0.0  ;;  %v1275_v48 = vadd.f32 %v1169_v10, %v1030_v26  ;;  %v604_v19 = vsel %vm599_vm0, %v601_v58, %v603_v13  ;;  %v1625_v6 = vmul.f32 %v10955_v18, %v11080_v9  ;;  %v11186_v22 = vld [vmem:[%s10895_s24 + $0x68] sm:$0xff] }
  0x34   : > { %2110 = vadd.xlane.f32.xlu0 %v2109_v40  ;;  %v713_v35 = vadd.f32 %v604_v19, %v435_v44  ;;  %v850_v43 = vsel %vm845_vm1, %v847_v62, %v849_v33  ;;  %v1408_v57 = vrot.slane %v1311_v37, 2  ;;  %v1164_v41 = vsel %vm599_vm0, %v1161_v31, %v1163_v34 }
  0x35   : > { %v1520_v42 = vadd.f32 %v1414_v17, %v1275_v48  ;;  %v1555_v51 = vmul.f32 %v10963_v23, %v10922_v8  ;;  %v1870_v58 = vmul.f32 %v10977_v29, %v11080_v9  ;;  %v1722_v46 = vrot.slane %v1625_v6, 1 }
  0x36   : > { %v959_v38 = vadd.f32 %v850_v43, %v713_v35  ;;  %v439_v55 = vmul.f32 %v10900_v2, %v10922_v8  ;;  %v11154_v62 = vmul.f32 %v10885_v0, %v10922_v8  ;;  %v1409_v11 = vsel %vm845_vm1, %v1406_v5, %v1408_v57 }
  0x37   : > { %v1589_v47 = vadd.f32 %v1557_v20, %v1520_v42  ;;  %v511_v31 = vmul.f32 %v10885_v0, %v11080_v9  ;;  %v11163_v49 = vmul.f32 %v10890_v1, %v10922_v8  ;;  %v1967_v53 = vrot.slane %v1870_v58, 2 }
  0x38   : > { %v1028_v52 = vadd.f32 %v996_v28, %v959_v38  ;;  %v611_v60 = vrot.slane %v11154_v62, 1  ;;  %v757_v10 = vmul.f32 %v10890_v1, %v11080_v9  ;;  %v1723_v16 = vsel %vm599_vm0, %v1720_v50, %v1722_v46  ;;  %v11195_v28 = vld [vmem:[%s10895_s24 + $0x70] sm:$0x3] }
  0x39   : > { %v1834_v61 = vadd.f32 %v1728_v25, %v1589_v47  ;;  %v613_v5 = vrot.slane %v511_v31, 1  ;;  %v857_v20 = vrot.slane %v11163_v49, 2  ;;  %v1000_v8 = vmul.f32 %v10944_v15, %v10966_v24 }
  0x3a   : > { %v1273_v63 = vadd.f32 %v1164_v41, %v1028_v52  ;;  %v859_v59 = vrot.slane %v757_v10, 2  ;;  %v1071_v21 = vmul.f32 %v10905_v3, %v10966_v24  ;;  %v1072_v36 = vmul.f32 %v10905_v3, %v11095_v32  ;;  %v11226_v10 = vld [vmem:[%s10895_s24 + $0x60] sm:$0xff] }
  0x3b   : > { %v2079_v44 = vadd.f32 %v1973_v39, %v1834_v61  ;;  %v614_v9 = vsel %vm599_vm0, %v611_v60, %v613_v5  ;;  %v11181_v50 = vmul.f32 %v10910_v4, %v10966_v24  ;;  %v1317_v13 = vmul.f32 %v10910_v4, %v11095_v32 }
  0x3c   : > { %v1518_v14 = vadd.f32 %v1409_v11, %v1273_v63  ;;  %v717_v17 = vadd.f32 %v614_v9, %v439_v55  ;;  %v860_v25 = vsel %vm845_vm1, %v857_v20, %v859_v59  ;;  %v1171_v27 = vrot.slane %v1071_v21, 1 }
  0x3d   : > { %v2118_v56 = vsel %vm2108_vm2, %v2079_v44, 0.0  ;;  %v1173_v26 = vrot.slane %v1072_v36, 1  ;;  %v1416_v30 = vrot.slane %v11181_v50, 2  ;;  %v1968_v33 = vsel %vm845_vm1, %v1965_v54, %v1967_v53 }
  0x3e   : > { %2119 = vadd.xlane.f32.xlu1 %v2118_v56  ;;  %v1587_v39 = vadd.f32 %v1555_v51, %v1518_v14  ;;  %v963_v37 = vadd.f32 %v860_v25, %v717_v17  ;;  %v11199_v40 = vmul.f32 %v10955_v18, %v11186_v22  ;;  %v1418_v19 = vrot.slane %v1317_v13, 2 }
  0x3f   : > { %v1174_v48 = vsel %vm599_vm0, %v1171_v27, %v1173_v26  ;;  %v1631_v34 = vmul.f32 %v10955_v18, %v11195_v28  ;;  %v11206_v35 = vmul.f32 %v10977_v29, %v11186_v22  ;;  %v1876_v57 = vmul.f32 %v10977_v29, %v11195_v28 }
  0x40   : > { %v1832_v45 = vadd.f32 %v1723_v16, %v1587_v39  ;;  %v1032_v43 = vadd.f32 %v1000_v8, %v963_v37  ;;  %v1730_v54 = vrot.slane %v11199_v40, 1  ;;  %v1419_v6 = vsel %vm845_vm1, %v1416_v30, %v1418_v19 }
  0x41   : > { %v1559_v42 = vmul.f32 %v10963_v23, %v11186_v22  ;;  %v1732_v41 = vrot.slane %v1631_v34, 1  ;;  %v1975_v38 = vrot.slane %v11206_v35, 2  ;;  %v509_v46 = vmul.f32 %v10885_v0, %v10919_v7 }
  0x42   : > { %v2077_v51 = vadd.f32 %v1968_v33, %v1832_v45  ;;  %v1277_v58 = vadd.f32 %v1174_v48, %v1032_v43  ;;  %v1977_v55 = vrot.slane %v1876_v57, 2  ;;  %v438_v62 = vmul.f32 %v10900_v2, %v10919_v7 }
  0x43   : > { %v755_v47 = vmul.f32 %v10890_v1, %v10919_v7  ;;  %v1070_v11 = vmul.f32 %v10905_v3, %v10933_v12  ;;  %v1733_v52 = vsel %vm599_vm0, %v1730_v54, %v1732_v41  ;;  %v610_v53 = vrot.slane %v509_v46, 1 }
  0x44   : > { %v2112_v31 = vsel %vm2108_vm2, %v2077_v51, 0.0  ;;  %v1522_v49 = vadd.f32 %v1419_v6, %v1277_v58  ;;  %v999_v16 = vmul.f32 %v10944_v15, %v10933_v12  ;;  %v1315_v7 = vmul.f32 %v10910_v4, %v10933_v12 }
  0x45   : > { %2113 = vadd.xlane.f32.xlu0 %v2112_v31  ;;  %v856_v61 = vrot.slane %v755_v47, 2  ;;  %v1170_v5 = vrot.slane %v1070_v11, 1  ;;  %v612_v59 = vsel %vm599_vm0, %v610_v53, %v611_v60  ;;  %v1629_v8 = vmul.f32 %v10955_v18, %v11226_v10  ;;  %v11272_v47 = vld [vmem:[%s10895_s24 + $0x80] sm:$0xff] }
  0x46   : > { %v1591_v63 = vadd.f32 %v1559_v42, %v1522_v49  ;;  %v1874_v21 = vmul.f32 %v10977_v29, %v11226_v10  ;;  %v1978_v44 = vsel %vm845_vm1, %v1975_v38, %v1977_v55  ;;  %v716_v9 = vadd.f32 %v612_v59, %v438_v62  ;;  %v11276_v49 = vld [vmem:[%s10895_s24 + $0x88] sm:$0x3] }
  0x47   : > { %v858_v36 = vsel %vm845_vm1, %v856_v61, %v857_v20  ;;  %v1415_v50 = vrot.slane %v1315_v7, 2  ;;  %v1172_v17 = vsel %vm599_vm0, %v1170_v5, %v1171_v27  ;;  %v1558_v60 = vmul.f32 %v10963_v23, %v11226_v10 }
  0x48   : > { %v1836_v14 = vadd.f32 %v1733_v52, %v1591_v63  ;;  %v1729_v25 = vrot.slane %v1629_v8, 1  ;;  %v962_v56 = vadd.f32 %v858_v36, %v716_v9  ;;  %v1974_v26 = vrot.slane %v1874_v21, 2 }
  0x49   : > { %v11246_v13 = vmul.f32 %v10885_v0, %v10966_v24  ;;  %v514_v39 = vmul.f32 %v10885_v0, %v11095_v32  ;;  %v1417_v20 = vsel %vm845_vm1, %v1415_v50, %v1416_v30  ;;  %v441_v37 = vmul.f32 %v10900_v2, %v10966_v24 }
  0x4a   : > { %v2081_v33 = vadd.f32 %v1978_v44, %v1836_v14  ;;  %v759_v27 = vmul.f32 %v10890_v1, %v10966_v24  ;;  %v1031_v40 = vadd.f32 %v999_v16, %v962_v56  ;;  %v760_v34 = vmul.f32 %v10890_v1, %v11095_v32 }
  0x4b   : > { %v616_v48 = vrot.slane %v11246_v13, 1  ;;  %v618_v19 = vrot.slane %v514_v39, 1  ;;  %v1002_v30 = vmul.f32 %v10944_v15, %v11186_v22  ;;  %v1074_v57 = vmul.f32 %v10905_v3, %v11186_v22 }
  0x4c   : > { %v2124_v45 = vsel %vm2108_vm2, %v2081_v33, 0.0  ;;  %v862_v43 = vrot.slane %v759_v27, 2  ;;  %v1276_v24 = vadd.f32 %v1172_v17, %v1031_v40  ;;  %v864_v42 = vrot.slane %v760_v34, 2  ;;  %v11312_v40 = vld [vmem:[%s10895_s24 + $0x78] sm:$0xff] }
  0x4d   : > { %2125 = vadd.xlane.f32.xlu1 %v2124_v45  ;;  %v619_v6 = vsel %vm599_vm0, %v616_v48, %v618_v19  ;;  %v1075_v41 = vmul.f32 %v10905_v3, %v11195_v28  ;;  %v1176_v51 = vrot.slane %v1074_v57, 1  ;;  %v1319_v58 = vmul.f32 %v10910_v4, %v11186_v22 }
  0x4e   : > { %v719_v32 = vadd.f32 %v619_v6, %v441_v37  ;;  %v1320_v46 = vmul.f32 %v10910_v4, %v11195_v28  ;;  %v1521_v55 = vadd.f32 %v1417_v20, %v1276_v24  ;;  %v1731_v62 = vsel %vm599_vm0, %v1729_v25, %v1730_v54 }
  0x4f   : > { %v865_v11 = vsel %vm845_vm1, %v862_v43, %v864_v42  ;;  %v1178_v31 = vrot.slane %v1075_v41, 1  ;;  %v1421_v53 = vrot.slane %v1319_v58, 2  ;;  %v11280_v16 = vmul.f32 %v10955_v18, %v11272_v47 }
  0x50   : > { %v965_v52 = vadd.f32 %v865_v11, %v719_v32  ;;  %v1423_v61 = vrot.slane %v1320_v46, 2  ;;  %v1590_v5 = vadd.f32 %v1558_v60, %v1521_v55  ;;  %v1634_v54 = vmul.f32 %v10955_v18, %v11276_v49 }
  0x51   : > { %v1179_v7 = vsel %vm599_vm0, %v1176_v51, %v1178_v31  ;;  %v11287_v63 = vmul.f32 %v10977_v29, %v11272_v47  ;;  %v1976_v59 = vsel %vm845_vm1, %v1974_v26, %v1975_v38  ;;  %v1735_v21 = vrot.slane %v11280_v16, 1 }
  0x52   : > { %v1034_v8 = vadd.f32 %v1002_v30, %v965_v52  ;;  %v1879_v44 = vmul.f32 %v10977_v29, %v11276_v49  ;;  %v1835_v9 = vadd.f32 %v1731_v62, %v1590_v5  ;;  %v1424_v36 = vsel %vm845_vm1, %v1421_v53, %v1423_v61 }
  0x53   : > { %v1561_v50 = vmul.f32 %v10963_v23, %v11272_v47  ;;  %v1737_v14 = vrot.slane %v1634_v54, 1  ;;  %v1980_v60 = vrot.slane %v11287_v63, 2  ;;  %v512_v35 = vmul.f32 %v10885_v0, %v10933_v12 }
  0x54   : > { %v1279_v17 = vadd.f32 %v1179_v7, %v1034_v8  ;;  %v758_v38 = vmul.f32 %v10890_v1, %v10933_v12  ;;  %v2080_v25 = vadd.f32 %v1976_v59, %v1835_v9  ;;  %v1982_v56 = vrot.slane %v1879_v44, 2 }
  0x55   : > { %v440_v26 = vmul.f32 %v10900_v2, %v10933_v12  ;;  %v1073_v13 = vmul.f32 %v10905_v3, %v11226_v10  ;;  %v1738_v33 = vsel %vm599_vm0, %v1735_v21, %v1737_v14  ;;  %v615_v20 = vrot.slane %v512_v35, 1 }
  0x56   : > { %v1524_v39 = vadd.f32 %v1424_v36, %v1279_v17  ;;  %v861_v37 = vrot.slane %v758_v38, 2  ;;  %v2121_v27 = vsel %vm2108_vm2, %v2080_v25, 0.0  ;;  %v1001_v19 = vmul.f32 %v10944_v15, %v11226_v10 }
  0x57   : > { %v1175_v34 = vrot.slane %v1073_v13, 1  ;;  %v1318_v12 = vmul.f32 %v10910_v4, %v11226_v10  ;;  %2122 = vadd.xlane.f32.xlu0 %v2121_v27  ;;  %v617_v30 = vsel %vm599_vm0, %v615_v20, %v616_v48  ;;  %v1632_v24 = vmul.f32 %v10955_v18, %v11312_v40  ;;  %v11360_v13 = vld [vmem:[%s10895_s24 + $0x98] sm:$0xff]  ;;  %v11364_v20 = vld [vmem:[%s10895_s24 + $0xa0] sm:$0x3] }
  0x58   : > { %v1593_v45 = vadd.f32 %v1561_v50, %v1524_v39  ;;  %v863_v57 = vsel %vm845_vm1, %v861_v37, %v862_v43  ;;  %v1983_v6 = vsel %vm845_vm1, %v1980_v60, %v1982_v56  ;;  %v718_v42 = vadd.f32 %v617_v30, %v440_v26 }
  0x59   : > { %v1420_v41 = vrot.slane %v1318_v12, 2  ;;  %v1877_v32 = vmul.f32 %v10977_v29, %v11312_v40  ;;  %v1177_v46 = vsel %vm599_vm0, %v1175_v34, %v1176_v51  ;;  %v1560_v48 = vmul.f32 %v10963_v23, %v11312_v40 }
  0x5a   : > { %v1838_v58 = vadd.f32 %v1738_v33, %v1593_v45  ;;  %v11332_v43 = vmul.f32 %v10885_v0, %v11186_v22  ;;  %v964_v55 = vadd.f32 %v863_v57, %v718_v42  ;;  %v1734_v62 = vrot.slane %v1632_v24, 1 }
  0x5b   : > { %v443_v11 = vmul.f32 %v10900_v2, %v11186_v22  ;;  %v517_v31 = vmul.f32 %v10885_v0, %v11195_v28  ;;  %v1422_v61 = vsel %vm845_vm1, %v1420_v41, %v1421_v53  ;;  %v762_v5 = vmul.f32 %v10890_v1, %v11186_v22 }
  0x5c   : > { %v2083_v52 = vadd.f32 %v1983_v6, %v1838_v58  ;;  %v621_v51 = vrot.slane %v11332_v43, 1  ;;  %v1033_v7 = vadd.f32 %v1001_v19, %v964_v55  ;;  %v1979_v54 = vrot.slane %v1877_v32, 2 }
  0x5d   : > { %v623_v59 = vrot.slane %v517_v31, 1  ;;  %v763_v8 = vmul.f32 %v10890_v1, %v11195_v28  ;;  %v867_v9 = vrot.slane %v762_v5, 2  ;;  %v1004_v36 = vmul.f32 %v10944_v15, %v11272_v47 }
  0x5e   : > { %v2130_v44 = vsel %vm2108_vm2, %v2083_v52, 0.0  ;;  %v1077_v53 = vmul.f32 %v10905_v3, %v11272_v47  ;;  %v1278_v50 = vadd.f32 %v1177_v46, %v1033_v7  ;;  %v1078_v17 = vmul.f32 %v10905_v3, %v11276_v49 }
  0x5f   : > { %2131 = vadd.xlane.f32.xlu1 %v2130_v44  ;;  %v624_v22 = vsel %vm599_vm0, %v621_v51, %v623_v59  ;;  %v869_v14 = vrot.slane %v763_v8, 2  ;;  %v1322_v38 = vmul.f32 %v10910_v4, %v11272_v47  ;;  %v1323_v25 = vmul.f32 %v10910_v4, %v11276_v49 }
  0x60   : > { %v721_v28 = vadd.f32 %v624_v22, %v443_v11  ;;  %v1181_v35 = vrot.slane %v1077_v53, 1  ;;  %v1523_v56 = vadd.f32 %v1422_v61, %v1278_v50  ;;  %v1736_v26 = vsel %vm599_vm0, %v1734_v62, %v1735_v21 }
  0x61   : > { %v870_v39 = vsel %vm845_vm1, %v867_v9, %v869_v14  ;;  %v1183_v33 = vrot.slane %v1078_v17, 1  ;;  %v1426_v27 = vrot.slane %v1322_v38, 2  ;;  %v1428_v19 = vrot.slane %v1323_v25, 2 }
  0x62   : > { %v967_v37 = vadd.f32 %v870_v39, %v721_v28  ;;  %v11368_v34 = vmul.f32 %v10955_v18, %v11360_v13  ;;  %v1592_v12 = vadd.f32 %v1560_v48, %v1523_v56  ;;  %v1637_v16 = vmul.f32 %v10955_v18, %v11364_v20 }
  0x63   : > { %v1184_v45 = vsel %vm599_vm0, %v1181_v35, %v1183_v33  ;;  %v11375_v21 = vmul.f32 %v10977_v29, %v11360_v13  ;;  %v1981_v30 = vsel %vm845_vm1, %v1979_v54, %v1980_v60  ;;  %v1882_v6 = vmul.f32 %v10977_v29, %v11364_v20  ;;  %v11400_v54 = vld [vmem:[%s10895_s24 + $0x90] sm:$0xff] }
  0x64   : > { %v1036_v57 = vadd.f32 %v1004_v36, %v967_v37  ;;  %v1740_v24 = vrot.slane %v11368_v34, 1  ;;  %v1837_v42 = vadd.f32 %v1736_v26, %v1592_v12  ;;  %v1429_v41 = vsel %vm845_vm1, %v1426_v27, %v1428_v19 }
  0x65   : > { %v1563_v32 = vmul.f32 %v10963_v23, %v11360_v13  ;;  %v1742_v58 = vrot.slane %v1637_v16, 1  ;;  %v1985_v48 = vrot.slane %v11375_v21, 2  ;;  %v515_v63 = vmul.f32 %v10885_v0, %v11226_v10 }
  0x66   : > { %v1281_v46 = vadd.f32 %v1184_v45, %v1036_v57  ;;  %v761_v60 = vmul.f32 %v10890_v1, %v11226_v10  ;;  %v2082_v43 = vadd.f32 %v1981_v30, %v1837_v42  ;;  %v1987_v55 = vrot.slane %v1882_v6, 2 }
  0x67   : > { %v442_v62 = vmul.f32 %v10900_v2, %v11226_v10  ;;  %v1076_v11 = vmul.f32 %v10905_v3, %v11312_v40  ;;  %v1743_v52 = vsel %vm599_vm0, %v1740_v24, %v1742_v58  ;;  %v620_v61 = vrot.slane %v515_v63, 1 }
  0x68   : > { %v1526_v31 = vadd.f32 %v1429_v41, %v1281_v46  ;;  %v866_v5 = vrot.slane %v761_v60, 2  ;;  %v2127_v7 = vsel %vm2108_vm2, %v2082_v43, 0.0  ;;  %v1003_v59 = vmul.f32 %v10944_v15, %v11312_v40 }
  0x69   : > { %v1180_v8 = vrot.slane %v1076_v11, 1  ;;  %v1321_v10 = vmul.f32 %v10910_v4, %v11312_v40  ;;  %2128 = vadd.xlane.f32.xlu0 %v2127_v7  ;;  %v622_v36 = vsel %vm599_vm0, %v620_v61, %v621_v51  ;;  %v1635_v50 = vmul.f32 %v10955_v18, %v11400_v54  ;;  %v11448_v11 = vld [vmem:[%s10895_s24 + $0xb0] sm:$0xff]  ;;  %v11452_v61 = vld [vmem:[%s10895_s24 + $0xb8] sm:$0x3] }
  0x6a   : > { %v1595_v44 = vadd.f32 %v1563_v32, %v1526_v31  ;;  %v868_v53 = vsel %vm845_vm1, %v866_v5, %v867_v9  ;;  %v1988_v22 = vsel %vm845_vm1, %v1985_v48, %v1987_v55  ;;  %v720_v14 = vadd.f32 %v622_v36, %v442_v62 }
  0x6b   : > { %v1425_v17 = vrot.slane %v1321_v10, 2  ;;  %v1880_v28 = vmul.f32 %v10977_v29, %v11400_v54  ;;  %v1182_v25 = vsel %vm599_vm0, %v1180_v8, %v1181_v35  ;;  %v1562_v51 = vmul.f32 %v10963_v23, %v11400_v54 }
  0x6c   : > { %v1840_v38 = vadd.f32 %v1743_v52, %v1595_v44  ;;  %v11420_v9 = vmul.f32 %v10885_v0, %v11272_v47  ;;  %v966_v56 = vadd.f32 %v868_v53, %v720_v14  ;;  %v1739_v26 = vrot.slane %v1635_v50, 1 }
  0x6d   : > { %v445_v39 = vmul.f32 %v10900_v2, %v11272_v47  ;;  %v520_v33 = vmul.f32 %v10885_v0, %v11276_v49  ;;  %v1427_v19 = vsel %vm845_vm1, %v1425_v17, %v1426_v27  ;;  %v765_v12 = vmul.f32 %v10890_v1, %v11272_v47 }
  0x6e   : > { %v2085_v37 = vadd.f32 %v1988_v22, %v1840_v38  ;;  %v626_v35 = vrot.slane %v11420_v9, 1  ;;  %v1035_v45 = vadd.f32 %v1003_v59, %v966_v56  ;;  %v1984_v16 = vrot.slane %v1880_v28, 2 }
  0x6f   : > { %v628_v30 = vrot.slane %v520_v33, 1  ;;  %v766_v57 = vmul.f32 %v10890_v1, %v11276_v49  ;;  %v872_v42 = vrot.slane %v765_v12, 2  ;;  %v1006_v41 = vmul.f32 %v10944_v15, %v11360_v13 }
  0x70   : > { %v2136_v6 = vsel %vm2108_vm2, %v2085_v37, 0.0  ;;  %v1080_v27 = vmul.f32 %v10905_v3, %v11360_v13  ;;  %v1280_v32 = vadd.f32 %v1182_v25, %v1035_v45  ;;  %v1081_v46 = vmul.f32 %v10905_v3, %v11364_v20 }
  0x71   : > { %2137 = vadd.xlane.f32.xlu1 %v2136_v6  ;;  %v629_v47 = vsel %vm599_vm0, %v626_v35, %v628_v30  ;;  %v874_v58 = vrot.slane %v766_v57, 2  ;;  %v1325_v60 = vmul.f32 %v10910_v4, %v11360_v13  ;;  %v1326_v43 = vmul.f32 %v10910_v4, %v11364_v20 }
  0x72   : > { %v723_v49 = vadd.f32 %v629_v47, %v445_v39  ;;  %v1186_v63 = vrot.slane %v1080_v27, 1  ;;  %v1525_v55 = vadd.f32 %v1427_v19, %v1280_v32  ;;  %v1741_v62 = vsel %vm599_vm0, %v1739_v26, %v1740_v24 }
  0x73   : > { %v875_v31 = vsel %vm845_vm1, %v872_v42, %v874_v58  ;;  %v1188_v52 = vrot.slane %v1081_v46, 1  ;;  %v1431_v7 = vrot.slane %v1325_v60, 2  ;;  %v1433_v59 = vrot.slane %v1326_v43, 2 }
  0x74   : > { %v969_v5 = vadd.f32 %v875_v31, %v723_v49  ;;  %v11456_v8 = vmul.f32 %v10955_v18, %v11448_v11  ;;  %v1594_v10 = vadd.f32 %v1562_v51, %v1525_v55  ;;  %v1640_v34 = vmul.f32 %v10955_v18, %v11452_v61 }
  0x75   : > { %v1189_v44 = vsel %vm599_vm0, %v1186_v63, %v1188_v52  ;;  %v11463_v24 = vmul.f32 %v10977_v29, %v11448_v11  ;;  %v1986_v36 = vsel %vm845_vm1, %v1984_v16, %v1985_v48  ;;  %v1885_v22 = vmul.f32 %v10977_v29, %v11452_v61  ;;  %v11488_v16 = vld [vmem:[%s10895_s24 + $0xa8] sm:$0xff] }
  0x76   : > { %v1038_v53 = vadd.f32 %v1006_v41, %v969_v5  ;;  %v1745_v50 = vrot.slane %v11456_v8, 1  ;;  %v1839_v14 = vadd.f32 %v1741_v62, %v1594_v10  ;;  %v1434_v17 = vsel %vm845_vm1, %v1431_v7, %v1433_v59 }
  0x77   : > { %v1565_v28 = vmul.f32 %v10963_v23, %v11448_v11  ;;  %v1747_v38 = vrot.slane %v1640_v34, 1  ;;  %v1990_v51 = vrot.slane %v11463_v24, 2  ;;  %v518_v21 = vmul.f32 %v10885_v0, %v11312_v40  ;;  %v11577_v24 = vld [vmem:[%s15186_s1 + $0x1] ss:$0 sm:$0xff] }
  0x78   : > { %v1283_v25 = vadd.f32 %v1189_v44, %v1038_v53  ;;  %v764_v48 = vmul.f32 %v10890_v1, %v11312_v40  ;;  %v2084_v9 = vadd.f32 %v1986_v36, %v1839_v14  ;;  %v1992_v56 = vrot.slane %v1885_v22, 2 }
  0x79   : > { %v444_v26 = vmul.f32 %v10900_v2, %v11312_v40  ;;  %v1079_v39 = vmul.f32 %v10905_v3, %v11400_v54  ;;  %v1748_v37 = vsel %vm599_vm0, %v1745_v50, %v1747_v38  ;;  %v625_v19 = vrot.slane %v518_v21, 1 }
  0x7a   : > { %v1528_v33 = vadd.f32 %v1434_v17, %v1283_v25  ;;  %v871_v12 = vrot.slane %v764_v48, 2  ;;  %v2133_v45 = vsel %vm2108_vm2, %v2084_v9, 0.0  ;;  %v1005_v30 = vmul.f32 %v10944_v15, %v11400_v54  ;;  %v11546_v9 = vld [vmem:[%s10895_s24 + $0xc8] sm:$0xff] }
  0x7b   : > { %v1185_v57 = vrot.slane %v1079_v39, 1  ;;  %v1324_v40 = vmul.f32 %v10910_v4, %v11400_v54  ;;  %2134 = vadd.xlane.f32.xlu0 %v2133_v45  ;;  %v627_v41 = vsel %vm599_vm0, %v625_v19, %v626_v35  ;;  %v1638_v32 = vmul.f32 %v10955_v18, %v11488_v16 }
  0x7c   : > { %v1597_v6 = vadd.f32 %v1565_v28, %v1528_v33  ;;  %v873_v27 = vsel %vm845_vm1, %v871_v12, %v872_v42  ;;  %v1993_v47 = vsel %vm845_vm1, %v1990_v51, %v1992_v56  ;;  %v722_v58 = vadd.f32 %v627_v41, %v444_v26  ;;  %v11550_v26 = vld [vmem:[%s10895_s24 + $0xd0] sm:$0x3] }
  0x7d   : > { %v1430_v46 = vrot.slane %v1324_v40, 2  ;;  %v1883_v49 = vmul.f32 %v10977_v29, %v11488_v16  ;;  %v1187_v43 = vsel %vm599_vm0, %v1185_v57, %v1186_v63  ;;  %v1564_v35 = vmul.f32 %v10963_v23, %v11488_v16 }
  0x7e   : > { %v1842_v60 = vadd.f32 %v1748_v37, %v1597_v6  ;;  %v11508_v42 = vmul.f32 %v10885_v0, %v11360_v13  ;;  %v968_v55 = vadd.f32 %v873_v27, %v722_v58  ;;  %v1744_v62 = vrot.slane %v1638_v32, 1  ;;  %v11584_v58 = vld [vmem:[%s15186_s1 + $0x2] ss:$0 sm:$0xff] }
  0x7f   : > { %v447_v31 = vmul.f32 %v10900_v2, %v11360_v13  ;;  %v523_v52 = vmul.f32 %v10885_v0, %v11364_v20  ;;  %v1432_v59 = vsel %vm845_vm1, %v1430_v46, %v1431_v7  ;;  %v11518_v10 = vmul.f32 %v10890_v1, %v11360_v13 }
  0x80   : > { %v2087_v5 = vadd.f32 %v1993_v47, %v1842_v60  ;;  %v631_v63 = vrot.slane %v11508_v42, 1  ;;  %v1037_v44 = vadd.f32 %v1005_v30, %v968_v55  ;;  %v1989_v34 = vrot.slane %v1883_v49, 2  ;;  %v11591_v60 = vld [vmem:[%s15186_s1] ss:$0 sm:$0xff] }
  0x81   : > { %v633_v36 = vrot.slane %v523_v52, 1  ;;  %v769_v53 = vmul.f32 %v10890_v1, %v11364_v20  ;;  %v877_v0 = vrot.slane %v11518_v10, 2  ;;  %v1008_v7 = vmul.f32 %v10944_v15, %v11448_v11  ;;  %v11607_v10 = vld [vmem:[%s10895_s24 + $0xc0] sm:$0xff] }
  0x82   : > { %v2142_v2 = vsel %vm2108_vm2, %v2087_v5, 0.0  ;;  %v11528_v22 = vmul.f32 %v10905_v3, %v11448_v11  ;;  %v1282_v13 = vadd.f32 %v1187_v43, %v1037_v44  ;;  %v1084_v20 = vmul.f32 %v10905_v3, %v11452_v61 }
  0x83   : > { %2143 = vadd.xlane.f32.xlu1 %v2142_v2  ;;  %v634_v14 = vsel %vm599_vm0, %v631_v63, %v633_v36  ;;  %v879_v1 = vrot.slane %v769_v53, 2  ;;  %v11538_v38 = vmul.f32 %v10910_v4, %v11448_v11  ;;  %v1329_v25 = vmul.f32 %v10910_v4, %v11452_v61 }
  0x84   : > { %v725_v17 = vadd.f32 %v634_v14, %v447_v31  ;;  %v1191_v28 = vrot.slane %v11528_v22, 1  ;;  %v1527_v21 = vadd.f32 %v1432_v59, %v1282_v13  ;;  %v1746_v48 = vsel %vm599_vm0, %v1744_v62, %v1745_v50 }
  0x85   : > { %v880_v56 = vsel %vm845_vm1, %v877_v0, %v879_v1  ;;  %v1193_v3 = vrot.slane %v1084_v20, 1  ;;  %v1436_v33 = vrot.slane %v11538_v38, 2  ;;  %v1438_v37 = vrot.slane %v1329_v25, 2  ;;  %v11638_v20 = vld [vmem:[%s15186_s1 + $0x6] ss:$0 sm:$0xff] }
  0x86   : > { %v971_v39 = vadd.f32 %v880_v56, %v725_v17  ;;  %v11555_v19 = vmul.f32 %v10955_v18, %v11546_v9  ;;  %v1596_v4 = vadd.f32 %v1564_v35, %v1527_v21  ;;  %v1643_v50 = vmul.f32 %v10955_v18, %v11550_v26  ;;  %v11598_v35 = vld [vmem:[%s15186_s1 + $0x4] ss:$0 sm:$0xff] }
  0x87   : > { %v1194_v8 = vsel %vm599_vm0, %v1191_v28, %v1193_v3  ;;  %v11562_v12 = vmul.f32 %v10977_v29, %v11546_v9  ;;  %v1991_v45 = vsel %vm845_vm1, %v1989_v34, %v1990_v51  ;;  %v1888_v40 = vmul.f32 %v10977_v29, %v11550_v26  ;;  %v11614_v34 = vld [vmem:[%s15186_s1 + $0x5] ss:$0 sm:$0xff] }
  0x88   : > { %v1040_v30 = vadd.f32 %v1008_v7, %v971_v39  ;;  %v1750_v57 = vrot.slane %v11555_v19, 1  ;;  %v1841_v6 = vadd.f32 %v1746_v48, %v1596_v4  ;;  %v1439_v41 = vsel %vm845_vm1, %v1436_v33, %v1438_v37 }
  0x89   : > { %v1567_v18 = vmul.f32 %v10963_v23, %v11546_v9  ;;  %v1752_v27 = vrot.slane %v1643_v50, 1  ;;  %v1995_v47 = vrot.slane %v11562_v12, 2  ;;  %v521_v51 = vmul.f32 %v11577_v24, %v11400_v54 }
  0x8a   : > { %v1285_v32 = vadd.f32 %v1194_v8, %v1040_v30  ;;  %v767_v23 = vmul.f32 %v11584_v58, %v11400_v54  ;;  %v2086_v46 = vadd.f32 %v1991_v45, %v1841_v6  ;;  %v1997_v49 = vrot.slane %v1888_v40, 2 }
  0x8b   : > { %v446_v43 = vmul.f32 %v11591_v60, %v11400_v54  ;;  %v1082_v55 = vmul.f32 %v11598_v35, %v11488_v16  ;;  %v1753_v31 = vsel %vm599_vm0, %v1750_v57, %v1752_v27  ;;  %v630_v52 = vrot.slane %v521_v51, 1 }
  0x8c   : > { %v1530_v62 = vadd.f32 %v1439_v41, %v1285_v32  ;;  %v876_v5 = vrot.slane %v767_v23, 2  ;;  %v2139_v59 = vsel %vm2108_vm2, %v2086_v46, 0.0  ;;  %v1007_v54 = vmul.f32 %v10944_v15, %v11488_v16  ;;  %v11625_v15 = vld [vmem:[%s15186_s1 + $0x7] ss:$0 sm:$0xff] }
  0x8d   : > { %v1190_v44 = vrot.slane %v1082_v55, 1  ;;  %v1327_v36 = vmul.f32 %v11614_v34, %v11488_v16  ;;  %2140 = vadd.xlane.f32.xlu0 %v2139_v59  ;;  %v632_v2 = vsel %vm599_vm0, %v630_v52, %v631_v63  ;;  %v1641_v22 = vmul.f32 %v11625_v15, %v11607_v10 }
  0x8e   : > { %v1599_v53 = vadd.f32 %v1567_v18, %v1530_v62  ;;  %v878_v7 = vsel %vm845_vm1, %v876_v5, %v877_v0  ;;  %v1998_v13 = vsel %vm845_vm1, %v1995_v47, %v1997_v49  ;;  %v724_v14 = vadd.f32 %v632_v2, %v446_v43  ;;  %v11682_v43 = vld [vmem:[%s10895_s24 + $0xe0] sm:$0xff] }
  0x8f   : > { %v1435_v1 = vrot.slane %v1327_v36, 2  ;;  %v1886_v42 = vmul.f32 %v10977_v29, %v11607_v10  ;;  %v1192_v0 = vsel %vm599_vm0, %v1190_v44, %v1191_v28  ;;  %v1566_v17 = vmul.f32 %v11638_v20, %v11607_v10 }
  0x90   : > { %v1844_v63 = vadd.f32 %v1753_v31, %v1599_v53  ;;  %v11644_v38 = vmul.f32 %v11577_v24, %v11448_v11  ;;  %v970_v25 = vadd.f32 %v878_v7, %v724_v14  ;;  %v1749_v21 = vrot.slane %v1641_v22, 1  ;;  %v11686_v31 = vld [vmem:[%s10895_s24 + $0xe8] sm:$0x3] }
  0x91   : > { %v449_v29 = vmul.f32 %v11591_v60, %v11448_v11  ;;  %v526_v28 = vmul.f32 %v11577_v24, %v11452_v61  ;;  %v1437_v56 = vsel %vm845_vm1, %v1435_v1, %v1436_v33  ;;  %v11654_v39 = vmul.f32 %v11584_v58, %v11448_v11  ;;  %v11663_v33 = vld [vmem:[%s15186_s1 + $0x3] ss:$0 sm:$0xff] }
  0x92   : > { %v2089_v48 = vadd.f32 %v1998_v13, %v1844_v63  ;;  %v636_v3 = vrot.slane %v11644_v38, 1  ;;  %v1039_v37 = vadd.f32 %v1007_v54, %v970_v25  ;;  %v1994_v4 = vrot.slane %v1886_v42, 2 }
  0x93   : > { %v638_v8 = vrot.slane %v526_v28, 1  ;;  %v772_v50 = vmul.f32 %v11584_v58, %v11452_v61  ;;  %v882_v30 = vrot.slane %v11654_v39, 2  ;;  %v1010_v11 = vmul.f32 %v11663_v33, %v11546_v9 }
  0x94   : > { %v2148_v45 = vsel %vm2108_vm2, %v2089_v48, 0.0  ;;  %v1086_v40 = vmul.f32 %v11598_v35, %v11546_v9  ;;  %v1284_v6 = vadd.f32 %v1192_v0, %v1039_v37  ;;  %v1087_v18 = vmul.f32 %v11598_v35, %v11550_v26 }
  0x95   : > { %2149 = vadd.xlane.f32.xlu1 %v2148_v45  ;;  %v639_v61 = vsel %vm599_vm0, %v636_v3, %v638_v8  ;;  %v884_v41 = vrot.slane %v772_v50, 2  ;;  %v1331_v51 = vmul.f32 %v11614_v34, %v11546_v9  ;;  %v1332_v23 = vmul.f32 %v11614_v34, %v11550_v26  ;;  %v11727_v8 = vld [vmem:[%s10895_s24 + $0xd8] sm:$0xff] }
  0x96   : > { %v727_v27 = vadd.f32 %v639_v61, %v449_v29  ;;  %v1196_v32 = vrot.slane %v1086_v40, 1  ;;  %v1529_v46 = vadd.f32 %v1437_v56, %v1284_v6  ;;  %v1751_v49 = vsel %vm599_vm0, %v1749_v21, %v1750_v57  ;;  %v11698_v57 = vld [vmem:[%s15186_s1 + $0x8] ss:$0 sm:$0xff] }
  0x97   : > { %v885_v55 = vsel %vm845_vm1, %v882_v30, %v884_v41  ;;  %v1198_v62 = vrot.slane %v1087_v18, 1  ;;  %v1441_v5 = vrot.slane %v1331_v51, 2  ;;  %v1443_v59 = vrot.slane %v1332_v23, 2 }
  0x98   : > { %v973_v52 = vadd.f32 %v885_v55, %v727_v27  ;;  %v11690_v54 = vmul.f32 %v11625_v15, %v11682_v43  ;;  %v1598_v44 = vadd.f32 %v1566_v17, %v1529_v46  ;;  %v1646_v19 = vmul.f32 %v11625_v15, %v11686_v31 }
  0x99   : > { %v1199_v36 = vsel %vm599_vm0, %v1196_v32, %v1198_v62  ;;  %v11702_v53 = vmul.f32 %v11698_v57, %v11682_v43  ;;  %v1996_v2 = vsel %vm845_vm1, %v1994_v4, %v1995_v47  ;;  %v1891_v13 = vmul.f32 %v11698_v57, %v11686_v31 }
  0x9a   : > { %v1042_v7 = vadd.f32 %v1010_v11, %v973_v52  ;;  %v1755_v22 = vrot.slane %v11690_v54, 1  ;;  %v1843_v14 = vadd.f32 %v1751_v49, %v1598_v44  ;;  %v1444_v1 = vsel %vm845_vm1, %v1441_v5, %v1443_v59 }
  0x9b   : > { %v1569_v42 = vmul.f32 %v11638_v20, %v11682_v43  ;;  %v1757_v63 = vrot.slane %v1646_v19, 1  ;;  %v2000_v17 = vrot.slane %v11702_v53, 2  ;;  %v524_v12 = vmul.f32 %v11577_v24, %v11488_v16 }
  0x9c   : > { %v1287_v0 = vadd.f32 %v1199_v36, %v1042_v7  ;;  %v770_v47 = vmul.f32 %v11584_v58, %v11488_v16  ;;  %v2088_v25 = vadd.f32 %v1996_v2, %v1843_v14  ;;  %v2002_v21 = vrot.slane %v1891_v13, 2 }
  0x9d   : > { %v448_v29 = vmul.f32 %v11591_v60, %v11488_v16  ;;  %v1085_v28 = vmul.f32 %v11598_v35, %v11607_v10  ;;  %v1758_v56 = vsel %vm599_vm0, %v1755_v22, %v1757_v63  ;;  %v635_v39 = vrot.slane %v524_v12, 1 }
  0x9e   : > { %v1532_v48 = vadd.f32 %v1444_v1, %v1287_v0  ;;  %v881_v37 = vrot.slane %v770_v47, 2  ;;  %v2145_v4 = vsel %vm2108_vm2, %v2088_v25, 0.0  ;;  %v1009_v50 = vmul.f32 %v11663_v33, %v11607_v10 }
  0x9f   : > { %v1195_v45 = vrot.slane %v1085_v28, 1  ;;  %v1330_v16 = vmul.f32 %v11614_v34, %v11607_v10  ;;  %2146 = vadd.xlane.f32.xlu0 %v2145_v4  ;;  %v637_v40 = vsel %vm599_vm0, %v635_v39, %v636_v3  ;;  %v1644_v61 = vmul.f32 %v11625_v15, %v11727_v8  ;;  %v11777_v28 = vld [vmem:[%s10895_s24 + $0xf8] sm:$0xff]  ;;  %v11781_v39 = vld [vmem:[%s10895_s24 + $0x100] sm:$0x3] }
  0xa0   : > { %v1601_v11 = vadd.f32 %v1569_v42, %v1532_v48  ;;  %v883_v6 = vsel %vm845_vm1, %v881_v37, %v882_v30  ;;  %v2003_v41 = vsel %vm845_vm1, %v2000_v17, %v2002_v21  ;;  %v726_v18 = vadd.f32 %v637_v40, %v448_v29 }
  0xa1   : > { %v1440_v27 = vrot.slane %v1330_v16, 2  ;;  %v1889_v51 = vmul.f32 %v11698_v57, %v11727_v8  ;;  %v1197_v46 = vsel %vm599_vm0, %v1195_v45, %v1196_v32  ;;  %v1568_v38 = vmul.f32 %v11638_v20, %v11727_v8 }
  0xa2   : > { %v1846_v23 = vadd.f32 %v1758_v56, %v1601_v11  ;;  %v11749_v3 = vmul.f32 %v11577_v24, %v11546_v9  ;;  %v972_v30 = vadd.f32 %v883_v6, %v726_v18  ;;  %v1754_v49 = vrot.slane %v1644_v61, 1 }
  0xa3   : > { %v451_v55 = vmul.f32 %v11591_v60, %v11546_v9  ;;  %v529_v62 = vmul.f32 %v11577_v24, %v11550_v26  ;;  %v1442_v59 = vsel %vm845_vm1, %v1440_v27, %v1441_v5  ;;  %v774_v44 = vmul.f32 %v11584_v58, %v11546_v9 }
  0xa4   : > { %v2091_v52 = vadd.f32 %v2003_v41, %v1846_v23  ;;  %v641_v32 = vrot.slane %v11749_v3, 1  ;;  %v1041_v36 = vadd.f32 %v1009_v50, %v972_v30  ;;  %v1999_v19 = vrot.slane %v1889_v51, 2 }
  0xa5   : > { %v643_v2 = vrot.slane %v529_v62, 1  ;;  %v775_v7 = vmul.f32 %v11584_v58, %v11550_v26  ;;  %v887_v14 = vrot.slane %v774_v44, 2  ;;  %v1012_v1 = vmul.f32 %v11663_v33, %v11682_v43 }
  0xa6   : > { %v2154_v13 = vsel %vm2108_vm2, %v2091_v52, 0.0  ;;  %v1089_v5 = vmul.f32 %v11598_v35, %v11682_v43  ;;  %v1286_v42 = vadd.f32 %v1197_v46, %v1041_v36  ;;  %v1090_v0 = vmul.f32 %v11598_v35, %v11686_v31 }
  0xa7   : > { %2155 = vadd.xlane.f32.xlu1 %v2154_v13  ;;  %v644_v9 = vsel %vm599_vm0, %v641_v32, %v643_v2  ;;  %v889_v63 = vrot.slane %v775_v7, 2  ;;  %v1334_v47 = vmul.f32 %v11614_v34, %v11682_v43  ;;  %v1335_v25 = vmul.f32 %v11614_v34, %v11686_v31 }
  0xa8   : > { %v729_v26 = vadd.f32 %v644_v9, %v451_v55  ;;  %v1201_v12 = vrot.slane %v1089_v5, 1  ;;  %v1531_v21 = vadd.f32 %v1442_v59, %v1286_v42  ;;  %v1756_v29 = vsel %vm599_vm0, %v1754_v49, %v1755_v22 }
  0xa9   : > { %v890_v48 = vsel %vm845_vm1, %v887_v14, %v889_v63  ;;  %v1203_v56 = vrot.slane %v1090_v0, 1  ;;  %v1446_v4 = vrot.slane %v1334_v47, 2  ;;  %v1448_v50 = vrot.slane %v1335_v25, 2 }
  0xaa   : > { %v975_v37 = vadd.f32 %v890_v48, %v729_v26  ;;  %v11785_v45 = vmul.f32 %v11625_v15, %v11777_v28  ;;  %v1600_v16 = vadd.f32 %v1568_v38, %v1531_v21  ;;  %v1649_v54 = vmul.f32 %v11625_v15, %v11781_v39 }
  0xab   : > { %v1204_v11 = vsel %vm599_vm0, %v1201_v12, %v1203_v56  ;;  %v11792_v22 = vmul.f32 %v11698_v57, %v11777_v28  ;;  %v2001_v40 = vsel %vm845_vm1, %v1999_v19, %v2000_v17  ;;  %v1894_v41 = vmul.f32 %v11698_v57, %v11781_v39  ;;  %v11817_v19 = vld [vmem:[%s10895_s24 + $0xf0] sm:$0xff] }
  0xac   : > { %v1044_v6 = vadd.f32 %v1012_v1, %v975_v37  ;;  %v1760_v61 = vrot.slane %v11785_v45, 1  ;;  %v1845_v18 = vadd.f32 %v1756_v29, %v1600_v16  ;;  %v1449_v27 = vsel %vm845_vm1, %v1446_v4, %v1448_v50 }
  0xad   : > { %v1571_v51 = vmul.f32 %v11638_v20, %v11777_v28  ;;  %v1762_v23 = vrot.slane %v1649_v54, 1  ;;  %v2005_v38 = vrot.slane %v11792_v22, 2  ;;  %v527_v53 = vmul.f32 %v11577_v24, %v11607_v10 }
  0xae   : > { %v1289_v46 = vadd.f32 %v1204_v11, %v1044_v6  ;;  %v773_v17 = vmul.f32 %v11584_v58, %v11607_v10  ;;  %v2090_v3 = vadd.f32 %v2001_v40, %v1845_v18  ;;  %v2007_v30 = vrot.slane %v1894_v41, 2 }
  0xaf   : > { %v450_v49 = vmul.f32 %v11591_v60, %v11607_v10  ;;  %v1088_v55 = vmul.f32 %v11598_v35, %v11727_v8  ;;  %v1763_v52 = vsel %vm599_vm0, %v1760_v61, %v1762_v23  ;;  %v640_v59 = vrot.slane %v527_v53, 1 }
  0xb0   : > { %v1534_v62 = vadd.f32 %v1449_v27, %v1289_v46  ;;  %v886_v44 = vrot.slane %v773_v17, 2  ;;  %v2151_v36 = vsel %vm2108_vm2, %v2090_v3, 0.0  ;;  %v1011_v2 = vmul.f32 %v11663_v33, %v11727_v8 }
  0xb1   : > { %v1200_v7 = vrot.slane %v1088_v55, 1  ;;  %v1333_v10 = vmul.f32 %v11614_v34, %v11727_v8  ;;  %2152 = vadd.xlane.f32.xlu0 %v2151_v36  ;;  %v642_v1 = vsel %vm599_vm0, %v640_v59, %v641_v32  ;;  %v1647_v42 = vmul.f32 %v11625_v15, %v11817_v19  ;;  %v11865_v55 = vld [vmem:[%s10895_s24 + $0x110] sm:$0xff]  ;;  %v11869_v59 = vld [vmem:[%s10895_s24 + $0x118] sm:$0x3] }
  0xb2   : > { %v1603_v13 = vadd.f32 %v1571_v51, %v1534_v62  ;;  %v888_v5 = vsel %vm845_vm1, %v886_v44, %v887_v14  ;;  %v2008_v9 = vsel %vm845_vm1, %v2005_v38, %v2007_v30  ;;  %v728_v63 = vadd.f32 %v642_v1, %v450_v49 }
  0xb3   : > { %v1445_v0 = vrot.slane %v1333_v10, 2  ;;  %v1892_v26 = vmul.f32 %v11698_v57, %v11817_v19  ;;  %v1202_v25 = vsel %vm599_vm0, %v1200_v7, %v1201_v12  ;;  %v1570_v32 = vmul.f32 %v11638_v20, %v11817_v19 }
  0xb4   : > { %v1848_v47 = vadd.f32 %v1763_v52, %v1603_v13  ;;  %v11837_v14 = vmul.f32 %v11577_v24, %v11682_v43  ;;  %v974_v21 = vadd.f32 %v888_v5, %v728_v63  ;;  %v1759_v29 = vrot.slane %v1647_v42, 1 }
  0xb5   : > { %v453_v48 = vmul.f32 %v11591_v60, %v11682_v43  ;;  %v532_v56 = vmul.f32 %v11577_v24, %v11686_v31  ;;  %v1447_v50 = vsel %vm845_vm1, %v1445_v0, %v1446_v4  ;;  %v777_v16 = vmul.f32 %v11584_v58, %v11682_v43 }
  0xb6   : > { %v2093_v37 = vadd.f32 %v2008_v9, %v1848_v47  ;;  %v646_v12 = vrot.slane %v11837_v14, 1  ;;  %v1043_v11 = vadd.f32 %v1011_v2, %v974_v21  ;;  %v2004_v54 = vrot.slane %v1892_v26, 2 }
  0xb7   : > { %v648_v40 = vrot.slane %v532_v56, 1  ;;  %v778_v6 = vmul.f32 %v11584_v58, %v11686_v31  ;;  %v892_v18 = vrot.slane %v777_v16, 2  ;;  %v1014_v27 = vmul.f32 %v11663_v33, %v11777_v28 }
  0xb8   : > { %v2160_v41 = vsel %vm2108_vm2, %v2093_v37, 0.0  ;;  %v1092_v4 = vmul.f32 %v11598_v35, %v11777_v28  ;;  %v1288_v51 = vadd.f32 %v1202_v25, %v1043_v11  ;;  %v1093_v46 = vmul.f32 %v11598_v35, %v11781_v39 }
  0xb9   : > { %2161 = vadd.xlane.f32.xlu1 %v2160_v41  ;;  %v649_v43 = vsel %vm599_vm0, %v646_v12, %v648_v40  ;;  %v894_v23 = vrot.slane %v778_v6, 2  ;;  %v1337_v17 = vmul.f32 %v11614_v34, %v11777_v28  ;;  %v1338_v3 = vmul.f32 %v11614_v34, %v11781_v39 }
  0xba   : > { %v731_v31 = vadd.f32 %v649_v43, %v453_v48  ;;  %v1206_v53 = vrot.slane %v1092_v4, 1  ;;  %v1533_v30 = vadd.f32 %v1447_v50, %v1288_v51  ;;  %v1761_v49 = vsel %vm599_vm0, %v1759_v29, %v1760_v61 }
  0xbb   : > { %v895_v62 = vsel %vm845_vm1, %v892_v18, %v894_v23  ;;  %v1208_v52 = vrot.slane %v1093_v46, 1  ;;  %v1451_v36 = vrot.slane %v1337_v17, 2  ;;  %v1453_v2 = vrot.slane %v1338_v3, 2 }
  0xbc   : > { %v977_v44 = vadd.f32 %v895_v62, %v731_v31  ;;  %v11873_v7 = vmul.f32 %v11625_v15, %v11865_v55  ;;  %v1602_v10 = vadd.f32 %v1570_v32, %v1533_v30  ;;  %v1652_v45 = vmul.f32 %v11625_v15, %v11869_v59 }
  0xbd   : > { %v1209_v13 = vsel %vm599_vm0, %v1206_v53, %v1208_v52  ;;  %v11880_v61 = vmul.f32 %v11698_v57, %v11865_v55  ;;  %v2006_v1 = vsel %vm845_vm1, %v2004_v54, %v2005_v38  ;;  %v1897_v9 = vmul.f32 %v11698_v57, %v11869_v59  ;;  %v11905_v54 = vld [vmem:[%s10895_s24 + $0x108] sm:$0xff] }
  0xbe   : > { %v1046_v5 = vadd.f32 %v1014_v27, %v977_v44  ;;  %v1765_v42 = vrot.slane %v11873_v7, 1  ;;  %v1847_v63 = vadd.f32 %v1761_v49, %v1602_v10  ;;  %v1454_v0 = vsel %vm845_vm1, %v1451_v36, %v1453_v2 }
  0xbf   : > { %v1573_v26 = vmul.f32 %v11638_v20, %v11865_v55  ;;  %v1767_v47 = vrot.slane %v1652_v45, 1  ;;  %v2010_v32 = vrot.slane %v11880_v61, 2  ;;  %v530_v22 = vmul.f32 %v11577_v24, %v11727_v8 }
  0xc0   : > { %v1291_v25 = vadd.f32 %v1209_v13, %v1046_v5  ;;  %v776_v38 = vmul.f32 %v11584_v58, %v11727_v8  ;;  %v2092_v14 = vadd.f32 %v2006_v1, %v1847_v63  ;;  %v2012_v21 = vrot.slane %v1897_v9, 2 }
  0xc1   : > { %v452_v29 = vmul.f32 %v11591_v60, %v11727_v8  ;;  %v1091_v48 = vmul.f32 %v11598_v35, %v11817_v19  ;;  %v1768_v37 = vsel %vm599_vm0, %v1765_v42, %v1767_v47  ;;  %v645_v50 = vrot.slane %v530_v22, 1 }
  0xc2   : > { %v1536_v56 = vadd.f32 %v1454_v0, %v1291_v25  ;;  %v891_v16 = vrot.slane %v776_v38, 2  ;;  %v2157_v11 = vsel %vm2108_vm2, %v2092_v14, 0.0  ;;  %v1013_v40 = vmul.f32 %v11663_v33, %v11817_v19 }
  0xc3   : > { %v1205_v6 = vrot.slane %v1091_v48, 1  ;;  %v1336_v8 = vmul.f32 %v11614_v34, %v11817_v19  ;;  %2158 = vadd.xlane.f32.xlu0 %v2157_v11  ;;  %v647_v27 = vsel %vm599_vm0, %v645_v50, %v646_v12  ;;  %v1650_v51 = vmul.f32 %v11625_v15, %v11905_v54  ;;  %v11953_v48 = vld [vmem:[%s10895_s24 + $0x128] sm:$0xff]  ;;  %v11957_v50 = vld [vmem:[%s10895_s24 + $0x130] sm:$0x3] }
  0xc4   : > { %v1605_v41 = vadd.f32 %v1573_v26, %v1536_v56  ;;  %v893_v4 = vsel %vm845_vm1, %v891_v16, %v892_v18  ;;  %v2013_v43 = vsel %vm845_vm1, %v2010_v32, %v2012_v21  ;;  %v730_v23 = vadd.f32 %v647_v27, %v452_v29 }
  0xc5   : > { %v1450_v46 = vrot.slane %v1336_v8, 2  ;;  %v1895_v31 = vmul.f32 %v11698_v57, %v11905_v54  ;;  %v1207_v3 = vsel %vm599_vm0, %v1205_v6, %v1206_v53  ;;  %v1572_v12 = vmul.f32 %v11638_v20, %v11905_v54 }
  0xc6   : > { %v1850_v17 = vadd.f32 %v1768_v37, %v1605_v41  ;;  %v11925_v18 = vmul.f32 %v11577_v24, %v11777_v28  ;;  %v976_v30 = vadd.f32 %v893_v4, %v730_v23  ;;  %v1764_v49 = vrot.slane %v1650_v51, 1 }
  0xc7   : > { %v455_v62 = vmul.f32 %v11591_v60, %v11777_v28  ;;  %v535_v52 = vmul.f32 %v11577_v24, %v11781_v39  ;;  %v1452_v2 = vsel %vm845_vm1, %v1450_v46, %v1451_v36  ;;  %v780_v10 = vmul.f32 %v11584_v58, %v11777_v28 }
  0xc8   : > { %v2095_v44 = vadd.f32 %v2013_v43, %v1850_v17  ;;  %v651_v53 = vrot.slane %v11925_v18, 1  ;;  %v1045_v13 = vadd.f32 %v1013_v40, %v976_v30  ;;  %v2009_v45 = vrot.slane %v1895_v31, 2 }
  0xc9   : > { %v653_v1 = vrot.slane %v535_v52, 1  ;;  %v781_v5 = vmul.f32 %v11584_v58, %v11781_v39  ;;  %v897_v63 = vrot.slane %v780_v10, 2  ;;  %v1016_v0 = vmul.f32 %v11663_v33, %v11865_v55 }
  0xca   : > { %v2166_v9 = vsel %vm2108_vm2, %v2095_v44, 0.0  ;;  %v1095_v36 = vmul.f32 %v11598_v35, %v11865_v55  ;;  %v1290_v26 = vadd.f32 %v1207_v3, %v1045_v13  ;;  %v1096_v25 = vmul.f32 %v11598_v35, %v11869_v59 }
  0xcb   : > { %2167 = vadd.xlane.f32.xlu1 %v2166_v9  ;;  %v654_v28 = vsel %vm599_vm0, %v651_v53, %v653_v1  ;;  %v899_v47 = vrot.slane %v781_v5, 2  ;;  %v1340_v38 = vmul.f32 %v11614_v34, %v11865_v55  ;;  %v1341_v14 = vmul.f32 %v11614_v34, %v11869_v59 }
  0xcc   : > { %v733_v39 = vadd.f32 %v654_v28, %v455_v62  ;;  %v1211_v22 = vrot.slane %v1095_v36, 1  ;;  %v1535_v21 = vadd.f32 %v1452_v2, %v1290_v26  ;;  %v1766_v29 = vsel %vm599_vm0, %v1764_v49, %v1765_v42 }
  0xcd   : > { %v900_v56 = vsel %vm845_vm1, %v897_v63, %v899_v47  ;;  %v1213_v37 = vrot.slane %v1096_v25, 1  ;;  %v1456_v11 = vrot.slane %v1340_v38, 2  ;;  %v1458_v40 = vrot.slane %v1341_v14, 2 }
  0xce   : > { %v979_v16 = vadd.f32 %v900_v56, %v733_v39  ;;  %v11961_v6 = vmul.f32 %v11625_v15, %v11953_v48  ;;  %v1604_v8 = vadd.f32 %v1572_v12, %v1535_v21  ;;  %v1655_v7 = vmul.f32 %v11625_v15, %v11957_v50 }
  0xcf   : > { %v1214_v41 = vsel %vm599_vm0, %v1211_v22, %v1213_v37  ;;  %v11968_v42 = vmul.f32 %v11698_v57, %v11953_v48  ;;  %v2011_v27 = vsel %vm845_vm1, %v2009_v45, %v2010_v32  ;;  %v1900_v43 = vmul.f32 %v11698_v57, %v11957_v50  ;;  %v11993_v45 = vld [vmem:[%s10895_s24 + $0x120] sm:$0xff] }
  0xd0   : > { %v1048_v4 = vadd.f32 %v1016_v0, %v979_v16  ;;  %v1770_v51 = vrot.slane %v11961_v6, 1  ;;  %v1849_v23 = vadd.f32 %v1766_v29, %v1604_v8  ;;  %v1459_v46 = vsel %vm845_vm1, %v1456_v11, %v1458_v40 }
  0xd1   : > { %v1575_v31 = vmul.f32 %v11638_v20, %v11953_v48  ;;  %v1772_v17 = vrot.slane %v1655_v7, 1  ;;  %v2015_v12 = vrot.slane %v11968_v42, 2  ;;  %v533_v61 = vmul.f32 %v11577_v24, %v11817_v19 }
  0xd2   : > { %v1293_v3 = vadd.f32 %v1214_v41, %v1048_v4  ;;  %v779_v32 = vmul.f32 %v11584_v58, %v11817_v19  ;;  %v2094_v18 = vadd.f32 %v2011_v27, %v1849_v23  ;;  %v2017_v30 = vrot.slane %v1900_v43, 2 }
  0xd3   : > { %v454_v49 = vmul.f32 %v11591_v60, %v11817_v19  ;;  %v1094_v62 = vmul.f32 %v11598_v35, %v11905_v54  ;;  %v1773_v44 = vsel %vm599_vm0, %v1770_v51, %v1772_v17  ;;  %v650_v2 = vrot.slane %v533_v61, 1 }
  0xd4   : > { %v1538_v52 = vadd.f32 %v1459_v46, %v1293_v3  ;;  %v896_v10 = vrot.slane %v779_v32, 2  ;;  %v2163_v13 = vsel %vm2108_vm2, %v2094_v18, 0.0  ;;  %v1015_v1 = vmul.f32 %v11663_v33, %v11905_v54 }
  0xd5   : > { %v1210_v5 = vrot.slane %v1094_v62, 1  ;;  %v1339_v19 = vmul.f32 %v11614_v34, %v11905_v54  ;;  %2164 = vadd.xlane.f32.xlu0 %v2163_v13  ;;  %v652_v0 = vsel %vm599_vm0, %v650_v2, %v651_v53  ;;  %v1653_v26 = vmul.f32 %v11625_v15, %v11993_v45  ;;  %v12041_v62 = vld [vmem:[%s10895_s24 + $0x140] sm:$0xff]  ;;  %v12045_v2 = vld [vmem:[%s10895_s24 + $0x148] sm:$0x3] }
  0xd6   : > { %v1607_v9 = vadd.f32 %v1575_v31, %v1538_v52  ;;  %v898_v36 = vsel %vm845_vm1, %v896_v10, %v897_v63  ;;  %v2018_v28 = vsel %vm845_vm1, %v2015_v12, %v2017_v30  ;;  %v732_v47 = vadd.f32 %v652_v0, %v454_v49 }
  0xd7   : > { %v1455_v25 = vrot.slane %v1339_v19, 2  ;;  %v1898_v39 = vmul.f32 %v11698_v57, %v11993_v45  ;;  %v1212_v14 = vsel %vm599_vm0, %v1210_v5, %v1211_v22  ;;  %v1574_v53 = vmul.f32 %v11638_v20, %v11993_v45 }
  0xd8   : > { %v1852_v38 = vadd.f32 %v1773_v44, %v1607_v9  ;;  %v12013_v63 = vmul.f32 %v11577_v24, %v11865_v55  ;;  %v978_v21 = vadd.f32 %v898_v36, %v732_v47  ;;  %v1769_v29 = vrot.slane %v1653_v26, 1 }
  0xd9   : > { %v457_v56 = vmul.f32 %v11591_v60, %v11865_v55  ;;  %v538_v37 = vmul.f32 %v11577_v24, %v11869_v59  ;;  %v1457_v40 = vsel %vm845_vm1, %v1455_v25, %v1456_v11  ;;  %v783_v8 = vmul.f32 %v11584_v58, %v11865_v55 }
  0xda   : > { %v2097_v16 = vadd.f32 %v2018_v28, %v1852_v38  ;;  %v656_v22 = vrot.slane %v12013_v63, 1  ;;  %v1047_v41 = vadd.f32 %v1015_v1, %v978_v21  ;;  %v2014_v7 = vrot.slane %v1898_v39, 2 }
  0xdb   : > { %v658_v27 = vrot.slane %v538_v37, 1  ;;  %v784_v4 = vmul.f32 %v11584_v58, %v11869_v59  ;;  %v902_v23 = vrot.slane %v783_v8, 2  ;;  %v1018_v46 = vmul.f32 %v11663_v33, %v11953_v48 }
  0xdc   : > { %v2172_v43 = vsel %vm2108_vm2, %v2097_v16, 0.0  ;;  %v1098_v11 = vmul.f32 %v11598_v35, %v11953_v48  ;;  %v1292_v31 = vadd.f32 %v1212_v14, %v1047_v41  ;;  %v1099_v3 = vmul.f32 %v11598_v35, %v11957_v50 }
  0xdd   : > { %2173 = vadd.xlane.f32.xlu1 %v2172_v43  ;;  %v659_v55 = vsel %vm599_vm0, %v656_v22, %v658_v27  ;;  %v904_v17 = vrot.slane %v784_v4, 2  ;;  %v1343_v32 = vmul.f32 %v11614_v34, %v11953_v48  ;;  %v1344_v18 = vmul.f32 %v11614_v34, %v11957_v50 }
  0xde   : > { %v735_v59 = vadd.f32 %v659_v55, %v457_v56  ;;  %v1216_v61 = vrot.slane %v1098_v11, 1  ;;  %v1537_v30 = vadd.f32 %v1457_v40, %v1292_v31  ;;  %v1771_v49 = vsel %vm599_vm0, %v1769_v29, %v1770_v51 }
  0xdf   : > { %v905_v52 = vsel %vm845_vm1, %v902_v23, %v904_v17  ;;  %v1218_v44 = vrot.slane %v1099_v3, 1  ;;  %v1461_v13 = vrot.slane %v1343_v32, 2  ;;  %v1463_v1 = vrot.slane %v1344_v18, 2 }
  0xe0   : > { %v981_v10 = vadd.f32 %v905_v52, %v735_v59  ;;  %v12049_v5 = vmul.f32 %v11625_v15, %v12041_v62  ;;  %v1606_v19 = vadd.f32 %v1574_v53, %v1537_v30  ;;  %v1658_v6 = vmul.f32 %v11625_v15, %v12045_v2 }
  0xe1   : > { %v1219_v9 = vsel %vm599_vm0, %v1216_v61, %v1218_v44  ;;  %v12056_v51 = vmul.f32 %v11698_v57, %v12041_v62  ;;  %v2016_v0 = vsel %vm845_vm1, %v2014_v7, %v2015_v12  ;;  %v1903_v28 = vmul.f32 %v11698_v57, %v12045_v2  ;;  %v12081_v7 = vld [vmem:[%s10895_s24 + $0x138] sm:$0xff] }
  0xe2   : > { %v1050_v36 = vadd.f32 %v1018_v46, %v981_v10  ;;  %v1775_v26 = vrot.slane %v12049_v5, 1  ;;  %v1851_v47 = vadd.f32 %v1771_v49, %v1606_v19  ;;  %v1464_v25 = vsel %vm845_vm1, %v1461_v13, %v1463_v1 }
  0xe3   : > { %v1577_v39 = vmul.f32 %v11638_v20, %v12041_v62  ;;  %v1777_v38 = vrot.slane %v1658_v6, 1  ;;  %v2020_v53 = vrot.slane %v12056_v51, 2  ;;  %v536_v42 = vmul.f32 %v11577_v24, %v11905_v54 }
  0xe4   : > { %v1295_v14 = vadd.f32 %v1219_v9, %v1050_v36  ;;  %v782_v12 = vmul.f32 %v11584_v58, %v11905_v54  ;;  %v2096_v63 = vadd.f32 %v2016_v0, %v1851_v47  ;;  %v2022_v21 = vrot.slane %v1903_v28, 2 }
  0xe5   : > { %v456_v29 = vmul.f32 %v11591_v60, %v11905_v54  ;;  %v1097_v56 = vmul.f32 %v11598_v35, %v11993_v45  ;;  %v1778_v16 = vsel %vm599_vm0, %v1775_v26, %v1777_v38  ;;  %v655_v40 = vrot.slane %v536_v42, 1 }
  0xe6   : > { %v1540_v37 = vadd.f32 %v1464_v25, %v1295_v14  ;;  %v901_v8 = vrot.slane %v782_v12, 2  ;;  %v2169_v41 = vsel %vm2108_vm2, %v2096_v63, 0.0  ;;  %v1017_v27 = vmul.f32 %v11663_v33, %v11993_v45 }
  0xe7   : > { %v1215_v4 = vrot.slane %v1097_v56, 1  ;;  %v1342_v54 = vmul.f32 %v11614_v34, %v11993_v45  ;;  %2170 = vadd.xlane.f32.xlu0 %v2169_v41  ;;  %v657_v46 = vsel %vm599_vm0, %v655_v40, %v656_v22  ;;  %v1656_v31 = vmul.f32 %v11625_v15, %v12081_v7  ;;  %v12129_v56 = vld [vmem:[%s10895_s24 + $0x158] sm:$0xff]  ;;  %v12133_v40 = vld [vmem:[%s10895_s24 + $0x160] sm:$0x3] }
  0xe8   : > { %v1609_v43 = vadd.f32 %v1577_v39, %v1540_v37  ;;  %v903_v11 = vsel %vm845_vm1, %v901_v8, %v902_v23  ;;  %v2023_v55 = vsel %vm845_vm1, %v2020_v53, %v2022_v21  ;;  %v734_v17 = vadd.f32 %v657_v46, %v456_v29 }
  0xe9   : > { %v1460_v3 = vrot.slane %v1342_v54, 2  ;;  %v1901_v59 = vmul.f32 %v11698_v57, %v12081_v7  ;;  %v1217_v18 = vsel %vm599_vm0, %v1215_v4, %v1216_v61  ;;  %v1576_v22 = vmul.f32 %v11638_v20, %v12081_v7 }
  0xea   : > { %v1854_v32 = vadd.f32 %v1778_v16, %v1609_v43  ;;  %v12101_v23 = vmul.f32 %v11577_v24, %v11953_v48  ;;  %v980_v30 = vadd.f32 %v903_v11, %v734_v17  ;;  %v1774_v49 = vrot.slane %v1656_v31, 1 }
  0xeb   : > { %v459_v52 = vmul.f32 %v11591_v60, %v11953_v48  ;;  %v541_v44 = vmul.f32 %v11577_v24, %v11957_v50  ;;  %v1462_v1 = vsel %vm845_vm1, %v1460_v3, %v1461_v13  ;;  %v786_v19 = vmul.f32 %v11584_v58, %v11953_v48 }
  0xec   : > { %v2099_v10 = vadd.f32 %v2023_v55, %v1854_v32  ;;  %v661_v61 = vrot.slane %v12101_v23, 1  ;;  %v1049_v9 = vadd.f32 %v1017_v27, %v980_v30  ;;  %v2019_v6 = vrot.slane %v1901_v59, 2 }
  0xed   : > { %v663_v0 = vrot.slane %v541_v44, 1  ;;  %v787_v36 = vmul.f32 %v11584_v58, %v11957_v50  ;;  %v907_v47 = vrot.slane %v786_v19, 2  ;;  %v1020_v25 = vmul.f32 %v11663_v33, %v12041_v62 }
  0xee   : > { %v2178_v28 = vsel %vm2108_vm2, %v2099_v10, 0.0  ;;  %v1101_v13 = vmul.f32 %v11598_v35, %v12041_v62  ;;  %v1294_v39 = vadd.f32 %v1217_v18, %v1049_v9  ;;  %v1102_v14 = vmul.f32 %v11598_v35, %v12045_v2 }
  0xef   : > { %2179 = vadd.xlane.f32.xlu1 %v2178_v28  ;;  %v664_v48 = vsel %vm599_vm0, %v661_v61, %v663_v0  ;;  %v909_v38 = vrot.slane %v787_v36, 2  ;;  %v1346_v12 = vmul.f32 %v11614_v34, %v12041_v62  ;;  %v1347_v63 = vmul.f32 %v11614_v34, %v12045_v2 }
  0xf0   : > { %v737_v50 = vadd.f32 %v664_v48, %v459_v52  ;;  %v1221_v42 = vrot.slane %v1101_v13, 1  ;;  %v1539_v21 = vadd.f32 %v1462_v1, %v1294_v39  ;;  %v1776_v29 = vsel %vm599_vm0, %v1774_v49, %v1775_v26 }
  0xf1   : > { %v910_v37 = vsel %vm845_vm1, %v907_v47, %v909_v38  ;;  %v1223_v16 = vrot.slane %v1102_v14, 1  ;;  %v1466_v41 = vrot.slane %v1346_v12, 2  ;;  %v1468_v27 = vrot.slane %v1347_v63, 2 }
  0xf2   : > { %v983_v8 = vadd.f32 %v910_v37, %v737_v50  ;;  %v12137_v4 = vmul.f32 %v11625_v15, %v12129_v56  ;;  %v1608_v54 = vadd.f32 %v1576_v22, %v1539_v21  ;;  %v1661_v5 = vmul.f32 %v11625_v15, %v12133_v40 }
  0xf3   : > { %v1224_v43 = vsel %vm599_vm0, %v1221_v42, %v1223_v16  ;;  %v12144_v26 = vmul.f32 %v11698_v57, %v12129_v56  ;;  %v2021_v46 = vsel %vm845_vm1, %v2019_v6, %v2020_v53  ;;  %v1906_v55 = vmul.f32 %v11698_v57, %v12133_v40  ;;  %v12169_v6 = vld [vmem:[%s10895_s24 + $0x150] sm:$0xff] }
  0xf4   : > { %v1052_v11 = vadd.f32 %v1020_v25, %v983_v8  ;;  %v1780_v31 = vrot.slane %v12137_v4, 1  ;;  %v1853_v17 = vadd.f32 %v1776_v29, %v1608_v54  ;;  %v1469_v3 = vsel %vm845_vm1, %v1466_v41, %v1468_v27 }
  0xf5   : > { %v1579_v59 = vmul.f32 %v11638_v20, %v12129_v56  ;;  %v1782_v32 = vrot.slane %v1661_v5, 1  ;;  %v2025_v22 = vrot.slane %v12144_v26, 2  ;;  %v539_v51 = vmul.f32 %v11577_v24, %v11993_v45  ;;  %v12258_v26 = vld [vmem:[%s15186_s1 + $0x1] ss:$0 sm:$0xff] }
  0xf6   : > { %v1297_v18 = vadd.f32 %v1224_v43, %v1052_v11  ;;  %v785_v53 = vmul.f32 %v11584_v58, %v11993_v45  ;;  %v2098_v23 = vadd.f32 %v2021_v46, %v1853_v17  ;;  %v2027_v30 = vrot.slane %v1906_v55, 2 }
  0xf7   : > { %v458_v49 = vmul.f32 %v11591_v60, %v11993_v45  ;;  %v1100_v52 = vmul.f32 %v11598_v35, %v12081_v7  ;;  %v1783_v10 = vsel %vm599_vm0, %v1780_v31, %v1782_v32  ;;  %v660_v1 = vrot.slane %v539_v51, 1 }
  0xf8   : > { %v1542_v44 = vadd.f32 %v1469_v3, %v1297_v18  ;;  %v906_v19 = vrot.slane %v785_v53, 2  ;;  %v2175_v9 = vsel %vm2108_vm2, %v2098_v23, 0.0  ;;  %v1019_v0 = vmul.f32 %v11663_v33, %v12081_v7  ;;  %v12227_v23 = vld [vmem:[%s10895_s24 + $0x170] sm:$0xff] }
  0xf9   : > { %v1220_v36 = vrot.slane %v1100_v52, 1  ;;  %v1345_v45 = vmul.f32 %v11614_v34, %v12081_v7  ;;  %2176 = vadd.xlane.f32.xlu0 %v2175_v9  ;;  %v662_v25 = vsel %vm599_vm0, %v660_v1, %v661_v61  ;;  %v1659_v39 = vmul.f32 %v11625_v15, %v12169_v6 }
  0xfa   : > { %v1611_v28 = vadd.f32 %v1579_v59, %v1542_v44  ;;  %v908_v13 = vsel %vm845_vm1, %v906_v19, %v907_v47  ;;  %v2028_v48 = vsel %vm845_vm1, %v2025_v22, %v2027_v30  ;;  %v736_v38 = vadd.f32 %v662_v25, %v458_v49  ;;  %v12231_v49 = vld [vmem:[%s10895_s24 + $0x178] sm:$0x3] }
  0xfb   : > { %v1465_v14 = vrot.slane %v1345_v45, 2  ;;  %v1904_v50 = vmul.f32 %v11698_v57, %v12169_v6  ;;  %v1222_v63 = vsel %vm599_vm0, %v1220_v36, %v1221_v42  ;;  %v1578_v61 = vmul.f32 %v11638_v20, %v12169_v6 }
  0xfc   : > { %v1856_v12 = vadd.f32 %v1783_v10, %v1611_v28  ;;  %v12189_v47 = vmul.f32 %v11577_v24, %v12041_v62  ;;  %v982_v21 = vadd.f32 %v908_v13, %v736_v38  ;;  %v1779_v29 = vrot.slane %v1659_v39, 1  ;;  %v12265_v38 = vld [vmem:[%s15186_s1 + $0x2] ss:$0 sm:$0xff] }
  0xfd   : > { %v461_v37 = vmul.f32 %v11591_v60, %v12041_v62  ;;  %v544_v16 = vmul.f32 %v11577_v24, %v12045_v2  ;;  %v1467_v27 = vsel %vm845_vm1, %v1465_v14, %v1466_v41  ;;  %v12199_v54 = vmul.f32 %v11584_v58, %v12041_v62 }
  0xfe   : > { %v2101_v8 = vadd.f32 %v2028_v48, %v1856_v12  ;;  %v666_v42 = vrot.slane %v12189_v47, 1  ;;  %v1051_v43 = vadd.f32 %v1019_v0, %v982_v21  ;;  %v2024_v5 = vrot.slane %v1904_v50, 2  ;;  %v12272_v12 = vld [vmem:[%s15186_s1] ss:$0 sm:$0xff] }
  0xff   : > { %v668_v46 = vrot.slane %v544_v16, 1  ;;  %v790_v11 = vmul.f32 %v11584_v58, %v12045_v2  ;;  %v912_v24 = vrot.slane %v12199_v54, 2  ;;  %v1022_v41 = vmul.f32 %v11663_v33, %v12129_v56  ;;  %v12288_v54 = vld [vmem:[%s10895_s24 + $0x168] sm:$0xff] }
 0x100   : > { %v2184_v60 = vsel %vm2108_vm2, %v2101_v8, 0.0  ;;  %v12209_v55 = vmul.f32 %v11598_v35, %v12129_v56  ;;  %v1296_v62 = vadd.f32 %v1222_v63, %v1051_v43  ;;  %v1105_v2 = vmul.f32 %v11598_v35, %v12133_v40 }
 0x101   : > { %2185 = vadd.xlane.f32.xlu1 %v2184_v60  ;;  %v669_v17 = vsel %vm599_vm0, %v666_v42, %v668_v46  ;;  %v914_v58 = vrot.slane %v790_v11, 2  ;;  %v12219_v32 = vmul.f32 %v11614_v34, %v12129_v56  ;;  %v1350_v18 = vmul.f32 %v11614_v34, %v12133_v40 }
 0x102   : > { %v739_v3 = vadd.f32 %v669_v17, %v461_v37  ;;  %v1226_v59 = vrot.slane %v12209_v55, 1  ;;  %v1541_v51 = vadd.f32 %v1467_v27, %v1296_v62  ;;  %v1781_v53 = vsel %vm599_vm0, %v1779_v29, %v1780_v31  ;;  %v12310_v62 = vpop.xlane.xlu1 %2116 }
 0x103   : > { %v915_v30 = vsel %vm845_vm1, %v912_v24, %v914_v58  ;;  %v1228_v35 = vrot.slane %v1105_v2, 1  ;;  %v1471_v44 = vrot.slane %v12219_v32, 2  ;;  %v1473_v10 = vrot.slane %v1350_v18, 2 }
 0x104   : > { %v985_v52 = vadd.f32 %v915_v30, %v739_v3  ;;  %v12236_v1 = vmul.f32 %v11625_v15, %v12227_v23  ;;  %v1610_v34 = vadd.f32 %v1578_v61, %v1541_v51  ;;  %v1664_v31 = vmul.f32 %v11625_v15, %v12231_v49  ;;  %v12279_v61 = vld [vmem:[%s15186_s1 + $0x4] ss:$0 sm:$0xff]  ;;  %v12321_v3 = vld [vmem:[%s15186_s1 + $0x6] ss:$0 sm:$0xff] }
 0x105   : > { %v1229_v4 = vsel %vm599_vm0, %v1226_v59, %v1228_v35  ;;  %v12243_v19 = vmul.f32 %v11698_v57, %v12227_v23  ;;  %v2026_v9 = vsel %vm845_vm1, %v2024_v5, %v2025_v22  ;;  %v1909_v45 = vmul.f32 %v11698_v57, %v12231_v49  ;;  %v12295_v5 = vld [vmem:[%s15186_s1 + $0x5] ss:$0 sm:$0xff] }
 0x106   : > { %v1054_v0 = vadd.f32 %v1022_v41, %v985_v52  ;;  %v1785_v36 = vrot.slane %v12236_v1, 1  ;;  %v1855_v28 = vadd.f32 %v1781_v53, %v1610_v34  ;;  %v1474_v25 = vsel %vm845_vm1, %v1471_v44, %v1473_v10  ;;  %v12391_v1 = vld [vmem:[%s15186_s1 + $0x8] ss:$0 sm:$0xff] }
 0x107   : > { %v1581_v15 = vmul.f32 %v11638_v20, %v12227_v23  ;;  %v1787_v13 = vrot.slane %v1664_v31, 1  ;;  %v2030_v48 = vrot.slane %v12243_v19, 2  ;;  %v542_v22 = vmul.f32 %v12258_v26, %v12081_v7 }
 0x108   : > { %v1299_v39 = vadd.f32 %v1229_v4, %v1054_v0  ;;  %v788_v20 = vmul.f32 %v12265_v38, %v12081_v7  ;;  %v2100_v14 = vadd.f32 %v2026_v9, %v1855_v28  ;;  %v2032_v50 = vrot.slane %v1909_v45, 2 }
 0x109   : > { %v460_v63 = vmul.f32 %v12272_v12, %v12081_v7  ;;  %v1103_v21 = vmul.f32 %v12279_v61, %v12169_v6  ;;  %v1788_v37 = vsel %vm599_vm0, %v1785_v36, %v1787_v13  ;;  %v665_v16 = vrot.slane %v542_v22, 1  ;;  %v12359_v13 = vld [vmem:[%s10895_s24 + $0x188] sm:$0xff] }
 0x10a   : > { %v1544_v29 = vadd.f32 %v1474_v25, %v1299_v39  ;;  %v911_v8 = vrot.slane %v788_v20, 2  ;;  %v2181_v27 = vsel %vm2108_vm2, %v2100_v14, 0.0  ;;  %v1021_v7 = vmul.f32 %v11663_v33, %v12169_v6  ;;  %v12306_v33 = vld [vmem:[%s15186_s1 + $0x7] ss:$0 sm:$0xff]  ;;  %v12354_v25 = vpop.xlane.xlu0 %2110  ;;  %v12367_v14 = vld [vmem:[%s10895_s24 + $0x190] sm:$0x3] }
 0x10b   : > { %v1225_v43 = vrot.slane %v1103_v21, 1  ;;  %v1348_v46 = vmul.f32 %v12295_v5, %v12169_v6  ;;  %2182 = vadd.xlane.f32.xlu0 %v2181_v27  ;;  %v667_v60 = vsel %vm599_vm0, %v665_v16, %v666_v42  ;;  %v1662_v55 = vmul.f32 %v12306_v33, %v12288_v54 }
 0x10c   : > { %v1613_v11 = vadd.f32 %v1581_v15, %v1544_v29  ;;  %v913_v41 = vsel %vm845_vm1, %v911_v8, %v912_v24  ;;  %v2033_v17 = vsel %vm845_vm1, %v2030_v48, %v2032_v50  ;;  %v738_v58 = vadd.f32 %v667_v60, %v460_v63  ;;  %v12356_v15 = vpop.xlane.xlu1 %2119 }
 0x10d   : > { %v1470_v47 = vrot.slane %v1348_v46, 2  ;;  %v1907_v42 = vmul.f32 %v11698_v57, %v12288_v54  ;;  %v1227_v2 = vsel %vm599_vm0, %v1225_v43, %v1226_v59  ;;  %v1580_v32 = vmul.f32 %v12321_v3, %v12288_v54 }
 0x10e   : > { %v1858_v24 = vadd.f32 %v1788_v37, %v1613_v11  ;;  %v12327_v18 = vmul.f32 %v12258_v26, %v12129_v56  ;;  %v984_v51 = vadd.f32 %v913_v41, %v738_v58  ;;  %v1784_v53 = vrot.slane %v1662_v55, 1 }
 0x10f   : > { %v463_v57 = vmul.f32 %v12272_v12, %v12129_v56  ;;  %v547_v59 = vmul.f32 %v12258_v26, %v12133_v40  ;;  %v1472_v35 = vsel %vm845_vm1, %v1470_v47, %v1471_v44  ;;  %v12337_v10 = vmul.f32 %v12265_v38, %v12129_v56  ;;  %v12346_v44 = vld [vmem:[%s15186_s1 + $0x3] ss:$0 sm:$0xff] }
 0x110   : > { %v2103_v30 = vadd.f32 %v2033_v17, %v1858_v24  ;;  %v671_v52 = vrot.slane %v12327_v18, 1  ;;  %v1053_v34 = vadd.f32 %v1021_v7, %v984_v51  ;;  %v2029_v4 = vrot.slane %v1907_v42, 2  ;;  %v12403_v24 = vpop.xlane.xlu0 %2113 }
 0x111   : > { %v673_v31 = vrot.slane %v547_v59, 1  ;;  %v793_v9 = vmul.f32 %v12265_v38, %v12133_v40  ;;  %v917_v45 = vrot.slane %v12337_v10, 2  ;;  %v1024_v56 = vmul.f32 %v12346_v44, %v12227_v23 }
 0x112   : > { %v2190_v0 = vsel %vm2108_vm2, %v2103_v30, 0.0  ;;  %v12352_v28 = vmul.f32 %v12279_v61, %v12227_v23  ;;  %v1298_v40 = vadd.f32 %v1227_v2, %v1053_v34  ;;  %v1108_v20 = vmul.f32 %v12279_v61, %v12231_v49  ;;  %v12405_v2 = vpop.xlane.xlu1 %2125  ;;  %v423_v34 = vld [vmem:[%s10895_s24 + $0x180] sm:$0xff] }
 0x113   : > { %2191 = vadd.xlane.f32.xlu1 %v2190_v0  ;;  %v674_v39 = vsel %vm599_vm0, %v671_v52, %v673_v31  ;;  %v919_v22 = vrot.slane %v793_v9, 2  ;;  %v12372_v21 = vmul.f32 %v12295_v5, %v12227_v23  ;;  %v1353_v29 = vmul.f32 %v12295_v5, %v12231_v49 }
 0x114   : > { %v741_v50 = vadd.f32 %v674_v39, %v463_v57  ;;  %v1231_v63 = vrot.slane %v12352_v28, 1  ;;  %v1543_v37 = vadd.f32 %v1472_v35, %v1298_v40  ;;  %v1786_v16 = vsel %vm599_vm0, %v1784_v53, %v1785_v36 }
 0x115   : > { %v920_v8 = vsel %vm845_vm1, %v917_v45, %v919_v22  ;;  %v1233_v27 = vrot.slane %v1108_v20, 1  ;;  %v1476_v43 = vrot.slane %v12372_v21, 2  ;;  %v1478_v46 = vrot.slane %v1353_v29, 2 }
 0x116   : > { %v987_v7 = vadd.f32 %v920_v8, %v741_v50  ;;  %v12383_v11 = vmul.f32 %v12306_v33, %v12359_v13  ;;  %v1612_v60 = vadd.f32 %v1580_v32, %v1543_v37  ;;  %v1667_v55 = vmul.f32 %v12306_v33, %v12367_v14  ;;  %v12433_v37 = vpop.xlane.xlu0 %2122 }
 0x117   : > { %v1234_v41 = vsel %vm599_vm0, %v1231_v63, %v1233_v27  ;;  %v12395_v36 = vmul.f32 %v12391_v1, %v12359_v13  ;;  %v2031_v17 = vsel %vm845_vm1, %v2029_v4, %v2030_v48  ;;  %v1912_v42 = vmul.f32 %v12391_v1, %v12367_v14 }
 0x118   : > { %v1056_v58 = vadd.f32 %v1024_v56, %v987_v7  ;;  %v1790_v47 = vrot.slane %v12383_v11, 1  ;;  %v1857_v32 = vadd.f32 %v1786_v16, %v1612_v60  ;;  %v1479_v51 = vsel %vm845_vm1, %v1476_v43, %v1478_v46  ;;  %v12435_v16 = vpop.xlane.xlu1 %2131 }
 0x119   : > { %v1583_v53 = vmul.f32 %v12321_v3, %v12359_v13  ;;  %v1792_v19 = vrot.slane %v1667_v55, 1  ;;  %v2035_v48 = vrot.slane %v12395_v36, 2  ;;  %v545_v59 = vmul.f32 %v12258_v26, %v12169_v6 }
 0x11a   : > { %v1301_v57 = vadd.f32 %v1234_v41, %v1056_v58  ;;  %v791_v30 = vmul.f32 %v12265_v38, %v12169_v6  ;;  %v2102_v35 = vadd.f32 %v2031_v17, %v1857_v32  ;;  %v2037_v10 = vrot.slane %v1912_v42, 2 }
 0x11b   : > { %v462_v4 = vmul.f32 %v12272_v12, %v12169_v6  ;;  %v1106_v31 = vmul.f32 %v12279_v61, %v12288_v54  ;;  %v1793_v0 = vsel %vm599_vm0, %v1790_v47, %v1792_v19  ;;  %v670_v56 = vrot.slane %v545_v59, 1 }
 0x11c   : > { %v1546_v9 = vadd.f32 %v1479_v51, %v1301_v57  ;;  %v916_v28 = vrot.slane %v791_v30, 2  ;;  %v2187_v40 = vsel %vm2108_vm2, %v2102_v35, 0.0  ;;  %v1023_v39 = vmul.f32 %v12346_v44, %v12288_v54 }
 0x11d   : > { %v1230_v22 = vrot.slane %v1106_v31, 1  ;;  %v1351_v20 = vmul.f32 %v12295_v5, %v12288_v54  ;;  %2188 = vadd.xlane.f32.xlu0 %v2187_v40  ;;  %v672_v50 = vsel %vm599_vm0, %v670_v56, %v671_v52  ;;  %v1665_v29 = vmul.f32 %v12306_v33, %v423_v34  ;;  %v12464_v31 = vpop.xlane.xlu1 %2137  ;;  %v427_v40 = vld [vmem:[%s10895_s24 + $0x1a0] sm:$0xff] }
 0x11e   : > { %v1615_v6 = vadd.f32 %v1583_v53, %v1546_v9  ;;  %v918_v21 = vsel %vm845_vm1, %v916_v28, %v917_v45  ;;  %v2038_v8 = vsel %vm845_vm1, %v2035_v48, %v2037_v10  ;;  %v740_v27 = vadd.f32 %v672_v50, %v462_v4  ;;  %v12462_v4 = vpop.xlane.xlu0 %2128  ;;  %v426_v9 = vld [vmem:[%s10895_s24 + $0x198] sm:$0xff] }
 0x11f   : > { %v1475_v7 = vrot.slane %v1351_v20, 2  ;;  %v1910_v46 = vmul.f32 %v12391_v1, %v423_v34  ;;  %v1232_v18 = vsel %vm599_vm0, %v1230_v22, %v1231_v63  ;;  %v1582_v52 = vmul.f32 %v12321_v3, %v423_v34 }
 0x120   : > { %v1860_v60 = vadd.f32 %v1793_v0, %v1615_v6  ;;  %v548_v45 = vmul.f32 %v12258_v26, %v12288_v54  ;;  %v986_v41 = vadd.f32 %v918_v21, %v740_v27  ;;  %v1789_v55 = vrot.slane %v1665_v29, 1 }
 0x121   : > { %v464_v17 = vmul.f32 %v12272_v12, %v12288_v54  ;;  %v12449_v58 = vmul.f32 %v12258_v26, %v12227_v23  ;;  %v1477_v32 = vsel %vm845_vm1, %v1475_v7, %v1476_v43  ;;  %v794_v63 = vmul.f32 %v12265_v38, %v12288_v54 }
 0x122   : > { %v2105_v42 = vadd.f32 %v2038_v8, %v1860_v60  ;;  %v675_v51 = vrot.slane %v548_v45, 1  ;;  %v1055_v53 = vadd.f32 %v1023_v39, %v986_v41  ;;  %v2034_v19 = vrot.slane %v1910_v46, 2 }
 0x123   : > { %v676_v57 = vrot.slane %v12449_v58, 1  ;;  %v12457_v59 = vmul.f32 %v12265_v38, %v12227_v23  ;;  %v921_v35 = vrot.slane %v794_v63, 2  ;;  %v1025_v10 = vmul.f32 %v12346_v44, %v423_v34  ;;  %v12497_v58 = vpop.xlane.xlu0 %2134 }
 0x124   : > { %v2196_v30 = vsel %vm2108_vm2, %v2105_v42, 0.0  ;;  %v1109_v43 = vmul.f32 %v12279_v61, %v423_v34  ;;  %v1300_v54 = vadd.f32 %v1232_v18, %v1055_v53  ;;  %v12471_v28 = vmul.f32 %v12279_v61, %v12359_v13 }
 0x125   : > { %2197 = vadd.xlane.f32.xlu1 %v2196_v30  ;;  %v677_v0 = vsel %vm599_vm0, %v675_v51, %v676_v57  ;;  %v922_v56 = vrot.slane %v12457_v59, 2  ;;  %v1354_v20 = vmul.f32 %v12295_v5, %v423_v34  ;;  %v12477_v6 = vmul.f32 %v12295_v5, %v12359_v13 }
 0x126   : > { %v742_v39 = vadd.f32 %v677_v0, %v464_v17  ;;  %v1235_v22 = vrot.slane %v1109_v43, 1  ;;  %v1545_v50 = vadd.f32 %v1477_v32, %v1300_v54  ;;  %v1791_v21 = vsel %vm599_vm0, %v1789_v55, %v1790_v47 }
 0x127   : > { %v923_v29 = vsel %vm845_vm1, %v921_v35, %v922_v56  ;;  %v1236_v8 = vrot.slane %v12471_v28, 1  ;;  %v1480_v7 = vrot.slane %v1354_v20, 2  ;;  %v1481_v46 = vrot.slane %v12477_v6, 2  ;;  %v428_v35 = vld [vmem:[%s10895_s24 + $0x1a8] sm:$0x3]  ;;  %v12531_v20 = vpop.xlane.xlu0 %2140  ;;  %s9289_s24 = sshll.u32 %s15391_s18, 8 }
 0x128   : > { %v988_v27 = vadd.f32 %v923_v29, %v742_v39  ;;  %v1668_v60 = vmul.f32 %v12306_v33, %v426_v9  ;;  %v1614_v34 = vadd.f32 %v1582_v52, %v1545_v50  ;;  %v12488_v45 = vmul.f32 %v12306_v33, %v427_v40  ;;  %v12499_v52 = vpop.xlane.xlu1 %2143  ;;  %s12631_s20 = scalar_lea.vmem %s15194_s9, %s9289_s24  ;;  %s15096_s14 = scalar_lea.vmem %s15195_s10, %s9289_s24 }
 0x129   : > { %v1237_v18 = vsel %vm599_vm0, %v1235_v22, %v1236_v8  ;;  %v1913_v11 = vmul.f32 %v12391_v1, %v426_v9  ;;  %v2036_v47 = vsel %vm845_vm1, %v2034_v19, %v2035_v48  ;;  %v12495_v17 = vmul.f32 %v12391_v1, %v427_v40 }
 0x12a   : > { %v1057_v41 = vadd.f32 %v1025_v10, %v988_v27  ;;  %v1794_v55 = vrot.slane %v1668_v60, 1  ;;  %v1859_v42 = vadd.f32 %v1791_v21, %v1614_v34  ;;  %v1482_v32 = vsel %vm845_vm1, %v1480_v7, %v1481_v46 }
 0x12b   : > { %v1584_v51 = vmul.f32 %v12321_v3, %v426_v9  ;;  %v1795_v63 = vrot.slane %v12488_v45, 1  ;;  %v2039_v53 = vrot.slane %v1913_v11, 2  ;;  %v550_v48 = vmul.f32 %v12258_v26, %v12231_v49 }
 0x12c   : > { %v1302_v36 = vadd.f32 %v1237_v18, %v1057_v41  ;;  %v796_v19 = vmul.f32 %v12265_v38, %v12231_v49  ;;  %v2104_v59 = vadd.f32 %v2036_v47, %v1859_v42  ;;  %v2040_v30 = vrot.slane %v12495_v17, 2  ;;  %v12533_v6 = vpop.xlane.xlu1 %2149  ;;  %v2147_v11 = vpop.xlane.xlu0 %2146 }
 0x12d   : > { %v465_v10 = vmul.f32 %v12272_v12, %v12227_v23  ;;  %v1111_v43 = vmul.f32 %v12279_v61, %v12367_v14  ;;  %v1796_v26 = vsel %vm599_vm0, %v1794_v55, %v1795_v63  ;;  %v678_v9 = vrot.slane %v550_v48, 1 }
 0x12e   : > { %v1547_v54 = vadd.f32 %v1482_v32, %v1302_v36  ;;  %v924_v0 = vrot.slane %v796_v19, 2  ;;  %v2193_v49 = vsel %vm2108_vm2, %v2104_v59, 0.0  ;;  %v12522_v38 = vmul.f32 %v12346_v44, %v12359_v13 }
 0x12f   : > { %v1238_v28 = vrot.slane %v1111_v43, 1  ;;  %v1356_v23 = vmul.f32 %v12295_v5, %v12367_v14  ;;  %2194 = vadd.xlane.f32.xlu0 %v2193_v49  ;;  %v679_v61 = vsel %vm599_vm0, %v676_v57, %v678_v9  ;;  %v12529_v22 = vmul.f32 %v12306_v33, %v428_v35 }
 0x130   : > { %v1616_v12 = vadd.f32 %v1584_v51, %v1547_v54  ;;  %v925_v39 = vsel %vm845_vm1, %v922_v56, %v924_v0  ;;  %v2041_v44 = vsel %vm845_vm1, %v2039_v53, %v2040_v30  ;;  %v743_v13 = vadd.f32 %v679_v61, %v465_v10 }
 0x131   : > { %v1483_v50 = vrot.slane %v1356_v23, 2  ;;  %v12539_v5 = vmul.f32 %v12391_v1, %v428_v35  ;;  %v12543_v57 = vmul.f32 %v12321_v3, %v427_v40  ;;  %v12546_v56 = vsel %vm599_vm0, %v1236_v8, %v1238_v28 }
 0x132   : > { %v1861_v14 = vadd.f32 %v1796_v26, %v1616_v12  ;;  %v989_v33 = vadd.f32 %v925_v39, %v743_v13  ;;  %v1797_v21 = vrot.slane %v12529_v22, 1  ;;  %v10808_v29 = vmov 0  }
 0x133   : > { %10647 = vset.pattern.permute.xlu1 %v10808_v29  ;;  %10646 = vset.pattern.permute.xlu0 %v10808_v29  ;;  %v12552_v1 = vsel %vm845_vm1, %v1481_v46, %v1483_v50  ;;  %v15196_v7 = vmov 0.0   ;;  %v12634_v3 = vstv %s12508_s2  ;;  %v2042_v8 = vrot.slane %v12539_v5, 2 }
 0x134   : > { %v12549_v27 = vadd.f32 %v2041_v44, %v1861_v14  ;;  %2273 = vst.msk [vmem:[#allocation2 + $0x8] sm:$0xff] %vm2239_vm3, %v15196_v7  ;;  %2272 = vst.msk [vmem:[#allocation2] sm:$0xff] %vm2239_vm3, %v15196_v7  ;;  %v1058_v40 = vadd.f32 %v12522_v38, %v989_v33  ;;  %v2209_v46 = vadd.f32 %v12634_v3, %v12310_v62  ;;  %v2156_v47 = vpop.xlane.xlu1 %2155 }
 0x135   : > { %2276 = vst.msk [vmem:[#allocation2 + $0x18] sm:$0xff] %vm2239_vm3, %v15196_v7  ;;  %2277 = vst.msk [vmem:[#allocation2 + $0x20] sm:$0xff] %vm2239_vm3, %v15196_v7  ;;  %v2207_v60 = vadd.f32 %v12634_v3, %v12354_v25  ;;  %v2210_v25 = vadd.f32 %v12634_v3, %v12356_v15  ;;  %v2208_v34 = vadd.f32 %v12634_v3, %v12403_v24 }
 0x136   : > { %2279 = vst.msk [vmem:[#allocation2 + $0x30] sm:$0xff] %vm2239_vm3, %v15196_v7  ;;  %2280 = vst.msk [vmem:[#allocation2 + $0x38] sm:$0xff] %vm2239_vm3, %v15196_v7  ;;  %v2199_v62 = vsel %vm2108_vm2, %v12549_v27, 0.0  ;;  %v2212_v18 = vadd.f32 %v12634_v3, %v12405_v2  ;;  %v1303_v41 = vadd.f32 %v12546_v56, %v1058_v40  ;;  %v2211_v15 = vadd.f32 %v12634_v3, %v12433_v37 }
 0x137   : > { %2282 = vst.msk [vmem:[#allocation2 + $0x48] sm:$0xff] %vm2239_vm3, %v15196_v7  ;;  %2283 = vst.msk [vmem:[#allocation2 + $0x50] sm:$0xff] %vm2239_vm3, %v15196_v7  ;;  %2200 = vadd.xlane.f32.xlu0 %v2199_v62  ;;  %v2214_v24 = vadd.f32 %v12634_v3, %v12435_v16  ;;  %v2213_v2 = vadd.f32 %v12634_v3, %v12462_v4  ;;  %v2216_v37 = vadd.f32 %v12634_v3, %v12464_v31 }
 0x138   : > { %2285 = vst.msk [vmem:[#allocation2 + $0x60] sm:$0xff] %vm2239_vm3, %v15196_v7  ;;  %2286 = vst.msk [vmem:[#allocation2 + $0x68] sm:$0xff] %vm2239_vm3, %v15196_v7  ;;  %v2215_v16 = vadd.f32 %v12634_v3, %v12497_v58  ;;  %v2218_v4 = vadd.f32 %v12634_v3, %v12499_v52  ;;  %v2217_v55 = vadd.f32 %v12634_v3, %v12531_v20 }
 0x139   : > { %2288 = vst.msk [vmem:[#allocation2 + $0x78] sm:$0xff] %vm2239_vm3, %v15196_v7  ;;  %2289 = vst.msk [vmem:[#allocation2 + $0x80] sm:$0xff] %vm2239_vm3, %v15196_v7  ;;  %v1548_v42 = vadd.f32 %v12552_v1, %v1303_v41  ;;  %v2220_v31 = vadd.f32 %v12634_v3, %v12533_v6  ;;  %v2219_v58 = vadd.f32 %v12634_v3, %v2147_v11 }
 0x13a   : > { %2291 = vst.msk [vmem:[#allocation2 + $0x90] sm:$0xff] %vm2239_vm3, %v15196_v7  ;;  %2292 = vst.msk [vmem:[#allocation2 + $0x98] sm:$0xff] %vm2239_vm3, %v15196_v7  ;;  %v2222_v52 = vadd.f32 %v12634_v3, %v2156_v47  ;;  %v1798_v32 = vsel %vm599_vm0, %v1795_v63, %v1797_v21  ;;  %v2043_v51 = vsel %vm845_vm1, %v2040_v30, %v2042_v8 }
 0x13b   : > { %2294 = vst.msk [vmem:[#allocation2 + $0xa8] sm:$0xff] %vm2239_vm3, %v15196_v7  ;;  %2295 = vst.msk [vmem:[#allocation2 + $0xb0] sm:$0xff] %vm2239_vm3, %v15196_v7  ;;  %v1617_v45 = vadd.f32 %v12543_v57, %v1548_v42  ;;  %v2360_v17 = vld [vmem:[#allocation2] sm:$0xff]  ;;  %v2361_v10 = vld [vmem:[#allocation2 + $0x8] sm:$0xff] }
 0x13c   : > { %2297 = vst.msk [vmem:[#allocation2 + $0xc0] sm:$0xff] %vm2239_vm3, %v15196_v7  ;;  %2298 = vst.msk [vmem:[#allocation2 + $0xc8] sm:$0xff] %vm2239_vm3, %v15196_v7  ;;  %v2621_v9 = vld [vmem:[#allocation2 + $0x1] sm:$0xff] }
 0x13d   : > { %2300 = vst.msk [vmem:[#allocation2 + $0xd8] sm:$0xff] %vm2239_vm3, %v15196_v7  ;;  %2301 = vst.msk [vmem:[#allocation2 + $0xe0] sm:$0xff] %vm2239_vm3, %v15196_v7  ;;  %v1862_v63 = vadd.f32 %v1798_v32, %v1617_v45 }
 0x13e   : > { %2303 = vst.msk [vmem:[#allocation2 + $0xf0] sm:$0xff] %vm2239_vm3, %v15196_v7  ;;  %2304 = vst.msk [vmem:[#allocation2 + $0xf8] sm:$0xff] %vm2239_vm3, %v15196_v7  ;;  %v2153_v53 = vpop.xlane.xlu0 %2152 }
 0x13f   : > { %2306 = vst.msk [vmem:[#allocation2 + $0x108] sm:$0xff] %vm2239_vm3, %v15196_v7  ;;  %2307 = vst.msk [vmem:[#allocation2 + $0x110] sm:$0xff] %vm2239_vm3, %v15196_v7  ;;  %v2107_v36 = vadd.f32 %v2043_v51, %v1862_v63  ;;  %v2221_v48 = vadd.f32 %v12634_v3, %v2153_v53 }
 0x140   : > { %2309 = vst.msk [vmem:[#allocation2 + $0x120] sm:$0xff] %vm2239_vm3, %v15196_v7  ;;  %2310 = vst.msk [vmem:[#allocation2 + $0x128] sm:$0xff] %vm2239_vm3, %v15196_v7 }
 0x141   : > { %2312 = vst.msk [vmem:[#allocation2 + $0x138] sm:$0xff] %vm2239_vm3, %v15196_v7  ;;  %2313 = vst.msk [vmem:[#allocation2 + $0x140] sm:$0xff] %vm2239_vm3, %v15196_v7  ;;  %v2202_v19 = vsel %vm2108_vm2, %v2107_v36, 0.0 }
 0x142   : > { %2315 = vst.msk [vmem:[#allocation2 + $0x150] sm:$0xff] %vm2239_vm3, %v15196_v7  ;;  %2316 = vst.msk [vmem:[#allocation2 + $0x158] sm:$0xff] %vm2239_vm3, %v15196_v7  ;;  %2203 = vadd.xlane.f32.xlu1 %v2202_v19 }
 0x143   : > { %2318 = vst.msk [vmem:[#allocation2 + $0x168] sm:$0xff] %vm2239_vm3, %v15196_v7  ;;  %2319 = vst.msk [vmem:[#allocation2 + $0x170] sm:$0xff] %vm2239_vm3, %v15196_v7 }
 0x144   : > { %2321 = vst.msk [vmem:[#allocation2 + $0x180] sm:$0xff] %vm2239_vm3, %v15196_v7  ;;  %2322 = vst.msk [vmem:[#allocation2 + $0x188] sm:$0xff] %vm2239_vm3, %v15196_v7 }
 0x145   : > { %2324 = vst.msk [vmem:[#allocation2 + $0x198] sm:$0xff] %vm2239_vm3, %v15196_v7  ;;  %2325 = vst.msk [vmem:[#allocation2 + $0x1a0] sm:$0xff] %vm2239_vm3, %v15196_v7 }
 0x146   : > { %2275 = vst.msk [vmem:[#allocation2 + $0x10] sm:$0x3] %vm2274_vm4, %v15196_v7  ;;  %2278 = vst.msk [vmem:[#allocation2 + $0x28] sm:$0x3] %vm2274_vm4, %v15196_v7  ;;  %v2162_v59 = vpop.xlane.xlu1 %2161 }
 0x147   : > { %2281 = vst.msk [vmem:[#allocation2 + $0x40] sm:$0x3] %vm2274_vm4, %v15196_v7  ;;  %2284 = vst.msk [vmem:[#allocation2 + $0x58] sm:$0x3] %vm2274_vm4, %v15196_v7  ;;  %v2224_v35 = vadd.f32 %v12634_v3, %v2162_v59 }
 0x148   : > { %2287 = vst.msk [vmem:[#allocation2 + $0x70] sm:$0x3] %vm2274_vm4, %v15196_v7  ;;  %2290 = vst.msk [vmem:[#allocation2 + $0x88] sm:$0x3] %vm2274_vm4, %v15196_v7 }
 0x149   : > { %2293 = vst.msk [vmem:[#allocation2 + $0xa0] sm:$0x3] %vm2274_vm4, %v15196_v7  ;;  %2296 = vst.msk [vmem:[#allocation2 + $0xb8] sm:$0x3] %vm2274_vm4, %v15196_v7 }
 0x14a   : > { %2299 = vst.msk [vmem:[#allocation2 + $0xd0] sm:$0x3] %vm2274_vm4, %v15196_v7  ;;  %2302 = vst.msk [vmem:[#allocation2 + $0xe8] sm:$0x3] %vm2274_vm4, %v15196_v7 }
 0x14b   : > { %2305 = vst.msk [vmem:[#allocation2 + $0x100] sm:$0x3] %vm2274_vm4, %v15196_v7  ;;  %2308 = vst.msk [vmem:[#allocation2 + $0x118] sm:$0x3] %vm2274_vm4, %v15196_v7 }
 0x14c   : > { %2311 = vst.msk [vmem:[#allocation2 + $0x130] sm:$0x3] %vm2274_vm4, %v15196_v7  ;;  %2314 = vst.msk [vmem:[#allocation2 + $0x148] sm:$0x3] %vm2274_vm4, %v15196_v7 }
 0x14d   : > { %2317 = vst.msk [vmem:[#allocation2 + $0x160] sm:$0x3] %vm2274_vm4, %v15196_v7  ;;  %2320 = vst.msk [vmem:[#allocation2 + $0x178] sm:$0x3] %vm2274_vm4, %v15196_v7  ;;  %2395 = vperm.xlu0 %10646, %v2360_v17   ;;  %v2622_v30 = vld [vmem:[#allocation2 + $0x9] sm:$0xff] }
 0x14e   : > { %2323 = vst.msk [vmem:[#allocation2 + $0x190] sm:$0x3] %vm2274_vm4, %v15196_v7  ;;  %2326 = vst.msk [vmem:[#allocation2 + $0x1a8] sm:$0x3] %vm2274_vm4, %v15196_v7 }
 0x14f   : > { %2242 = vst.msk [vmem:[%s12631_s20 + $0x10] sm:$0xff] %vm2239_vm3, %v2209_v46  ;;  %2330 = vst.msk [vmem:[#allocation2 + $0x31] sm:$0xff] %vm2239_vm3, %v2209_v46 }
 0x150   : > { %2240 = vst.msk [vmem:[%s12631_s20] sm:$0xff] %vm2239_vm3, %v2207_v60  ;;  %2328 = vst.msk [vmem:[#allocation2 + $0x19] sm:$0xff] %vm2239_vm3, %v2207_v60  ;;  %v2159_v43 = vpop.xlane.xlu0 %2158 }
 0x151   : > { %2243 = vst.msk [vmem:[%s12631_s20 + $0x18] sm:$0xff] %vm2239_vm3, %v2210_v25  ;;  %2331 = vst.msk [vmem:[#allocation2 + $0x39] sm:$0xff] %vm2239_vm3, %v2210_v25  ;;  %2661 = vperm.xlu0 %10646, %v2622_v30   ;;  %v2223_v26 = vadd.f32 %v12634_v3, %v2159_v43 }
 0x152   : > { %2241 = vst.msk [vmem:[%s12631_s20 + $0x8] sm:$0xff] %vm2239_vm3, %v2208_v34  ;;  %2329 = vst.msk [vmem:[#allocation2 + $0x21] sm:$0xff] %vm2239_vm3, %v2208_v34 }
 0x153   : > { %2245 = vst.msk [vmem:[%s12631_s20 + $0x28] sm:$0xff] %vm2239_vm3, %v2212_v18  ;;  %2333 = vst.msk [vmem:[#allocation2 + $0x51] sm:$0xff] %vm2239_vm3, %v2212_v18  ;;  %2400 = vperm.xlu1 %10647, %v2361_v10  }
 0x154   : > { %2244 = vst.msk [vmem:[%s12631_s20 + $0x20] sm:$0xff] %vm2239_vm3, %v2211_v15  ;;  %2332 = vst.msk [vmem:[#allocation2 + $0x49] sm:$0xff] %vm2239_vm3, %v2211_v15 }
 0x155   : > { %2247 = vst.msk [vmem:[%s12631_s20 + $0x38] sm:$0xff] %vm2239_vm3, %v2214_v24  ;;  %2335 = vst.msk [vmem:[#allocation2 + $0x69] sm:$0xff] %vm2239_vm3, %v2214_v24 }
 0x156   : > { %2246 = vst.msk [vmem:[%s12631_s20 + $0x30] sm:$0xff] %vm2239_vm3, %v2213_v2  ;;  %2334 = vst.msk [vmem:[#allocation2 + $0x61] sm:$0xff] %vm2239_vm3, %v2213_v2  ;;  %v12796_v39 = vld [vmem:[#allocation2 + $0x30] sm:$0xff] }
 0x157   : > { %2249 = vst.msk [vmem:[%s12631_s20 + $0x48] sm:$0xff] %vm2239_vm3, %v2216_v37  ;;  %2337 = vst.msk [vmem:[#allocation2 + $0x81] sm:$0xff] %vm2239_vm3, %v2216_v37  ;;  %2656 = vperm.xlu1 %10647, %v2621_v9   ;;  %v12780_v49 = vld [vmem:[#allocation2 + $0x18] sm:$0xff] }
 0x158   : > { %2248 = vst.msk [vmem:[%s12631_s20 + $0x40] sm:$0xff] %vm2239_vm3, %v2215_v16  ;;  %2336 = vst.msk [vmem:[#allocation2 + $0x79] sm:$0xff] %vm2239_vm3, %v2215_v16  ;;  %v2168_v38 = vpop.xlane.xlu1 %2167  ;;  %v12804_v44 = vld [vmem:[#allocation2 + $0x38] sm:$0xff] }
 0x159   : > { %2251 = vst.msk [vmem:[%s12631_s20 + $0x58] sm:$0xff] %vm2239_vm3, %v2218_v4  ;;  %2339 = vst.msk [vmem:[#allocation2 + $0x99] sm:$0xff] %vm2239_vm3, %v2218_v4  ;;  %v2226_v28 = vadd.f32 %v12634_v3, %v2168_v38  ;;  %v12790_v12 = vld [vmem:[#allocation2 + $0x20] sm:$0xff]  ;;  %v12925_v43 = vld [vmem:[#allocation2 + $0x31] sm:$0xff] }
 0x15a   : > { %2250 = vst.msk [vmem:[%s12631_s20 + $0x50] sm:$0xff] %vm2239_vm3, %v2217_v55  ;;  %2338 = vst.msk [vmem:[#allocation2 + $0x91] sm:$0xff] %vm2239_vm3, %v2217_v55  ;;  %v12917_v17 = vld [vmem:[#allocation2 + $0x21] sm:$0xff]  ;;  %v12919_v30 = vld [vmem:[#allocation2 + $0x19] sm:$0xff] }
 0x15b   : > { %2253 = vst.msk [vmem:[%s12631_s20 + $0x68] sm:$0xff] %vm2239_vm3, %v2220_v31  ;;  %2341 = vst.msk [vmem:[#allocation2 + $0xb1] sm:$0xff] %vm2239_vm3, %v2220_v31  ;;  %2405 = vperm.xlu1 %10647, %v12780_v49   ;;  %v12812_v50 = vld [vmem:[#allocation2 + $0x48] sm:$0xff]  ;;  %v12822_v33 = vld [vmem:[#allocation2 + $0x50] sm:$0xff] }
 0x15c   : > { %2252 = vst.msk [vmem:[%s12631_s20 + $0x60] sm:$0xff] %vm2239_vm3, %v2219_v58  ;;  %2340 = vst.msk [vmem:[#allocation2 + $0xa9] sm:$0xff] %vm2239_vm3, %v2219_v58  ;;  %v12923_v10 = vld [vmem:[#allocation2 + $0x39] sm:$0xff]  ;;  %v12933_v38 = vld [vmem:[#allocation2 + $0x51] sm:$0xff] }
 0x15d   : > { %2255 = vst.msk [vmem:[%s12631_s20 + $0x78] sm:$0xff] %vm2239_vm3, %v2222_v52  ;;  %2343 = vst.msk [vmem:[#allocation2 + $0xc9] sm:$0xff] %vm2239_vm3, %v2222_v52  ;;  %v12771_v54 = vld [vmem:[#allocation2 + $0x68] sm:$0xff]  ;;  %v12826_v56 = vld [vmem:[#allocation2 + $0x60] sm:$0xff] }
 0x15e   : > { %2254 = vst.msk [vmem:[%s12631_s20 + $0x70] sm:$0xff] %vm2239_vm3, %v2221_v48  ;;  %2342 = vst.msk [vmem:[#allocation2 + $0xc1] sm:$0xff] %vm2239_vm3, %v2221_v48  ;;  %2440 = vperm.xlu0 %10646, %v12771_v54  }
 0x15f   : > { %2257 = vst.msk [vmem:[%s12631_s20 + $0x88] sm:$0xff] %vm2239_vm3, %v2224_v35  ;;  %2345 = vst.msk [vmem:[#allocation2 + $0xe1] sm:$0xff] %vm2239_vm3, %v2224_v35  ;;  %v12778_v0 = vld [vmem:[#allocation2 + $0x80] sm:$0xff]  ;;  %2410 = vperm.xlu1 %10647, %v12790_v12   ;;  %v12829_v21 = vld [vmem:[#allocation2 + $0x78] sm:$0xff] }
 0x160   : > { %2256 = vst.msk [vmem:[%s12631_s20 + $0x80] sm:$0xff] %vm2239_vm3, %v2223_v26  ;;  %2344 = vst.msk [vmem:[#allocation2 + $0xd9] sm:$0xff] %vm2239_vm3, %v2223_v26 }
 0x161   : > { %v12784_v23 = vld [vmem:[#allocation2 + $0x98] sm:$0xff]  ;;  %2259 = vst.msk [vmem:[%s12631_s20 + $0x98] sm:$0xff] %vm2239_vm3, %v2226_v28  ;;  %2347 = vst.msk [vmem:[#allocation2 + $0xf9] sm:$0xff] %vm2239_vm3, %v2226_v28  ;;  %v12836_v1 = vld [vmem:[#allocation2 + $0x90] sm:$0xff] }
 0x162   : > { %2450 = vperm.xlu0 %10646, %v12778_v0   ;;  %v2165_v20 = vpop.xlane.xlu0 %2164  ;;  %v12935_v28 = vld [vmem:[#allocation2 + $0x49] sm:$0xff] }
 0x163   : > { %v12793_v61 = vld [vmem:[#allocation2 + $0xb0] sm:$0xff]  ;;  %2415 = vperm.xlu1 %10647, %v12796_v39   ;;  %v2225_v6 = vadd.f32 %v12634_v3, %v2165_v20  ;;  %v12839_v8 = vld [vmem:[#allocation2 + $0xa8] sm:$0xff] }
 0x164   : > { %v12939_v20 = vld [vmem:[#allocation2 + $0x69] sm:$0xff] }
 0x165   : > { %v12799_v22 = vld [vmem:[#allocation2 + $0xc8] sm:$0xff]  ;;  %2258 = vst.msk [vmem:[%s12631_s20 + $0x90] sm:$0xff] %vm2239_vm3, %v2225_v6  ;;  %2346 = vst.msk [vmem:[#allocation2 + $0xf1] sm:$0xff] %vm2239_vm3, %v2225_v6  ;;  %v12848_v62 = vld [vmem:[#allocation2 + $0xc0] sm:$0xff] }
 0x166   : > { %2460 = vperm.xlu0 %10646, %v12784_v23   ;;  %v12941_v6 = vld [vmem:[#allocation2 + $0x61] sm:$0xff] }
 0x167   : > { %v12809_v13 = vld [vmem:[#allocation2 + $0xe0] sm:$0xff]  ;;  %2420 = vperm.xlu1 %10647, %v12804_v44   ;;  %v12852_v25 = vld [vmem:[#allocation2 + $0xd8] sm:$0xff] }
 0x16a   : > { %2470 = vperm.xlu0 %10646, %v12793_v61   ;;  %v2174_v5 = vpop.xlane.xlu1 %2173 }
 0x16b   : > { %2425 = vperm.xlu1 %10647, %v12812_v50   ;;  %v2228_v14 = vadd.f32 %v12634_v3, %v2174_v5 }
 0x16c   : > { %v12820_v57 = vld [vmem:[#allocation2 + $0xf8] sm:$0xff]  ;;  %v12856_v11 = vld [vmem:[#allocation2 + $0xf0] sm:$0xff] }
 0x16d   : > { %2261 = vst.msk [vmem:[%s12631_s20 + $0xa8] sm:$0xff] %vm2239_vm3, %v2228_v14  ;;  %2349 = vst.msk [vmem:[#allocation2 + $0x111] sm:$0xff] %vm2239_vm3, %v2228_v14  ;;  %v2631_v14 = vld [vmem:[#allocation2 + $0x79] sm:$0xff] }
 0x16e   : > { %2480 = vperm.xlu0 %10646, %v12799_v22  }
 0x16f   : > { %2430 = vperm.xlu1 %10647, %v12822_v33  }
 0x172   : > { %2490 = vperm.xlu0 %10646, %v12809_v13  }
 0x173   : > { %2435 = vperm.xlu1 %10647, %v12826_v56  }
 0x174   : > { %v2171_v29 = vpop.xlane.xlu0 %2170 }
 0x175   : > { %v2227_v27 = vadd.f32 %v12634_v3, %v2171_v29 }
 0x176   : > { %2500 = vperm.xlu0 %10646, %v12820_v57  }
 0x177   : > { %2445 = vperm.xlu1 %10647, %v12829_v21   ;;  %2260 = vst.msk [vmem:[%s12631_s20 + $0xa0] sm:$0xff] %vm2239_vm3, %v2227_v27  ;;  %2348 = vst.msk [vmem:[#allocation2 + $0x109] sm:$0xff] %vm2239_vm3, %v2227_v27  ;;  %v2634_v27 = vld [vmem:[#allocation2 + $0x99] sm:$0xff] }
 0x17b   : > { %2455 = vperm.xlu1 %10647, %v12836_v1  }
 0x17c   : > { %v2180_v40 = vpop.xlane.xlu1 %2179 }
 0x17d   : > { %v2230_v46 = vadd.f32 %v12634_v3, %v2180_v40  ;;  %v2633_v40 = vld [vmem:[#allocation2 + $0x91] sm:$0xff] }
 0x17e   : > { %v12846_v60 = vld [vmem:[#allocation2 + $0x110] sm:$0xff]  ;;  %v12862_v47 = vld [vmem:[#allocation2 + $0x108] sm:$0xff] }
 0x17f   : > { %2263 = vst.msk [vmem:[%s12631_s20 + $0xb8] sm:$0xff] %vm2239_vm3, %v2230_v46  ;;  %2351 = vst.msk [vmem:[#allocation2 + $0x129] sm:$0xff] %vm2239_vm3, %v2230_v46  ;;  %2465 = vperm.xlu1 %10647, %v12839_v8   ;;  %2510 = vperm.xlu0 %10646, %v12846_v60  }
 0x183   : > { %2475 = vperm.xlu1 %10647, %v12848_v62  }
 0x186   : > { %v2177_v34 = vpop.xlane.xlu0 %2176 }
 0x187   : > { %2485 = vperm.xlu1 %10647, %v12852_v25   ;;  %v2229_v18 = vadd.f32 %v12634_v3, %v2177_v34  ;;  %v2636_v34 = vld [vmem:[#allocation2 + $0xb1] sm:$0xff] }
 0x189   : > { %2262 = vst.msk [vmem:[%s12631_s20 + $0xb0] sm:$0xff] %vm2239_vm3, %v2229_v18  ;;  %2350 = vst.msk [vmem:[#allocation2 + $0x121] sm:$0xff] %vm2239_vm3, %v2229_v18  ;;  %v2635_v18 = vld [vmem:[#allocation2 + $0xa9] sm:$0xff] }
 0x18b   : > { %2495 = vperm.xlu1 %10647, %v12856_v11  }
 0x18e   : > { %v2186_v41 = vpop.xlane.xlu1 %2185 }
 0x18f   : > { %v2232_v15 = vadd.f32 %v12634_v3, %v2186_v41  ;;  %2505 = vperm.xlu1 %10647, %v12862_v47   ;;  %v2638_v41 = vld [vmem:[#allocation2 + $0xc9] sm:$0xff] }
 0x190   : > { %v12869_v24 = vld [vmem:[#allocation2 + $0x128] sm:$0xff]  ;;  %v12871_v2 = vld [vmem:[#allocation2 + $0x120] sm:$0xff] }
 0x191   : > { %2265 = vst.msk [vmem:[%s12631_s20 + $0xc8] sm:$0xff] %vm2239_vm3, %v2232_v15  ;;  %2353 = vst.msk [vmem:[#allocation2 + $0x141] sm:$0xff] %vm2239_vm3, %v2232_v15  ;;  %2520 = vperm.xlu0 %10646, %v12869_v24   ;;  %v2637_v15 = vld [vmem:[#allocation2 + $0xc1] sm:$0xff] }
 0x193   : > { %2515 = vperm.xlu1 %10647, %v12871_v2  }
 0x198   : > { %v2183_v37 = vpop.xlane.xlu0 %2182 }
 0x199   : > { %v2231_v16 = vadd.f32 %v12634_v3, %v2183_v37 }
 0x19b   : > { %2264 = vst.msk [vmem:[%s12631_s20 + $0xc0] sm:$0xff] %vm2239_vm3, %v2231_v16  ;;  %2352 = vst.msk [vmem:[#allocation2 + $0x139] sm:$0xff] %vm2239_vm3, %v2231_v16  ;;  %v2640_v16 = vld [vmem:[#allocation2 + $0xe1] sm:$0xff] }
 0x1a0   : > { %v2192_v4 = vpop.xlane.xlu1 %2191 }
 0x1a1   : > { %v2234_v55 = vadd.f32 %v12634_v3, %v2192_v4  ;;  %v2639_v4 = vld [vmem:[#allocation2 + $0xd9] sm:$0xff] }
 0x1a2   : > { %v12883_v42 = vld [vmem:[#allocation2 + $0x140] sm:$0xff]  ;;  %v12885_v31 = vld [vmem:[#allocation2 + $0x138] sm:$0xff] }
 0x1a3   : > { %2267 = vst.msk [vmem:[%s12631_s20 + $0xd8] sm:$0xff] %vm2239_vm3, %v2234_v55  ;;  %2355 = vst.msk [vmem:[#allocation2 + $0x159] sm:$0xff] %vm2239_vm3, %v2234_v55  ;;  %2530 = vperm.xlu0 %10646, %v12883_v42   ;;  %2525 = vperm.xlu1 %10647, %v12885_v31  }
 0x1aa   : > { %v2189_v58 = vpop.xlane.xlu0 %2188 }
 0x1ab   : > { %v2233_v52 = vadd.f32 %v12634_v3, %v2189_v58  ;;  %v2642_v58 = vld [vmem:[#allocation2 + $0xf9] sm:$0xff] }
 0x1ad   : > { %2266 = vst.msk [vmem:[%s12631_s20 + $0xd0] sm:$0xff] %vm2239_vm3, %v2233_v52  ;;  %2354 = vst.msk [vmem:[#allocation2 + $0x151] sm:$0xff] %vm2239_vm3, %v2233_v52  ;;  %v2641_v52 = vld [vmem:[#allocation2 + $0xf1] sm:$0xff] }
 0x1b2   : > { %v2198_v32 = vpop.xlane.xlu1 %2197 }
 0x1b3   : > { %v2236_v45 = vadd.f32 %v12634_v3, %v2198_v32  ;;  %v2644_v32 = vld [vmem:[#allocation2 + $0x111] sm:$0xff] }
 0x1b4   : > { %v12897_v51 = vld [vmem:[#allocation2 + $0x158] sm:$0xff]  ;;  %v12899_v63 = vld [vmem:[#allocation2 + $0x150] sm:$0xff] }
 0x1b5   : > { %2269 = vst.msk [vmem:[%s12631_s20 + $0xe8] sm:$0xff] %vm2239_vm3, %v2236_v45  ;;  %2357 = vst.msk [vmem:[#allocation2 + $0x171] sm:$0xff] %vm2239_vm3, %v2236_v45  ;;  %2540 = vperm.xlu0 %10646, %v12897_v51   ;;  %2535 = vperm.xlu1 %10647, %v12899_v63   ;;  %v2643_v45 = vld [vmem:[#allocation2 + $0x109] sm:$0xff] }
 0x1bc   : > { %v2195_v36 = vpop.xlane.xlu0 %2194 }
 0x1bd   : > { %v2235_v53 = vadd.f32 %v12634_v3, %v2195_v36 }
 0x1bf   : > { %2268 = vst.msk [vmem:[%s12631_s20 + $0xe0] sm:$0xff] %vm2239_vm3, %v2235_v53  ;;  %2356 = vst.msk [vmem:[#allocation2 + $0x169] sm:$0xff] %vm2239_vm3, %v2235_v53  ;;  %v2646_v53 = vld [vmem:[#allocation2 + $0x129] sm:$0xff] }
 0x1c4   : > { %v2201_v48 = vpop.xlane.xlu0 %2200 }
 0x1c5   : > { %v2237_v19 = vadd.f32 %v12634_v3, %v2201_v48  ;;  %v2645_v48 = vld [vmem:[#allocation2 + $0x121] sm:$0xff] }
 0x1c6   : > { %v12908_v59 = vld [vmem:[#allocation2 + $0x170] sm:$0xff]  ;;  %v12910_v35 = vld [vmem:[#allocation2 + $0x168] sm:$0xff] }
 0x1c7   : > { %2270 = vst.msk [vmem:[%s12631_s20 + $0xf0] sm:$0xff] %vm2239_vm3, %v2237_v19  ;;  %2358 = vst.msk [vmem:[#allocation2 + $0x181] sm:$0xff] %vm2239_vm3, %v2237_v19  ;;  %2550 = vperm.xlu0 %10646, %v12908_v59   ;;  %2545 = vperm.xlu1 %10647, %v12910_v35  }
 0x1cb   : > { %2671 = vperm.xlu0 %10646, %v12917_v17   ;;  %2666 = vperm.xlu1 %10647, %v12919_v30  }
 0x1cf   : > { %v2204_v26 = vpop.xlane.xlu1 %2203  ;;  %2681 = vperm.xlu0 %10646, %v12923_v10   ;;  %2676 = vperm.xlu1 %10647, %v12925_v43  }
 0x1d0   : > { %v2238_v9 = vadd.f32 %v12634_v3, %v2204_v26  ;;  %v2632_v3 = vld [vmem:[#allocation2 + $0x81] sm:$0xff] }
 0x1d1   : > { %v2648_v26 = vld [vmem:[#allocation2 + $0x141] sm:$0xff] }
 0x1d2   : > { %2271 = vst.msk [vmem:[%s12631_s20 + $0xf8] sm:$0xff] %vm2239_vm3, %v2238_v9  ;;  %2359 = vst.msk [vmem:[#allocation2 + $0x189] sm:$0xff] %vm2239_vm3, %v2238_v9  ;;  %v12959_v9 = vpop.permute.xlu0 %2395 }
 0x1d3   : > { %2691 = vperm.xlu0 %10646, %v12933_v38   ;;  %2686 = vperm.xlu1 %10647, %v12935_v28   ;;  %v12943_v5 = vpop.permute.xlu1 %2400  ;;  %15230 = vst [vmem:[#allocation13_spill] sm:$0xff] %v12959_v9 }
 0x1d4   : > { %15223 = vst [vmem:[#allocation6_spill] sm:$0xff] %v12943_v5 }
 0x1d7   : > { %2701 = vperm.xlu0 %10646, %v12939_v20   ;;  %2696 = vperm.xlu1 %10647, %v12941_v6   ;;  %v12947_v29 = vpop.permute.xlu1 %2656 }
 0x1d8   : > { %15224 = vst [vmem:[#allocation7_spill] sm:$0xff] %v12947_v29  ;;  %v2896_v29 = vld [vmem:[#allocation2 + $0xaa] sm:$0xff] }
 0x1db   : > { %2711 = vperm.xlu0 %10646, %v2632_v3   ;;  %2706 = vperm.xlu1 %10647, %v2631_v14   ;;  %v12949_v46 = vpop.permute.xlu1 %2405  ;;  %v2647_v3 = vld [vmem:[#allocation2 + $0x139] sm:$0xff] }
 0x1dc   : > { %15225 = vst [vmem:[#allocation8_spill] sm:$0xff] %v12949_v46  ;;  %v2650_v14 = vld [vmem:[#allocation2 + $0x159] sm:$0xff] }
 0x1dd   : > { %v13015_v46 = vld [vmem:[#allocation2 + $0x92] sm:$0xff] }
 0x1de   : > { %15240 = vst [vmem:[#allocation23_spill] sm:$0xff] %v13015_v46 }
 0x1df   : > { %2721 = vperm.xlu0 %10646, %v2634_v27   ;;  %2716 = vperm.xlu1 %10647, %v2633_v40   ;;  %v12951_v37 = vpop.permute.xlu1 %2410  ;;  %v2649_v27 = vld [vmem:[#allocation2 + $0x151] sm:$0xff] }
 0x1e0   : > { %15226 = vst [vmem:[#allocation9_spill] sm:$0xff] %v12951_v37  ;;  %v2895_v37 = vld [vmem:[#allocation2 + $0x9a] sm:$0xff] }
 0x1e3   : > { %2731 = vperm.xlu0 %10646, %v2636_v34   ;;  %2726 = vperm.xlu1 %10647, %v2635_v18   ;;  %v12953_v55 = vpop.permute.xlu1 %2415  ;;  %v12963_v34 = vpop.permute.xlu0 %2661  ;;  %v2652_v18 = vld [vmem:[#allocation2 + $0x171] sm:$0xff] }
 0x1e4   : > { %15227 = vst [vmem:[#allocation10_spill] sm:$0xff] %v12953_v55  ;;  %15232 = vst [vmem:[#allocation15_spill] sm:$0xff] %v12963_v34  ;;  %v2897_v34 = vld [vmem:[#allocation2 + $0xb2] sm:$0xff] }
 0x1e7   : > { %2741 = vperm.xlu0 %10646, %v2638_v41   ;;  %2736 = vperm.xlu1 %10647, %v2637_v15   ;;  %v12955_v36 = vpop.permute.xlu1 %2420  ;;  %v2651_v41 = vld [vmem:[#allocation2 + $0x169] sm:$0xff] }
 0x1e8   : > { %15228 = vst [vmem:[#allocation11_spill] sm:$0xff] %v12955_v36  ;;  %v2883_v15 = vld [vmem:[#allocation2 + $0xa] sm:$0xff] }
 0x1eb   : > { %2751 = vperm.xlu0 %10646, %v2640_v16   ;;  %2746 = vperm.xlu1 %10647, %v2639_v4   ;;  %v12957_v19 = vpop.permute.xlu1 %2425  ;;  %v2882_v16 = vld [vmem:[#allocation2 + $0x2] sm:$0xff]  ;;  %v12965_v4 = vpop.permute.xlu0 %2440 }
 0x1ec   : > { %15229 = vst [vmem:[#allocation12_spill] sm:$0xff] %v12957_v19  ;;  %v13007_v19 = vld [vmem:[#allocation2 + $0x7a] sm:$0xff] }
 0x1ef   : > { %2761 = vperm.xlu0 %10646, %v2642_v58   ;;  %2756 = vperm.xlu1 %10647, %v2641_v52   ;;  %v12961_v40 = vpop.permute.xlu1 %2430  ;;  %v12969_v52 = vld [vmem:[#allocation2 + $0x22] sm:$0xff] }
 0x1f0   : > { %15231 = vst [vmem:[#allocation14_spill] sm:$0xff] %v12961_v40  ;;  %v13005_v40 = vld [vmem:[#allocation2 + $0x82] sm:$0xff] }
 0x1f1   : > { %15237 = vst [vmem:[#allocation20_spill] sm:$0xff] %v13005_v40 }
 0x1f3   : > { %2771 = vperm.xlu0 %10646, %v2644_v32   ;;  %2766 = vperm.xlu1 %10647, %v2643_v45   ;;  %v12967_v58 = vpop.permute.xlu1 %2435  ;;  %v12971_v32 = vld [vmem:[#allocation2 + $0x1a] sm:$0xff]  ;;  %v12973_v45 = vpop.permute.xlu0 %2450 }
 0x1f7   : > { %2781 = vperm.xlu0 %10646, %v2646_v53   ;;  %2776 = vperm.xlu1 %10647, %v2645_v48   ;;  %v12975_v53 = vpop.permute.xlu1 %2445  ;;  %v12979_v48 = vld [vmem:[#allocation2 + $0x3a] sm:$0xff] }
 0x1fb   : > { %2791 = vperm.xlu0 %10646, %v2648_v26   ;;  %2786 = vperm.xlu1 %10647, %v2647_v3   ;;  %v12981_v26 = vld [vmem:[#allocation2 + $0x32] sm:$0xff]  ;;  %v12985_v3 = vpop.permute.xlu0 %2460 }
 0x1fc   : > { %15233 = vst [vmem:[#allocation16_spill] sm:$0xff] %v12985_v3 }
 0x1ff   : > { %2801 = vperm.xlu0 %10646, %v2650_v14   ;;  %2796 = vperm.xlu1 %10647, %v2649_v27   ;;  %v12987_v14 = vpop.permute.xlu1 %2455  ;;  %v12989_v27 = vld [vmem:[#allocation2 + $0x52] sm:$0xff] }
 0x200   : > { %15234 = vst [vmem:[#allocation17_spill] sm:$0xff] %v12987_v14  ;;  %v2901_v14 = vld [vmem:[#allocation2 + $0xe2] sm:$0xff] }
 0x203   : > { %2811 = vperm.xlu0 %10646, %v2652_v18   ;;  %2806 = vperm.xlu1 %10647, %v2651_v41   ;;  %v12991_v18 = vld [vmem:[#allocation2 + $0x4a] sm:$0xff]  ;;  %v13001_v7 = vpop.permute.xlu1 %2465 }
 0x204   : > { %v12995_v41 = vld [vmem:[#allocation2 + $0x6a] sm:$0xff]  ;;  %15236 = vst [vmem:[#allocation19_spill] sm:$0xff] %v13001_v7 }
 0x205   : > { %v2899_v7 = vld [vmem:[#allocation2 + $0xca] sm:$0xff] }
 0x207   : > { %2922 = vperm.xlu0 %10646, %v2883_v15   ;;  %2917 = vperm.xlu1 %10647, %v2882_v16   ;;  %v12997_v15 = vld [vmem:[#allocation2 + $0x62] sm:$0xff]  ;;  %v12999_v16 = vpop.permute.xlu0 %2470  ;;  %v13013_v55 = vpop.permute.xlu1 %2475 }
 0x208   : > { %15235 = vst [vmem:[#allocation18_spill] sm:$0xff] %v12999_v16  ;;  %15239 = vst [vmem:[#allocation22_spill] sm:$0xff] %v13013_v55  ;;  %v2898_v16 = vld [vmem:[#allocation2 + $0xc2] sm:$0xff] }
 0x20b   : > { %2932 = vperm.xlu0 %10646, %v12969_v52   ;;  %2927 = vperm.xlu1 %10647, %v12971_v32   ;;  %v13011_v36 = vpop.permute.xlu0 %2480  ;;  %v13020_v9 = vpop.permute.xlu1 %2485 }
 0x20c   : > { %15238 = vst [vmem:[#allocation21_spill] sm:$0xff] %v13011_v36  ;;  %15242 = vst [vmem:[#allocation25_spill] sm:$0xff] %v13020_v9 }
 0x20f   : > { %2942 = vperm.xlu0 %10646, %v12979_v48   ;;  %2937 = vperm.xlu1 %10647, %v12981_v26   ;;  %v13018_v5 = vpop.permute.xlu0 %2490  ;;  %v13024_v55 = vpop.permute.xlu1 %2495 }
 0x210   : > { %15241 = vst [vmem:[#allocation24_spill] sm:$0xff] %v13018_v5  ;;  %15244 = vst [vmem:[#allocation27_spill] sm:$0xff] %v13024_v55  ;;  %v2902_v5 = vld [vmem:[#allocation2 + $0xf2] sm:$0xff]  ;;  %v2907_v55 = vld [vmem:[#allocation2 + $0x12a] sm:$0xff] }
 0x213   : > { %2952 = vperm.xlu0 %10646, %v12989_v27   ;;  %2947 = vperm.xlu1 %10647, %v12991_v18   ;;  %v13022_v36 = vpop.permute.xlu0 %2500 }
 0x214   : > { %15243 = vst [vmem:[#allocation26_spill] sm:$0xff] %v13022_v36  ;;  %v2906_v36 = vld [vmem:[#allocation2 + $0x122] sm:$0xff] }
 0x217   : > { %2962 = vperm.xlu0 %10646, %v12995_v41   ;;  %2957 = vperm.xlu1 %10647, %v12997_v15   ;;  %v13026_v3 = vpop.permute.xlu0 %2510 }
 0x218   : > { %15245 = vst [vmem:[#allocation28_spill] sm:$0xff] %v13026_v3  ;;  %v2908_v3 = vld [vmem:[#allocation2 + $0x13a] sm:$0xff] }
 0x21b   : > { %2972 = vperm.xlu0 %10646, %v13005_v40   ;;  %2967 = vperm.xlu1 %10647, %v13007_v19   ;;  %v13028_v40 = vpop.permute.xlu1 %2505 }
 0x21f   : > { %2982 = vperm.xlu0 %10646, %v2895_v37   ;;  %2977 = vperm.xlu1 %10647, %v13015_v46   ;;  %v2900_v37 = vld [vmem:[#allocation2 + $0xda] sm:$0xff] }
 0x220   : > { %v2903_v46 = vld [vmem:[#allocation2 + $0xfa] sm:$0xff] }
 0x223   : > { %2992 = vperm.xlu0 %10646, %v2897_v34   ;;  %2987 = vperm.xlu1 %10647, %v2896_v29   ;;  %v2905_v29 = vld [vmem:[#allocation2 + $0x112] sm:$0xff]  ;;  %v2904_v34 = vld [vmem:[#allocation2 + $0x10a] sm:$0xff] }
 0x227   : > { %3002 = vperm.xlu0 %10646, %v2899_v7   ;;  %2997 = vperm.xlu1 %10647, %v2898_v16   ;;  %v13030_v7 = vpop.permute.xlu0 %2520  ;;  %v13032_v16 = vpop.permute.xlu1 %2515 }
 0x228   : > { %15246 = vst [vmem:[#allocation29_spill] sm:$0xff] %v13030_v7  ;;  %15247 = vst [vmem:[#allocation30_spill] sm:$0xff] %v13032_v16  ;;  %v2913_v16 = vld [vmem:[#allocation2 + $0x172] sm:$0xff]  ;;  %v2912_v7 = vld [vmem:[#allocation2 + $0x16a] sm:$0xff] }
 0x22b   : > { %3012 = vperm.xlu0 %10646, %v2901_v14   ;;  %3007 = vperm.xlu1 %10647, %v2900_v37   ;;  %v2909_v14 = vld [vmem:[#allocation2 + $0x142] sm:$0xff]  ;;  %v13034_v37 = vpop.permute.xlu0 %2530  ;;  %v13036_v9 = vpop.permute.xlu1 %2525 }
 0x22f   : > { %3022 = vperm.xlu0 %10646, %v2903_v46   ;;  %3017 = vperm.xlu1 %10647, %v2902_v5   ;;  %v2911_v5 = vld [vmem:[#allocation2 + $0x15a] sm:$0xff]  ;;  %v2910_v46 = vld [vmem:[#allocation2 + $0x152] sm:$0xff] }
 0x233   : > { %3032 = vperm.xlu0 %10646, %v2905_v29   ;;  %3027 = vperm.xlu1 %10647, %v2904_v34  }
 0x234   : > { %v13038_v29 = vpop.permute.xlu0 %2540  ;;  %v13040_v34 = vpop.permute.xlu1 %2535 }
 0x235   : > { %15248 = vst [vmem:[#allocation31_spill] sm:$0xff] %v13038_v29  ;;  %15249 = vst [vmem:[#allocation32_spill] sm:$0xff] %v13040_v34 }
 0x237   : > { %3042 = vperm.xlu0 %10646, %v2907_v55   ;;  %3037 = vperm.xlu1 %10647, %v2906_v36  }
 0x23b   : > { %3052 = vperm.xlu0 %10646, %v2909_v14   ;;  %3047 = vperm.xlu1 %10647, %v2908_v3  }
 0x23f   : > { %3062 = vperm.xlu0 %10646, %v2911_v5   ;;  %3057 = vperm.xlu1 %10647, %v2910_v46   ;;  %v3173_v46 = vld [vmem:[#allocation2 + $0x180] sm:$0xff] }
 0x243   : > { %3072 = vperm.xlu0 %10646, %v2913_v16   ;;  %3067 = vperm.xlu1 %10647, %v2912_v7  }
 0x246   : > { %v13042_v55 = vpop.permute.xlu0 %2550  ;;  %v13044_v36 = vpop.permute.xlu1 %2545 }
 0x247   : > { %15250 = vst [vmem:[#allocation33_spill] sm:$0xff] %v13042_v55  ;;  %15251 = vst [vmem:[#allocation34_spill] sm:$0xff] %v13044_v36  ;;  %3183 = vperm.xlu0 %10646, %v12790_v12   ;;  %3178 = vperm.xlu1 %10647, %v12780_v49   ;;  %v15270_v36 = vmov 0.0  }
 0x248   : > { %4786 = vst.msk [vmem:[#allocation3 + $0x18] sm:$0xff] %vm4781_vm5, %v15270_v36  ;;  %4787 = vst.msk [vmem:[#allocation3 + $0x20] sm:$0xff] %vm4781_vm5, %v15270_v36 }
 0x249   : > { %4782 = vst.msk [vmem:[#allocation3] sm:$0xff] %vm4781_vm5, %v15270_v36  ;;  %4783 = vst.msk [vmem:[#allocation3 + $0x8] sm:$0xff] %vm4781_vm5, %v15270_v36 }
 0x24a   : > { %v13048_v3 = vpop.permute.xlu0 %2671  ;;  %v13050_v14 = vpop.permute.xlu1 %2666  ;;  %4789 = vst.msk [vmem:[#allocation3 + $0x30] sm:$0xff] %vm4781_vm5, %v15270_v36  ;;  %4790 = vst.msk [vmem:[#allocation3 + $0x38] sm:$0xff] %vm4781_vm5, %v15270_v36 }
 0x24b   : > { %15252 = vst [vmem:[#allocation35_spill] sm:$0xff] %v13048_v3  ;;  %15253 = vst [vmem:[#allocation36_spill] sm:$0xff] %v13050_v14  ;;  %3193 = vperm.xlu0 %10646, %v12804_v44   ;;  %3188 = vperm.xlu1 %10647, %v12796_v39  }
 0x24c   : > { %4792 = vst.msk [vmem:[#allocation3 + $0x48] sm:$0xff] %vm4781_vm5, %v15270_v36  ;;  %4793 = vst.msk [vmem:[#allocation3 + $0x50] sm:$0xff] %vm4781_vm5, %v15270_v36 }
 0x24d   : > { %4795 = vst.msk [vmem:[#allocation3 + $0x60] sm:$0xff] %vm4781_vm5, %v15270_v36  ;;  %4796 = vst.msk [vmem:[#allocation3 + $0x68] sm:$0xff] %vm4781_vm5, %v15270_v36 }
 0x24e   : > { %v13054_v5 = vpop.permute.xlu0 %2681  ;;  %v13056_v16 = vpop.permute.xlu1 %2676  ;;  %4798 = vst.msk [vmem:[#allocation3 + $0x78] sm:$0xff] %vm4781_vm5, %v15270_v36  ;;  %4799 = vst.msk [vmem:[#allocation3 + $0x80] sm:$0xff] %vm4781_vm5, %v15270_v36 }
 0x24f   : > { %15254 = vst [vmem:[#allocation37_spill] sm:$0xff] %v13054_v5  ;;  %15255 = vst [vmem:[#allocation38_spill] sm:$0xff] %v13056_v16  ;;  %3203 = vperm.xlu0 %10646, %v12822_v33   ;;  %3198 = vperm.xlu1 %10647, %v12812_v50   ;;  %v3928_v16 = vld [vmem:[#allocation2 + $0x38] sm:$0xff] }
 0x250   : > { %4801 = vst.msk [vmem:[#allocation3 + $0x90] sm:$0xff] %vm4781_vm5, %v15270_v36  ;;  %4802 = vst.msk [vmem:[#allocation3 + $0x98] sm:$0xff] %vm4781_vm5, %v15270_v36 }
 0x251   : > { %4804 = vst.msk [vmem:[#allocation3 + $0xa8] sm:$0xff] %vm4781_vm5, %v15270_v36  ;;  %4805 = vst.msk [vmem:[#allocation3 + $0xb0] sm:$0xff] %vm4781_vm5, %v15270_v36 }
 0x252   : > { %v13060_v7 = vpop.permute.xlu0 %2691  ;;  %v13062_v12 = vpop.permute.xlu1 %2686  ;;  %4807 = vst.msk [vmem:[#allocation3 + $0xc0] sm:$0xff] %vm4781_vm5, %v15270_v36  ;;  %4808 = vst.msk [vmem:[#allocation3 + $0xc8] sm:$0xff] %vm4781_vm5, %v15270_v36 }
 0x253   : > { %15256 = vst [vmem:[#allocation39_spill] sm:$0xff] %v13060_v7  ;;  %15257 = vst [vmem:[#allocation40_spill] sm:$0xff] %v13062_v12  ;;  %3213 = vperm.xlu0 %10646, %v12771_v54   ;;  %3208 = vperm.xlu1 %10647, %v12826_v56   ;;  %v3927_v12 = vld [vmem:[#allocation2 + $0x30] sm:$0xff] }
 0x254   : > { %4810 = vst.msk [vmem:[#allocation3 + $0xd8] sm:$0xff] %vm4781_vm5, %v15270_v36  ;;  %4811 = vst.msk [vmem:[#allocation3 + $0xe0] sm:$0xff] %vm4781_vm5, %v15270_v36 }
 0x255   : > { %4813 = vst.msk [vmem:[#allocation3 + $0xf0] sm:$0xff] %vm4781_vm5, %v15270_v36  ;;  %4814 = vst.msk [vmem:[#allocation3 + $0xf8] sm:$0xff] %vm4781_vm5, %v15270_v36 }
 0x256   : > { %v13066_v49 = vpop.permute.xlu0 %2701  ;;  %v13068_v44 = vpop.permute.xlu1 %2696  ;;  %4816 = vst.msk [vmem:[#allocation3 + $0x108] sm:$0xff] %vm4781_vm5, %v15270_v36  ;;  %4817 = vst.msk [vmem:[#allocation3 + $0x110] sm:$0xff] %vm4781_vm5, %v15270_v36 }
 0x257   : > { %3223 = vperm.xlu0 %10646, %v12778_v0   ;;  %3218 = vperm.xlu1 %10647, %v12829_v21   ;;  %4819 = vst.msk [vmem:[#allocation3 + $0x120] sm:$0xff] %vm4781_vm5, %v15270_v36  ;;  %4820 = vst.msk [vmem:[#allocation3 + $0x128] sm:$0xff] %vm4781_vm5, %v15270_v36 }
 0x258   : > { %4822 = vst.msk [vmem:[#allocation3 + $0x138] sm:$0xff] %vm4781_vm5, %v15270_v36  ;;  %4823 = vst.msk [vmem:[#allocation3 + $0x140] sm:$0xff] %vm4781_vm5, %v15270_v36 }
 0x259   : > { %4825 = vst.msk [vmem:[#allocation3 + $0x150] sm:$0xff] %vm4781_vm5, %v15270_v36  ;;  %4826 = vst.msk [vmem:[#allocation3 + $0x158] sm:$0xff] %vm4781_vm5, %v15270_v36 }
 0x25a   : > { %v13072_v39 = vpop.permute.xlu0 %2711  ;;  %v13074_v33 = vpop.permute.xlu1 %2706  ;;  %4828 = vst.msk [vmem:[#allocation3 + $0x168] sm:$0xff] %vm4781_vm5, %v15270_v36  ;;  %4829 = vst.msk [vmem:[#allocation3 + $0x170] sm:$0xff] %vm4781_vm5, %v15270_v36 }
 0x25b   : > { %3233 = vperm.xlu0 %10646, %v12784_v23   ;;  %3228 = vperm.xlu1 %10647, %v12836_v1   ;;  %4831 = vst.msk [vmem:[#allocation3 + $0x180] sm:$0xff] %vm4781_vm5, %v15270_v36  ;;  %4832 = vst.msk [vmem:[#allocation3 + $0x188] sm:$0xff] %vm4781_vm5, %v15270_v36 }
 0x25c   : > { %4834 = vst.msk [vmem:[#allocation3 + $0x198] sm:$0xff] %vm4781_vm5, %v15270_v36  ;;  %4835 = vst.msk [vmem:[#allocation3 + $0x1a0] sm:$0xff] %vm4781_vm5, %v15270_v36 }
 0x25d   : > { %4788 = vst.msk [vmem:[#allocation3 + $0x28] sm:$0x3] %vm4784_vm6, %v15270_v36  ;;  %4785 = vst.msk [vmem:[#allocation3 + $0x10] sm:$0x3] %vm4784_vm6, %v15270_v36 }
 0x25e   : > { %v13078_v50 = vpop.permute.xlu0 %2721  ;;  %v13080_v54 = vpop.permute.xlu1 %2716  ;;  %4791 = vst.msk [vmem:[#allocation3 + $0x40] sm:$0x3] %vm4784_vm6, %v15270_v36  ;;  %4794 = vst.msk [vmem:[#allocation3 + $0x58] sm:$0x3] %vm4784_vm6, %v15270_v36 }
 0x25f   : > { %3243 = vperm.xlu0 %10646, %v12793_v61   ;;  %3238 = vperm.xlu1 %10647, %v12839_v8   ;;  %4797 = vst.msk [vmem:[#allocation3 + $0x70] sm:$0x3] %vm4784_vm6, %v15270_v36  ;;  %4800 = vst.msk [vmem:[#allocation3 + $0x88] sm:$0x3] %vm4784_vm6, %v15270_v36 }
 0x260   : > { %4803 = vst.msk [vmem:[#allocation3 + $0xa0] sm:$0x3] %vm4784_vm6, %v15270_v36  ;;  %4806 = vst.msk [vmem:[#allocation3 + $0xb8] sm:$0x3] %vm4784_vm6, %v15270_v36 }
 0x261   : > { %4809 = vst.msk [vmem:[#allocation3 + $0xd0] sm:$0x3] %vm4784_vm6, %v15270_v36  ;;  %4812 = vst.msk [vmem:[#allocation3 + $0xe8] sm:$0x3] %vm4784_vm6, %v15270_v36 }
 0x262   : > { %v13084_v56 = vpop.permute.xlu0 %2731  ;;  %v13086_v0 = vpop.permute.xlu1 %2726  ;;  %4815 = vst.msk [vmem:[#allocation3 + $0x100] sm:$0x3] %vm4784_vm6, %v15270_v36  ;;  %4818 = vst.msk [vmem:[#allocation3 + $0x118] sm:$0x3] %vm4784_vm6, %v15270_v36 }
 0x263   : > { %3253 = vperm.xlu0 %10646, %v12799_v22   ;;  %3248 = vperm.xlu1 %10647, %v12848_v62   ;;  %4821 = vst.msk [vmem:[#allocation3 + $0x130] sm:$0x3] %vm4784_vm6, %v15270_v36  ;;  %4824 = vst.msk [vmem:[#allocation3 + $0x148] sm:$0x3] %vm4784_vm6, %v15270_v36 }
 0x264   : > { %4827 = vst.msk [vmem:[#allocation3 + $0x160] sm:$0x3] %vm4784_vm6, %v15270_v36  ;;  %4830 = vst.msk [vmem:[#allocation3 + $0x178] sm:$0x3] %vm4784_vm6, %v15270_v36 }
 0x265   : > { %4833 = vst.msk [vmem:[#allocation3 + $0x190] sm:$0x3] %vm4784_vm6, %v15270_v36  ;;  %4836 = vst.msk [vmem:[#allocation3 + $0x1a8] sm:$0x3] %vm4784_vm6, %v15270_v36  ;;  %v9055_v36 = vld [vmem:[%s15190_s5 + $0x110] sm:$0xff] }
 0x266   : > { %v13090_v21 = vpop.permute.xlu0 %2741  ;;  %v13092_v23 = vpop.permute.xlu1 %2736 }
 0x267   : > { %3263 = vperm.xlu0 %10646, %v12809_v13   ;;  %3258 = vperm.xlu1 %10647, %v12852_v25  }
 0x26a   : > { %v13096_v1 = vpop.permute.xlu0 %2751  ;;  %v13098_v61 = vpop.permute.xlu1 %2746 }
 0x26b   : > { %3273 = vperm.xlu0 %10646, %v12820_v57   ;;  %3268 = vperm.xlu1 %10647, %v12856_v11  }
 0x26e   : > { %v13102_v8 = vpop.permute.xlu0 %2761  ;;  %v13104_v22 = vpop.permute.xlu1 %2756 }
 0x26f   : > { %3283 = vperm.xlu0 %10646, %v12846_v60   ;;  %3278 = vperm.xlu1 %10647, %v12862_v47  }
 0x272   : > { %v13108_v62 = vpop.permute.xlu0 %2771  ;;  %v13110_v13 = vpop.permute.xlu1 %2766 }
 0x273   : > { %3293 = vperm.xlu0 %10646, %v12869_v24   ;;  %3288 = vperm.xlu1 %10647, %v12871_v2  }
 0x276   : > { %v13114_v25 = vpop.permute.xlu0 %2781  ;;  %v13116_v57 = vpop.permute.xlu1 %2776 }
 0x277   : > { %3303 = vperm.xlu0 %10646, %v12883_v42   ;;  %3298 = vperm.xlu1 %10647, %v12885_v31   ;;  %v3174_v42 = vld [vmem:[#allocation2 + $0x188] sm:$0xff] }
 0x27a   : > { %v13120_v11 = vpop.permute.xlu0 %2791  ;;  %v13122_v60 = vpop.permute.xlu1 %2786 }
 0x27b   : > { %3313 = vperm.xlu0 %10646, %v12897_v51   ;;  %3308 = vperm.xlu1 %10647, %v12899_v63  }
 0x27e   : > { %v13126_v47 = vpop.permute.xlu0 %2801  ;;  %v13128_v24 = vpop.permute.xlu1 %2796 }
 0x27f   : > { %15258 = vst [vmem:[#allocation41_spill] sm:$0xff] %v13126_v47  ;;  %15259 = vst [vmem:[#allocation42_spill] sm:$0xff] %v13128_v24  ;;  %3323 = vperm.xlu0 %10646, %v12908_v59   ;;  %3318 = vperm.xlu1 %10647, %v12910_v35   ;;  %v3414_v47 = vld [vmem:[#allocation2 + $0x91] sm:$0xff] }
 0x282   : > { %v13132_v2 = vpop.permute.xlu0 %2811  ;;  %v13134_v31 = vpop.permute.xlu1 %2806 }
 0x283   : > { %15260 = vst [vmem:[#allocation43_spill] sm:$0xff] %v13132_v2  ;;  %15261 = vst [vmem:[#allocation44_spill] sm:$0xff] %v13134_v31  ;;  %3333 = vperm.xlu0 %10646, %v3174_v42   ;;  %3328 = vperm.xlu1 %10647, %v3173_v46   ;;  %v9053_v31 = vld [vmem:[%s15190_s5 + $0x100] sm:$0xff] }
 0x286   : > { %v13136_v7 = vpop.permute.xlu0 %2922  ;;  %v13138_v51 = vpop.permute.xlu1 %2917 }
 0x287   : > { %15262 = vst [vmem:[#allocation45_spill] sm:$0xff] %v13136_v7  ;;  %15263 = vst [vmem:[#allocation46_spill] sm:$0xff] %v13138_v51  ;;  %3444 = vperm.xlu0 %10646, %v12917_v17   ;;  %3439 = vperm.xlu1 %10647, %v12919_v30  }
 0x28a   : > { %v13142_v63 = vpop.permute.xlu0 %2932  ;;  %v13144_v59 = vpop.permute.xlu1 %2927 }
 0x28b   : > { %15264 = vst [vmem:[#allocation47_spill] sm:$0xff] %v13142_v63  ;;  %15265 = vst [vmem:[#allocation48_spill] sm:$0xff] %v13144_v59  ;;  %3454 = vperm.xlu0 %10646, %v12923_v10   ;;  %3449 = vperm.xlu1 %10647, %v12925_v43   ;;  %v3930_v59 = vld [vmem:[#allocation2 + $0x50] sm:$0xff] }
 0x28e   : > { %v13148_v35 = vpop.permute.xlu0 %2942  ;;  %v13150_v42 = vpop.permute.xlu1 %2937 }
 0x28f   : > { %15266 = vst [vmem:[#allocation49_spill] sm:$0xff] %v13148_v35  ;;  %15267 = vst [vmem:[#allocation50_spill] sm:$0xff] %v13150_v42  ;;  %3464 = vperm.xlu0 %10646, %v12933_v38   ;;  %3459 = vperm.xlu1 %10647, %v12935_v28  }
 0x292   : > { %v13154_v46 = vpop.permute.xlu0 %2952  ;;  %v13156_v17 = vpop.permute.xlu1 %2947 }
 0x293   : > { %15268 = vst [vmem:[#allocation51_spill] sm:$0xff] %v13154_v46  ;;  %15269 = vst [vmem:[#allocation52_spill] sm:$0xff] %v13156_v17  ;;  %3700 = vperm.xlu0 %10646, %v12971_v32   ;;  %3469 = vperm.xlu1 %10647, %v12941_v6  }
 0x296   : > { %v13160_v30 = vpop.permute.xlu0 %2962  ;;  %v13162_v5 = vpop.permute.xlu1 %2957 }
 0x297   : > { %3962 = vperm.xlu0 %10646, %v3927_v12   ;;  %3705 = vperm.xlu1 %10647, %v12969_v52   ;;  %v3929_v12 = vld [vmem:[#allocation2 + $0x48] sm:$0xff] }
 0x29a   : > { %v13165_v35 = vpop.permute.xlu0 %2972  ;;  %v13167_v42 = vpop.permute.xlu1 %2967 }
 0x29b   : > { %3710 = vperm.xlu0 %10646, %v12981_v26   ;;  %3967 = vperm.xlu1 %10647, %v3928_v16  }
 0x29e   : > { %v13170_v46 = vpop.permute.xlu0 %2982  ;;  %v13172_v32 = vpop.permute.xlu1 %2977 }
 0x29f   : > { %3715 = vperm.xlu0 %10646, %v12979_v48   ;;  %4223 = vperm.xlu1 %10647, %v12925_v43  }
 0x2a2   : > { %v13176_v17 = vpop.permute.xlu0 %2992  ;;  %v13178_v52 = vpop.permute.xlu1 %2987 }
 0x2a3   : > { %3972 = vperm.xlu0 %10646, %v3929_v12   ;;  %4228 = vperm.xlu1 %10647, %v12923_v10   ;;  %v8901_v10 = vld [vmem:[%s15190_s5 + $0x40] sm:$0xff] }
 0x2a6   : > { %v13181_v63 = vpop.permute.xlu0 %3002  ;;  %v13183_v16 = vpop.permute.xlu1 %2997 }
 0x2a7   : > { %3977 = vperm.xlu0 %10646, %v3930_v59   ;;  %4484 = vperm.xlu1 %10647, %v12981_v26   ;;  %v8902_v26 = vld [vmem:[%s15190_s5 + $0x48] sm:$0xff] }
 0x2a8   : > { %v10227_v59 = vpack.c.bf16 %v8902_v26, %v8901_v10  ;;  %v8904_v10 = vld [vmem:[%s15190_s5 + $0x58] sm:$0xff] }
 0x2aa   : > { %v13186_v3 = vpop.permute.xlu0 %3012  ;;  %v13188_v14 = vpop.permute.xlu1 %3007  ;;  %10228 = vmatprep.subr.bf16.mxu1 %v10227_v59 }
 0x2ab   : > { %3720 = vperm.xlu0 %10646, %v12991_v18   ;;  %4489 = vperm.xlu1 %10647, %v12979_v48   ;;  %v3931_v48 = vld [vmem:[#allocation2 + $0x60] sm:$0xff] }
 0x2ac   : > { %10230 = vmatpush3.bf16.msra.mxu1 %v10227_v59  ;;  %v8906_v59 = vld [vmem:[%s15190_s5 + $0x68] sm:$0xff] }
 0x2ae   : > { %v13192_v43 = vpop.permute.xlu0 %3022  ;;  %v13194_v12 = vpop.permute.xlu1 %3017 }
 0x2af   : > { %3725 = vperm.xlu0 %10646, %v12989_v27   ;;  %4233 = vperm.xlu1 %10647, %v12935_v28   ;;  %v8903_v28 = vld [vmem:[%s15190_s5 + $0x50] sm:$0xff] }
 0x2b0   : > { %v10231_v26 = vpack.c.bf16 %v8904_v10, %v8903_v28 }
 0x2b2   : > { %v13204_v7 = vpop.permute.xlu0 %3032  ;;  %v13206_v51 = vpop.permute.xlu1 %3027  ;;  %10232 = vmatprep.subr.bf16.mxu1 %v10231_v26 }
 0x2b3   : > { %3982 = vperm.xlu0 %10646, %v3931_v48   ;;  %4238 = vperm.xlu1 %10647, %v12933_v38   ;;  %v9054_v48 = vld [vmem:[%s15190_s5 + $0x108] sm:$0xff] }
 0x2b4   : > { %v13293_v38 = vpack.c.bf16 %v9054_v48, %v9053_v31  ;;  %v8905_v31 = vld [vmem:[%s15190_s5 + $0x60] sm:$0xff]  ;;  %10234 = vmatpush3.bf16.msra.mxu1 %v10231_v26  ;;  %v3932_v26 = vld [vmem:[#allocation2 + $0x68] sm:$0xff] }
 0x2b5   : > { %v10235_v28 = vpack.c.bf16 %v8906_v59, %v8905_v31  ;;  %v8907_v31 = vld [vmem:[%s15190_s5 + $0x70] sm:$0xff]  ;;  %v8908_v59 = vld [vmem:[%s15190_s5 + $0x78] sm:$0xff] }
 0x2b6   : > { %15271 = vst [vmem:[#allocation53_spill] sm:$0xff] %v13293_v38  ;;  %v13295_v55 = vpop.permute.xlu0 %3042  ;;  %v13297_v2 = vpop.permute.xlu1 %3037  ;;  %10292 = vmatprep.subr.bf16.mxu0 %v13293_v38 }
 0x2b7   : > { %3474 = vperm.xlu0 %10646, %v12939_v20   ;;  %4494 = vperm.xlu1 %10647, %v12991_v18   ;;  %v9056_v18 = vld [vmem:[%s15190_s5 + $0x118] sm:$0xff] }
 0x2b8   : > { %10294 = vmatpush3.bf16.msra.mxu0 %v13293_v38  ;;  %v13351_v10 = vpack.c.bf16 %v9056_v18, %v9055_v36  ;;  %10236 = vmatprep.subr.bf16.mxu1 %v10235_v28  ;;  %v10239_v36 = vpack.c.bf16 %v8908_v59, %v8907_v31  ;;  %v9057_v18 = vld [vmem:[%s15190_s5 + $0x120] sm:$0xff]  ;;  %v9059_v31 = vld [vmem:[%s15190_s5 + $0x130] sm:$0xff]  ;;  %v9060_v59 = vld [vmem:[%s15190_s5 + $0x138] sm:$0xff] }
 0x2b9   : > { %10238 = vmatpush3.bf16.msra.mxu1 %v10235_v28  ;;  %v4910_v28 = vld [vmem:[#allocation3 + $0x1] sm:$0xff] }
 0x2ba   : > { %15272 = vst [vmem:[#allocation54_spill] sm:$0xff] %v13351_v10  ;;  %v13353_v48 = vpop.permute.xlu0 %3052  ;;  %v13355_v34 = vpop.permute.xlu1 %3047  ;;  %10296 = vmatprep.subr.bf16.mxu0 %v13351_v10  ;;  %10240 = vmatprep.subr.bf16.mxu1 %v10239_v36 }
 0x2bb   : > { %4499 = vperm.xlu0 %10646, %v12989_v27   ;;  %3987 = vperm.xlu1 %10647, %v3932_v26   ;;  %v9058_v27 = vld [vmem:[%s15190_s5 + $0x128] sm:$0xff] }
 0x2bc   : > { %10298 = vmatpush3.bf16.msra.mxu0 %v13351_v10  ;;  %v13372_v26 = vpack.c.bf16 %v9058_v27, %v9057_v18  ;;  %9667 = vmatprep.mubr.msk.f32.mxu1 %vm4781_vm5, %v4910_v28  ;;  %v4911_v18 = vld [vmem:[#allocation3 + $0x9] sm:$0xff] }
 0x2bd   : > { %10242 = vmatpush3.bf16.msra.mxu1 %v10239_v36  ;;  %v3933_v28 = vld [vmem:[#allocation2 + $0x78] sm:$0xff] }
 0x2be   : > { %15273 = vst [vmem:[#allocation55_spill] sm:$0xff] %v13372_v26  ;;  %v13374_v38 = vpop.permute.xlu0 %3062  ;;  %v13376_v29 = vpop.permute.xlu1 %3057  ;;  %10300 = vmatprep.subr.bf16.mxu0 %v13372_v26 }
 0x2bf   : > { %15274 = vst [vmem:[#allocation56_spill] sm:$0xff] %v13374_v38  ;;  %15275 = vst [vmem:[#allocation57_spill] sm:$0xff] %v13376_v29  ;;  %4243 = vperm.xlu0 %10646, %v12941_v6   ;;  %3730 = vperm.xlu1 %10647, %v12997_v15   ;;  %v13389_v6 = vpack.c.bf16 %v9060_v59, %v9059_v31  ;;  %v3412_v31 = vld [vmem:[#allocation2 + $0x79] sm:$0xff] }
 0x2c0   : > { %10302 = vmatpush3.bf16.msra.mxu0 %v13372_v26  ;;  %9668 = vmatmul.mubr.msk.f32.vlgmr.msra.gmra.mrb[0].mxu1 %vm4781_vm5, %v4911_v18 }
 0x2c1   : > { %15276 = vst [vmem:[#allocation58_spill] sm:$0xff] %v13389_v6  ;;  %10304 = vmatprep.subr.bf16.mxu0 %v13389_v6 }
 0x2c2   : > { %v13391_v27 = vpop.permute.xlu0 %3072  ;;  %v13393_v36 = vpop.permute.xlu1 %3067 }
 0x2c3   : > { %15277 = vst [vmem:[#allocation59_spill] sm:$0xff] %v13391_v27  ;;  %15278 = vst [vmem:[#allocation60_spill] sm:$0xff] %v13393_v36  ;;  %4248 = vperm.xlu0 %10646, %v12939_v20   ;;  %3735 = vperm.xlu1 %10647, %v12995_v41   ;;  %v3413_v36 = vld [vmem:[#allocation2 + $0x81] sm:$0xff] }
 0x2c4   : > { %10306 = vmatpush3.bf16.msra.mxu0 %v13389_v6  ;;  %v3934_v6 = vld [vmem:[#allocation2 + $0x80] sm:$0xff] }
 0x2c6   : > { %v13400_v26 = vpop.permute.xlu0 %3183  ;;  %v13402_v10 = vpop.permute.xlu1 %3178 }
 0x2c7   : > { %15279 = vst [vmem:[#allocation61_spill] sm:$0xff] %v13400_v26  ;;  %15280 = vst [vmem:[#allocation62_spill] sm:$0xff] %v13402_v10  ;;  %3992 = vperm.xlu0 %10646, %v3933_v28   ;;  %3479 = vperm.xlu1 %10647, %v3412_v31   ;;  %v13416_v26 = vld [vmem:[%s15188_s3 + $0x1] ss:$0 sm:$0xff] }
 0x2c8   : > { %v2827_v28 = vmul.f32 %v13416_v26, %v13066_v49 }
 0x2ca   : > { %v13404_v59 = vpop.permute.xlu0 %3193  ;;  %v13406_v20 = vpop.permute.xlu1 %3188 }
 0x2cb   : > { %15281 = vst [vmem:[#allocation63_spill] sm:$0xff] %v13404_v59  ;;  %15282 = vst [vmem:[#allocation64_spill] sm:$0xff] %v13406_v20  ;;  %3484 = vperm.xlu0 %10646, %v3413_v36   ;;  %4504 = vperm.xlu1 %10647, %v12997_v15   ;;  %v2826_v59 = vmul.f32 %v13416_v26, %v13068_v44  ;;  %v13426_v15 = vld [vmem:[%s15188_s3] ss:$0 sm:$0xff] }
 0x2ce   : > { %v13409_v18 = vpop.permute.xlu0 %3203  ;;  %v13411_v27 = vpop.permute.xlu1 %3198 }
 0x2cf   : > { %15283 = vst [vmem:[#allocation65_spill] sm:$0xff] %v13409_v18  ;;  %15284 = vst [vmem:[#allocation66_spill] sm:$0xff] %v13411_v27  ;;  %4509 = vperm.xlu0 %10646, %v12995_v41   ;;  %3997 = vperm.xlu1 %10647, %v3934_v6   ;;  %v13431_v18 = vld [vmem:[%s15188_s3 + $0x2] ss:$0 sm:$0xff]  ;;  %v2566_v41 = vmul.f32 %v13426_v15, %v12965_v4  ;;  %v2565_v6 = vmul.f32 %v13426_v15, %v12967_v58 }
 0x2d0   : > { %v3088_v49 = vmul.f32 %v13431_v18, %v13160_v30  ;;  %v3087_v44 = vmul.f32 %v13431_v18, %v13162_v5  ;;  %v2829_v4 = vmul.f32 %v13416_v26, %v13072_v39  ;;  %v2568_v58 = vmul.f32 %v13426_v15, %v12973_v45 }
 0x2d1   : > { %v2859_v10 = vadd.f32 %v2827_v28, %v2566_v41  ;;  %v2858_v29 = vadd.f32 %v2826_v59, %v2565_v6  ;;  %v2828_v30 = vmul.f32 %v13416_v26, %v13074_v33  ;;  %v2567_v5 = vmul.f32 %v13426_v15, %v12975_v53  ;;  %v13459_v28 = vld [vmem:[%s15188_s3 + $0x3] ss:$0 sm:$0xff]  ;;  %v15288_v6 = vld [vmem:[#allocation16_spill] sm:$0xff] }
 0x2d2   : > { %v13441_v27 = vpop.permute.xlu0 %3213  ;;  %v13443_v20 = vpop.permute.xlu1 %3208  ;;  %v3089_v45 = vmul.f32 %v13431_v18, %v13167_v42  ;;  %v2861_v41 = vadd.f32 %v2829_v4, %v2568_v58  ;;  %v3092_v4 = vmul.f32 %v13431_v18, %v13170_v46  ;;  %v15290_v46 = vld [vmem:[#allocation18_spill] sm:$0xff] }
 0x2d3   : > { %15285 = vst [vmem:[#allocation67_spill] sm:$0xff] %v13441_v27  ;;  %15286 = vst [vmem:[#allocation68_spill] sm:$0xff] %v13443_v20  ;;  %4253 = vperm.xlu0 %10646, %v3412_v31   ;;  %3740 = vperm.xlu1 %10647, %v13007_v19   ;;  %v3120_v27 = vadd.f32 %v3088_v49, %v2859_v10  ;;  %v3090_v31 = vmul.f32 %v13431_v18, %v13165_v35  ;;  %v15287_v10 = vld [vmem:[#allocation20_spill] sm:$0xff] }
 0x2d4   : > { %v3119_v20 = vadd.f32 %v3087_v44, %v2858_v29  ;;  %v2831_v29 = vmul.f32 %v13416_v26, %v13078_v50  ;;  %v2830_v35 = vmul.f32 %v13416_v26, %v13080_v54  ;;  %v2570_v49 = vmul.f32 %v13426_v15, %v15288_v6  ;;  %v3935_v54 = vld [vmem:[#allocation2 + $0x90] sm:$0xff] }
 0x2d5   : > { %v2860_v44 = vadd.f32 %v2828_v30, %v2567_v5  ;;  %v3091_v50 = vmul.f32 %v13431_v18, %v13172_v32  ;;  %v2833_v5 = vmul.f32 %v13416_v26, %v13084_v56  ;;  %v2832_v32 = vmul.f32 %v13416_v26, %v13086_v0 }
 0x2d6   : > { %v3224_v39 = vpop.permute.xlu0 %3223  ;;  %v3219_v59 = vpop.permute.xlu1 %3218  ;;  %v2863_v30 = vadd.f32 %v2831_v29, %v2570_v49  ;;  %v3094_v29 = vmul.f32 %v13431_v18, %v13176_v17  ;;  %v2834_v17 = vmul.f32 %v13416_v26, %v13092_v23 }
 0x2d7   : > { %v3349_v33 = vmul.f32 %v13459_v28, %v3224_v39  ;;  %4258 = vperm.xlu0 %10646, %v3413_v36   ;;  %v3348_v53 = vmul.f32 %v13459_v28, %v3219_v59  ;;  %3745 = vperm.xlu1 %10647, %v15287_v10   ;;  %v15289_v36 = vld [vmem:[#allocation17_spill] sm:$0xff]  ;;  %v3122_v59 = vadd.f32 %v3090_v31, %v2861_v41  ;;  %v15291_v41 = vld [vmem:[#allocation19_spill] sm:$0xff] }
 0x2d8   : > { %v2569_v39 = vmul.f32 %v13426_v15, %v15289_v36  ;;  %v3121_v6 = vadd.f32 %v3089_v45, %v2860_v44  ;;  %v2571_v44 = vmul.f32 %v13426_v15, %v15291_v41 }
 0x2d9   : > { %v13472_v38 = vadd.f32 %v3349_v33, %v3120_v27  ;;  %v13474_v42 = vadd.f32 %v3348_v53, %v3119_v20  ;;  %v2572_v33 = vmul.f32 %v13426_v15, %v15290_v46  ;;  %v3936_v46 = vld [vmem:[#allocation2 + $0x98] sm:$0xff] }
 0x2da   : > { %v3234_v58 = vpop.permute.xlu0 %3233  ;;  %v3229_v24 = vpop.permute.xlu1 %3228  ;;  %v2862_v31 = vadd.f32 %v2830_v35, %v2569_v39  ;;  %v3415_v35 = vld [vmem:[#allocation2 + $0x99] sm:$0xff]  ;;  %v3093_v39 = vmul.f32 %v13431_v18, %v13178_v52 }
 0x2db   : > { %v3351_v27 = vmul.f32 %v13459_v28, %v3234_v58  ;;  %4002 = vperm.xlu0 %10646, %v3935_v54   ;;  %v3350_v20 = vmul.f32 %v13459_v28, %v3229_v24  ;;  %3489 = vperm.xlu1 %10647, %v3414_v47   ;;  %v3124_v24 = vadd.f32 %v3092_v4, %v2863_v30 }
 0x2dc   : > { %v3123_v49 = vadd.f32 %v3091_v50, %v2862_v31  ;;  %v2865_v58 = vadd.f32 %v2833_v5, %v2572_v33  ;;  %v2835_v4 = vmul.f32 %v13416_v26, %v13090_v21  ;;  %v15292_v50 = vld [vmem:[#allocation21_spill] sm:$0xff]  ;;  %v3095_v21 = vmul.f32 %v13431_v18, %v13183_v16 }
 0x2dd   : > { %v13490_v53 = vadd.f32 %v3351_v27, %v3122_v59  ;;  %v13492_v45 = vadd.f32 %v3350_v20, %v3121_v6  ;;  %v2574_v54 = vmul.f32 %v13426_v15, %v15292_v50  ;;  %v2864_v6 = vadd.f32 %v2832_v32, %v2571_v44  ;;  %v15293_v20 = vld [vmem:[#allocation22_spill] sm:$0xff] }
 0x2de   : > { %v3244_v56 = vpop.permute.xlu0 %3243  ;;  %v3239_v36 = vpop.permute.xlu1 %3238  ;;  %v2573_v30 = vmul.f32 %v13426_v15, %v15293_v20  ;;  %v3126_v31 = vadd.f32 %v3094_v29, %v2865_v58  ;;  %v2836_v16 = vmul.f32 %v13416_v26, %v13098_v61  ;;  %v2839_v20 = vmul.f32 %v13416_v26, %v13102_v8 }
 0x2df   : > { %v3353_v0 = vmul.f32 %v13459_v28, %v3244_v56  ;;  %3494 = vperm.xlu0 %10646, %v3415_v35   ;;  %v3352_v59 = vmul.f32 %v13459_v28, %v3239_v36  ;;  %4514 = vperm.xlu1 %10647, %v13007_v19   ;;  %v3096_v19 = vmul.f32 %v13431_v18, %v13181_v63  ;;  %v15294_v63 = vld [vmem:[#allocation24_spill] sm:$0xff] }
 0x2e0   : > { %v3125_v33 = vadd.f32 %v3093_v39, %v2864_v6  ;;  %v2867_v44 = vadd.f32 %v2835_v4, %v2574_v54  ;;  %v2866_v29 = vadd.f32 %v2834_v17, %v2573_v30  ;;  %v15295_v39 = vld [vmem:[#allocation25_spill] sm:$0xff]  ;;  %v3097_v17 = vmul.f32 %v13431_v18, %v13188_v14  ;;  %v15296_v54 = vld [vmem:[#allocation23_spill] sm:$0xff]  ;;  %v15297_v30 = vld [vmem:[#allocation26_spill] sm:$0xff] }
 0x2e1   : > { %v13509_v27 = vadd.f32 %v3353_v0, %v3124_v24  ;;  %v13511_v52 = vadd.f32 %v3352_v59, %v3123_v49  ;;  %v2837_v24 = vmul.f32 %v13416_v26, %v13096_v1  ;;  %v2576_v49 = vmul.f32 %v13426_v15, %v15294_v63 }
 0x2e2   : > { %v3254_v5 = vpop.permute.xlu0 %3253  ;;  %v3249_v23 = vpop.permute.xlu1 %3248  ;;  %v3128_v0 = vadd.f32 %v3096_v19, %v2867_v44  ;;  %v3098_v59 = vmul.f32 %v13431_v18, %v13186_v3  ;;  %v3127_v58 = vadd.f32 %v3095_v21, %v2866_v29  ;;  %v2838_v3 = vmul.f32 %v13416_v26, %v13104_v22 }
 0x2e3   : > { %v3355_v32 = vmul.f32 %v13459_v28, %v3254_v5  ;;  %4519 = vperm.xlu0 %10646, %v15287_v10   ;;  %v3354_v41 = vmul.f32 %v13459_v28, %v3249_v23  ;;  %4007 = vperm.xlu1 %10647, %v3936_v46   ;;  %v2575_v10 = vmul.f32 %v13426_v15, %v15295_v39 }
 0x2e4   : > { %v2869_v6 = vadd.f32 %v2837_v24, %v2576_v49  ;;  %v3100_v46 = vmul.f32 %v13431_v18, %v13192_v43  ;;  %v3099_v8 = vmul.f32 %v13431_v18, %v13194_v12  ;;  %v2841_v63 = vmul.f32 %v13416_v26, %v13108_v62 }
 0x2e5   : > { %v13528_v56 = vadd.f32 %v3355_v32, %v3126_v31  ;;  %v13530_v36 = vadd.f32 %v3354_v41, %v3125_v33  ;;  %v2578_v31 = vmul.f32 %v13426_v15, %v15297_v30  ;;  %v2868_v19 = vadd.f32 %v2836_v16, %v2575_v10  ;;  %v3676_v32 = vld [vmem:[#allocation2 + $0x9a] sm:$0xff]  ;;  %v15299_v16 = vld [vmem:[#allocation28_spill] sm:$0xff] }
 0x2e6   : > { %v3264_v1 = vpop.permute.xlu0 %3263  ;;  %v3259_v4 = vpop.permute.xlu1 %3258  ;;  %v3130_v23 = vadd.f32 %v3098_v59, %v2869_v6  ;;  %v2580_v43 = vmul.f32 %v13426_v15, %v15299_v16  ;;  %v2840_v12 = vmul.f32 %v13416_v26, %v13110_v13  ;;  %v3102_v59 = vmul.f32 %v13431_v18, %v13204_v7  ;;  %v15300_v6 = vld [vmem:[#allocation29_spill] sm:$0xff] }
 0x2e7   : > { %v3357_v50 = vmul.f32 %v13459_v28, %v3264_v1  ;;  %4263 = vperm.xlu0 %10646, %v3414_v47   ;;  %v3356_v61 = vmul.f32 %v13459_v28, %v3259_v4  ;;  %3750 = vperm.xlu1 %10647, %v15296_v54   ;;  %v15298_v47 = vld [vmem:[#allocation27_spill] sm:$0xff]  ;;  %v3129_v41 = vadd.f32 %v3097_v17, %v2868_v19 }
 0x2e8   : > { %v2577_v5 = vmul.f32 %v13426_v15, %v15298_v47  ;;  %v2871_v29 = vadd.f32 %v2839_v20, %v2578_v31  ;;  %v3937_v1 = vld [vmem:[#allocation2 + $0xa8] sm:$0xff]  ;;  %v2873_v54 = vadd.f32 %v2841_v63, %v2580_v43  ;;  %v2842_v7 = vmul.f32 %v13416_v26, %v13116_v57  ;;  %v15301_v31 = vld [vmem:[#allocation30_spill] sm:$0xff]  ;;  %v3417_v57 = vld [vmem:[#allocation2 + $0xb1] sm:$0xff] }
 0x2e9   : > { %v13547_v21 = vadd.f32 %v3357_v50, %v3128_v0  ;;  %v13549_v14 = vadd.f32 %v3356_v61, %v3127_v58  ;;  %v3416_v17 = vld [vmem:[#allocation2 + $0xa9] sm:$0xff]  ;;  %v3101_v50 = vmul.f32 %v13431_v18, %v13206_v51  ;;  %v2582_v20 = vmul.f32 %v13426_v15, %v15300_v6 }
 0x2ea   : > { %v3274_v33 = vpop.permute.xlu0 %3273  ;;  %v3269_v22 = vpop.permute.xlu1 %3268  ;;  %v2870_v49 = vadd.f32 %v2838_v3, %v2577_v5  ;;  %v3132_v0 = vadd.f32 %v3100_v46, %v2871_v29  ;;  %v2581_v19 = vmul.f32 %v13426_v15, %v15301_v31  ;;  %v3134_v47 = vadd.f32 %v3102_v59, %v2873_v54  ;;  %v3938_v59 = vld [vmem:[#allocation2 + $0xb0] sm:$0xff] }
 0x2eb   : > { %v3359_v44 = vmul.f32 %v13459_v28, %v3274_v33  ;;  %4268 = vperm.xlu0 %10646, %v3415_v35   ;;  %v3358_v24 = vmul.f32 %v13459_v28, %v3269_v22  ;;  %3755 = vperm.xlu1 %10647, %v3676_v32   ;;  %v2579_v35 = vmul.f32 %v13426_v15, %v13028_v40  ;;  %v15306_v6 = vld [vmem:[#allocation56_spill] sm:$0xff] }
 0x2ec   : > { %v3131_v58 = vadd.f32 %v3099_v8, %v2870_v49  ;;  %v2843_v40 = vmul.f32 %v13416_v26, %v13114_v25  ;;  %v3104_v5 = vmul.f32 %v13431_v18, %v13295_v55  ;;  %v3103_v25 = vmul.f32 %v13431_v18, %v13297_v2  ;;  %v4457_v8 = vld [vmem:[#allocation2 + $0x92] sm:$0xff] }
 0x2ed   : > { %v13565_v39 = vadd.f32 %v3359_v44, %v3130_v23  ;;  %v13567_v10 = vadd.f32 %v3358_v24, %v3129_v41  ;;  %v2872_v3 = vadd.f32 %v2840_v12, %v2579_v35  ;;  %v2845_v24 = vmul.f32 %v13416_v26, %v13120_v11 }
 0x2ee   : > { %v3284_v62 = vpop.permute.xlu0 %3283  ;;  %v3279_v4 = vpop.permute.xlu1 %3278  ;;  %v2875_v44 = vadd.f32 %v2843_v40, %v2582_v20  ;;  %v2874_v29 = vadd.f32 %v2842_v7, %v2581_v19  ;;  %v2584_v55 = vmul.f32 %v13426_v15, %v13034_v37  ;;  %v2844_v2 = vmul.f32 %v13416_v26, %v13122_v60  ;;  %v15305_v40 = vld [vmem:[#allocation32_spill] sm:$0xff] }
 0x2ef   : > { %v3361_v13 = vmul.f32 %v13459_v28, %v3284_v62  ;;  %4012 = vperm.xlu0 %10646, %v3937_v1   ;;  %v3360_v61 = vmul.f32 %v13459_v28, %v3279_v4  ;;  %3499 = vperm.xlu1 %10647, %v3416_v17   ;;  %v3133_v33 = vadd.f32 %v3101_v50, %v2872_v3  ;;  %v15302_v1 = vld [vmem:[#allocation41_spill] sm:$0xff]  ;;  %v15303_v4 = vld [vmem:[#allocation42_spill] sm:$0xff]  ;;  %v15304_v50 = vld [vmem:[#allocation31_spill] sm:$0xff] }
 0x2f0   : > { %v2583_v16 = vmul.f32 %v13426_v15, %v13036_v9  ;;  %v3136_v43 = vadd.f32 %v3104_v5, %v2875_v44  ;;  %v3106_v12 = vmul.f32 %v13431_v18, %v13353_v48  ;;  %v3135_v35 = vadd.f32 %v3103_v25, %v2874_v29  ;;  %v15307_v3 = vld [vmem:[#allocation57_spill] sm:$0xff]  ;;  %v3677_v5 = vld [vmem:[#allocation2 + $0xaa] sm:$0xff] }
 0x2f1   : > { %v13583_v30 = vadd.f32 %v3361_v13, %v3132_v0  ;;  %v13585_v51 = vadd.f32 %v3360_v61, %v3131_v58  ;;  %v3105_v37 = vmul.f32 %v13431_v18, %v13355_v34  ;;  %v2877_v62 = vadd.f32 %v2845_v24, %v2584_v55  ;;  %v15309_v44 = vld [vmem:[#allocation33_spill] sm:$0xff]  ;;  %v15310_v29 = vld [vmem:[#allocation44_spill] sm:$0xff] }
 0x2f2   : > { %v3294_v23 = vpop.permute.xlu0 %3293  ;;  %v3289_v46 = vpop.permute.xlu1 %3288  ;;  %v2847_v9 = vmul.f32 %v13416_v26, %v15302_v1  ;;  %v2846_v48 = vmul.f32 %v13416_v26, %v15303_v4  ;;  %v2586_v13 = vmul.f32 %v13426_v15, %v15304_v50  ;;  %v2876_v61 = vadd.f32 %v2844_v2, %v2583_v16 }
 0x2f3   : > { %v3363_v22 = vmul.f32 %v13459_v28, %v3294_v23  ;;  %3504 = vperm.xlu0 %10646, %v3417_v57   ;;  %v3362_v41 = vmul.f32 %v13459_v28, %v3289_v46  ;;  %4524 = vperm.xlu1 %10647, %v4457_v8   ;;  %v3138_v7 = vadd.f32 %v3106_v12, %v2877_v62 }
 0x2f4   : > { %v3108_v20 = vmul.f32 %v13431_v18, %v15306_v6  ;;  %v3107_v31 = vmul.f32 %v13431_v18, %v15307_v3  ;;  %v3137_v25 = vadd.f32 %v3105_v37, %v2876_v61  ;;  %v2879_v8 = vadd.f32 %v2847_v9, %v2586_v13  ;;  %v3418_v6 = vld [vmem:[#allocation2 + $0xc1] sm:$0xff] }
 0x2f5   : > { %v13601_v63 = vadd.f32 %v3363_v22, %v3134_v47  ;;  %v13603_v49 = vadd.f32 %v3362_v41, %v3133_v33  ;;  %v15308_v33 = vld [vmem:[#allocation43_spill] sm:$0xff]  ;;  %v2588_v24 = vmul.f32 %v13426_v15, %v15309_v44  ;;  %v2848_v55 = vmul.f32 %v13416_v26, %v15310_v29 }
 0x2f6   : > { %v3304_v11 = vpop.permute.xlu0 %3303  ;;  %v3299_v0 = vpop.permute.xlu1 %3298  ;;  %v2849_v22 = vmul.f32 %v13416_v26, %v15308_v33  ;;  %v3140_v12 = vadd.f32 %v3108_v20, %v2879_v8  ;;  %v3940_v33 = vld [vmem:[#allocation2 + $0xc8] sm:$0xff] }
 0x2f7   : > { %v3365_v60 = vmul.f32 %v13459_v28, %v3304_v11  ;;  %4529 = vperm.xlu0 %10646, %v3676_v32   ;;  %v3364_v58 = vmul.f32 %v13459_v28, %v3299_v0  ;;  %4017 = vperm.xlu1 %10647, %v3938_v59   ;;  %v2585_v32 = vmul.f32 %v13426_v15, %v15305_v40  ;;  %v4462_v29 = vld [vmem:[#allocation2 + $0xca] sm:$0xff] }
 0x2f8   : > { %v2881_v4 = vadd.f32 %v2849_v22, %v2588_v24 }
 0x2f9   : > { %v13619_v54 = vadd.f32 %v3365_v60, %v3136_v43  ;;  %v13621_v34 = vadd.f32 %v3364_v58, %v3135_v35  ;;  %v2878_v41 = vadd.f32 %v2846_v48, %v2585_v32  ;;  %v15313_v43 = vld [vmem:[#allocation34_spill] sm:$0xff]  ;;  %v15314_v35 = vld [vmem:[#allocation59_spill] sm:$0xff]  ;;  %v3678_v60 = vld [vmem:[#allocation2 + $0xb2] sm:$0xff] }
 0x2fa   : > { %v3314_v19 = vpop.permute.xlu0 %3313  ;;  %v3309_v47 = vpop.permute.xlu1 %3308  ;;  %v3110_v11 = vmul.f32 %v13431_v18, %v15314_v35  ;;  %v15315_v58 = vld [vmem:[#allocation60_spill] sm:$0xff]  ;;  %v3939_v32 = vld [vmem:[#allocation2 + $0xc0] sm:$0xff] }
 0x2fb   : > { %v3367_v23 = vmul.f32 %v13459_v28, %v3314_v19  ;;  %4273 = vperm.xlu0 %10646, %v3416_v17   ;;  %v3366_v46 = vmul.f32 %v13459_v28, %v3309_v47  ;;  %3760 = vperm.xlu1 %10647, %v3677_v5   ;;  %v2587_v17 = vmul.f32 %v13426_v15, %v15313_v43  ;;  %v15320_v43 = vld [vmem:[#allocation13_spill] sm:$0xff]  ;;  %v15322_v35 = vld [vmem:[#allocation46_spill] sm:$0xff] }
 0x2fc   : > { %v3139_v0 = vadd.f32 %v3107_v31, %v2878_v41  ;;  %v3109_v62 = vmul.f32 %v13431_v18, %v15315_v58  ;;  %v3142_v61 = vadd.f32 %v3110_v11, %v2881_v4  ;;  %v4461_v41 = vld [vmem:[#allocation2 + $0xc2] sm:$0xff]  ;;  %v3079_v11 = vmul.f32 %v13431_v18, %v15322_v35 }
 0x2fd   : > { %v13637_v2 = vadd.f32 %v3367_v23, %v3138_v7  ;;  %v13639_v16 = vadd.f32 %v3366_v46, %v3137_v25  ;;  %v2880_v48 = vadd.f32 %v2848_v55, %v2587_v17  ;;  %v3419_v25 = vld [vmem:[#allocation2 + $0xc9] sm:$0xff]  ;;  %v15323_v58 = vld [vmem:[#allocation62_spill] sm:$0xff] }
 0x2fe   : > { %v3324_v59 = vpop.permute.xlu0 %3323  ;;  %v3319_v37 = vpop.permute.xlu1 %3318  ;;  %v15321_v17 = vld [vmem:[#allocation7_spill] sm:$0xff] }
 0x2ff   : > { %15311 = vst [vmem:[#allocation20_spill] sm:$0xff] %v13637_v2  ;;  %15312 = vst [vmem:[#allocation16_spill] sm:$0xff] %v13639_v16  ;;  %v3369_v1 = vmul.f32 %v13459_v28, %v3324_v59  ;;  %4278 = vperm.xlu0 %10646, %v3417_v57   ;;  %v3368_v9 = vmul.f32 %v13459_v28, %v3319_v37  ;;  %3765 = vperm.xlu1 %10647, %v3678_v60   ;;  %v3941_v37 = vld [vmem:[#allocation2 + $0xd8] sm:$0xff]  ;;  %v15342_v2 = vld [vmem:[#allocation66_spill] sm:$0xff] }
 0x300   : > { %v3141_v20 = vadd.f32 %v3109_v62, %v2880_v48  ;;  %v3340_v62 = vmul.f32 %v13459_v28, %v15323_v58  ;;  %v15324_v48 = vld [vmem:[#allocation6_spill] sm:$0xff] }
 0x301   : > { %v13649_v50 = vadd.f32 %v3369_v1, %v3140_v12  ;;  %v13651_v13 = vadd.f32 %v3368_v9, %v3139_v0  ;;  %v2818_v12 = vmul.f32 %v13416_v26, %v15321_v17  ;;  %v13680_v1 = vld [vmem:[%s15188_s3 + $0x4] ss:$0 sm:$0xff]  ;;  %v13701_v17 = vld [vmem:[%s15188_s3 + $0x6] ss:$0 sm:$0xff] }
 0x302   : > { %v3334_v40 = vpop.permute.xlu0 %3333  ;;  %v3329_v7 = vpop.permute.xlu1 %3328 }
 0x303   : > { %15316 = vst [vmem:[#allocation17_spill] sm:$0xff] %v13649_v50  ;;  %15317 = vst [vmem:[#allocation18_spill] sm:$0xff] %v13651_v13  ;;  %v3371_v3 = vmul.f32 %v13459_v28, %v3334_v40  ;;  %4022 = vperm.xlu0 %10646, %v3939_v32   ;;  %v3370_v57 = vmul.f32 %v13459_v28, %v3329_v7  ;;  %3509 = vperm.xlu1 %10647, %v3418_v6   ;;  %v15325_v40 = vld [vmem:[#allocation15_spill] sm:$0xff] }
 0x304   : > { %v2819_v32 = vmul.f32 %v13416_v26, %v15325_v40 }
 0x305   : > { %v13655_v31 = vadd.f32 %v3371_v3, %v3142_v61  ;;  %v13657_v19 = vadd.f32 %v3370_v57, %v3141_v20  ;;  %v2558_v61 = vmul.f32 %v13426_v15, %v15324_v48  ;;  %v3942_v20 = vld [vmem:[#allocation2 + $0xe0] sm:$0xff]  ;;  %v15326_v57 = vld [vmem:[#allocation45_spill] sm:$0xff] }
 0x306   : > { %v3445_v47 = vpop.permute.xlu0 %3444  ;;  %v3440_v23 = vpop.permute.xlu1 %3439 }
 0x307   : > { %15318 = vst [vmem:[#allocation19_spill] sm:$0xff] %v13655_v31  ;;  %15319 = vst [vmem:[#allocation21_spill] sm:$0xff] %v13657_v19  ;;  %3514 = vperm.xlu0 %10646, %v3419_v25   ;;  %4534 = vperm.xlu1 %10647, %v3677_v5   ;;  %v2557_v5 = vmul.f32 %v13426_v15, %v15320_v43  ;;  %v3601_v4 = vmul.f32 %v13680_v1, %v3440_v23  ;;  %v13694_v23 = vld [vmem:[%s15188_s3 + $0x5] ss:$0 sm:$0xff]  ;;  %v15327_v43 = vld [vmem:[#allocation61_spill] sm:$0xff] }
 0x308   : > { %v3602_v58 = vmul.f32 %v13680_v1, %v3445_v47  ;;  %v13718_v47 = vld [vmem:[%s15188_s3 + $0x8] ss:$0 sm:$0xff] }
 0x30a   : > { %v13659_v46 = vpop.permute.xlu0 %3454  ;;  %v13661_v8 = vpop.permute.xlu1 %3449 }
 0x30b   : > { %4539 = vperm.xlu0 %10646, %v3678_v60   ;;  %4027 = vperm.xlu1 %10647, %v3940_v33   ;;  %v2850_v60 = vadd.f32 %v2818_v12, %v2557_v5  ;;  %v3341_v5 = vmul.f32 %v13459_v28, %v15327_v43  ;;  %v4203_v12 = vld [vmem:[#allocation2 + $0xe1] sm:$0xff] }
 0x30c   : > { %v4464_v43 = vld [vmem:[#allocation2 + $0xe2] sm:$0xff] }
 0x30d   : > { %v3111_v9 = vadd.f32 %v3079_v11, %v2850_v60  ;;  %v4202_v11 = vld [vmem:[#allocation2 + $0xd9] sm:$0xff] }
 0x30e   : > { %v13663_v22 = vpop.permute.xlu0 %3464  ;;  %v13665_v44 = vpop.permute.xlu1 %3459 }
 0x30f   : > { %4283 = vperm.xlu0 %10646, %v3418_v6   ;;  %3770 = vperm.xlu1 %10647, %v4461_v41   ;;  %v3372_v3 = vadd.f32 %v3340_v62, %v3111_v9  ;;  %v13710_v62 = vld [vmem:[%s15188_s3 + $0x7] ss:$0 sm:$0xff] }
 0x311   : > { %v3633_v33 = vadd.f32 %v3601_v4, %v3372_v3 }
 0x312   : > { %v3701_v24 = vpop.permute.xlu0 %3700  ;;  %v13667_v55 = vpop.permute.xlu1 %3469 }
 0x313   : > { %4288 = vperm.xlu0 %10646, %v3419_v25   ;;  %3775 = vperm.xlu1 %10647, %v4462_v29   ;;  %v3080_v25 = vmul.f32 %v13431_v18, %v15326_v57 }
 0x316   : > { %v3963_v0 = vpop.permute.xlu0 %3962  ;;  %v3706_v59 = vpop.permute.xlu1 %3705 }
 0x317   : > { %4544 = vperm.xlu0 %10646, %v4461_v41   ;;  %4032 = vperm.xlu1 %10647, %v3941_v37   ;;  %v2851_v41 = vadd.f32 %v2819_v32, %v2558_v61  ;;  %v3862_v37 = vmul.f32 %v13694_v23, %v3701_v24  ;;  %v4124_v4 = vmul.f32 %v13701_v17, %v3963_v0  ;;  %v4463_v32 = vld [vmem:[#allocation2 + $0xda] sm:$0xff]  ;;  %v15328_v0 = vld [vmem:[#allocation36_spill] sm:$0xff] }
 0x318   : > { %v3863_v61 = vmul.f32 %v13694_v23, %v3706_v59 }
 0x319   : > { %v3112_v60 = vadd.f32 %v3080_v25, %v2851_v41  ;;  %v3894_v9 = vadd.f32 %v3862_v37, %v3633_v33  ;;  %v2820_v33 = vmul.f32 %v13416_v26, %v15328_v0  ;;  %v15333_v0 = vld [vmem:[#allocation47_spill] sm:$0xff] }
 0x31a   : > { %v13687_v7 = vpop.permute.xlu0 %3710  ;;  %v3968_v6 = vpop.permute.xlu1 %3967 }
 0x31b   : > { %4549 = vperm.xlu0 %10646, %v4462_v29   ;;  %4037 = vperm.xlu1 %10647, %v3942_v20   ;;  %v3373_v48 = vadd.f32 %v3341_v5, %v3112_v60  ;;  %v4156_v57 = vadd.f32 %v4124_v4, %v3894_v9  ;;  %v4125_v25 = vmul.f32 %v13701_v17, %v3968_v6  ;;  %v15329_v60 = vld [vmem:[#allocation8_spill] sm:$0xff]  ;;  %v15330_v9 = vld [vmem:[#allocation35_spill] sm:$0xff]  ;;  %v13732_v4 = vld [vmem:[%s15189_s4] ss:$0 sm:$0xff] }
 0x31c   : > { %v2821_v6 = vmul.f32 %v13416_v26, %v15330_v9 }
 0x31d   : > { %v3634_v3 = vadd.f32 %v3602_v58, %v3373_v48  ;;  %v2559_v58 = vmul.f32 %v13426_v15, %v15329_v60  ;;  %v15331_v48 = vld [vmem:[#allocation48_spill] sm:$0xff] }
 0x31e   : > { %v13703_v29 = vpop.permute.xlu0 %3715  ;;  %v4224_v35 = vpop.permute.xlu1 %4223  ;;  %v15334_v60 = vld [vmem:[#allocation64_spill] sm:$0xff] }
 0x31f   : > { %4298 = vperm.xlu0 %10646, %v4203_v12   ;;  %4293 = vperm.xlu1 %10647, %v4202_v11   ;;  %v4385_v24 = vmul.f32 %v13710_v62, %v4224_v35  ;;  %v3895_v59 = vadd.f32 %v3863_v61, %v3634_v3  ;;  %v3081_v61 = vmul.f32 %v13431_v18, %v15331_v48 }
 0x320   : > { %v3342_v9 = vmul.f32 %v13459_v28, %v15334_v60 }
 0x321   : > { %v4417_v37 = vadd.f32 %v4385_v24, %v4156_v57  ;;  %v4157_v24 = vadd.f32 %v4125_v25, %v3895_v59 }
 0x322   : > { %v3973_v40 = vpop.permute.xlu0 %3972  ;;  %v4229_v20 = vpop.permute.xlu1 %4228 }
 0x323   : > { %4554 = vperm.xlu0 %10646, %v4463_v32   ;;  %3519 = vperm.xlu1 %10647, %v4202_v11   ;;  %v4386_v35 = vmul.f32 %v13710_v62, %v4229_v20  ;;  %v15332_v20 = vld [vmem:[#allocation9_spill] sm:$0xff] }
 0x324   : > { %v2560_v57 = vmul.f32 %v13426_v15, %v15332_v20 }
 0x325   : > { %v4418_v13 = vadd.f32 %v4386_v35, %v4157_v24  ;;  %v3943_v24 = vld [vmem:[#allocation2 + $0xf0] sm:$0xff] }
 0x326   : > { %v3978_v41 = vpop.permute.xlu0 %3977  ;;  %v4485_v5 = vpop.permute.xlu1 %4484  ;;  %v2853_v59 = vadd.f32 %v2821_v6, %v2560_v57  ;;  %v3864_v6 = vmul.f32 %v13694_v23, %v13687_v7  ;;  %v3865_v7 = vmul.f32 %v13694_v23, %v13703_v29 }
 0x327   : > { %4559 = vperm.xlu0 %10646, %v4464_v43   ;;  %v4646_v11 = vmul.f32 %v13718_v47, %v4485_v5  ;;  %3524 = vperm.xlu1 %10647, %v4203_v12   ;;  %v2852_v12 = vadd.f32 %v2820_v33, %v2559_v58  ;;  %v3082_v5 = vmul.f32 %v13431_v18, %v15333_v0 }
 0x328   : > { %v3603_v58 = vmul.f32 %v13680_v1, %v13661_v8 }
 0x329   : > { %v4678_v3 = vadd.f32 %v4646_v11, %v4417_v37  ;;  %v15335_v37 = vld [vmem:[#allocation63_spill] sm:$0xff]  ;;  %v3113_v11 = vadd.f32 %v3081_v61, %v2852_v12  ;;  %v3114_v0 = vadd.f32 %v3082_v5, %v2853_v59  ;;  %v4126_v12 = vmul.f32 %v13701_v17, %v3973_v40  ;;  %v4205_v59 = vld [vmem:[#allocation2 + $0xf9] sm:$0xff] }
 0x32a   : > { %v13742_v19 = vpop.permute.xlu0 %3720  ;;  %v4490_v31 = vpop.permute.xlu1 %4489  ;;  %v3343_v33 = vmul.f32 %v13459_v28, %v15335_v37 }
 0x32b   : > { %3785 = vperm.xlu0 %10646, %v4464_v43   ;;  %v4717_v50 = vadd.f32 %v13732_v4, %v4678_v3  ;;  %v4647_v25 = vmul.f32 %v13718_v47, %v4490_v31  ;;  %3780 = vperm.xlu1 %10647, %v4463_v32   ;;  %v3604_v43 = vmul.f32 %v13680_v1, %v13659_v46  ;;  %v4204_v3 = vld [vmem:[#allocation2 + $0xf1] sm:$0xff] }
 0x32c   : > { %v3374_v32 = vadd.f32 %v3342_v9, %v3113_v11  ;;  %v3375_v46 = vadd.f32 %v3343_v33, %v3114_v0 }
 0x32d   : > { %v4749_v48 = vmax.f32 %v4717_v50, 0.0  ;;  %v4679_v20 = vadd.f32 %v4647_v25, %v4418_v13  ;;  %v9093_v50 = vld [vmem:[%s15190_s5 + $0x140] sm:$0xff]  ;;  %v9094_v13 = vld [vmem:[%s15190_s5 + $0x148] sm:$0xff]  ;;  %v3944_v25 = vld [vmem:[#allocation2 + $0xf8] sm:$0xff] }
 0x32e   : > { %v13752_v35 = vpop.permute.xlu0 %3725  ;;  %v4234_v31 = vpop.permute.xlu1 %4233  ;;  %v10307_v61 = vpack.c.bf16 %v9094_v13, %v9093_v50  ;;  %v3635_v57 = vadd.f32 %v3603_v58, %v3374_v32  ;;  %v3636_v60 = vadd.f32 %v3604_v43, %v3375_v46  ;;  %v13775_v43 = vld [vmem:[#allocation2 + $0xf2] sm:$0xff] }
 0x32f   : > { %4042 = vperm.xlu0 %10646, %v3943_v24   ;;  %4838 = vst.msk [vmem:[#allocation3 + $0x19] sm:$0xff] %vm4781_vm5, %v4749_v48  ;;  %v4718_v8 = vadd.f32 %v13732_v4, %v4679_v20  ;;  %3529 = vperm.xlu1 %10647, %v4204_v3   ;;  %v4127_v48 = vmul.f32 %v13701_v17, %v3978_v41 }
 0x330   : > { %10308 = vmatprep.subr.bf16.mxu0 %v10307_v61  ;;  %v3896_v11 = vadd.f32 %v3864_v6, %v3635_v57  ;;  %v4387_v33 = vmul.f32 %v13710_v62, %v4234_v31  ;;  %v3897_v29 = vadd.f32 %v3865_v7, %v3636_v60  ;;  %v9095_v31 = vld [vmem:[%s15190_s5 + $0x150] sm:$0xff]  ;;  %v13789_v57 = vld [vmem:[#allocation2 + $0xfa] sm:$0xff] }
 0x331   : > { %v4750_v5 = vmax.f32 %v4718_v8, 0.0  ;;  %v9096_v8 = vld [vmem:[%s15190_s5 + $0x158] sm:$0xff] }
 0x332   : > { %v13767_v9 = vpop.permute.xlu0 %3982  ;;  %v4239_v37 = vpop.permute.xlu1 %4238  ;;  %v4158_v58 = vadd.f32 %v4126_v12, %v3896_v11  ;;  %v4159_v32 = vadd.f32 %v4127_v48, %v3897_v29  ;;  %v10311_v12 = vpack.c.bf16 %v9096_v8, %v9095_v31  ;;  %v9097_v11 = vld [vmem:[%s15190_s5 + $0x160] sm:$0xff]  ;;  %v9098_v48 = vld [vmem:[%s15190_s5 + $0x168] sm:$0xff]  ;;  %v15341_v31 = vld [vmem:[#allocation49_spill] sm:$0xff] }
 0x333   : > { %4047 = vperm.xlu0 %10646, %v3944_v25   ;;  %4839 = vst.msk [vmem:[#allocation3 + $0x21] sm:$0xff] %vm4781_vm5, %v4750_v5  ;;  %3534 = vperm.xlu1 %10647, %v4205_v59   ;;  %v4388_v40 = vmul.f32 %v13710_v62, %v4239_v37  ;;  %v15336_v5 = vld [vmem:[#allocation38_spill] sm:$0xff]  ;;  %v3084_v8 = vmul.f32 %v13431_v18, %v15341_v31  ;;  %v3425_v31 = vld [vmem:[#allocation2 + $0x111] sm:$0xff] }
 0x334   : > { %v4419_v6 = vadd.f32 %v4387_v33, %v4158_v58  ;;  %v2822_v60 = vmul.f32 %v13416_v26, %v15336_v5  ;;  %v15337_v33 = vld [vmem:[#allocation37_spill] sm:$0xff] }
 0x335   : > { %v4420_v50 = vadd.f32 %v4388_v40, %v4159_v32  ;;  %v2823_v29 = vmul.f32 %v13416_v26, %v15337_v33  ;;  %v15339_v40 = vld [vmem:[#allocation50_spill] sm:$0xff]  ;;  %v10315_v33 = vpack.c.bf16 %v9098_v48, %v9097_v11  ;;  %v15343_v11 = vld [vmem:[#allocation65_spill] sm:$0xff] }
 0x336   : > { %v13773_v20 = vpop.permute.xlu0 %3474  ;;  %v4495_v0 = vpop.permute.xlu1 %4494  ;;  %v4912_v24 = vld [vmem:[#allocation3 + $0x19] sm:$0xff] }
 0x337   : > { %4303 = vperm.xlu0 %10646, %v4204_v3   ;;  %v4648_v41 = vmul.f32 %v13718_v47, %v4495_v0  ;;  %3790 = vperm.xlu1 %10647, %v13775_v43   ;;  %v3083_v0 = vmul.f32 %v13431_v18, %v15339_v40  ;;  %v3344_v40 = vmul.f32 %v13459_v28, %v15342_v2 }
 0x338   : > { %9670 = vmatprep.mubr.msk.f32.mxu1 %vm4781_vm5, %v4912_v24  ;;  %9923 = vmatprep.mubr.msk.f32.mxu0 %vm4781_vm5, %v4912_v24  ;;  %v3605_v2 = vmul.f32 %v13680_v1, %v13665_v44 }
 0x339   : > { %v4680_v13 = vadd.f32 %v4648_v41, %v4419_v6  ;;  %v15340_v6 = vld [vmem:[#allocation11_spill] sm:$0xff] }
 0x33a   : > { %v4500_v3 = vpop.permute.xlu0 %4499  ;;  %v13787_v46 = vpop.permute.xlu1 %3987  ;;  %v4913_v7 = vld [vmem:[#allocation3 + $0x21] sm:$0xff]  ;;  %v2562_v41 = vmul.f32 %v13426_v15, %v15340_v6 }
 0x33b   : > { %v4649_v25 = vmul.f32 %v13718_v47, %v4500_v3  ;;  %4308 = vperm.xlu0 %10646, %v4205_v59   ;;  %v4719_v37 = vadd.f32 %v13732_v4, %v4680_v13  ;;  %3795 = vperm.xlu1 %10647, %v13789_v57   ;;  %v15338_v59 = vld [vmem:[#allocation10_spill] sm:$0xff]  ;;  %v3945_v3 = vld [vmem:[#allocation2 + $0x108] sm:$0xff] }
 0x33c   : > { %9671 = vmatmul.mubr.msk.f32.gmra.mrb[2].mxu1 %vm4781_vm5, %v4913_v7  ;;  %9924 = vmatmul.mubr.msk.f32.vlgmr.msra.gmra.mrb[0].mxu0 %vm4781_vm5, %v4913_v7  ;;  %v2561_v58 = vmul.f32 %v13426_v15, %v15338_v59  ;;  %v3424_v7 = vld [vmem:[#allocation2 + $0x109] sm:$0xff] }
 0x33d   : > { %v4681_v24 = vadd.f32 %v4649_v25, %v4420_v50  ;;  %v4751_v32 = vmax.f32 %v4719_v37, 0.0  ;;  %10310 = vmatpush3.bf16.msra.mxu0 %v10307_v61  ;;  %v9099_v61 = vld [vmem:[%s15190_s5 + $0x170] sm:$0xff]  ;;  %v9100_v25 = vld [vmem:[%s15190_s5 + $0x178] sm:$0xff]  ;;  %v2855_v37 = vadd.f32 %v2823_v29, %v2562_v41  ;;  %v3866_v41 = vmul.f32 %v13694_v23, %v13742_v19 }
 0x33e   : > { %v4244_v13 = vpop.permute.xlu0 %4243  ;;  %v13814_v5 = vpop.permute.xlu1 %3730  ;;  %10312 = vmatprep.subr.bf16.mxu0 %v10311_v12  ;;  %v2854_v59 = vadd.f32 %v2822_v60, %v2561_v58  ;;  %v3345_v60 = vmul.f32 %v13459_v28, %v15343_v11  ;;  %v10319_v16 = vpack.c.bf16 %v9100_v25, %v9099_v61  ;;  %v3946_v19 = vld [vmem:[#allocation2 + $0x110] sm:$0xff]  ;;  %v4129_v25 = vmul.f32 %v13701_v17, %v13787_v46 }
 0x33f   : > { %v4720_v50 = vadd.f32 %v13732_v4, %v4681_v24  ;;  %4052 = vperm.xlu0 %10646, %v3945_v3   ;;  %4840 = vst.msk [vmem:[#allocation3 + $0x31] sm:$0xff] %vm4781_vm5, %v4751_v32  ;;  %3539 = vperm.xlu1 %10647, %v3424_v7   ;;  %v3116_v24 = vadd.f32 %v3084_v8, %v2855_v37 }
 0x340   : > { %v3115_v48 = vadd.f32 %v3083_v0, %v2854_v59  ;;  %v3606_v32 = vmul.f32 %v13680_v1, %v13663_v22  ;;  %v3867_v22 = vmul.f32 %v13694_v23, %v13752_v35  ;;  %v4128_v0 = vmul.f32 %v13701_v17, %v13767_v9 }
 0x341   : > { %v4752_v58 = vmax.f32 %v4720_v50, 0.0  ;;  %10314 = vmatpush3.bf16.msra.mxu0 %v10311_v12  ;;  %v3377_v44 = vadd.f32 %v3345_v60, %v3116_v24  ;;  %v15345_v24 = vld [vmem:[#allocation12_spill] sm:$0xff] }
 0x342   : > { %v4249_v6 = vpop.permute.xlu0 %4248  ;;  %v13832_v3 = vpop.permute.xlu1 %3735  ;;  %10316 = vmatprep.subr.bf16.mxu0 %v10315_v33  ;;  %v3376_v29 = vadd.f32 %v3344_v40, %v3115_v48 }
 0x343   : > { %4841 = vst.msk [vmem:[#allocation3 + $0x39] sm:$0xff] %vm4781_vm5, %v4752_v58  ;;  %3544 = vperm.xlu0 %10646, %v3425_v31   ;;  %4564 = vperm.xlu1 %10647, %v13775_v43   ;;  %v3638_v8 = vadd.f32 %v3606_v32, %v3377_v44  ;;  %v4389_v43 = vmul.f32 %v13710_v62, %v4244_v13  ;;  %v15344_v13 = vld [vmem:[#allocation40_spill] sm:$0xff] }
 0x344   : > { %v3637_v12 = vadd.f32 %v3605_v2, %v3376_v29  ;;  %v2824_v2 = vmul.f32 %v13416_v26, %v15344_v13  ;;  %v2563_v32 = vmul.f32 %v13426_v15, %v15345_v24  ;;  %v15351_v24 = vld [vmem:[#allocation67_spill] sm:$0xff] }
 0x345   : > { %10318 = vmatpush3.bf16.msra.mxu0 %v10315_v33  ;;  %v3899_v35 = vadd.f32 %v3867_v22, %v3638_v8  ;;  %v3686_v8 = vld [vmem:[#allocation2 + $0x112] sm:$0xff] }
 0x346   : > { %v13842_v59 = vpop.permute.xlu0 %3992  ;;  %v13844_v40 = vpop.permute.xlu1 %3479  ;;  %v4914_v50 = vld [vmem:[#allocation3 + $0x31] sm:$0xff]  ;;  %10320 = vmatprep.subr.bf16.mxu0 %v10319_v16  ;;  %v3898_v61 = vadd.f32 %v3866_v41, %v3637_v12 }
 0x347   : > { %4569 = vperm.xlu0 %10646, %v13789_v57   ;;  %4057 = vperm.xlu1 %10647, %v3946_v19   ;;  %v4161_v48 = vadd.f32 %v4129_v25, %v3899_v35  ;;  %v3685_v57 = vld [vmem:[#allocation2 + $0x10a] sm:$0xff] }
 0x348   : > { %9673 = vmatprep.mubr.msk.f32.mxu1 %vm4781_vm5, %v4914_v50  ;;  %9926 = vmatprep.mubr.msk.f32.mxu0 %vm4781_vm5, %v4914_v50  ;;  %v4160_v9 = vadd.f32 %v4128_v0, %v3898_v61  ;;  %v15347_v19 = vld [vmem:[#allocation39_spill] sm:$0xff]  ;;  %v15348_v61 = vld [vmem:[#allocation68_spill] sm:$0xff] }
 0x349   : > { %10322 = vmatpush3.bf16.msra.mxu0 %v10319_v16  ;;  %v4390_v16 = vmul.f32 %v13710_v62, %v4249_v6  ;;  %v2825_v50 = vmul.f32 %v13416_v26, %v15347_v19  ;;  %v2856_v6 = vadd.f32 %v2824_v2, %v2563_v32  ;;  %v3607_v26 = vmul.f32 %v13680_v1, %v13667_v55 }
 0x34a   : > { %v13852_v33 = vpop.permute.xlu0 %3484  ;;  %v4915_v37 = vld [vmem:[#allocation3 + $0x39] sm:$0xff]  ;;  %v4505_v11 = vpop.permute.xlu1 %4504  ;;  %v4421_v60 = vadd.f32 %v4389_v43, %v4160_v9  ;;  %v3346_v43 = vmul.f32 %v13459_v28, %v15348_v61  ;;  %v15349_v9 = vld [vmem:[#allocation14_spill] sm:$0xff]  ;;  %v3868_v32 = vmul.f32 %v13694_v23, %v13814_v5  ;;  %v3608_v55 = vmul.f32 %v13680_v1, %v13773_v20 }
 0x34b   : > { %4313 = vperm.xlu0 %10646, %v3424_v7   ;;  %9674 = vmatmul.mubr.msk.f32.gmra.mrb[4].mxu1 %vm4781_vm5, %v4915_v37  ;;  %v4650_v46 = vmul.f32 %v13718_v47, %v4505_v11  ;;  %v15346_v7 = vld [vmem:[#allocation52_spill] sm:$0xff]  ;;  %v4422_v12 = vadd.f32 %v4390_v16, %v4161_v48  ;;  %v15350_v11 = vld [vmem:[#allocation51_spill] sm:$0xff]  ;;  %v3947_v48 = vld [vmem:[#allocation2 + $0x120] sm:$0xff]  ;;  %v4130_v20 = vmul.f32 %v13701_v17, %v13842_v59 }
 0x34c   : > { %9927 = vmatmul.mubr.msk.f32.gmra.mrb[2].mxu0 %vm4781_vm5, %v4915_v37  ;;  %3800 = vperm.xlu1 %10647, %v3685_v57   ;;  %v3085_v44 = vmul.f32 %v13431_v18, %v15346_v7  ;;  %v2564_v37 = vmul.f32 %v13426_v15, %v15349_v9  ;;  %v3426_v16 = vld [vmem:[#allocation2 + $0x121] sm:$0xff]  ;;  %v3347_v15 = vmul.f32 %v13459_v28, %v15351_v24 }
 0x34d   : > { %v4682_v58 = vadd.f32 %v4650_v46, %v4421_v60  ;;  %v3086_v60 = vmul.f32 %v13431_v18, %v15350_v11  ;;  %v3948_v9 = vld [vmem:[#allocation2 + $0x128] sm:$0xff] }
 0x34e   : > { %v4510_v29 = vpop.permute.xlu0 %4509  ;;  %v3998_v41 = vpop.permute.xlu1 %3997  ;;  %v3117_v13 = vadd.f32 %v3085_v44, %v2856_v6 }
 0x34f   : > { %v4651_v22 = vmul.f32 %v13718_v47, %v4510_v29  ;;  %4318 = vperm.xlu0 %10646, %v3425_v31   ;;  %v4721_v0 = vadd.f32 %v13732_v4, %v4682_v58  ;;  %v2857_v58 = vadd.f32 %v2825_v50, %v2564_v37  ;;  %v3869_v50 = vmul.f32 %v13694_v23, %v13832_v3 }
 0x350   : > { %3805 = vperm.xlu1 %10647, %v3686_v8   ;;  %v3378_v18 = vadd.f32 %v3346_v43, %v3117_v13 }
 0x351   : > { %v4683_v25 = vadd.f32 %v4651_v22, %v4422_v12  ;;  %v4753_v35 = vmax.f32 %v4721_v0, 0.0  ;;  %v3118_v7 = vadd.f32 %v3086_v60, %v2857_v58  ;;  %v3427_v12 = vld [vmem:[#allocation2 + $0x129] sm:$0xff] }
 0x352   : > { %v4254_v31 = vpop.permute.xlu0 %4253  ;;  %v13874_v46 = vpop.permute.xlu1 %3740  ;;  %v3639_v0 = vadd.f32 %v3607_v26, %v3378_v18 }
 0x353   : > { %v4722_v2 = vadd.f32 %v13732_v4, %v4683_v25  ;;  %4062 = vperm.xlu0 %10646, %v3947_v48   ;;  %4842 = vst.msk [vmem:[#allocation3 + $0x49] sm:$0xff] %vm4781_vm5, %v4753_v35  ;;  %v3379_v19 = vadd.f32 %v3347_v15, %v3118_v7  ;;  %v4391_v25 = vmul.f32 %v13710_v62, %v4254_v31  ;;  %v3949_v7 = vld [vmem:[#allocation2 + $0x138] sm:$0xff] }
 0x354   : > { %3549 = vperm.xlu1 %10647, %v3426_v16   ;;  %v3900_v28 = vadd.f32 %v3868_v32, %v3639_v0  ;;  %v4131_v35 = vmul.f32 %v13701_v17, %v3998_v41  ;;  %v3687_v41 = vld [vmem:[#allocation2 + $0x122] sm:$0xff] }
 0x355   : > { %v4754_v29 = vmax.f32 %v4722_v2, 0.0  ;;  %v3640_v5 = vadd.f32 %v3608_v55, %v3379_v19  ;;  %v3428_v19 = vld [vmem:[#allocation2 + $0x139] sm:$0xff] }
 0x356   : > { %v4259_v44 = vpop.permute.xlu0 %4258  ;;  %v13886_v22 = vpop.permute.xlu1 %3745 }
 0x357   : > { %4843 = vst.msk [vmem:[#allocation3 + $0x51] sm:$0xff] %vm4781_vm5, %v4754_v29  ;;  %3554 = vperm.xlu0 %10646, %v3427_v12   ;;  %v3901_v3 = vadd.f32 %v3869_v50, %v3640_v5  ;;  %v3610_v50 = vmul.f32 %v13680_v1, %v13852_v33 }
 0x358   : > { %4574 = vperm.xlu1 %10647, %v3685_v57   ;;  %v4162_v57 = vadd.f32 %v4130_v20, %v3900_v28 }
 0x359   : > { %v4163_v13 = vadd.f32 %v4131_v35, %v3901_v3  ;;  %v3871_v35 = vmul.f32 %v13694_v23, %v13886_v22 }
 0x35a   : > { %v4003_v6 = vpop.permute.xlu0 %4002  ;;  %v13891_v61 = vpop.permute.xlu1 %3489  ;;  %v4916_v43 = vld [vmem:[#allocation3 + $0x49] sm:$0xff]  ;;  %v4423_v48 = vadd.f32 %v4391_v25, %v4162_v57 }
 0x35b   : > { %4579 = vperm.xlu0 %10646, %v3686_v8   ;;  %9676 = vmatprep.mubr.msk.f32.mxu1 %vm4781_vm5, %v4916_v43  ;;  %v4392_v8 = vmul.f32 %v13710_v62, %v4259_v44  ;;  %v3609_v44 = vmul.f32 %v13680_v1, %v13844_v40  ;;  %v4132_v57 = vmul.f32 %v13701_v17, %v4003_v6 }
 0x35c   : > { %4067 = vperm.xlu1 %10647, %v3948_v9   ;;  %9929 = vmatprep.mubr.msk.f32.mxu0 %vm4781_vm5, %v4916_v43  ;;  %v3429_v43 = vld [vmem:[#allocation2 + $0x141] sm:$0xff] }
 0x35d   : > { %v4424_v58 = vadd.f32 %v4392_v8, %v4163_v13  ;;  %v3641_v40 = vadd.f32 %v3609_v44, %v13474_v42 }
 0x35e   : > { %v13899_v37 = vpop.permute.xlu0 %3494  ;;  %v4917_v11 = vld [vmem:[#allocation3 + $0x51] sm:$0xff]  ;;  %v4515_v60 = vpop.permute.xlu1 %4514 }
 0x35f   : > { %4323 = vperm.xlu0 %10646, %v3426_v16   ;;  %9677 = vmatmul.mubr.msk.f32.gmra.mrb[6].mxu1 %vm4781_vm5, %v4917_v11  ;;  %v4652_v59 = vmul.f32 %v13718_v47, %v4515_v60  ;;  %v3688_v16 = vld [vmem:[#allocation2 + $0x12a] sm:$0xff]  ;;  %v3950_v60 = vld [vmem:[#allocation2 + $0x140] sm:$0xff] }
 0x360   : > { %9930 = vmatmul.mubr.msk.f32.gmra.mrb[4].mxu0 %vm4781_vm5, %v4917_v11  ;;  %3810 = vperm.xlu1 %10647, %v3687_v41  }
 0x361   : > { %v4684_v31 = vadd.f32 %v4652_v59, %v4423_v48 }
 0x362   : > { %v4520_v26 = vpop.permute.xlu0 %4519  ;;  %v4008_v2 = vpop.permute.xlu1 %4007 }
 0x363   : > { %v4653_v24 = vmul.f32 %v13718_v47, %v4520_v26  ;;  %4328 = vperm.xlu0 %10646, %v3427_v12   ;;  %v4723_v15 = vadd.f32 %v13732_v4, %v4684_v31  ;;  %v3870_v12 = vmul.f32 %v13694_v23, %v13874_v46  ;;  %v3642_v46 = vadd.f32 %v3610_v50, %v13472_v38  ;;  %v3689_v31 = vld [vmem:[#allocation2 + $0x13a] sm:$0xff]  ;;  %v3430_v50 = vld [vmem:[#allocation2 + $0x151] sm:$0xff] }
 0x364   : > { %3815 = vperm.xlu1 %10647, %v3688_v16   ;;  %v4133_v42 = vmul.f32 %v13701_v17, %v4008_v2 }
 0x365   : > { %v4685_v18 = vadd.f32 %v4653_v24, %v4424_v58  ;;  %v4755_v32 = vmax.f32 %v4723_v15, 0.0  ;;  %v3902_v25 = vadd.f32 %v3870_v12, %v3641_v40  ;;  %v3903_v22 = vadd.f32 %v3871_v35, %v3642_v46  ;;  %v3431_v35 = vld [vmem:[#allocation2 + $0x159] sm:$0xff] }
 0x366   : > { %v4264_v29 = vpop.permute.xlu0 %4263  ;;  %v13907_v55 = vpop.permute.xlu1 %3750  ;;  %v3611_v12 = vmul.f32 %v13680_v1, %v13891_v61  ;;  %v3612_v40 = vmul.f32 %v13680_v1, %v13899_v37 }
 0x367   : > { %v4724_v0 = vadd.f32 %v13732_v4, %v4685_v18  ;;  %4072 = vperm.xlu0 %10646, %v3949_v7   ;;  %4844 = vst.msk [vmem:[#allocation3 + $0x61] sm:$0xff] %vm4781_vm5, %v4755_v32  ;;  %v4393_v11 = vmul.f32 %v13710_v62, %v4264_v29  ;;  %v4164_v48 = vadd.f32 %v4132_v57, %v3902_v25  ;;  %v3690_v32 = vld [vmem:[#allocation2 + $0x142] sm:$0xff] }
 0x368   : > { %3559 = vperm.xlu1 %10647, %v3428_v19   ;;  %v4165_v8 = vadd.f32 %v4133_v42, %v3903_v22 }
 0x369   : > { %v4756_v28 = vmax.f32 %v4724_v0, 0.0  ;;  %v3951_v0 = vld [vmem:[#allocation2 + $0x150] sm:$0xff] }
 0x36a   : > { %v4269_v5 = vpop.permute.xlu0 %4268  ;;  %v13917_v20 = vpop.permute.xlu1 %3755 }
 0x36b   : > { %4845 = vst.msk [vmem:[#allocation3 + $0x69] sm:$0xff] %vm4781_vm5, %v4756_v28  ;;  %3564 = vperm.xlu0 %10646, %v3429_v43   ;;  %v4394_v26 = vmul.f32 %v13710_v62, %v4269_v5  ;;  %v3872_v5 = vmul.f32 %v13694_v23, %v13907_v55  ;;  %v3873_v57 = vmul.f32 %v13694_v23, %v13917_v20 }
 0x36c   : > { %4584 = vperm.xlu1 %10647, %v3687_v41   ;;  %v4425_v41 = vadd.f32 %v4393_v11, %v4164_v48  ;;  %v3644_v11 = vadd.f32 %v3612_v40, %v13490_v53  ;;  %v3952_v48 = vld [vmem:[#allocation2 + $0x158] sm:$0xff] }
 0x36d   : > { %v4426_v15 = vadd.f32 %v4394_v26, %v4165_v8 }
 0x36e   : > { %v4013_v9 = vpop.permute.xlu0 %4012  ;;  %v13924_v3 = vpop.permute.xlu1 %3499  ;;  %v4918_v33 = vld [vmem:[#allocation3 + $0x61] sm:$0xff]  ;;  %v3905_v20 = vadd.f32 %v3873_v57, %v3644_v11 }
 0x36f   : > { %4589 = vperm.xlu0 %10646, %v3688_v16   ;;  %9679 = vmatprep.mubr.msk.f32.mxu1 %vm4781_vm5, %v4918_v33  ;;  %v4134_v37 = vmul.f32 %v13701_v17, %v4013_v9  ;;  %v3433_v11 = vld [vmem:[#allocation2 + $0x171] sm:$0xff] }
 0x370   : > { %4077 = vperm.xlu1 %10647, %v3950_v60   ;;  %9932 = vmatprep.mubr.msk.f32.mxu0 %vm4781_vm5, %v4918_v33  ;;  %v3643_v33 = vadd.f32 %v3611_v12, %v13492_v45 }
 0x372   : > { %v13931_v38 = vpop.permute.xlu0 %3504  ;;  %v4919_v13 = vld [vmem:[#allocation3 + $0x69] sm:$0xff]  ;;  %v4525_v59 = vpop.permute.xlu1 %4524  ;;  %v3904_v61 = vadd.f32 %v3872_v5, %v3643_v33 }
 0x373   : > { %4333 = vperm.xlu0 %10646, %v3428_v19   ;;  %9680 = vmatmul.mubr.msk.f32.gmra.mrb[8].mxu1 %vm4781_vm5, %v4919_v13  ;;  %v4654_v6 = vmul.f32 %v13718_v47, %v4525_v59 }
 0x374   : > { %9933 = vmatmul.mubr.msk.f32.gmra.mrb[6].mxu0 %vm4781_vm5, %v4919_v13  ;;  %3820 = vperm.xlu1 %10647, %v3689_v31   ;;  %v4166_v13 = vadd.f32 %v4134_v37, %v3904_v61 }
 0x375   : > { %v4686_v2 = vadd.f32 %v4654_v6, %v4425_v41 }
 0x376   : > { %v4530_v58 = vpop.permute.xlu0 %4529  ;;  %v4018_v24 = vpop.permute.xlu1 %4017 }
 0x377   : > { %v4655_v16 = vmul.f32 %v13718_v47, %v4530_v58  ;;  %4338 = vperm.xlu0 %10646, %v3429_v43   ;;  %v4725_v18 = vadd.f32 %v13732_v4, %v4686_v2  ;;  %v4135_v45 = vmul.f32 %v13701_v17, %v4018_v24 }
 0x378   : > { %3825 = vperm.xlu1 %10647, %v3690_v32  }
 0x379   : > { %v4687_v29 = vadd.f32 %v4655_v16, %v4426_v15  ;;  %v4757_v7 = vmax.f32 %v4725_v18, 0.0  ;;  %v4167_v6 = vadd.f32 %v4135_v45, %v3905_v20  ;;  %v3613_v15 = vmul.f32 %v13680_v1, %v13924_v3 }
 0x37a   : > { %v4274_v44 = vpop.permute.xlu0 %4273  ;;  %v3761_v19 = vpop.permute.xlu1 %3760 }
 0x37b   : > { %v4726_v28 = vadd.f32 %v13732_v4, %v4687_v29  ;;  %4082 = vperm.xlu0 %10646, %v3951_v0   ;;  %4846 = vst.msk [vmem:[#allocation3 + $0x79] sm:$0xff] %vm4781_vm5, %v4757_v7  ;;  %v4395_v22 = vmul.f32 %v13710_v62, %v4274_v44  ;;  %v3692_v29 = vld [vmem:[#allocation2 + $0x15a] sm:$0xff]  ;;  %v3614_v7 = vmul.f32 %v13680_v1, %v13931_v38 }
 0x37c   : > { %3569 = vperm.xlu1 %10647, %v3430_v50   ;;  %v3874_v44 = vmul.f32 %v13694_v23, %v3761_v19  ;;  %v3645_v3 = vadd.f32 %v3613_v15, %v13511_v52  ;;  %v4902_v38 = vld [vmem:[%s15190_s5] sm:$0xff]  ;;  %v4903_v19 = vld [vmem:[%s15190_s5 + $0x8] sm:$0xff] }
 0x37d   : > { %v4758_v43 = vmax.f32 %v4726_v28, 0.0  ;;  %v4427_v8 = vadd.f32 %v4395_v22, %v4166_v13  ;;  %v3646_v52 = vadd.f32 %v3614_v7, %v13509_v27 }
 0x37e   : > { %v4279_v25 = vpop.permute.xlu0 %4278  ;;  %v3766_v46 = vpop.permute.xlu1 %3765  ;;  %v3906_v33 = vadd.f32 %v3874_v44, %v3645_v3 }
 0x37f   : > { %4847 = vst.msk [vmem:[#allocation3 + $0x81] sm:$0xff] %vm4781_vm5, %v4758_v43  ;;  %3574 = vperm.xlu0 %10646, %v3431_v35   ;;  %v4396_v26 = vmul.f32 %v13710_v62, %v4279_v25  ;;  %v3875_v43 = vmul.f32 %v13694_v23, %v3766_v46  ;;  %v3432_v25 = vld [vmem:[#allocation2 + $0x169] sm:$0xff] }
 0x380   : > { %4594 = vperm.xlu1 %10647, %v3689_v31   ;;  %v3691_v31 = vld [vmem:[#allocation2 + $0x152] sm:$0xff] }
 0x381   : > { %v4428_v16 = vadd.f32 %v4396_v26, %v4167_v6  ;;  %v3907_v22 = vadd.f32 %v3875_v43, %v3646_v52  ;;  %v4476_v43 = vld [vmem:[#allocation2 + $0x172] sm:$0xff] }
 0x382   : > { %v4023_v55 = vpop.permute.xlu0 %4022  ;;  %v13952_v42 = vpop.permute.xlu1 %3509  ;;  %v4920_v60 = vld [vmem:[#allocation3 + $0x79] sm:$0xff] }
 0x383   : > { %4599 = vperm.xlu0 %10646, %v3690_v32   ;;  %9682 = vmatprep.mubr.msk.f32.mxu1 %vm4781_vm5, %v4920_v60  ;;  %v4136_v37 = vmul.f32 %v13701_v17, %v4023_v55  ;;  %v3615_v20 = vmul.f32 %v13680_v1, %v13952_v42 }
 0x384   : > { %4087 = vperm.xlu1 %10647, %v3952_v48   ;;  %9935 = vmatprep.mubr.msk.f32.mxu0 %vm4781_vm5, %v4920_v60 }
 0x385   : > { %v4168_v48 = vadd.f32 %v4136_v37, %v3906_v33 }
 0x386   : > { %v13959_v53 = vpop.permute.xlu0 %3514  ;;  %v4921_v59 = vld [vmem:[#allocation3 + $0x81] sm:$0xff]  ;;  %v4535_v41 = vpop.permute.xlu1 %4534 }
 0x387   : > { %4343 = vperm.xlu0 %10646, %v3430_v50   ;;  %9683 = vmatmul.mubr.msk.f32.gmra.mrb[10].mxu1 %vm4781_vm5, %v4921_v59  ;;  %v4656_v9 = vmul.f32 %v13718_v47, %v4535_v41  ;;  %v3953_v50 = vld [vmem:[#allocation2 + $0x168] sm:$0xff] }
 0x388   : > { %9936 = vmatmul.mubr.msk.f32.gmra.mrb[8].mxu0 %vm4781_vm5, %v4921_v59  ;;  %3830 = vperm.xlu1 %10647, %v3691_v31  }
 0x389   : > { %v4688_v2 = vadd.f32 %v4656_v9, %v4427_v8  ;;  %v3954_v9 = vld [vmem:[#allocation2 + $0x170] sm:$0xff] }
 0x38a   : > { %v4540_v58 = vpop.permute.xlu0 %4539  ;;  %v4028_v24 = vpop.permute.xlu1 %4027 }
 0x38b   : > { %v4657_v18 = vmul.f32 %v13718_v47, %v4540_v58  ;;  %4348 = vperm.xlu0 %10646, %v3431_v35   ;;  %v4727_v32 = vadd.f32 %v13732_v4, %v4688_v2  ;;  %v10243_v35 = vpack.c.bf16 %v4903_v19, %v4902_v38  ;;  %v4137_v61 = vmul.f32 %v13701_v17, %v4028_v24 }
 0x38c   : > { %3835 = vperm.xlu1 %10647, %v3692_v29   ;;  %v3647_v58 = vadd.f32 %v3615_v20, %v13530_v36  ;;  %v3956_v20 = vld [vmem:[#allocation2 + $0x188] sm:$0xff] }
 0x38d   : > { %v4689_v0 = vadd.f32 %v4657_v18, %v4428_v16  ;;  %v4759_v12 = vmax.f32 %v4727_v32, 0.0  ;;  %10244 = vmatprep.subr.bf16.mxu1 %v10243_v35  ;;  %v4169_v27 = vadd.f32 %v4137_v61, %v3907_v22 }
 0x38e   : > { %v4284_v28 = vpop.permute.xlu0 %4283  ;;  %v3771_v5 = vpop.permute.xlu1 %3770  ;;  %10246 = vmatpush3.bf16.msra.mxu1 %v10243_v35 }
 0x38f   : > { %v4728_v40 = vadd.f32 %v13732_v4, %v4689_v0  ;;  %4092 = vperm.xlu0 %10646, %v3953_v50   ;;  %4848 = vst.msk [vmem:[#allocation3 + $0x91] sm:$0xff] %vm4781_vm5, %v4759_v12  ;;  %v4397_v45 = vmul.f32 %v13710_v62, %v4284_v28  ;;  %v3876_v42 = vmul.f32 %v13694_v23, %v3771_v5 }
 0x390   : > { %3579 = vperm.xlu1 %10647, %v3432_v25  }
 0x391   : > { %v4760_v46 = vmax.f32 %v4728_v40, 0.0  ;;  %v4429_v8 = vadd.f32 %v4397_v45, %v4168_v48  ;;  %v3908_v44 = vadd.f32 %v3876_v42, %v3647_v58  ;;  %v4904_v40 = vld [vmem:[%s15190_s5 + $0x10] sm:$0xff]  ;;  %v4907_v58 = vld [vmem:[%s15190_s5 + $0x28] sm:$0xff] }
 0x392   : > { %v4289_v57 = vpop.permute.xlu0 %4288  ;;  %v3776_v60 = vpop.permute.xlu1 %3775 }
 0x393   : > { %4849 = vst.msk [vmem:[#allocation3 + $0x99] sm:$0xff] %vm4781_vm5, %v4760_v46  ;;  %3584 = vperm.xlu0 %10646, %v3433_v11   ;;  %v4398_v6 = vmul.f32 %v13710_v62, %v4289_v57  ;;  %v3877_v15 = vmul.f32 %v13694_v23, %v3776_v60  ;;  %v3955_v57 = vld [vmem:[#allocation2 + $0x180] sm:$0xff] }
 0x394   : > { %4604 = vperm.xlu1 %10647, %v3691_v31   ;;  %v3616_v31 = vmul.f32 %v13680_v1, %v13959_v53  ;;  %v4475_v53 = vld [vmem:[#allocation2 + $0x16a] sm:$0xff] }
 0x395   : > { %v4430_v2 = vadd.f32 %v4398_v6, %v4169_v27 }
 0x396   : > { %v4545_v13 = vpop.permute.xlu0 %4544  ;;  %v4033_v59 = vpop.permute.xlu1 %4032  ;;  %v4922_v41 = vld [vmem:[#allocation3 + $0x91] sm:$0xff]  ;;  %v3648_v7 = vadd.f32 %v3616_v31, %v13528_v56 }
 0x397   : > { %v4658_v55 = vmul.f32 %v13718_v47, %v4545_v13  ;;  %4609 = vperm.xlu0 %10646, %v3692_v29   ;;  %9685 = vmatprep.mubr.msk.f32.mxu1 %vm4781_vm5, %v4922_v41  ;;  %v4138_v1 = vmul.f32 %v13701_v17, %v4033_v59 }
 0x398   : > { %4097 = vperm.xlu1 %10647, %v3954_v9   ;;  %9938 = vmatprep.mubr.msk.f32.mxu0 %vm4781_vm5, %v4922_v41  ;;  %v3909_v5 = vadd.f32 %v3877_v15, %v3648_v7  ;;  %v4217_v41 = vld [vmem:[#allocation2 + $0x189] sm:$0xff] }
 0x399   : > { %v4690_v26 = vadd.f32 %v4658_v55, %v4429_v8  ;;  %v4170_v3 = vadd.f32 %v4138_v1, %v3908_v44 }
 0x39a   : > { %v4550_v24 = vpop.permute.xlu0 %4549  ;;  %v4923_v16 = vld [vmem:[#allocation3 + $0x99] sm:$0xff]  ;;  %v4038_v18 = vpop.permute.xlu1 %4037 }
 0x39b   : > { %v4729_v32 = vadd.f32 %v13732_v4, %v4690_v26  ;;  %v4659_v29 = vmul.f32 %v13718_v47, %v4550_v24  ;;  %4353 = vperm.xlu0 %10646, %v3432_v25   ;;  %9686 = vmatmul.mubr.msk.f32.gmra.mrb[12].mxu1 %vm4781_vm5, %v4923_v16  ;;  %v4139_v0 = vmul.f32 %v13701_v17, %v4038_v18  ;;  %v4905_v17 = vld [vmem:[%s15190_s5 + $0x18] sm:$0xff]  ;;  %v4478_v26 = vld [vmem:[#allocation2 + $0x18a] sm:$0xff]  ;;  %v9133_v24 = vld [vmem:[%s15190_s5 + $0x180] sm:$0xff] }
 0x39c   : > { %9939 = vmatmul.mubr.msk.f32.gmra.mrb[10].mxu0 %vm4781_vm5, %v4923_v16  ;;  %3840 = vperm.xlu1 %10647, %v4475_v53   ;;  %v10247_v25 = vpack.c.bf16 %v4905_v17, %v4904_v40  ;;  %v9134_v16 = vld [vmem:[%s15190_s5 + $0x188] sm:$0xff] }
 0x39d   : > { %v4761_v36 = vmax.f32 %v4729_v32, 0.0  ;;  %v4691_v23 = vadd.f32 %v4659_v29, %v4430_v2  ;;  %v4171_v19 = vadd.f32 %v4139_v0, %v3909_v5  ;;  %v4477_v2 = vld [vmem:[#allocation2 + $0x182] sm:$0xff]  ;;  %v10323_v18 = vpack.c.bf16 %v9134_v16, %v9133_v24 }
 0x39e   : > { %v4299_v12 = vpop.permute.xlu0 %4298  ;;  %v4294_v28 = vpop.permute.xlu1 %4293  ;;  %10248 = vmatprep.subr.bf16.mxu1 %v10247_v25  ;;  %v14057_v0 = vld [vmem:[%s15188_s3 + $0x5] ss:$0 sm:$0xff] }
 0x39f   : > { %4850 = vst.msk [vmem:[#allocation3 + $0xa9] sm:$0xff] %vm4781_vm5, %v4761_v36  ;;  %v4730_v50 = vadd.f32 %v13732_v4, %v4691_v23  ;;  %4358 = vperm.xlu0 %10646, %v3433_v11   ;;  %v4399_v56 = vmul.f32 %v13710_v62, %v4294_v28  ;;  %v4400_v46 = vmul.f32 %v13710_v62, %v4299_v12  ;;  %v3958_v28 = vld [vmem:[#allocation2 + $0x1a0] sm:$0xff] }
 0x3a0   : > { %3845 = vperm.xlu1 %10647, %v4476_v43   ;;  %10250 = vmatpush3.bf16.msra.mxu1 %v10247_v25  ;;  %v6776_v25 = vld [vmem:[#allocation3 + $0x22] sm:$0xff] }
 0x3a1   : > { %v4762_v38 = vmax.f32 %v4730_v50, 0.0  ;;  %v4431_v35 = vadd.f32 %v4399_v56, %v4170_v3  ;;  %v4432_v11 = vadd.f32 %v4400_v46, %v4171_v19  ;;  %10324 = vmatprep.subr.bf16.mxu0 %v10323_v18  ;;  %v6775_v50 = vld [vmem:[#allocation3 + $0x1a] sm:$0xff]  ;;  %v6777_v19 = vld [vmem:[#allocation3 + $0x32] sm:$0xff] }
 0x3a2   : > { %v4555_v52 = vpop.permute.xlu0 %4554  ;;  %v3520_v33 = vpop.permute.xlu1 %3519 }
 0x3a3   : > { %4851 = vst.msk [vmem:[#allocation3 + $0xb1] sm:$0xff] %vm4781_vm5, %v4762_v38  ;;  %v4660_v61 = vmul.f32 %v13718_v47, %v4555_v52  ;;  %4614 = vperm.xlu0 %10646, %v4475_v53   ;;  %v14049_v53 = vld [vmem:[%s15188_s3 + $0x4] ss:$0 sm:$0xff] }
 0x3a4   : > { %4102 = vperm.xlu1 %10647, %v3955_v57   ;;  %v3617_v7 = vmul.f32 %v14049_v53, %v3520_v33  ;;  %v4219_v38 = vld [vmem:[#allocation2 + $0x1a1] sm:$0xff]  ;;  %v4218_v33 = vld [vmem:[#allocation2 + $0x199] sm:$0xff] }
 0x3a5   : > { %v4692_v60 = vadd.f32 %v4660_v61, %v4431_v35 }
 0x3a6   : > { %v4560_v37 = vpop.permute.xlu0 %4559  ;;  %v4924_v22 = vld [vmem:[#allocation3 + $0xa9] sm:$0xff]  ;;  %v3525_v45 = vpop.permute.xlu1 %3524  ;;  %v3649_v5 = vadd.f32 %v3617_v7, %v13549_v14  ;;  %v14071_v14 = vld [vmem:[%s15188_s3 + $0x6] ss:$0 sm:$0xff] }
 0x3a7   : > { %v4661_v48 = vmul.f32 %v13718_v47, %v4560_v37  ;;  %4619 = vperm.xlu0 %10646, %v4476_v43   ;;  %9688 = vmatprep.mubr.msk.f32.mxu1 %vm4781_vm5, %v4924_v22  ;;  %v4731_v27 = vadd.f32 %v13732_v4, %v4692_v60  ;;  %v4216_v47 = vld [vmem:[#allocation2 + $0x181] sm:$0xff]  ;;  %v3618_v3 = vmul.f32 %v14049_v53, %v3525_v45  ;;  %v3957_v43 = vld [vmem:[#allocation2 + $0x198] sm:$0xff]  ;;  %v6778_v60 = vld [vmem:[#allocation3 + $0x3a] sm:$0xff] }
 0x3a8   : > { %9941 = vmatprep.mubr.msk.f32.mxu0 %vm4781_vm5, %v4924_v22  ;;  %4107 = vperm.xlu1 %10647, %v3956_v20   ;;  %v4480_v37 = vld [vmem:[#allocation2 + $0x1a2] sm:$0xff]  ;;  %v6779_v22 = vld [vmem:[#allocation3 + $0x4a] sm:$0xff]  ;;  %v4908_v20 = vld [vmem:[%s15190_s5 + $0x30] sm:$0xff] }
 0x3a9   : > { %v4693_v62 = vadd.f32 %v4661_v48, %v4432_v11  ;;  %v4763_v13 = vmax.f32 %v4731_v27, 0.0  ;;  %v3650_v52 = vadd.f32 %v3618_v3, %v13547_v21  ;;  %v4479_v21 = vld [vmem:[#allocation2 + $0x19a] sm:$0xff]  ;;  %v14086_v48 = vld [vmem:[%s15188_s3 + $0x7] ss:$0 sm:$0xff] }
 0x3aa   : > { %v14021_v59 = vpop.permute.xlu0 %3785  ;;  %v4925_v8 = vld [vmem:[#allocation3 + $0xb1] sm:$0xff]  ;;  %v3781_v6 = vpop.permute.xlu1 %3780  ;;  %v14118_v7 = vld [vmem:[%s15189_s4] ss:$0 sm:$0xff] }
 0x3ab   : > { %v4732_v55 = vadd.f32 %v13732_v4, %v4693_v62  ;;  %4852 = vst.msk [vmem:[#allocation3 + $0xc1] sm:$0xff] %vm4781_vm5, %v4763_v13  ;;  %4368 = vperm.xlu0 %10646, %v4217_v41   ;;  %9689 = vmatmul.mubr.msk.f32.gmra.mrb[14].mxu1 %vm4781_vm5, %v4925_v8  ;;  %v4906_v4 = vld [vmem:[%s15190_s5 + $0x20] sm:$0xff]  ;;  %v3878_v12 = vmul.f32 %v14057_v0, %v3781_v6  ;;  %v4909_v62 = vld [vmem:[%s15190_s5 + $0x38] sm:$0xff]  ;;  %v9135_v13 = vld [vmem:[%s15190_s5 + $0x190] sm:$0xff] }
 0x3ac   : > { %9942 = vmatmul.mubr.msk.f32.gmra.mrb[12].mxu0 %vm4781_vm5, %v4925_v8  ;;  %4363 = vperm.xlu1 %10647, %v4216_v47   ;;  %v10251_v15 = vpack.c.bf16 %v4907_v58, %v4906_v4  ;;  %v3879_v57 = vmul.f32 %v14057_v0, %v14021_v59  ;;  %v10255_v6 = vpack.c.bf16 %v4909_v62, %v4908_v20  ;;  %v6781_v58 = vld [vmem:[#allocation3 + $0x62] sm:$0xff] }
 0x3ad   : > { %v4764_v9 = vmax.f32 %v4732_v55, 0.0  ;;  %v3910_v17 = vadd.f32 %v3878_v12, %v3649_v5  ;;  %v9136_v55 = vld [vmem:[%s15190_s5 + $0x198] sm:$0xff]  ;;  %v6783_v12 = vld [vmem:[#allocation3 + $0x7a] sm:$0xff] }
 0x3ae   : > { %v4043_v31 = vpop.permute.xlu0 %4042  ;;  %v14027_v42 = vpop.permute.xlu1 %3529  ;;  %10252 = vmatprep.subr.bf16.mxu1 %v10251_v15  ;;  %v3911_v45 = vadd.f32 %v3879_v57, %v3650_v52  ;;  %v10327_v4 = vpack.c.bf16 %v9136_v55, %v9135_v13 }
 0x3af   : > { %4853 = vst.msk [vmem:[#allocation3 + $0xc9] sm:$0xff] %vm4781_vm5, %v4764_v9  ;;  %4629 = vperm.xlu0 %10646, %v4478_v26   ;;  %10254 = vmatpush3.bf16.msra.mxu1 %v10251_v15  ;;  %v4140_v35 = vmul.f32 %v14071_v14, %v4043_v31  ;;  %v6780_v31 = vld [vmem:[#allocation3 + $0x52] sm:$0xff] }
 0x3b0   : > { %4624 = vperm.xlu1 %10647, %v4477_v2   ;;  %10256 = vmatprep.subr.bf16.mxu1 %v10255_v6 }
 0x3b1   : > { %v4172_v11 = vadd.f32 %v4140_v35, %v3910_v17  ;;  %v3619_v17 = vmul.f32 %v14049_v53, %v14027_v42  ;;  %v9137_v42 = vld [vmem:[%s15190_s5 + $0x1a0] sm:$0xff] }
 0x3b2   : > { %v4048_v32 = vpop.permute.xlu0 %4047  ;;  %v4926_v29 = vld [vmem:[#allocation3 + $0xc1] sm:$0xff]  ;;  %v14042_v1 = vpop.permute.xlu1 %3534 }
 0x3b3   : > { %3594 = vperm.xlu0 %10646, %v4217_v41   ;;  %9691 = vmatprep.mubr.msk.f32.mxu1 %vm4781_vm5, %v4926_v29  ;;  %v4141_v59 = vmul.f32 %v14071_v14, %v4048_v32 }
 0x3b4   : > { %9944 = vmatprep.mubr.msk.f32.mxu0 %vm4781_vm5, %v4926_v29  ;;  %3589 = vperm.xlu1 %10647, %v4216_v47  }
 0x3b5   : > { %v4173_v24 = vadd.f32 %v4141_v59, %v3911_v45  ;;  %10258 = vmatpush3.bf16.msra.mxu1 %v10255_v6  ;;  %v3651_v45 = vadd.f32 %v3619_v17, %v13567_v10 }
 0x3b6   : > { %v4304_v36 = vpop.permute.xlu0 %4303  ;;  %v4927_v44 = vld [vmem:[#allocation3 + $0xc9] sm:$0xff]  ;;  %v14052_v23 = vpop.permute.xlu1 %3790 }
 0x3b7   : > { %3855 = vperm.xlu0 %10646, %v4478_v26   ;;  %9692 = vmatmul.mubr.msk.f32.gmra.mrb[16].mxu1 %vm4781_vm5, %v4927_v44  ;;  %v4401_v27 = vmul.f32 %v14086_v48, %v4304_v36  ;;  %v14109_v26 = vld [vmem:[%s15188_s3 + $0x8] ss:$0 sm:$0xff]  ;;  %v3880_v57 = vmul.f32 %v14057_v0, %v14052_v23  ;;  %v6789_v55 = vld [vmem:[#allocation3 + $0xc2] sm:$0xff] }
 0x3b8   : > { %9945 = vmatmul.mubr.msk.f32.gmra.mrb[14].mxu0 %vm4781_vm5, %v4927_v44  ;;  %3850 = vperm.xlu1 %10647, %v4477_v2   ;;  %v6782_v44 = vld [vmem:[#allocation3 + $0x6a] sm:$0xff] }
 0x3b9   : > { %9987 = vmatprep.mubr.msk.f32.mxu0 %vm4781_vm5, %v6775_v50  ;;  %v4433_v47 = vadd.f32 %v4401_v27, %v4172_v11  ;;  %v6787_v27 = vld [vmem:[#allocation3 + $0xaa] sm:$0xff] }
 0x3ba   : > { %v4309_v56 = vpop.permute.xlu0 %4308  ;;  %v14065_v40 = vpop.permute.xlu1 %3795 }
 0x3bb   : > { %4117 = vperm.xlu0 %10646, %v3958_v28   ;;  %v4402_v9 = vmul.f32 %v14086_v48, %v4309_v56  ;;  %v3881_v23 = vmul.f32 %v14057_v0, %v14065_v40 }
 0x3bc   : > { %9988 = vmatmul.mubr.msk.f32.vlgmr.msra.gmra.mrb[0].mxu0 %vm4781_vm5, %v6776_v25  ;;  %4112 = vperm.xlu1 %10647, %v3957_v43   ;;  %v6784_v43 = vld [vmem:[#allocation3 + $0x82] sm:$0xff]  ;;  %v6785_v25 = vld [vmem:[#allocation3 + $0x92] sm:$0xff] }
 0x3bd   : > { %9990 = vmatprep.mubr.msk.f32.mxu0 %vm4781_vm5, %v6777_v19  ;;  %10326 = vmatpush3.bf16.msra.mxu0 %v10323_v18  ;;  %v4434_v32 = vadd.f32 %v4402_v9, %v4173_v24  ;;  %v8974_v19 = vld [vmem:[%s15190_s5 + $0x88] sm:$0xff] }
 0x3be   : > { %v14076_v46 = vpop.permute.xlu0 %4052  ;;  %v14078_v61 = vpop.permute.xlu1 %3539  ;;  %10328 = vmatprep.subr.bf16.mxu0 %v10327_v4 }
 0x3bf   : > { %4378 = vperm.xlu0 %10646, %v4219_v38   ;;  %v8973_v38 = vld [vmem:[%s15190_s5 + $0x80] sm:$0xff]  ;;  %v4142_v6 = vmul.f32 %v14071_v14, %v14076_v46 }
 0x3c0   : > { %9991 = vmatmul.mubr.msk.f32.gmra.mrb[2].mxu0 %vm4781_vm5, %v6778_v60  ;;  %4373 = vperm.xlu1 %10647, %v4218_v33   ;;  %v14137_v52 = vpack.c.bf16 %v8974_v19, %v8973_v38  ;;  %v9138_v33 = vld [vmem:[%s15190_s5 + $0x1a8] sm:$0xff] }
 0x3c1   : > { %9993 = vmatprep.mubr.msk.f32.mxu0 %vm4781_vm5, %v6779_v22  ;;  %10330 = vmatpush3.bf16.msra.mxu0 %v10327_v4  ;;  %v10331_v60 = vpack.c.bf16 %v9138_v33, %v9137_v42  ;;  %v6786_v22 = vld [vmem:[#allocation3 + $0x9a] sm:$0xff] }
 0x3c2   : > { %v14100_v41 = vpop.permute.xlu0 %3544  ;;  %v4565_v8 = vpop.permute.xlu1 %4564  ;;  %10260 = vmatprep.subr.bf16.mxu1 %v14137_v52 }
 0x3c3   : > { %4639 = vperm.xlu0 %10646, %v4480_v37   ;;  %v4662_v2 = vmul.f32 %v14109_v26, %v4565_v8  ;;  %v3620_v37 = vmul.f32 %v14049_v53, %v14042_v1  ;;  %10332 = vmatprep.subr.bf16.mxu0 %v10331_v60  ;;  %v3912_v1 = vadd.f32 %v3880_v57, %v3651_v45  ;;  %v6788_v8 = vld [vmem:[#allocation3 + $0xb2] sm:$0xff] }
 0x3c4   : > { %9994 = vmatmul.mubr.msk.f32.gmra.mrb[4].mxu0 %vm4781_vm5, %v6780_v31  ;;  %4634 = vperm.xlu1 %10647, %v4479_v21  }
 0x3c5   : > { %9996 = vmatprep.mubr.msk.f32.mxu0 %vm4781_vm5, %v6781_v58  ;;  %v4694_v15 = vadd.f32 %v4662_v2, %v4433_v47  ;;  %10334 = vmatpush3.bf16.msra.mxu0 %v10331_v60  ;;  %v3652_v13 = vadd.f32 %v3620_v37, %v13565_v39  ;;  %v9139_v47 = vld [vmem:[%s15190_s5 + $0x1b0] sm:$0xff]  ;;  %v9140_v39 = vld [vmem:[%s15190_s5 + $0x1b8] sm:$0xff]  ;;  %v4174_v2 = vadd.f32 %v4142_v6, %v3912_v1 }
 0x3c6   : > { %v4570_v16 = vpop.permute.xlu0 %4569  ;;  %v4058_v18 = vpop.permute.xlu1 %4057  ;;  %v10335_v31 = vpack.c.bf16 %v9140_v39, %v9139_v47  ;;  %v3622_v60 = vmul.f32 %v14049_v53, %v14100_v41 }
 0x3c7   : > { %v4663_v29 = vmul.f32 %v14109_v26, %v4570_v16  ;;  %v4733_v36 = vadd.f32 %v14118_v7, %v4694_v15  ;;  %v4143_v59 = vmul.f32 %v14071_v14, %v4058_v18  ;;  %v3913_v9 = vadd.f32 %v3881_v23, %v3652_v13  ;;  %v6790_v15 = vld [vmem:[#allocation3 + $0xca] sm:$0xff] }
 0x3c8   : > { %9997 = vmatmul.mubr.msk.f32.gmra.mrb[6].mxu0 %vm4781_vm5, %v6782_v44  ;;  %10336 = vmatprep.subr.bf16.mxu0 %v10335_v31  ;;  %v3654_v41 = vadd.f32 %v3622_v60, %v13583_v30 }
 0x3c9   : > { %v4695_v28 = vadd.f32 %v4663_v29, %v4434_v32  ;;  %v4765_v50 = vmax.f32 %v4733_v36, 0.0  ;;  %9999 = vmatprep.mubr.msk.f32.mxu0 %vm4781_vm5, %v6783_v12  ;;  %v4175_v24 = vadd.f32 %v4143_v59, %v3913_v9  ;;  %10338 = vmatpush3.bf16.msra.mxu0 %v10335_v31 }
 0x3ca   : > { %v4314_v5 = vpop.permute.xlu0 %4313 }
 0x3cb   : > { %v4734_v3 = vadd.f32 %v14118_v7, %v4695_v28  ;;  %4854 = vst.msk [vmem:[#allocation3 + $0xd9] sm:$0xff] %vm4781_vm5, %v4765_v50  ;;  %v14125_v56 = vpop.permute.xlu1 %3800  ;;  %v4403_v40 = vmul.f32 %v14086_v48, %v4314_v5 }
 0x3cc   : > { %10000 = vmatmul.mubr.msk.f32.gmra.mrb[8].mxu0 %vm4781_vm5, %v6784_v43  ;;  %v3882_v33 = vmul.f32 %v14057_v0, %v14125_v56 }
 0x3cd   : > { %v4766_v35 = vmax.f32 %v4734_v3, 0.0  ;;  %10002 = vmatprep.mubr.msk.f32.mxu0 %vm4781_vm5, %v6785_v25  ;;  %v4435_v18 = vadd.f32 %v4403_v40, %v4174_v2 }
 0x3ce   : > { %v4319_v11 = vpop.permute.xlu0 %4318 }
 0x3cf   : > { %4855 = vst.msk [vmem:[#allocation3 + $0xe1] sm:$0xff] %vm4781_vm5, %v4766_v35  ;;  %v14150_v21 = vpop.permute.xlu1 %3805  ;;  %v4404_v29 = vmul.f32 %v14086_v48, %v4319_v11  ;;  %v3621_v35 = vmul.f32 %v14049_v53, %v14078_v61  ;;  %v9173_v11 = vld [vmem:[%s15190_s5 + $0x1c0] sm:$0xff]  ;;  %v9174_v61 = vld [vmem:[%s15190_s5 + $0x1c8] sm:$0xff] }
 0x3d0   : > { %10003 = vmatmul.mubr.msk.f32.gmra.mrb[10].mxu0 %vm4781_vm5, %v6786_v22  ;;  %v14202_v45 = vpack.c.bf16 %v9174_v61, %v9173_v11  ;;  %v3883_v56 = vmul.f32 %v14057_v0, %v14150_v21 }
 0x3d1   : > { %10005 = vmatprep.mubr.msk.f32.mxu0 %vm4781_vm5, %v6787_v27  ;;  %v4436_v12 = vadd.f32 %v4404_v29, %v4175_v24  ;;  %v3653_v22 = vadd.f32 %v3621_v35, %v13585_v51 }
 0x3d2   : > { %v14158_v20 = vpop.permute.xlu0 %4062  ;;  %v4928_v62 = vld [vmem:[#allocation3 + $0xd9] sm:$0xff]  ;;  %10340 = vmatprep.subr.bf16.mxu0 %v14202_v45 }
 0x3d3   : > { %v14162_v10 = vpop.permute.xlu1 %3549  ;;  %9694 = vmatprep.mubr.msk.f32.mxu1 %vm4781_vm5, %v4928_v62  ;;  %v3914_v27 = vadd.f32 %v3882_v33, %v3653_v22  ;;  %v4144_v59 = vmul.f32 %v14071_v14, %v14158_v20 }
 0x3d4   : > { %10006 = vmatmul.mubr.msk.f32.gmra.mrb[12].mxu0 %vm4781_vm5, %v6788_v8  ;;  %v3915_v8 = vadd.f32 %v3883_v56, %v3654_v41 }
 0x3d5   : > { %10008 = vmatprep.mubr.msk.f32.mxu0 %vm4781_vm5, %v6789_v55  ;;  %v4176_v21 = vadd.f32 %v4144_v59, %v3914_v27 }
 0x3d6   : > { %v14176_v4 = vpop.permute.xlu0 %3554  ;;  %v6791_v46 = vld [vmem:[#allocation3 + $0xda] sm:$0xff]  ;;  %v6792_v50 = vld [vmem:[#allocation3 + $0xe2] sm:$0xff] }
 0x3d7   : > { %v4929_v58 = vld [vmem:[#allocation3 + $0xe1] sm:$0xff]  ;;  %v4575_v16 = vpop.permute.xlu1 %4574 }
 0x3d8   : > { %9695 = vmatmul.mubr.msk.f32.gmra.mrb[18].mxu1 %vm4781_vm5, %v4929_v58  ;;  %10009 = vmatmul.mubr.msk.f32.gmra.mrb[14].mxu0 %vm4781_vm5, %v6790_v15  ;;  %v4664_v32 = vmul.f32 %v14109_v26, %v4575_v16 }
 0x3d9   : > { %10011 = vmatprep.mubr.msk.f32.mxu0 %vm4781_vm5, %v6791_v46 }
 0x3da   : > { %v4580_v36 = vpop.permute.xlu0 %4579  ;;  %v4696_v44 = vadd.f32 %v4664_v32, %v4435_v18 }
 0x3db   : > { %v4665_v28 = vmul.f32 %v14109_v26, %v4580_v36  ;;  %v4068_v5 = vpop.permute.xlu1 %4067 }
 0x3dc   : > { %v4735_v3 = vadd.f32 %v14118_v7, %v4696_v44  ;;  %10012 = vmatmul.mubr.msk.f32.gmra.mrb[16].mxu0 %vm4781_vm5, %v6792_v50  ;;  %v4145_v1 = vmul.f32 %v14071_v14, %v4068_v5 }
 0x3dd   : > { %v4697_v43 = vadd.f32 %v4665_v28, %v4436_v12  ;;  %v3623_v12 = vmul.f32 %v14049_v53, %v14162_v10 }
 0x3de   : > { %v4324_v17 = vpop.permute.xlu0 %4323  ;;  %v4767_v25 = vmax.f32 %v4735_v3, 0.0  ;;  %v4177_v30 = vadd.f32 %v4145_v1, %v3915_v8  ;;  %v3624_v3 = vmul.f32 %v14049_v53, %v14176_v4 }
 0x3df   : > { %v4736_v38 = vadd.f32 %v14118_v7, %v4697_v43  ;;  %v3811_v19 = vpop.permute.xlu1 %3810  ;;  %v4405_v51 = vmul.f32 %v14086_v48, %v4324_v17  ;;  %v3655_v17 = vadd.f32 %v3623_v12, %v13603_v49 }
 0x3e0   : > { %4856 = vst.msk [vmem:[#allocation3 + $0xf1] sm:$0xff] %vm4781_vm5, %v4767_v25  ;;  %v3884_v50 = vmul.f32 %v14057_v0, %v3811_v19  ;;  %v3656_v10 = vadd.f32 %v3624_v3, %v13601_v63 }
 0x3e1   : > { %v4768_v42 = vmax.f32 %v4736_v38, 0.0  ;;  %v4437_v39 = vadd.f32 %v4405_v51, %v4176_v21 }
 0x3e2   : > { %v4329_v57 = vpop.permute.xlu0 %4328  ;;  %v3916_v38 = vadd.f32 %v3884_v50, %v3655_v17 }
 0x3e3   : > { %4857 = vst.msk [vmem:[#allocation3 + $0xf9] sm:$0xff] %vm4781_vm5, %v4768_v42  ;;  %v3816_v37 = vpop.permute.xlu1 %3815  ;;  %v4406_v31 = vmul.f32 %v14086_v48, %v4329_v57 }
 0x3e4   : > { %v3885_v25 = vmul.f32 %v14057_v0, %v3816_v37 }
 0x3e5   : > { %v4438_v58 = vadd.f32 %v4406_v31, %v4177_v30 }
 0x3e6   : > { %v4073_v23 = vpop.permute.xlu0 %4072  ;;  %v3917_v49 = vadd.f32 %v3885_v25, %v3656_v10 }
 0x3e7   : > { %v14209_v62 = vpop.permute.xlu1 %3559  ;;  %v4930_v13 = vld [vmem:[#allocation3 + $0xf1] sm:$0xff]  ;;  %v4146_v57 = vmul.f32 %v14071_v14, %v4073_v23 }
 0x3e8   : > { %9697 = vmatprep.mubr.msk.f32.mxu1 %vm4781_vm5, %v4930_v13  ;;  %v3625_v31 = vmul.f32 %v14049_v53, %v14209_v62 }
 0x3e9   : > { %v4178_v11 = vadd.f32 %v4146_v57, %v3916_v38 }
 0x3ea   : > { %v14215_v6 = vpop.permute.xlu0 %3564  ;;  %v14217_v40 = vld [vmem:[#allocation3 + $0xf2] sm:$0xff]  ;;  %v14222_v47 = vld [vmem:[#allocation3 + $0xfa] sm:$0xff] }
 0x3eb   : > { %v4931_v55 = vld [vmem:[#allocation3 + $0xf9] sm:$0xff]  ;;  %10014 = vmatprep.mubr.msk.f32.mxu0 %vm4781_vm5, %v14217_v40  ;;  %v4585_v20 = vpop.permute.xlu1 %4584 }
 0x3ec   : > { %9698 = vmatmul.mubr.msk.f32.gmra.mrb[20].mxu1 %vm4781_vm5, %v4931_v55  ;;  %10015 = vmatmul.mubr.msk.f32.gmra.mrb[18].mxu0 %vm4781_vm5, %v14222_v47  ;;  %v4666_v9 = vmul.f32 %v14109_v26, %v4585_v20 }
 0x3ee   : > { %v4590_v2 = vpop.permute.xlu0 %4589  ;;  %v4698_v46 = vadd.f32 %v4666_v9, %v4437_v39 }
 0x3ef   : > { %v4667_v24 = vmul.f32 %v14109_v26, %v4590_v2  ;;  %v4078_v15 = vpop.permute.xlu1 %4077 }
 0x3f0   : > { %v4737_v16 = vadd.f32 %v14118_v7, %v4698_v46  ;;  %v4147_v42 = vmul.f32 %v14071_v14, %v4078_v15 }
 0x3f1   : > { %v4699_v18 = vadd.f32 %v4667_v24, %v4438_v58  ;;  %v3626_v24 = vmul.f32 %v14049_v53, %v14215_v6 }
 0x3f2   : > { %v4334_v32 = vpop.permute.xlu0 %4333  ;;  %v4769_v29 = vmax.f32 %v4737_v16, 0.0  ;;  %v4179_v61 = vadd.f32 %v4147_v42, %v3917_v49  ;;  %v3657_v16 = vadd.f32 %v3625_v31, %v13621_v34 }
 0x3f3   : > { %v4738_v36 = vadd.f32 %v14118_v7, %v4699_v18  ;;  %v3821_v44 = vpop.permute.xlu1 %3820  ;;  %v4407_v4 = vmul.f32 %v14086_v48, %v4334_v32  ;;  %v3658_v62 = vadd.f32 %v3626_v24, %v13619_v54 }
 0x3f4   : > { %4858 = vst.msk [vmem:[#allocation3 + $0x109] sm:$0xff] %vm4781_vm5, %v4769_v29  ;;  %v3886_v46 = vmul.f32 %v14057_v0, %v3821_v44 }
 0x3f5   : > { %v4770_v28 = vmax.f32 %v4738_v36, 0.0  ;;  %v4439_v27 = vadd.f32 %v4407_v4, %v4178_v11 }
 0x3f6   : > { %v4339_v5 = vpop.permute.xlu0 %4338  ;;  %v3918_v32 = vadd.f32 %v3886_v46, %v3657_v16 }
 0x3f7   : > { %4859 = vst.msk [vmem:[#allocation3 + $0x111] sm:$0xff] %vm4781_vm5, %v4770_v28  ;;  %v3826_v43 = vpop.permute.xlu1 %3825  ;;  %v4408_v41 = vmul.f32 %v14086_v48, %v4339_v5 }
 0x3f8   : > { %v3887_v18 = vmul.f32 %v14057_v0, %v3826_v43 }
 0x3f9   : > { %v4440_v59 = vadd.f32 %v4408_v41, %v4179_v61 }
 0x3fa   : > { %v4083_v35 = vpop.permute.xlu0 %4082  ;;  %v3919_v50 = vadd.f32 %v3887_v18, %v3658_v62 }
 0x3fb   : > { %v14242_v33 = vpop.permute.xlu1 %3569  ;;  %v14244_v19 = vld [vmem:[#allocation3 + $0x109] sm:$0xff]  ;;  %v4148_v44 = vmul.f32 %v14071_v14, %v4083_v35 }
 0x3fc   : > { %9700 = vmatprep.mubr.msk.f32.mxu1 %vm4781_vm5, %v14244_v19  ;;  %v3627_v4 = vmul.f32 %v14049_v53, %v14242_v33 }
 0x3fd   : > { %v4180_v34 = vadd.f32 %v4148_v44, %v3918_v32 }
 0x3fe   : > { %v14250_v60 = vpop.permute.xlu0 %3574  ;;  %v14252_v37 = vld [vmem:[#allocation3 + $0x10a] sm:$0xff]  ;;  %v14260_v22 = vld [vmem:[#allocation3 + $0x112] sm:$0xff] }
 0x3ff   : > { %v14254_v63 = vld [vmem:[#allocation3 + $0x111] sm:$0xff]  ;;  %10017 = vmatprep.mubr.msk.f32.mxu0 %vm4781_vm5, %v14252_v37  ;;  %v4595_v56 = vpop.permute.xlu1 %4594 }
 0x400   : > { %9701 = vmatmul.mubr.msk.f32.gmra.mrb[22].mxu1 %vm4781_vm5, %v14254_v63  ;;  %10018 = vmatmul.mubr.msk.f32.gmra.mrb[20].mxu0 %vm4781_vm5, %v14260_v22  ;;  %v4668_v23 = vmul.f32 %v14109_v26, %v4595_v56 }
 0x402   : > { %v4600_v1 = vpop.permute.xlu0 %4599  ;;  %v4700_v13 = vadd.f32 %v4668_v23, %v4439_v27  ;;  %v3628_v27 = vmul.f32 %v14049_v53, %v14250_v60 }
 0x403   : > { %v4669_v51 = vmul.f32 %v14109_v26, %v4600_v1  ;;  %v4088_v8 = vpop.permute.xlu1 %4087 }
 0x404   : > { %v4739_v21 = vadd.f32 %v14118_v7, %v4700_v13  ;;  %v4149_v36 = vmul.f32 %v14071_v14, %v4088_v8 }
 0x405   : > { %v4701_v55 = vadd.f32 %v4669_v51, %v4440_v59  ;;  %v15352_v59 = vld [vmem:[#allocation16_spill] sm:$0xff] }
 0x406   : > { %v4344_v30 = vpop.permute.xlu0 %4343  ;;  %v4771_v20 = vmax.f32 %v4739_v21, 0.0  ;;  %v4181_v54 = vadd.f32 %v4149_v36, %v3919_v50  ;;  %v3659_v51 = vadd.f32 %v3627_v4, %v15352_v59 }
 0x407   : > { %v4740_v39 = vadd.f32 %v14118_v7, %v4701_v55  ;;  %v3831_v9 = vpop.permute.xlu1 %3830  ;;  %v4409_v6 = vmul.f32 %v14086_v48, %v4344_v30  ;;  %v15353_v55 = vld [vmem:[#allocation20_spill] sm:$0xff] }
 0x408   : > { %4860 = vst.msk [vmem:[#allocation3 + $0x121] sm:$0xff] %vm4781_vm5, %v4771_v20  ;;  %v3888_v23 = vmul.f32 %v14057_v0, %v3831_v9  ;;  %v3660_v30 = vadd.f32 %v3628_v27, %v15353_v55 }
 0x409   : > { %v4772_v2 = vmax.f32 %v4740_v39, 0.0  ;;  %v4441_v38 = vadd.f32 %v4409_v6, %v4180_v34 }
 0x40a   : > { %v4349_v58 = vpop.permute.xlu0 %4348  ;;  %v3920_v20 = vadd.f32 %v3888_v23, %v3659_v51  ;;  %v15355_v23 = vld [vmem:[#allocation18_spill] sm:$0xff] }
 0x40b   : > { %4861 = vst.msk [vmem:[#allocation3 + $0x129] sm:$0xff] %vm4781_vm5, %v4772_v2  ;;  %v3836_v15 = vpop.permute.xlu1 %3835  ;;  %v4410_v10 = vmul.f32 %v14086_v48, %v4349_v58 }
 0x40c   : > { %v3889_v8 = vmul.f32 %v14057_v0, %v3836_v15 }
 0x40d   : > { %v4442_v49 = vadd.f32 %v4410_v10, %v4181_v54  ;;  %v15354_v54 = vld [vmem:[#allocation17_spill] sm:$0xff] }
 0x40e   : > { %v4093_v29 = vpop.permute.xlu0 %4092  ;;  %v3921_v2 = vadd.f32 %v3889_v8, %v3660_v30 }
 0x40f   : > { %v3580_v12 = vpop.permute.xlu1 %3579  ;;  %v14280_v28 = vld [vmem:[#allocation3 + $0x121] sm:$0xff]  ;;  %v4150_v9 = vmul.f32 %v14071_v14, %v4093_v29 }
 0x410   : > { %9703 = vmatprep.mubr.msk.f32.mxu1 %vm4781_vm5, %v14280_v28 }
 0x411   : > { %v4182_v24 = vadd.f32 %v4150_v9, %v3920_v20 }
 0x412   : > { %v3585_v5 = vpop.permute.xlu0 %3584  ;;  %v14286_v3 = vld [vmem:[#allocation3 + $0x122] sm:$0xff]  ;;  %v14294_v17 = vld [vmem:[#allocation3 + $0x12a] sm:$0xff] }
 0x413   : > { %v14288_v43 = vld [vmem:[#allocation3 + $0x129] sm:$0xff]  ;;  %10020 = vmatprep.mubr.msk.f32.mxu0 %vm4781_vm5, %v14286_v3  ;;  %v4605_v25 = vpop.permute.xlu1 %4604  ;;  %v3630_v16 = vmul.f32 %v14049_v53, %v3585_v5  ;;  %v3629_v5 = vmul.f32 %v14049_v53, %v3580_v12 }
 0x414   : > { %9704 = vmatmul.mubr.msk.f32.gmra.mrb[24].mxu1 %vm4781_vm5, %v14288_v43  ;;  %10021 = vmatmul.mubr.msk.f32.gmra.mrb[22].mxu0 %vm4781_vm5, %v14294_v17  ;;  %v4670_v35 = vmul.f32 %v14109_v26, %v4605_v25 }
 0x415   : > { %v3662_v25 = vadd.f32 %v3630_v16, %v15354_v54 }
 0x416   : > { %v4610_v42 = vpop.permute.xlu0 %4609  ;;  %v4702_v57 = vadd.f32 %v4670_v35, %v4441_v38 }
 0x417   : > { %v4671_v11 = vmul.f32 %v14109_v26, %v4610_v42  ;;  %v4098_v61 = vpop.permute.xlu1 %4097 }
 0x418   : > { %v4741_v56 = vadd.f32 %v14118_v7, %v4702_v57  ;;  %v4151_v60 = vmul.f32 %v14071_v14, %v4098_v61 }
 0x419   : > { %v4703_v41 = vadd.f32 %v4671_v11, %v4442_v49 }
 0x41a   : > { %v4354_v1 = vpop.permute.xlu0 %4353  ;;  %v4773_v13 = vmax.f32 %v4741_v56, 0.0  ;;  %v4183_v15 = vadd.f32 %v4151_v60, %v3921_v2 }
 0x41b   : > { %v4742_v33 = vadd.f32 %v14118_v7, %v4703_v41  ;;  %v3841_v21 = vpop.permute.xlu1 %3840  ;;  %v4411_v46 = vmul.f32 %v14086_v48, %v4354_v1  ;;  %v3661_v41 = vadd.f32 %v3629_v5, %v15355_v23 }
 0x41c   : > { %4862 = vst.msk [vmem:[#allocation3 + $0x139] sm:$0xff] %vm4781_vm5, %v4773_v13  ;;  %v3890_v12 = vmul.f32 %v14057_v0, %v3841_v21 }
 0x41d   : > { %v4774_v39 = vmax.f32 %v4742_v33, 0.0  ;;  %v4443_v32 = vadd.f32 %v4411_v46, %v4182_v24 }
 0x41e   : > { %v4359_v31 = vpop.permute.xlu0 %4358  ;;  %v3922_v21 = vadd.f32 %v3890_v12, %v3661_v41 }
 0x41f   : > { %4863 = vst.msk [vmem:[#allocation3 + $0x141] sm:$0xff] %vm4781_vm5, %v4774_v39  ;;  %v3846_v58 = vpop.permute.xlu1 %3845  ;;  %v4412_v62 = vmul.f32 %v14086_v48, %v4359_v31 }
 0x420   : > { %v3891_v29 = vmul.f32 %v14057_v0, %v3846_v58 }
 0x421   : > { %v4444_v34 = vadd.f32 %v4412_v62, %v4183_v15 }
 0x422   : > { %v4615_v18 = vpop.permute.xlu0 %4614  ;;  %v3923_v11 = vadd.f32 %v3891_v29, %v3662_v25 }
 0x423   : > { %v4672_v36 = vmul.f32 %v14109_v26, %v4615_v18  ;;  %v4103_v44 = vpop.permute.xlu1 %4102  ;;  %v14319_v6 = vld [vmem:[#allocation3 + $0x139] sm:$0xff] }
 0x424   : > { %9706 = vmatprep.mubr.msk.f32.mxu1 %vm4781_vm5, %v14319_v6  ;;  %v4152_v13 = vmul.f32 %v14071_v14, %v4103_v44 }
 0x425   : > { %v4704_v50 = vadd.f32 %v4672_v36, %v4443_v32 }
 0x426   : > { %v4620_v38 = vpop.permute.xlu0 %4619  ;;  %v14326_v35 = vld [vmem:[#allocation3 + $0x13a] sm:$0xff]  ;;  %v14336_v4 = vld [vmem:[#allocation3 + $0x142] sm:$0xff]  ;;  %v4184_v39 = vadd.f32 %v4152_v13, %v3922_v21 }
 0x427   : > { %v14328_v10 = vld [vmem:[#allocation3 + $0x141] sm:$0xff]  ;;  %v4743_v42 = vadd.f32 %v14118_v7, %v4704_v50  ;;  %v4673_v57 = vmul.f32 %v14109_v26, %v4620_v38  ;;  %10023 = vmatprep.mubr.msk.f32.mxu0 %vm4781_vm5, %v14326_v35  ;;  %v4108_v49 = vpop.permute.xlu1 %4107 }
 0x428   : > { %9707 = vmatmul.mubr.msk.f32.gmra.mrb[26].mxu1 %vm4781_vm5, %v14328_v10  ;;  %10024 = vmatmul.mubr.msk.f32.gmra.mrb[24].mxu0 %vm4781_vm5, %v14336_v4  ;;  %v4153_v61 = vmul.f32 %v14071_v14, %v4108_v49  ;;  %v4870_v13 = vld [vmem:[#allocation3] sm:$0xff] }
 0x429   : > { %v4775_v56 = vmax.f32 %v4743_v42, 0.0  ;;  %v4705_v27 = vadd.f32 %v4673_v57, %v4444_v34 }
 0x42a   : > { %v4369_v1 = vpop.permute.xlu0 %4368  ;;  %v4185_v59 = vadd.f32 %v4153_v61, %v3923_v11  ;;  %v15356_v11 = vld [vmem:[#allocation19_spill] sm:$0xff] }
 0x42b   : > { %4864 = vst.msk [vmem:[#allocation3 + $0x151] sm:$0xff] %vm4781_vm5, %v4775_v56  ;;  %v4744_v51 = vadd.f32 %v14118_v7, %v4705_v27  ;;  %v4414_v8 = vmul.f32 %v14086_v48, %v4369_v1  ;;  %v4364_v33 = vpop.permute.xlu1 %4363  ;;  %v15357_v27 = vld [vmem:[#allocation21_spill] sm:$0xff] }
 0x42c   : > { %v4413_v55 = vmul.f32 %v14086_v48, %v4364_v33 }
 0x42d   : > { %v4776_v30 = vmax.f32 %v4744_v51, 0.0  ;;  %v4446_v20 = vadd.f32 %v4414_v8, %v4185_v59 }
 0x42e   : > { %v4630_v60 = vpop.permute.xlu0 %4629  ;;  %v4445_v2 = vadd.f32 %v4413_v55, %v4184_v39 }
 0x42f   : > { %4865 = vst.msk [vmem:[#allocation3 + $0x159] sm:$0xff] %vm4781_vm5, %v4776_v30  ;;  %v4675_v31 = vmul.f32 %v14109_v26, %v4630_v60  ;;  %v4625_v9 = vpop.permute.xlu1 %4624 }
 0x430   : > { %v4674_v46 = vmul.f32 %v14109_v26, %v4625_v9 }
 0x431   : > { %v4707_v58 = vadd.f32 %v4675_v31, %v4446_v20  ;;  %v8976_v20 = vld [vmem:[%s15190_s5 + $0x98] sm:$0xff] }
 0x432   : > { %v3595_v24 = vpop.permute.xlu0 %3594  ;;  %v14351_v15 = vld [vmem:[#allocation3 + $0x151] sm:$0xff]  ;;  %v4706_v16 = vadd.f32 %v4674_v46, %v4445_v2  ;;  %v4871_v31 = vld [vmem:[#allocation3 + $0x8] sm:$0xff] }
 0x433   : > { %v4746_v18 = vadd.f32 %v14118_v7, %v4707_v58  ;;  %9709 = vmatprep.mubr.msk.f32.mxu1 %vm4781_vm5, %v14351_v15  ;;  %v3590_v32 = vpop.permute.xlu1 %3589  ;;  %v3632_v5 = vmul.f32 %v14049_v53, %v3595_v24 }
 0x434   : > { %v4745_v62 = vadd.f32 %v14118_v7, %v4706_v16  ;;  %v3631_v42 = vmul.f32 %v14049_v53, %v3590_v32  ;;  %v8978_v32 = vld [vmem:[%s15190_s5 + $0xa8] sm:$0xff] }
 0x435   : > { %v4778_v36 = vmax.f32 %v4746_v18, 0.0  ;;  %v3664_v61 = vadd.f32 %v3632_v5, %v15356_v11  ;;  %v8977_v18 = vld [vmem:[%s15190_s5 + $0xa0] sm:$0xff]  ;;  %v14420_v5 = vld [vmem:[#allocation3 + $0x20] sm:$0xff] }
 0x436   : > { %v3856_v44 = vpop.permute.xlu0 %3855  ;;  %v14357_v29 = vld [vmem:[#allocation3 + $0x159] sm:$0xff]  ;;  %v4777_v54 = vmax.f32 %v4745_v62, 0.0  ;;  %v3663_v23 = vadd.f32 %v3631_v42, %v15357_v27  ;;  %v8980_v42 = vld [vmem:[%s15190_s5 + $0xb8] sm:$0xff]  ;;  %v9013_v11 = vld [vmem:[%s15190_s5 + $0xc0] sm:$0xff] }
 0x437   : > { %v14359_v50 = vld [vmem:[#allocation3 + $0x152] sm:$0xff]  ;;  %v14361_v34 = vld [vmem:[#allocation3 + $0x15a] sm:$0xff]  ;;  %4867 = vst.msk [vmem:[#allocation3 + $0x171] sm:$0xff] %vm4781_vm5, %v4778_v36  ;;  %9710 = vmatmul.mubr.msk.f32.gmra.mrb[28].mxu1 %vm4781_vm5, %v14357_v29  ;;  %v3851_v25 = vpop.permute.xlu1 %3850  ;;  %v3893_v57 = vmul.f32 %v14057_v0, %v3856_v44 }
 0x438   : > { %10026 = vmatprep.mubr.msk.f32.mxu0 %vm4781_vm5, %v14359_v50  ;;  %4866 = vst.msk [vmem:[#allocation3 + $0x169] sm:$0xff] %vm4781_vm5, %v4777_v54  ;;  %v3892_v12 = vmul.f32 %v14057_v0, %v3851_v25  ;;  %v8975_v0 = vld [vmem:[%s15190_s5 + $0x90] sm:$0xff]  ;;  %v14413_v36 = vld [vmem:[#allocation3 + $0x18] sm:$0xff]  ;;  %v10267_v54 = vpack.c.bf16 %v8978_v32, %v8977_v18  ;;  %v14540_v32 = vld [vmem:[#allocation3 + $0xc8] sm:$0xff] }
 0x439   : > { %10027 = vmatmul.mubr.msk.f32.gmra.mrb[26].mxu0 %vm4781_vm5, %v14361_v34  ;;  %v3925_v59 = vadd.f32 %v3893_v57, %v3664_v61  ;;  %v10263_v58 = vpack.c.bf16 %v8976_v20, %v8975_v0  ;;  %v14430_v57 = vld [vmem:[#allocation3 + $0x30] sm:$0xff]  ;;  %v9014_v61 = vld [vmem:[%s15190_s5 + $0xc8] sm:$0xff]  ;;  %v9176_v0 = vld [vmem:[%s15190_s5 + $0x1d8] sm:$0xff] }
 0x43a   : > { %v4118_v38 = vpop.permute.xlu0 %4117  ;;  %v3924_v21 = vadd.f32 %v3892_v12, %v3663_v23  ;;  %v14436_v12 = vld [vmem:[#allocation3 + $0x38] sm:$0xff]  ;;  %v14450_v27 = vpack.c.bf16 %v9014_v61, %v9013_v11  ;;  %v14452_v23 = vld [vmem:[#allocation3 + $0x50] sm:$0xff]  ;;  %v14603_v11 = vld [vmem:[#allocation3 + $0x140] sm:$0xff] }
 0x43b   : > { %v4113_v49 = vpop.permute.xlu1 %4112  ;;  %v4155_v56 = vmul.f32 %v14071_v14, %v4118_v38  ;;  %v8979_v38 = vld [vmem:[%s15190_s5 + $0xb0] sm:$0xff]  ;;  %v14491_v20 = vld [vmem:[#allocation3 + $0x90] sm:$0xff]  ;;  %v9214_v18 = vld [vmem:[%s15190_s5 + $0x208] sm:$0xff]  ;;  %15365 = vst [vmem:[#allocation29_spill] sm:$0xff] %v14603_v11 }
 0x43c   : > { %v4154_v1 = vmul.f32 %v14071_v14, %v4113_v49  ;;  %v14609_v61 = vld [vmem:[#allocation3 + $0x150] sm:$0xff] }
 0x43d   : > { %v4187_v39 = vadd.f32 %v4155_v56, %v3925_v59  ;;  %v14446_v56 = vld [vmem:[#allocation3 + $0x48] sm:$0xff]  ;;  %15366 = vst [vmem:[#allocation30_spill] sm:$0xff] %v14609_v61 }
 0x43e   : > { %v4379_v41 = vpop.permute.xlu0 %4378  ;;  %v14392_v14 = vld [vmem:[#allocation3 + $0x171] sm:$0xff]  ;;  %v4186_v60 = vadd.f32 %v4154_v1, %v3924_v21  ;;  %v14485_v21 = vld [vmem:[#allocation3 + $0x80] sm:$0xff] }
 0x43f   : > { %v4416_v51 = vmul.f32 %v14086_v48, %v4379_v41  ;;  %v4374_v8 = vpop.permute.xlu1 %4373  ;;  %v14380_v53 = vld [vmem:[#allocation3 + $0x169] sm:$0xff]  ;;  %v14394_v30 = vld [vmem:[#allocation3 + $0x172] sm:$0xff]  ;;  %v14456_v41 = vld [vmem:[#allocation3 + $0x60] sm:$0xff] }
 0x440   : > { %v14382_v33 = vld [vmem:[#allocation3 + $0x16a] sm:$0xff]  ;;  %v4415_v55 = vmul.f32 %v14086_v48, %v4374_v8  ;;  %9712 = vmatprep.mubr.msk.f32.mxu1 %vm4781_vm5, %v14380_v53  ;;  %v9175_v8 = vld [vmem:[%s15190_s5 + $0x1d0] sm:$0xff] }
 0x441   : > { %10029 = vmatprep.mubr.msk.f32.mxu0 %vm4781_vm5, %v14382_v33  ;;  %9713 = vmatmul.mubr.msk.f32.gmra.mrb[30].mxu1 %vm4781_vm5, %v14392_v14  ;;  %v4448_v9 = vadd.f32 %v4416_v51, %v4187_v39  ;;  %v14473_v51 = vld [vmem:[#allocation3 + $0x78] sm:$0xff]  ;;  %v9177_v39 = vld [vmem:[%s15190_s5 + $0x1e0] sm:$0xff] }
 0x442   : > { %10030 = vmatmul.mubr.msk.f32.gmra.mrb[28].mxu0 %vm4781_vm5, %v14394_v30  ;;  %v4640_v48 = vpop.permute.xlu0 %4639  ;;  %9731 = vmatprep.mubr.msk.f32.mxu1 %vm4781_vm5, %v4870_v13  ;;  %v4447_v24 = vadd.f32 %v4415_v55, %v4186_v60  ;;  %v14465_v13 = vld [vmem:[#allocation3 + $0x68] sm:$0xff]  ;;  %v10343_v55 = vpack.c.bf16 %v9176_v0, %v9175_v8  ;;  %v14504_v60 = vld [vmem:[#allocation3 + $0x98] sm:$0xff] }
 0x443   : > { %v4677_v2 = vmul.f32 %v14109_v26, %v4640_v48  ;;  %v4635_v46 = vpop.permute.xlu1 %4634  ;;  %v9178_v48 = vld [vmem:[%s15190_s5 + $0x1e8] sm:$0xff]  ;;  %v14621_v0 = vld [vmem:[#allocation3 + $0x168] sm:$0xff] }
 0x444   : > { %v4676_v16 = vmul.f32 %v14109_v26, %v4635_v46  ;;  %v14522_v46 = vld [vmem:[#allocation3 + $0xb0] sm:$0xff]  ;;  %v14615_v8 = vld [vmem:[#allocation3 + $0x158] sm:$0xff]  ;;  %15368 = vst [vmem:[#allocation42_spill] sm:$0xff] %v14621_v0 }
 0x445   : > { %v4709_v62 = vadd.f32 %v4677_v2, %v4448_v9  ;;  %9732 = vmatmul.mubr.msk.f32.vlgmr.msra.gmra.mrb[0].mxu1 %vm4781_vm5, %v4871_v31  ;;  %v10347_v31 = vpack.c.bf16 %v9178_v48, %v9177_v39  ;;  %v14510_v9 = vld [vmem:[#allocation3 + $0xa8] sm:$0xff]  ;;  %v9179_v2 = vld [vmem:[%s15190_s5 + $0x1f0] sm:$0xff]  ;;  %15367 = vst [vmem:[#allocation41_spill] sm:$0xff] %v14615_v8  ;;  %v14627_v39 = vld [vmem:[#allocation3 + $0x170] sm:$0xff] }
 0x446   : > { %v4708_v44 = vadd.f32 %v4676_v16, %v4447_v24  ;;  %10262 = vmatpush3.bf16.msra.mxu1 %v14137_v52  ;;  %9734 = vmatprep.mubr.msk.f32.mxu1 %vm4781_vm5, %v14413_v36  ;;  %v14528_v24 = vld [vmem:[#allocation3 + $0xc0] sm:$0xff]  ;;  %v9213_v16 = vld [vmem:[%s15190_s5 + $0x200] sm:$0xff]  ;;  %15369 = vst [vmem:[#allocation31_spill] sm:$0xff] %v14627_v39 }
 0x447   : > { %v4748_v26 = vadd.f32 %v14118_v7, %v4709_v62  ;;  %10264 = vmatprep.subr.bf16.mxu1 %v10263_v58  ;;  %v14542_v62 = vpack.c.bf16 %v9214_v18, %v9213_v16  ;;  %v9015_v48 = vld [vmem:[%s15190_s5 + $0xd0] sm:$0xff]  ;;  %v9017_v16 = vld [vmem:[%s15190_s5 + $0xe0] sm:$0xff]  ;;  %v9018_v18 = vld [vmem:[%s15190_s5 + $0xe8] sm:$0xff] }
 0x448   : > { %v4747_v25 = vadd.f32 %v14118_v7, %v4708_v44  ;;  %v10271_v7 = vpack.c.bf16 %v8980_v42, %v8979_v38  ;;  %v14548_v44 = vld [vmem:[#allocation3 + $0xd8] sm:$0xff]  ;;  %v14573_v38 = vld [vmem:[#allocation3 + $0x108] sm:$0xff]  ;;  %v14579_v42 = vld [vmem:[#allocation3 + $0x110] sm:$0xff] }
 0x449   : > { %v4780_v52 = vmax.f32 %v4748_v26, 0.0  ;;  %9735 = vmatmul.mubr.msk.f32.gmra.mrb[2].mxu1 %vm4781_vm5, %v14420_v5  ;;  %v14554_v26 = vld [vmem:[#allocation3 + $0xe0] sm:$0xff]  ;;  %15360 = vst [vmem:[#allocation25_spill] sm:$0xff] %v14573_v38  ;;  %15361 = vst [vmem:[#allocation23_spill] sm:$0xff] %v14579_v42 }
 0x44a   : > { %v4779_v49 = vmax.f32 %v4747_v25, 0.0  ;;  %9737 = vmatprep.mubr.msk.f32.mxu1 %vm4781_vm5, %v14430_v57  ;;  %10266 = vmatpush3.bf16.msra.mxu1 %v10263_v58  ;;  %v14567_v25 = vld [vmem:[#allocation3 + $0xf8] sm:$0xff] }
 0x44b   : > { %4869 = vst.msk [vmem:[#allocation3 + $0x189] sm:$0xff] %vm4781_vm5, %v4780_v52  ;;  %10268 = vmatprep.subr.bf16.mxu1 %v10267_v54  ;;  %v14585_v52 = vld [vmem:[#allocation3 + $0x120] sm:$0xff] }
 0x44c   : > { %4868 = vst.msk [vmem:[#allocation3 + $0x181] sm:$0xff] %vm4781_vm5, %v4779_v49  ;;  %15362 = vst [vmem:[#allocation26_spill] sm:$0xff] %v14585_v52  ;;  %v14591_v49 = vld [vmem:[#allocation3 + $0x128] sm:$0xff] }
 0x44d   : > { %9738 = vmatmul.mubr.msk.f32.gmra.mrb[4].mxu1 %vm4781_vm5, %v14436_v12  ;;  %15363 = vst [vmem:[#allocation27_spill] sm:$0xff] %v14591_v49 }
 0x44e   : > { %9740 = vmatprep.mubr.msk.f32.mxu1 %vm4781_vm5, %v14446_v56  ;;  %10270 = vmatpush3.bf16.msra.mxu1 %v10267_v54  ;;  %v14561_v54 = vld [vmem:[#allocation3 + $0xf0] sm:$0xff] }
 0x44f   : > { %10272 = vmatprep.subr.bf16.mxu1 %v10271_v7 }
 0x451   : > { %9741 = vmatmul.mubr.msk.f32.gmra.mrb[6].mxu1 %vm4781_vm5, %v14452_v23 }
 0x452   : > { %9743 = vmatprep.mubr.msk.f32.mxu1 %vm4781_vm5, %v14456_v41  ;;  %10274 = vmatpush3.bf16.msra.mxu1 %v10271_v7  ;;  %v14467_v59 = vld [vmem:[#allocation3 + $0x18a] sm:$0xff]  ;;  %v14597_v7 = vld [vmem:[#allocation3 + $0x138] sm:$0xff] }
 0x453   : > { %v14460_v1 = vld [vmem:[#allocation3 + $0x182] sm:$0xff]  ;;  %10276 = vmatprep.subr.bf16.mxu1 %v14450_v27  ;;  %15359 = vst [vmem:[#allocation24_spill] sm:$0xff] %v14467_v59  ;;  %15364 = vst [vmem:[#allocation28_spill] sm:$0xff] %v14597_v7 }
 0x454   : > { %15358 = vst [vmem:[#allocation22_spill] sm:$0xff] %v14460_v1  ;;  %10032 = vmatprep.mubr.msk.f32.mxu0 %vm4781_vm5, %v14460_v1  ;;  %v7201_v1 = vld [vmem:[#allocation3 + $0x1a0] sm:$0xff] }
 0x455   : > { %9744 = vmatmul.mubr.msk.f32.gmra.mrb[8].mxu1 %vm4781_vm5, %v14465_v13  ;;  %10033 = vmatmul.mubr.msk.f32.gmra.mrb[30].mxu0 %vm4781_vm5, %v14467_v59  ;;  %v14684_v59 = vld [vmem:[#allocation3 + $0x52] sm:$0xff] }
 0x456   : > { %9746 = vmatprep.mubr.msk.f32.mxu1 %vm4781_vm5, %v14473_v51  ;;  %10051 = vmatprep.mubr.msk.f32.mxu0 %vm4781_vm5, %v14430_v57 }
 0x459   : > { %9747 = vmatmul.mubr.msk.f32.gmra.mrb[10].mxu1 %vm4781_vm5, %v14485_v21  ;;  %10052 = vmatmul.mubr.msk.f32.vlgmr.msra.gmra.mrb[0].mxu0 %vm4781_vm5, %v14436_v12 }
 0x45a   : > { %9749 = vmatprep.mubr.msk.f32.mxu1 %vm4781_vm5, %v14491_v20  ;;  %10054 = vmatprep.mubr.msk.f32.mxu0 %vm4781_vm5, %v14446_v56 }
 0x45b   : > { %10342 = vmatpush3.bf16.msra.mxu0 %v14202_v45  ;;  %v9180_v45 = vld [vmem:[%s15190_s5 + $0x1f8] sm:$0xff] }
 0x45c   : > { %10344 = vmatprep.subr.bf16.mxu0 %v10343_v55  ;;  %v10351_v58 = vpack.c.bf16 %v9180_v45, %v9179_v2  ;;  %v5594_v2 = vld [vmem:[#allocation3 + $0xa] sm:$0xff] }
 0x45d   : > { %9750 = vmatmul.mubr.msk.f32.gmra.mrb[12].mxu1 %vm4781_vm5, %v14504_v60  ;;  %10055 = vmatmul.mubr.msk.f32.gmra.mrb[2].mxu0 %vm4781_vm5, %v14452_v23 }
 0x45e   : > { %9752 = vmatprep.mubr.msk.f32.mxu1 %vm4781_vm5, %v14510_v9  ;;  %10057 = vmatprep.mubr.msk.f32.mxu0 %vm4781_vm5, %v14456_v41 }
 0x45f   : > { %10346 = vmatpush3.bf16.msra.mxu0 %v10343_v55  ;;  %v5593_v55 = vld [vmem:[#allocation3 + $0x2] sm:$0xff] }
 0x460   : > { %10348 = vmatprep.subr.bf16.mxu0 %v10347_v31 }
 0x461   : > { %9753 = vmatmul.mubr.msk.f32.gmra.mrb[14].mxu1 %vm4781_vm5, %v14522_v46  ;;  %10058 = vmatmul.mubr.msk.f32.gmra.mrb[4].mxu0 %vm4781_vm5, %v14465_v13 }
 0x462   : > { %9755 = vmatprep.mubr.msk.f32.mxu1 %vm4781_vm5, %v14528_v24  ;;  %10060 = vmatprep.mubr.msk.f32.mxu0 %vm4781_vm5, %v14473_v51 }
 0x463   : > { %10350 = vmatpush3.bf16.msra.mxu0 %v10347_v31  ;;  %v9016_v31 = vld [vmem:[%s15190_s5 + $0xd8] sm:$0xff] }
 0x464   : > { %10352 = vmatprep.subr.bf16.mxu0 %v10351_v58  ;;  %v10279_v45 = vpack.c.bf16 %v9016_v31, %v9015_v48  ;;  %v10283_v48 = vpack.c.bf16 %v9018_v18, %v9017_v16  ;;  %v14658_v31 = vld [vmem:[#allocation3 + $0x32] sm:$0xff]  ;;  %v14676_v18 = vld [vmem:[#allocation3 + $0x4a] sm:$0xff] }
 0x465   : > { %9756 = vmatmul.mubr.msk.f32.gmra.mrb[16].mxu1 %vm4781_vm5, %v14540_v32  ;;  %10061 = vmatmul.mubr.msk.f32.gmra.mrb[6].mxu0 %vm4781_vm5, %v14485_v21 }
 0x466   : > { %9758 = vmatprep.mubr.msk.f32.mxu1 %vm4781_vm5, %v14548_v44  ;;  %10063 = vmatprep.mubr.msk.f32.mxu0 %vm4781_vm5, %v14491_v20 }
 0x467   : > { %10354 = vmatpush3.bf16.msra.mxu0 %v10351_v58  ;;  %v5595_v58 = vld [vmem:[#allocation3 + $0x1a] sm:$0xff] }
 0x468   : > { %10356 = vmatprep.subr.bf16.mxu0 %v14542_v62 }
 0x469   : > { %9759 = vmatmul.mubr.msk.f32.gmra.mrb[18].mxu1 %vm4781_vm5, %v14554_v26  ;;  %10064 = vmatmul.mubr.msk.f32.gmra.mrb[8].mxu0 %vm4781_vm5, %v14504_v60 }
 0x46a   : > { %9761 = vmatprep.mubr.msk.f32.mxu1 %vm4781_vm5, %v14561_v54  ;;  %10066 = vmatprep.mubr.msk.f32.mxu0 %vm4781_vm5, %v14510_v9 }
 0x46d   : > { %9762 = vmatmul.mubr.msk.f32.gmra.mrb[20].mxu1 %vm4781_vm5, %v14567_v25  ;;  %10067 = vmatmul.mubr.msk.f32.gmra.mrb[10].mxu0 %vm4781_vm5, %v14522_v46 }
 0x46e   : > { %9764 = vmatprep.mubr.msk.f32.mxu1 %vm4781_vm5, %v14573_v38  ;;  %10069 = vmatprep.mubr.msk.f32.mxu0 %vm4781_vm5, %v14528_v24 }
 0x471   : > { %9765 = vmatmul.mubr.msk.f32.gmra.mrb[22].mxu1 %vm4781_vm5, %v14579_v42  ;;  %10070 = vmatmul.mubr.msk.f32.gmra.mrb[12].mxu0 %vm4781_vm5, %v14540_v32 }
 0x472   : > { %9767 = vmatprep.mubr.msk.f32.mxu1 %vm4781_vm5, %v14585_v52  ;;  %10072 = vmatprep.mubr.msk.f32.mxu0 %vm4781_vm5, %v14548_v44 }
 0x475   : > { %9768 = vmatmul.mubr.msk.f32.gmra.mrb[24].mxu1 %vm4781_vm5, %v14591_v49  ;;  %10073 = vmatmul.mubr.msk.f32.gmra.mrb[14].mxu0 %vm4781_vm5, %v14554_v26 }
 0x476   : > { %9770 = vmatprep.mubr.msk.f32.mxu1 %vm4781_vm5, %v14597_v7  ;;  %10075 = vmatprep.mubr.msk.f32.mxu0 %vm4781_vm5, %v14561_v54 }
 0x479   : > { %9771 = vmatmul.mubr.msk.f32.gmra.mrb[26].mxu1 %vm4781_vm5, %v14603_v11  ;;  %10076 = vmatmul.mubr.msk.f32.gmra.mrb[16].mxu0 %vm4781_vm5, %v14567_v25 }
 0x47a   : > { %9773 = vmatprep.mubr.msk.f32.mxu1 %vm4781_vm5, %v14609_v61  ;;  %10078 = vmatprep.mubr.msk.f32.mxu0 %vm4781_vm5, %v14573_v38  ;;  %v7570_v38 = vld [vmem:[#allocation3 + $0x79] sm:$0xff] }
 0x47d   : > { %9774 = vmatmul.mubr.msk.f32.gmra.mrb[28].mxu1 %vm4781_vm5, %v14615_v8  ;;  %10079 = vmatmul.mubr.msk.f32.gmra.mrb[18].mxu0 %vm4781_vm5, %v14579_v42  ;;  %v9219_v42 = vld [vmem:[%s15190_s5 + $0x230] sm:$0xff] }
 0x47e   : > { %9776 = vmatprep.mubr.msk.f32.mxu1 %vm4781_vm5, %v14621_v0  ;;  %10081 = vmatprep.mubr.msk.f32.mxu0 %vm4781_vm5, %v14585_v52  ;;  %v14736_v52 = vld [vmem:[#allocation3 + $0xaa] sm:$0xff] }
 0x481   : > { %9777 = vmatmul.mubr.msk.f32.gmra.mrb[30].mxu1 %vm4781_vm5, %v14627_v39  ;;  %10082 = vmatmul.mubr.msk.f32.gmra.mrb[20].mxu0 %vm4781_vm5, %v14591_v49 }
 0x482   : > { %10084 = vmatprep.mubr.msk.f32.mxu0 %vm4781_vm5, %v14597_v7  ;;  %9795 = vmatprep.mubr.msk.f32.mxu1 %vm4781_vm5, %v5593_v55  ;;  %v5596_v55 = vld [vmem:[#allocation3 + $0x22] sm:$0xff]  ;;  %v9217_v7 = vld [vmem:[%s15190_s5 + $0x220] sm:$0xff] }
 0x485   : > { %9796 = vmatmul.mubr.msk.f32.vlgmr.msra.gmra.mrb[0].mxu1 %vm4781_vm5, %v5594_v2  ;;  %10085 = vmatmul.mubr.msk.f32.gmra.mrb[22].mxu0 %vm4781_vm5, %v14603_v11  ;;  %v9019_v2 = vld [vmem:[%s15190_s5 + $0xf0] sm:$0xff]  ;;  %v14719_v11 = vld [vmem:[#allocation3 + $0x92] sm:$0xff] }
 0x486   : > { %10278 = vmatpush3.bf16.msra.mxu1 %v14450_v27  ;;  %9798 = vmatprep.mubr.msk.f32.mxu1 %vm4781_vm5, %v5595_v58  ;;  %v9020_v27 = vld [vmem:[%s15190_s5 + $0xf8] sm:$0xff]  ;;  %v14670_v58 = vld [vmem:[#allocation3 + $0x3a] sm:$0xff] }
 0x487   : > { %10087 = vmatprep.mubr.msk.f32.mxu0 %vm4781_vm5, %v14609_v61  ;;  %10280 = vmatprep.subr.bf16.mxu1 %v10279_v45  ;;  %v10287_v16 = vpack.c.bf16 %v9020_v27, %v9019_v2  ;;  %v14686_v2 = vld [vmem:[#allocation3 + $0x188] sm:$0xff] }
 0x488   : > { %15371 = vst [vmem:[#allocation56_spill] sm:$0xff] %v14686_v2  ;;  %v14692_v27 = vld [vmem:[#allocation3 + $0x62] sm:$0xff] }
 0x489   : > { %9799 = vmatmul.mubr.msk.f32.gmra.mrb[2].mxu1 %vm4781_vm5, %v5596_v55  ;;  %10088 = vmatmul.mubr.msk.f32.gmra.mrb[24].mxu0 %vm4781_vm5, %v14615_v8  ;;  %v14678_v55 = vld [vmem:[#allocation3 + $0x180] sm:$0xff]  ;;  %v7566_v61 = vld [vmem:[#allocation3 + $0x49] sm:$0xff] }
 0x48a   : > { %9801 = vmatprep.mubr.msk.f32.mxu1 %vm4781_vm5, %v14658_v31  ;;  %10090 = vmatprep.mubr.msk.f32.mxu0 %vm4781_vm5, %v14621_v0  ;;  %15370 = vst [vmem:[#allocation32_spill] sm:$0xff] %v14678_v55  ;;  %v9215_v0 = vld [vmem:[%s15190_s5 + $0x210] sm:$0xff] }
 0x48b   : > { %10282 = vmatpush3.bf16.msra.mxu1 %v10279_v45  ;;  %v7200_v45 = vld [vmem:[#allocation3 + $0x198] sm:$0xff] }
 0x48c   : > { %10284 = vmatprep.subr.bf16.mxu1 %v10283_v48  ;;  %v7565_v8 = vld [vmem:[#allocation3 + $0x39] sm:$0xff] }
 0x48d   : > { %9802 = vmatmul.mubr.msk.f32.gmra.mrb[4].mxu1 %vm4781_vm5, %v14670_v58  ;;  %10091 = vmatmul.mubr.msk.f32.gmra.mrb[26].mxu0 %vm4781_vm5, %v14627_v39  ;;  %v15372_v39 = vld [vmem:[#allocation53_spill] sm:$0xff] }
 0x48e   : > { %9804 = vmatprep.mubr.msk.f32.mxu1 %vm4781_vm5, %v14676_v18  ;;  %10093 = vmatprep.mubr.msk.f32.mxu0 %vm4781_vm5, %v14678_v55  ;;  %v7564_v55 = vld [vmem:[#allocation3 + $0x31] sm:$0xff] }
 0x48f   : > { %10286 = vmatpush3.bf16.msra.mxu1 %v10283_v48  ;;  %v14697_v48 = vld [vmem:[#allocation3 + $0x6a] sm:$0xff] }
 0x490   : > { %10288 = vmatprep.subr.bf16.mxu1 %v10287_v16 }
 0x491   : > { %9805 = vmatmul.mubr.msk.f32.gmra.mrb[6].mxu1 %vm4781_vm5, %v14684_v59  ;;  %10094 = vmatmul.mubr.msk.f32.gmra.mrb[28].mxu0 %vm4781_vm5, %v14686_v2  ;;  %v14703_v2 = vld [vmem:[#allocation3 + $0x7a] sm:$0xff] }
 0x492   : > { %9807 = vmatprep.mubr.msk.f32.mxu1 %vm4781_vm5, %v14692_v27  ;;  %10096 = vmatprep.mubr.msk.f32.mxu0 %vm4781_vm5, %v7200_v45  ;;  %v14714_v45 = vld [vmem:[#allocation3 + $0x82] sm:$0xff] }
 0x493   : > { %10290 = vmatpush3.bf16.msra.mxu1 %v10287_v16  ;;  %v9216_v16 = vld [vmem:[%s15190_s5 + $0x218] sm:$0xff] }
 0x494   : > { %10371 = vmatprep.subr.bf16.mxu1 %v15372_v39 }
 0x495   : > { %9808 = vmatmul.mubr.msk.f32.gmra.mrb[8].mxu1 %vm4781_vm5, %v14697_v48  ;;  %10097 = vmatmul.mubr.msk.f32.gmra.mrb[30].mxu0 %vm4781_vm5, %v7201_v1  ;;  %v10359_v1 = vpack.c.bf16 %v9216_v16, %v9215_v0  ;;  %v14731_v0 = vld [vmem:[#allocation3 + $0x9a] sm:$0xff] }
 0x496   : > { %9810 = vmatprep.mubr.msk.f32.mxu1 %vm4781_vm5, %v14703_v2  ;;  %10115 = vmatprep.mubr.msk.f32.mxu0 %vm4781_vm5, %v7564_v55  ;;  %v9218_v55 = vld [vmem:[%s15190_s5 + $0x228] sm:$0xff]  ;;  %v7568_v16 = vld [vmem:[#allocation3 + $0x61] sm:$0xff] }
 0x497   : > { %v10363_v49 = vpack.c.bf16 %v9218_v55, %v9217_v7  ;;  %v14747_v7 = vld [vmem:[#allocation3 + $0xb2] sm:$0xff] }
 0x499   : > { %9811 = vmatmul.mubr.msk.f32.gmra.mrb[10].mxu1 %vm4781_vm5, %v14714_v45  ;;  %10116 = vmatmul.mubr.msk.f32.vlgmr.msra.gmra.mrb[0].mxu0 %vm4781_vm5, %v7565_v8  ;;  %v7567_v8 = vld [vmem:[#allocation3 + $0x51] sm:$0xff] }
 0x49a   : > { %9813 = vmatprep.mubr.msk.f32.mxu1 %vm4781_vm5, %v14719_v11  ;;  %10118 = vmatprep.mubr.msk.f32.mxu0 %vm4781_vm5, %v7566_v61  ;;  %v7569_v61 = vld [vmem:[#allocation3 + $0x69] sm:$0xff] }
 0x49b   : > { %10358 = vmatpush3.bf16.msra.mxu0 %v14542_v62  ;;  %v9220_v62 = vld [vmem:[%s15190_s5 + $0x238] sm:$0xff] }
 0x49c   : > { %10360 = vmatprep.subr.bf16.mxu0 %v10359_v1  ;;  %v10367_v55 = vpack.c.bf16 %v9220_v62, %v9219_v42  ;;  %v14762_v42 = vld [vmem:[#allocation3 + $0xda] sm:$0xff]  ;;  %v7572_v62 = vld [vmem:[#allocation3 + $0x91] sm:$0xff] }
 0x49d   : > { %9814 = vmatmul.mubr.msk.f32.gmra.mrb[12].mxu1 %vm4781_vm5, %v14731_v0  ;;  %10119 = vmatmul.mubr.msk.f32.gmra.mrb[2].mxu0 %vm4781_vm5, %v7567_v8  ;;  %v14752_v8 = vld [vmem:[#allocation3 + $0xc2] sm:$0xff] }
 0x49e   : > { %9816 = vmatprep.mubr.msk.f32.mxu1 %vm4781_vm5, %v14736_v52  ;;  %10121 = vmatprep.mubr.msk.f32.mxu0 %vm4781_vm5, %v7568_v16  ;;  %v7571_v16 = vld [vmem:[#allocation3 + $0x81] sm:$0xff] }
 0x49f   : > { %10362 = vmatpush3.bf16.msra.mxu0 %v10359_v1  ;;  %v14757_v1 = vld [vmem:[#allocation3 + $0xca] sm:$0xff] }
 0x4a0   : > { %10364 = vmatprep.subr.bf16.mxu0 %v10363_v49 }
 0x4a1   : > { %9817 = vmatmul.mubr.msk.f32.gmra.mrb[14].mxu1 %vm4781_vm5, %v14747_v7  ;;  %10122 = vmatmul.mubr.msk.f32.gmra.mrb[4].mxu0 %vm4781_vm5, %v7569_v61  ;;  %v7574_v61 = vld [vmem:[#allocation3 + $0xa9] sm:$0xff] }
 0x4a2   : > { %9819 = vmatprep.mubr.msk.f32.mxu1 %vm4781_vm5, %v14752_v8  ;;  %10124 = vmatprep.mubr.msk.f32.mxu0 %vm4781_vm5, %v7570_v38  ;;  %v14767_v38 = vld [vmem:[#allocation3 + $0xe2] sm:$0xff] }
 0x4a3   : > { %10366 = vmatpush3.bf16.msra.mxu0 %v10363_v49  ;;  %v7573_v49 = vld [vmem:[#allocation3 + $0x99] sm:$0xff] }
 0x4a4   : > { %10368 = vmatprep.subr.bf16.mxu0 %v10367_v55 }
 0x4a5   : > { %9820 = vmatmul.mubr.msk.f32.gmra.mrb[16].mxu1 %vm4781_vm5, %v14757_v1  ;;  %10125 = vmatmul.mubr.msk.f32.gmra.mrb[6].mxu0 %vm4781_vm5, %v7571_v16  ;;  %v7575_v16 = vld [vmem:[#allocation3 + $0xb1] sm:$0xff] }
 0x4a6   : > { %9822 = vmatprep.mubr.msk.f32.mxu1 %vm4781_vm5, %v14762_v42  ;;  %10127 = vmatprep.mubr.msk.f32.mxu0 %vm4781_vm5, %v7572_v62  ;;  %v7577_v62 = vld [vmem:[#allocation3 + $0xc9] sm:$0xff] }
 0x4a7   : > { %10370 = vmatpush3.bf16.msra.mxu0 %v10367_v55  ;;  %v7576_v55 = vld [vmem:[#allocation3 + $0xc1] sm:$0xff] }
 0x4a9   : > { %9823 = vmatmul.mubr.msk.f32.gmra.mrb[18].mxu1 %vm4781_vm5, %v14767_v38  ;;  %10128 = vmatmul.mubr.msk.f32.gmra.mrb[8].mxu0 %vm4781_vm5, %v7573_v49  ;;  %v14994_v49 = vld [vmem:[%s15191_s6] ss:$0 sm:$0xff] }
 0x4aa   : > { %9825 = vmatprep.mubr.msk.f32.mxu1 %vm4781_vm5, %v14217_v40  ;;  %10130 = vmatprep.mubr.msk.f32.mxu0 %vm4781_vm5, %v7574_v61  ;;  %v14784_v40 = vld [vmem:[#allocation3 + $0xd9] sm:$0xff] }
 0x4ad   : > { %9826 = vmatmul.mubr.msk.f32.gmra.mrb[20].mxu1 %vm4781_vm5, %v14222_v47  ;;  %10131 = vmatmul.mubr.msk.f32.gmra.mrb[10].mxu0 %vm4781_vm5, %v7575_v16  ;;  %v14790_v47 = vld [vmem:[#allocation3 + $0xe1] sm:$0xff] }
 0x4ae   : > { %9828 = vmatprep.mubr.msk.f32.mxu1 %vm4781_vm5, %v14252_v37  ;;  %10133 = vmatprep.mubr.msk.f32.mxu0 %vm4781_vm5, %v7576_v55  ;;  %v14796_v37 = vld [vmem:[#allocation3 + $0xf1] sm:$0xff] }
 0x4b1   : > { %9829 = vmatmul.mubr.msk.f32.gmra.mrb[22].mxu1 %vm4781_vm5, %v14260_v22  ;;  %10134 = vmatmul.mubr.msk.f32.gmra.mrb[12].mxu0 %vm4781_vm5, %v7577_v62  ;;  %v14802_v22 = vld [vmem:[#allocation3 + $0xf9] sm:$0xff] }
 0x4b2   : > { %9831 = vmatprep.mubr.msk.f32.mxu1 %vm4781_vm5, %v14286_v3  ;;  %10136 = vmatprep.mubr.msk.f32.mxu0 %vm4781_vm5, %v14784_v40  ;;  %v7594_v3 = vld [vmem:[#allocation3 + $0x199] sm:$0xff] }
 0x4b5   : > { %9832 = vmatmul.mubr.msk.f32.gmra.mrb[24].mxu1 %vm4781_vm5, %v14294_v17  ;;  %10137 = vmatmul.mubr.msk.f32.gmra.mrb[14].mxu0 %vm4781_vm5, %v14790_v47  ;;  %v15375_v17 = vld [vmem:[#allocation58_spill] sm:$0xff] }
 0x4b6   : > { %9834 = vmatprep.mubr.msk.f32.mxu1 %vm4781_vm5, %v14326_v35  ;;  %10139 = vmatprep.mubr.msk.f32.mxu0 %vm4781_vm5, %v14796_v37  ;;  %v15376_v35 = vld [vmem:[#allocation25_spill] sm:$0xff] }
 0x4b9   : > { %9835 = vmatmul.mubr.msk.f32.gmra.mrb[26].mxu1 %vm4781_vm5, %v14336_v4  ;;  %10140 = vmatmul.mubr.msk.f32.gmra.mrb[16].mxu0 %vm4781_vm5, %v14802_v22  ;;  %v15378_v4 = vld [vmem:[#allocation26_spill] sm:$0xff] }
 0x4ba   : > { %9837 = vmatprep.mubr.msk.f32.mxu1 %vm4781_vm5, %v14359_v50  ;;  %10142 = vmatprep.mubr.msk.f32.mxu0 %vm4781_vm5, %v14244_v19  ;;  %v15373_v19 = vld [vmem:[#allocation54_spill] sm:$0xff]  ;;  %v15381_v50 = vld [vmem:[#allocation29_spill] sm:$0xff] }
 0x4bd   : > { %9838 = vmatmul.mubr.msk.f32.gmra.mrb[28].mxu1 %vm4781_vm5, %v14361_v34  ;;  %10143 = vmatmul.mubr.msk.f32.gmra.mrb[18].mxu0 %vm4781_vm5, %v14254_v63  ;;  %v15374_v63 = vld [vmem:[#allocation55_spill] sm:$0xff] }
 0x4be   : > { %9840 = vmatprep.mubr.msk.f32.mxu1 %vm4781_vm5, %v14382_v33  ;;  %10145 = vmatprep.mubr.msk.f32.mxu0 %vm4781_vm5, %v14280_v28  ;;  %v14852_v28 = vld [vmem:[#allocation3 + $0x181] sm:$0xff]  ;;  %v7974_v34 = vld [vmem:[#allocation3 + $0xf2] sm:$0xff] }
 0x4c1   : > { %9841 = vmatmul.mubr.msk.f32.gmra.mrb[30].mxu1 %vm4781_vm5, %v14394_v30  ;;  %10146 = vmatmul.mubr.msk.f32.gmra.mrb[20].mxu0 %vm4781_vm5, %v14288_v43  ;;  %v14859_v43 = vld [vmem:[#allocation3 + $0x189] sm:$0xff] }
 0x4c2   : > { %9859 = vmatprep.mubr.msk.f32.mxu1 %vm4781_vm5, %v14413_v36  ;;  %10148 = vmatprep.mubr.msk.f32.mxu0 %vm4781_vm5, %v14319_v6  ;;  %v7595_v6 = vld [vmem:[#allocation3 + $0x1a1] sm:$0xff] }
 0x4c3   : > { %v15383_v36 = vld [vmem:[#allocation41_spill] sm:$0xff] }
 0x4c5   : > { %9860 = vmatmul.mubr.msk.f32.vlgmr.msra.gmra.mrb[0].mxu1 %vm4781_vm5, %v14420_v5  ;;  %10149 = vmatmul.mubr.msk.f32.gmra.mrb[22].mxu0 %vm4781_vm5, %v14328_v10  ;;  %v15377_v10 = vld [vmem:[#allocation23_spill] sm:$0xff]  ;;  %v7976_v5 = vld [vmem:[#allocation3 + $0x10a] sm:$0xff] }
 0x4c6   : > { %10375 = vmatpush3.bf16.msra.mxu1 %v15372_v39  ;;  %9862 = vmatprep.mubr.msk.f32.mxu1 %vm4781_vm5, %v14430_v57  ;;  %v15384_v57 = vld [vmem:[#allocation42_spill] sm:$0xff] }
 0x4c7   : > { %10151 = vmatprep.mubr.msk.f32.mxu0 %vm4781_vm5, %v14351_v15  ;;  %10372 = vmatprep.subr.bf16.mxu1 %v15373_v19  ;;  %v15379_v15 = vld [vmem:[#allocation27_spill] sm:$0xff]  ;;  %v6409_v39 = vld [vmem:[#allocation3 + $0x169] sm:$0xff] }
 0x4c9   : > { %9863 = vmatmul.mubr.msk.f32.gmra.mrb[2].mxu1 %vm4781_vm5, %v14436_v12  ;;  %10152 = vmatmul.mubr.msk.f32.gmra.mrb[24].mxu0 %vm4781_vm5, %v14357_v29  ;;  %v15380_v29 = vld [vmem:[#allocation28_spill] sm:$0xff]  ;;  %v7977_v12 = vld [vmem:[#allocation3 + $0x112] sm:$0xff] }
 0x4ca   : > { %9865 = vmatprep.mubr.msk.f32.mxu1 %vm4781_vm5, %v14446_v56  ;;  %10154 = vmatprep.mubr.msk.f32.mxu0 %vm4781_vm5, %v14380_v53  ;;  %v15382_v53 = vld [vmem:[#allocation30_spill] sm:$0xff]  ;;  %v15385_v56 = vld [vmem:[#allocation31_spill] sm:$0xff] }
 0x4cb   : > { %10376 = vmatpush3.bf16.msra.mxu1 %v15373_v19  ;;  %v15003_v19 = vld [vmem:[%s15192_s7] ss:$0 sm:$0xff] }
 0x4cc   : > { %10373 = vmatprep.subr.bf16.mxu1 %v15374_v63 }
 0x4cd   : > { %9866 = vmatmul.mubr.msk.f32.gmra.mrb[4].mxu1 %vm4781_vm5, %v14452_v23  ;;  %10155 = vmatmul.mubr.msk.f32.gmra.mrb[26].mxu0 %vm4781_vm5, %v14392_v14  ;;  %v7975_v14 = vld [vmem:[#allocation3 + $0xfa] sm:$0xff]  ;;  %v7978_v23 = vld [vmem:[#allocation3 + $0x122] sm:$0xff] }
 0x4ce   : > { %9868 = vmatprep.mubr.msk.f32.mxu1 %vm4781_vm5, %v14456_v41  ;;  %10157 = vmatprep.mubr.msk.f32.mxu0 %vm4781_vm5, %v14852_v28  ;;  %v15386_v41 = vld [vmem:[#allocation32_spill] sm:$0xff] }
 0x4cf   : > { %10377 = vmatpush3.bf16.msra.mxu1 %v15374_v63 }
 0x4d0   : > { %10374 = vmatprep.subr.bf16.mxu1 %v15375_v17 }
 0x4d1   : > { %9869 = vmatmul.mubr.msk.f32.gmra.mrb[6].mxu1 %vm4781_vm5, %v14465_v13  ;;  %10158 = vmatmul.mubr.msk.f32.gmra.mrb[28].mxu0 %vm4781_vm5, %v14859_v43  ;;  %v7979_v13 = vld [vmem:[#allocation3 + $0x12a] sm:$0xff] }
 0x4d2   : > { %9871 = vmatprep.mubr.msk.f32.mxu1 %vm4781_vm5, %v14473_v51  ;;  %10160 = vmatprep.mubr.msk.f32.mxu0 %vm4781_vm5, %v7594_v3  ;;  %v7980_v51 = vld [vmem:[#allocation3 + $0x13a] sm:$0xff] }
 0x4d3   : > { %10378 = vmatpush3.bf16.msra.mxu1 %v15375_v17 }
 0x4d5   : > { %9872 = vmatmul.mubr.msk.f32.gmra.mrb[8].mxu1 %vm4781_vm5, %v14485_v21  ;;  %10161 = vmatmul.mubr.msk.f32.gmra.mrb[30].mxu0 %vm4781_vm5, %v7595_v6  ;;  %v7981_v21 = vld [vmem:[#allocation3 + $0x142] sm:$0xff] }
 0x4d6   : > { %9874 = vmatprep.mubr.msk.f32.mxu1 %vm4781_vm5, %v14491_v20  ;;  %10179 = vmatprep.mubr.msk.f32.mxu0 %vm4781_vm5, %v14658_v31  ;;  %v7982_v20 = vld [vmem:[#allocation3 + $0x152] sm:$0xff] }
 0x4d7   : > { %v6410_v31 = vld [vmem:[#allocation3 + $0x171] sm:$0xff] }
 0x4d9   : > { %9875 = vmatmul.mubr.msk.f32.gmra.mrb[10].mxu1 %vm4781_vm5, %v14504_v60  ;;  %10180 = vmatmul.mubr.msk.f32.vlgmr.msra.gmra.mrb[0].mxu0 %vm4781_vm5, %v14670_v58  ;;  %v7983_v60 = vld [vmem:[#allocation3 + $0x15a] sm:$0xff] }
 0x4da   : > { %9877 = vmatprep.mubr.msk.f32.mxu1 %vm4781_vm5, %v14510_v9  ;;  %10182 = vmatprep.mubr.msk.f32.mxu0 %vm4781_vm5, %v14676_v18  ;;  %v6401_v9 = vld [vmem:[#allocation3 + $0x109] sm:$0xff] }
 0x4dd   : > { %9878 = vmatmul.mubr.msk.f32.gmra.mrb[12].mxu1 %vm4781_vm5, %v14522_v46  ;;  %10183 = vmatmul.mubr.msk.f32.gmra.mrb[2].mxu0 %vm4781_vm5, %v14684_v59  ;;  %v15387_v59 = vld [vmem:[#allocation56_spill] sm:$0xff]  ;;  %v6402_v46 = vld [vmem:[#allocation3 + $0x111] sm:$0xff] }
 0x4de   : > { %9880 = vmatprep.mubr.msk.f32.mxu1 %vm4781_vm5, %v14528_v24  ;;  %10185 = vmatprep.mubr.msk.f32.mxu0 %vm4781_vm5, %v14692_v27  ;;  %v6403_v24 = vld [vmem:[#allocation3 + $0x121] sm:$0xff] }
 0x4e1   : > { %9881 = vmatmul.mubr.msk.f32.gmra.mrb[14].mxu1 %vm4781_vm5, %v14540_v32  ;;  %10186 = vmatmul.mubr.msk.f32.gmra.mrb[4].mxu0 %vm4781_vm5, %v14697_v48  ;;  %v15388_v32 = vld [vmem:[#allocation22_spill] sm:$0xff] }
 0x4e2   : > { %9883 = vmatprep.mubr.msk.f32.mxu1 %vm4781_vm5, %v14548_v44  ;;  %10188 = vmatprep.mubr.msk.f32.mxu0 %vm4781_vm5, %v14703_v2  ;;  %v7988_v44 = vld [vmem:[#allocation3 + $0x19a] sm:$0xff] }
 0x4e5   : > { %9884 = vmatmul.mubr.msk.f32.gmra.mrb[16].mxu1 %vm4781_vm5, %v14554_v26  ;;  %10189 = vmatmul.mubr.msk.f32.gmra.mrb[6].mxu0 %vm4781_vm5, %v14714_v45  ;;  %v6404_v26 = vld [vmem:[#allocation3 + $0x129] sm:$0xff] }
 0x4e6   : > { %9886 = vmatprep.mubr.msk.f32.mxu1 %vm4781_vm5, %v14561_v54  ;;  %10191 = vmatprep.mubr.msk.f32.mxu0 %vm4781_vm5, %v14719_v11  ;;  %v15389_v54 = vld [vmem:[#allocation24_spill] sm:$0xff] }
 0x4e7   : > { %v6408_v11 = vld [vmem:[#allocation3 + $0x159] sm:$0xff] }
 0x4e9   : > { %9887 = vmatmul.mubr.msk.f32.gmra.mrb[18].mxu1 %vm4781_vm5, %v14567_v25  ;;  %10192 = vmatmul.mubr.msk.f32.gmra.mrb[8].mxu0 %vm4781_vm5, %v14731_v0  ;;  %v7989_v25 = vld [vmem:[#allocation3 + $0x1a2] sm:$0xff] }
 0x4ea   : > { %9889 = vmatprep.mubr.msk.f32.mxu1 %vm4781_vm5, %v15376_v35  ;;  %10194 = vmatprep.mubr.msk.f32.mxu0 %vm4781_vm5, %v14736_v52  ;;  %v6407_v52 = vld [vmem:[#allocation3 + $0x151] sm:$0xff] }
 0x4ed   : > { %9890 = vmatmul.mubr.msk.f32.gmra.mrb[20].mxu1 %vm4781_vm5, %v15377_v10  ;;  %10195 = vmatmul.mubr.msk.f32.gmra.mrb[10].mxu0 %vm4781_vm5, %v14747_v7 }
 0x4ee   : > { %9892 = vmatprep.mubr.msk.f32.mxu1 %vm4781_vm5, %v15378_v4  ;;  %10197 = vmatprep.mubr.msk.f32.mxu0 %vm4781_vm5, %v14752_v8 }
 0x4f1   : > { %9893 = vmatmul.mubr.msk.f32.gmra.mrb[22].mxu1 %vm4781_vm5, %v15379_v15  ;;  %10198 = vmatmul.mubr.msk.f32.gmra.mrb[12].mxu0 %vm4781_vm5, %v14757_v1 }
 0x4f2   : > { %9895 = vmatprep.mubr.msk.f32.mxu1 %vm4781_vm5, %v15380_v29  ;;  %10200 = vmatprep.mubr.msk.f32.mxu0 %vm4781_vm5, %v14762_v42 }
 0x4f5   : > { %9896 = vmatmul.mubr.msk.f32.gmra.mrb[24].mxu1 %vm4781_vm5, %v15381_v50  ;;  %10201 = vmatmul.mubr.msk.f32.gmra.mrb[14].mxu0 %vm4781_vm5, %v14767_v38 }
 0x4f6   : > { %9898 = vmatprep.mubr.msk.f32.mxu1 %vm4781_vm5, %v15382_v53  ;;  %10203 = vmatprep.mubr.msk.f32.mxu0 %vm4781_vm5, %v7974_v34 }
 0x4f9   : > { %9899 = vmatmul.mubr.msk.f32.gmra.mrb[26].mxu1 %vm4781_vm5, %v15383_v36  ;;  %10204 = vmatmul.mubr.msk.f32.gmra.mrb[16].mxu0 %vm4781_vm5, %v7975_v14 }
 0x4fa   : > { %9901 = vmatprep.mubr.msk.f32.mxu1 %vm4781_vm5, %v15384_v57  ;;  %10206 = vmatprep.mubr.msk.f32.mxu0 %vm4781_vm5, %v7976_v5 }
 0x4fd   : > { %9902 = vmatmul.mubr.msk.f32.gmra.mrb[28].mxu1 %vm4781_vm5, %v15385_v56  ;;  %10207 = vmatmul.mubr.msk.f32.gmra.mrb[18].mxu0 %vm4781_vm5, %v7977_v12 }
 0x4fe   : > { %9904 = vmatprep.mubr.msk.f32.mxu1 %vm4781_vm5, %v15386_v41  ;;  %10209 = vmatprep.mubr.msk.f32.mxu0 %vm4781_vm5, %v7978_v23 }
 0x501   : > { %9905 = vmatmul.mubr.msk.f32.gmra.mrb[30].mxu1 %vm4781_vm5, %v15387_v59  ;;  %10210 = vmatmul.mubr.msk.f32.gmra.mrb[20].mxu0 %vm4781_vm5, %v7979_v13 }
 0x502   : > { %9947 = vmatprep.mubr.msk.f32.mxu1 %vm4781_vm5, %v14784_v40  ;;  %10212 = vmatprep.mubr.msk.f32.mxu0 %vm4781_vm5, %v7980_v51 }
 0x505   : > { %9948 = vmatmul.mubr.msk.f32.vlgmr.msra.gmra.mrb[16].mxu1 %vm4781_vm5, %v14790_v47  ;;  %10213 = vmatmul.mubr.msk.f32.gmra.mrb[22].mxu0 %vm4781_vm5, %v7981_v21 }
 0x506   : > { %9950 = vmatprep.mubr.msk.f32.mxu1 %vm4781_vm5, %v14796_v37  ;;  %10215 = vmatprep.mubr.msk.f32.mxu0 %vm4781_vm5, %v7982_v20 }
 0x509   : > { %9951 = vmatmul.mubr.msk.f32.gmra.mrb[18].mxu1 %vm4781_vm5, %v14802_v22  ;;  %10216 = vmatmul.mubr.msk.f32.gmra.mrb[24].mxu0 %vm4781_vm5, %v7983_v60 }
 0x50a   : > { %9953 = vmatprep.mubr.msk.f32.mxu1 %vm4781_vm5, %v6401_v9  ;;  %10218 = vmatprep.mubr.msk.f32.mxu0 %vm4781_vm5, %v14382_v33  ;;  %v6405_v33 = vld [vmem:[#allocation3 + $0x139] sm:$0xff] }
 0x50d   : > { %9954 = vmatmul.mubr.msk.f32.gmra.mrb[20].mxu1 %vm4781_vm5, %v6402_v46  ;;  %10219 = vmatmul.mubr.msk.f32.gmra.mrb[26].mxu0 %vm4781_vm5, %v14394_v30  ;;  %v6406_v30 = vld [vmem:[#allocation3 + $0x141] sm:$0xff] }
 0x50e   : > { %9956 = vmatprep.mubr.msk.f32.mxu1 %vm4781_vm5, %v6403_v24  ;;  %10221 = vmatprep.mubr.msk.f32.mxu0 %vm4781_vm5, %v15388_v32 }
 0x511   : > { %9957 = vmatmul.mubr.msk.f32.gmra.mrb[22].mxu1 %vm4781_vm5, %v6404_v26  ;;  %10222 = vmatmul.mubr.msk.f32.gmra.mrb[28].mxu0 %vm4781_vm5, %v15389_v54 }
 0x512   : > { %9959 = vmatprep.mubr.msk.f32.mxu1 %vm4781_vm5, %v6405_v33  ;;  %10224 = vmatprep.mubr.msk.f32.mxu0 %vm4781_vm5, %v7988_v44 }
 0x515   : > { %9960 = vmatmul.mubr.msk.f32.gmra.mrb[24].mxu1 %vm4781_vm5, %v6406_v30  ;;  %10225 = vmatmul.mubr.msk.f32.gmra.mrb[30].mxu0 %vm4781_vm5, %v7989_v25 }
 0x516   : > { %9962 = vmatprep.mubr.msk.f32.mxu1 %vm4781_vm5, %v6407_v52 }
 0x519   : > { %9963 = vmatmul.mubr.msk.f32.gmra.mrb[26].mxu1 %vm4781_vm5, %v6408_v11 }
 0x51a   : > { %9965 = vmatprep.mubr.msk.f32.mxu1 %vm4781_vm5, %v6409_v39 }
 0x51d   : > { %9966 = vmatmul.mubr.msk.f32.gmra.mrb[28].mxu1 %vm4781_vm5, %v6410_v31 }
 0x51e   : > { %9968 = vmatprep.mubr.msk.f32.mxu1 %vm4781_vm5, %v14852_v28 }
 0x521   : > { %9969 = vmatmul.mubr.msk.f32.gmra.mrb[30].mxu1 %vm4781_vm5, %v14859_v43 }
 0x598   : > { %v9861_v58 = vpop.f32.mrb[0].mxu1 }
 0x599   : > { %v6190_v18 = vpop.f32.mrb[1].mxu1 }
 0x59c   : > { %v9864_v2 = vpop.f32.mrb[2].mxu1 }
 0x59d   : > { %v6200_v27 = vpop.f32.mrb[3].mxu1 }
 0x5a0   : > { %v9867_v48 = vpop.f32.mrb[4].mxu1 }
 0x5a1   : > { %v6210_v45 = vpop.f32.mrb[5].mxu1 }
 0x5a4   : > { %v9870_v0 = vpop.f32.mrb[6].mxu1 }
 0x5a5   : > { %v6220_v7 = vpop.f32.mrb[7].mxu1 }
 0x5a8   : > { %v9873_v8 = vpop.f32.mrb[8].mxu1 }
 0x5a9   : > { %v6230_v1 = vpop.f32.mrb[9].mxu1 }
 0x5ac   : > { %v9876_v42 = vpop.f32.mrb[10].mxu1  ;;  %v10181_v38 = vpop.f32.mrb[0].mxu0 }
 0x5ad   : > { %v10379_v61 = vadd.f32 %v10181_v38, %v9861_v58  ;;  %v6240_v16 = vpop.f32.mrb[11].mxu1  ;;  %v8161_v55 = vpop.f32.mrb[1].mxu0 }
 0x5ae   : > { %v10380_v62 = vadd.f32 %v8161_v55, %v6190_v18 }
 0x5af   : > { %v8360_v40 = vadd.f32 %v10379_v61, %v14994_v49 }
 0x5b0   : > { %v8359_v47 = vadd.f32 %v10380_v62, %v14994_v49  ;;  %v14998_v37 = vpop.f32.mrb[12].mxu1  ;;  %v10184_v22 = vpop.f32.mrb[2].mxu0 }
 0x5b1   : > { %v8392_v63 = vmax.f32 %v8360_v40, 0.0  ;;  %v10381_v28 = vadd.f32 %v10184_v22, %v9864_v2  ;;  %v15005_v3 = vpop.f32.mrb[13].mxu1  ;;  %v8171_v43 = vpop.f32.mrb[3].mxu0 }
 0x5b2   : > { %v8391_v17 = vmax.f32 %v8359_v47, 0.0  ;;  %v10382_v6 = vadd.f32 %v8171_v43, %v6200_v27 }
 0x5b3   : > { %v8362_v35 = vadd.f32 %v10381_v28, %v14994_v49  ;;  %v8431_v10 = vmul.f32 %v15003_v19, %v8392_v63 }
 0x5b4   : > { %v8361_v4 = vadd.f32 %v10382_v6, %v14994_v49  ;;  %v15010_v15 = vpop.f32.mrb[14].mxu1  ;;  %v10187_v29 = vpop.f32.mrb[4].mxu0  ;;  %v8430_v50 = vmul.f32 %v15003_v19, %v8391_v17 }
 0x5b5   : > { %v8394_v34 = vmax.f32 %v8362_v35, 0.0  ;;  %v10383_v53 = vadd.f32 %v10187_v29, %v9867_v48  ;;  %v15013_v14 = vpop.f32.mrb[15].mxu1  ;;  %8464 = vadd.xlane.f32.xlu0 %v8431_v10  ;;  %v8181_v36 = vpop.f32.mrb[5].mxu0 }
 0x5b6   : > { %v8393_v5 = vmax.f32 %v8361_v4, 0.0  ;;  %v10384_v57 = vadd.f32 %v8181_v36, %v6210_v45  ;;  %8462 = vadd.xlane.f32.xlu1 %v8430_v50 }
 0x5b7   : > { %v8364_v12 = vadd.f32 %v10383_v53, %v14994_v49  ;;  %v8433_v56 = vmul.f32 %v15003_v19, %v8394_v34 }
 0x5b8   : > { %v8363_v23 = vadd.f32 %v10384_v57, %v14994_v49  ;;  %v10190_v41 = vpop.f32.mrb[6].mxu0  ;;  %v8432_v13 = vmul.f32 %v15003_v19, %v8393_v5 }
 0x5b9   : > { %v8396_v59 = vmax.f32 %v8364_v12, 0.0  ;;  %v10385_v51 = vadd.f32 %v10190_v41, %v9870_v0  ;;  %v8191_v21 = vpop.f32.mrb[7].mxu0 }
 0x5ba   : > { %v8395_v20 = vmax.f32 %v8363_v23, 0.0  ;;  %v10386_v60 = vadd.f32 %v8191_v21, %v6220_v7  ;;  %8468 = vadd.xlane.f32.xlu1 %v8433_v56  ;;  %8466 = vadd.xlane.f32.xlu0 %v8432_v13 }
 0x5bb   : > { %v8366_v9 = vadd.f32 %v10385_v51, %v14994_v49  ;;  %v8435_v46 = vmul.f32 %v15003_v19, %v8396_v59 }
 0x5bc   : > { %v8365_v24 = vadd.f32 %v10386_v60, %v14994_v49  ;;  %v10193_v32 = vpop.f32.mrb[8].mxu0  ;;  %v8434_v44 = vmul.f32 %v15003_v19, %v8395_v20 }
 0x5bd   : > { %v8398_v26 = vmax.f32 %v8366_v9, 0.0  ;;  %v10387_v54 = vadd.f32 %v10193_v32, %v9873_v8  ;;  %v8201_v33 = vpop.f32.mrb[9].mxu0 }
 0x5be   : > { %v8397_v25 = vmax.f32 %v8365_v24, 0.0  ;;  %v10388_v30 = vadd.f32 %v8201_v33, %v6230_v1  ;;  %8472 = vadd.xlane.f32.xlu1 %v8435_v46  ;;  %8470 = vadd.xlane.f32.xlu0 %v8434_v44 }
 0x5bf   : > { %v8368_v52 = vadd.f32 %v10387_v54, %v14994_v49  ;;  %v8437_v11 = vmul.f32 %v15003_v19, %v8398_v26 }
 0x5c0   : > { %v8367_v39 = vadd.f32 %v10388_v30, %v14994_v49  ;;  %v10196_v31 = vpop.f32.mrb[10].mxu0  ;;  %v8436_v58 = vmul.f32 %v15003_v19, %v8397_v25 }
 0x5c1   : > { %v8400_v18 = vmax.f32 %v8368_v52, 0.0  ;;  %v10389_v2 = vadd.f32 %v10196_v31, %v9876_v42  ;;  %v8211_v27 = vpop.f32.mrb[11].mxu0 }
 0x5c2   : > { %v8399_v48 = vmax.f32 %v8367_v39, 0.0  ;;  %v10390_v45 = vadd.f32 %v8211_v27, %v6240_v16  ;;  %8476 = vadd.xlane.f32.xlu1 %v8437_v11  ;;  %8474 = vadd.xlane.f32.xlu0 %v8436_v58 }
 0x5c3   : > { %v8370_v0 = vadd.f32 %v10389_v2, %v14994_v49  ;;  %v8439_v7 = vmul.f32 %v15003_v19, %v8400_v18 }
 0x5c4   : > { %v8369_v8 = vadd.f32 %v10390_v45, %v14994_v49  ;;  %v10199_v1 = vpop.f32.mrb[12].mxu0  ;;  %v8438_v38 = vmul.f32 %v15003_v19, %v8399_v48 }
 0x5c5   : > { %v8402_v61 = vmax.f32 %v8370_v0, 0.0  ;;  %v10391_v55 = vadd.f32 %v10199_v1, %v14998_v37  ;;  %v8221_v62 = vpop.f32.mrb[13].mxu0 }
 0x5c6   : > { %v8401_v40 = vmax.f32 %v8369_v8, 0.0  ;;  %v10392_v42 = vadd.f32 %v8221_v62, %v15005_v3  ;;  %8480 = vadd.xlane.f32.xlu1 %v8439_v7  ;;  %8478 = vadd.xlane.f32.xlu0 %v8438_v38 }
 0x5c7   : > { %v8372_v16 = vadd.f32 %v10391_v55, %v14994_v49  ;;  %v8441_v47 = vmul.f32 %v15003_v19, %v8402_v61 }
 0x5c8   : > { %v8371_v22 = vadd.f32 %v10392_v42, %v14994_v49  ;;  %v10202_v63 = vpop.f32.mrb[14].mxu0  ;;  %v8440_v28 = vmul.f32 %v15003_v19, %v8401_v40 }
 0x5c9   : > { %v8404_v43 = vmax.f32 %v8372_v16, 0.0  ;;  %v10393_v17 = vadd.f32 %v10202_v63, %v15010_v15  ;;  %v8231_v6 = vpop.f32.mrb[15].mxu0 }
 0x5ca   : > { %v8403_v37 = vmax.f32 %v8371_v22, 0.0  ;;  %v10394_v35 = vadd.f32 %v8231_v6, %v15013_v14  ;;  %8484 = vadd.xlane.f32.xlu1 %v8441_v47  ;;  %8482 = vadd.xlane.f32.xlu0 %v8440_v28 }
 0x5cb   : > { %v8374_v3 = vadd.f32 %v10393_v17, %v14994_v49  ;;  %v8443_v10 = vmul.f32 %v15003_v19, %v8404_v43 }
 0x5cc   : > { %v8373_v4 = vadd.f32 %v10394_v35, %v14994_v49  ;;  %v10205_v29 = vpop.f32.mrb[16].mxu0  ;;  %v8442_v50 = vmul.f32 %v15003_v19, %v8403_v37 }
 0x5cd   : > { %v8406_v34 = vmax.f32 %v8374_v3, 0.0  ;;  %v8241_v53 = vpop.f32.mrb[17].mxu0 }
 0x5ce   : > { %v8405_v36 = vmax.f32 %v8373_v4, 0.0  ;;  %8488 = vadd.xlane.f32.xlu1 %v8443_v10  ;;  %8486 = vadd.xlane.f32.xlu0 %v8442_v50 }
 0x5cf   : > { %v8445_v15 = vmul.f32 %v15003_v19, %v8406_v34 }
 0x5d0   : > { %v10208_v5 = vpop.f32.mrb[18].mxu0  ;;  %v8444_v14 = vmul.f32 %v15003_v19, %v8405_v36 }
 0x5d1   : > { %v8251_v57 = vpop.f32.mrb[19].mxu0 }
 0x5d2   : > { %8492 = vadd.xlane.f32.xlu1 %v8445_v15  ;;  %8490 = vadd.xlane.f32.xlu0 %v8444_v14 }
 0x5d4   : > { %v10211_v12 = vpop.f32.mrb[20].mxu0 }
 0x5d5   : > { %v8261_v56 = vpop.f32.mrb[21].mxu0 }
 0x5d8   : > { %v9949_v23 = vpop.f32.mrb[16].mxu1  ;;  %v10214_v41 = vpop.f32.mrb[22].mxu0 }
 0x5d9   : > { %v10395_v13 = vadd.f32 %v10205_v29, %v9949_v23  ;;  %v6664_v59 = vpop.f32.mrb[17].mxu1  ;;  %v8271_v51 = vpop.f32.mrb[23].mxu0 }
 0x5da   : > { %v10396_v21 = vadd.f32 %v8241_v53, %v6664_v59 }
 0x5db   : > { %v8376_v20 = vadd.f32 %v10395_v13, %v14994_v49 }
 0x5dc   : > { %v8375_v60 = vadd.f32 %v10396_v21, %v14994_v49  ;;  %v9952_v9 = vpop.f32.mrb[18].mxu1  ;;  %v10217_v46 = vpop.f32.mrb[24].mxu0 }
 0x5dd   : > { %v8408_v24 = vmax.f32 %v8376_v20, 0.0  ;;  %v10397_v32 = vadd.f32 %v10208_v5, %v9952_v9  ;;  %v6674_v44 = vpop.f32.mrb[19].mxu1  ;;  %v8281_v26 = vpop.f32.mrb[25].mxu0 }
 0x5de   : > { %v8407_v54 = vmax.f32 %v8375_v60, 0.0  ;;  %v10398_v33 = vadd.f32 %v8251_v57, %v6674_v44 }
 0x5df   : > { %v8378_v25 = vadd.f32 %v10397_v32, %v14994_v49  ;;  %v8447_v30 = vmul.f32 %v15003_v19, %v8408_v24 }
 0x5e0   : > { %v8377_v52 = vadd.f32 %v10398_v33, %v14994_v49  ;;  %v9955_v11 = vpop.f32.mrb[20].mxu1  ;;  %v10220_v39 = vpop.f32.mrb[26].mxu0  ;;  %v8446_v31 = vmul.f32 %v15003_v19, %v8407_v54 }
 0x5e1   : > { %v8410_v58 = vmax.f32 %v8378_v25, 0.0  ;;  %v10399_v18 = vadd.f32 %v10211_v12, %v9955_v11  ;;  %v8291_v2 = vpop.f32.mrb[27].mxu0  ;;  %8496 = vadd.xlane.f32.xlu1 %v8447_v30  ;;  %v6684_v27 = vpop.f32.mrb[21].mxu1 }
 0x5e2   : > { %v8409_v48 = vmax.f32 %v8377_v52, 0.0  ;;  %v10400_v45 = vadd.f32 %v8261_v56, %v6684_v27  ;;  %8494 = vadd.xlane.f32.xlu0 %v8446_v31 }
 0x5e3   : > { %v8380_v0 = vadd.f32 %v10399_v18, %v14994_v49  ;;  %v8449_v7 = vmul.f32 %v15003_v19, %v8410_v58 }
 0x5e4   : > { %v8379_v8 = vadd.f32 %v10400_v45, %v14994_v49  ;;  %v9958_v1 = vpop.f32.mrb[22].mxu1  ;;  %v10223_v38 = vpop.f32.mrb[28].mxu0  ;;  %v8448_v61 = vmul.f32 %v15003_v19, %v8409_v48 }
 0x5e5   : > { %v8412_v55 = vmax.f32 %v8380_v0, 0.0  ;;  %v10401_v62 = vadd.f32 %v10214_v41, %v9958_v1  ;;  %v8301_v40 = vpop.f32.mrb[29].mxu0  ;;  %8500 = vadd.xlane.f32.xlu1 %v8449_v7  ;;  %v6694_v42 = vpop.f32.mrb[23].mxu1  ;;  %v15077_v0 = vstv %s8526_s11 }
 0x5e6   : > { %v8411_v16 = vmax.f32 %v8379_v8, 0.0  ;;  %v10402_v47 = vadd.f32 %v8271_v51, %v6694_v42  ;;  %8498 = vadd.xlane.f32.xlu0 %v8448_v61 }
 0x5e7   : > { %v8382_v22 = vadd.f32 %v10401_v62, %v14994_v49  ;;  %v8451_v63 = vmul.f32 %v15003_v19, %v8412_v55 }
 0x5e8   : > { %v8381_v28 = vadd.f32 %v10402_v47, %v14994_v49  ;;  %v9961_v43 = vpop.f32.mrb[24].mxu1  ;;  %v10226_v17 = vpop.f32.mrb[30].mxu0  ;;  %v8450_v6 = vmul.f32 %v15003_v19, %v8411_v16 }
 0x5e9   : > { %v8414_v37 = vmax.f32 %v8382_v22, 0.0  ;;  %v10403_v35 = vadd.f32 %v10217_v46, %v9961_v43  ;;  %v8311_v3 = vpop.f32.mrb[31].mxu0  ;;  %8504 = vadd.xlane.f32.xlu1 %v8451_v63  ;;  %v6704_v10 = vpop.f32.mrb[25].mxu1 }
 0x5ea   : > { %v8413_v4 = vmax.f32 %v8381_v28, 0.0  ;;  %v10404_v29 = vadd.f32 %v8281_v26, %v6704_v10  ;;  %8502 = vadd.xlane.f32.xlu0 %v8450_v6 }
 0x5eb   : > { %v8384_v50 = vadd.f32 %v10403_v35, %v14994_v49  ;;  %v8453_v34 = vmul.f32 %v15003_v19, %v8414_v37 }
 0x5ec   : > { %v8383_v53 = vadd.f32 %v10404_v29, %v14994_v49  ;;  %v9964_v36 = vpop.f32.mrb[26].mxu1  ;;  %v8452_v15 = vmul.f32 %v15003_v19, %v8413_v4 }
 0x5ed   : > { %v8416_v5 = vmax.f32 %v8384_v50, 0.0  ;;  %v10405_v14 = vadd.f32 %v10220_v39, %v9964_v36  ;;  %8508 = vadd.xlane.f32.xlu1 %v8453_v34  ;;  %v6714_v57 = vpop.f32.mrb[27].mxu1 }
 0x5ee   : > { %v8415_v12 = vmax.f32 %v8383_v53, 0.0  ;;  %v10406_v56 = vadd.f32 %v8291_v2, %v6714_v57  ;;  %8506 = vadd.xlane.f32.xlu0 %v8452_v15 }
 0x5ef   : > { %v8386_v23 = vadd.f32 %v10405_v14, %v14994_v49  ;;  %v8455_v41 = vmul.f32 %v15003_v19, %v8416_v5 }
 0x5f0   : > { %v8385_v13 = vadd.f32 %v10406_v56, %v14994_v49  ;;  %v9967_v59 = vpop.f32.mrb[28].mxu1  ;;  %v8454_v51 = vmul.f32 %v15003_v19, %v8415_v12 }
 0x5f1   : > { %v8418_v21 = vmax.f32 %v8386_v23, 0.0  ;;  %v10407_v20 = vadd.f32 %v10223_v38, %v9967_v59  ;;  %8512 = vadd.xlane.f32.xlu1 %v8455_v41  ;;  %v6724_v60 = vpop.f32.mrb[29].mxu1 }
 0x5f2   : > { %v8417_v9 = vmax.f32 %v8385_v13, 0.0  ;;  %v10408_v46 = vadd.f32 %v8301_v40, %v6724_v60  ;;  %8510 = vadd.xlane.f32.xlu0 %v8454_v51 }
 0x5f3   : > { %v8388_v24 = vadd.f32 %v10407_v20, %v14994_v49  ;;  %v8457_v32 = vmul.f32 %v15003_v19, %v8418_v21 }
 0x5f4   : > { %v8387_v44 = vadd.f32 %v10408_v46, %v14994_v49  ;;  %v9970_v26 = vpop.f32.mrb[30].mxu1  ;;  %v8456_v54 = vmul.f32 %v15003_v19, %v8417_v9 }
 0x5f5   : > { %v8420_v33 = vmax.f32 %v8388_v24, 0.0  ;;  %v10409_v25 = vadd.f32 %v10226_v17, %v9970_v26  ;;  %8516 = vadd.xlane.f32.xlu1 %v8457_v32  ;;  %v6734_v30 = vpop.f32.mrb[31].mxu1 }
 0x5f6   : > { %v8419_v52 = vmax.f32 %v8387_v44, 0.0  ;;  %v10410_v11 = vadd.f32 %v8311_v3, %v6734_v30  ;;  %8514 = vadd.xlane.f32.xlu0 %v8456_v54 }
 0x5f7   : > { %v8390_v39 = vadd.f32 %v10409_v25, %v14994_v49  ;;  %v8459_v31 = vmul.f32 %v15003_v19, %v8420_v33 }
 0x5f8   : > { %v8389_v58 = vadd.f32 %v10410_v11, %v14994_v49  ;;  %v8458_v18 = vmul.f32 %v15003_v19, %v8419_v52 }
 0x5f9   : > { %v8422_v2 = vmax.f32 %v8390_v39, 0.0  ;;  %8520 = vadd.xlane.f32.xlu1 %v8459_v31 }
 0x5fa   : > { %v8421_v27 = vmax.f32 %v8389_v58, 0.0  ;;  %8518 = vadd.xlane.f32.xlu0 %v8458_v18 }
 0x5fb   : > { %v8461_v48 = vmul.f32 %v15003_v19, %v8422_v2 }
 0x5fc   : > { %v8460_v45 = vmul.f32 %v15003_v19, %v8421_v27 }
 0x5fd   : > { %8524 = vadd.xlane.f32.xlu1 %v8461_v48 }
 0x5fe   : > { %8522 = vadd.xlane.f32.xlu0 %v8460_v45 }
 0x642   : > { %v8465_v7 = vpop.xlane.xlu0 %8464 }
 0x643   : > { %v8529_v8 = vadd.f32 %v15077_v0, %v8465_v7  ;;  %v8463_v1 = vpop.xlane.xlu1 %8462 }
 0x644   : > { %v8528_v49 = vadd.f32 %v15077_v0, %v8463_v1 }
 0x645   : > { %v9256_v38 = vmul.f32 -1.442695, %v8529_v8 }
 0x646   : > { %v9255_v61 = vmul.f32 -1.442695, %v8528_v49 }
 0x647   : > { %10648 = vpow2.f32 %v9256_v38  ;;  %v8469_v55 = vpop.xlane.xlu1 %8468  ;;  %v8467_v62 = vpop.xlane.xlu0 %8466 }
 0x648   : > { %10650 = vpow2.f32 %v9255_v61  ;;  %v8531_v40 = vadd.f32 %v15077_v0, %v8469_v55  ;;  %v8530_v19 = vadd.f32 %v15077_v0, %v8467_v62 }
 0x64a   : > { %v9258_v42 = vmul.f32 -1.442695, %v8531_v40  ;;  %v9257_v16 = vmul.f32 -1.442695, %v8530_v19 }
 0x64b   : > { %v8473_v47 = vpop.xlane.xlu1 %8472  ;;  %v8471_v22 = vpop.xlane.xlu0 %8470 }
 0x64c   : > { %10652 = vpow2.f32 %v9258_v42  ;;  %v8533_v63 = vadd.f32 %v15077_v0, %v8473_v47  ;;  %v8532_v28 = vadd.f32 %v15077_v0, %v8471_v22 }
 0x64d   : > { %10654 = vpow2.f32 %v9257_v16 }
 0x64e   : > { %v9260_v43 = vmul.f32 -1.442695, %v8533_v63  ;;  %v9259_v17 = vmul.f32 -1.442695, %v8532_v28 }
 0x64f   : > { %v8477_v6 = vpop.xlane.xlu1 %8476  ;;  %v8475_v37 = vpop.xlane.xlu0 %8474 }
 0x650   : > { %10656 = vpow2.f32 %v9260_v43  ;;  %v8535_v35 = vadd.f32 %v15077_v0, %v8477_v6  ;;  %v8534_v3 = vadd.f32 %v15077_v0, %v8475_v37 }
 0x651   : > { %v10649_v10 = vpop.eup %10648  ;;  %10658 = vpow2.f32 %v9259_v17 }
 0x652   : > { %v10651_v4 = vpop.eup %10650  ;;  %v8657_v29 = vadd.f32 1.0, %v10649_v10  ;;  %v9262_v50 = vmul.f32 -1.442695, %v8535_v35  ;;  %v9261_v53 = vmul.f32 -1.442695, %v8534_v3 }
 0x653   : > { %v8656_v34 = vadd.f32 1.0, %v10651_v4  ;;  %v8481_v36 = vpop.xlane.xlu1 %8480  ;;  %v8479_v15 = vpop.xlane.xlu0 %8478 }
 0x654   : > { %10660 = vrcp.f32 %v8657_v29  ;;  %v8537_v5 = vadd.f32 %v15077_v0, %v8481_v36  ;;  %v8536_v14 = vadd.f32 %v15077_v0, %v8479_v15 }
 0x655   : > { %10662 = vrcp.f32 %v8656_v34 }
 0x656   : > { %v10653_v57 = vpop.eup %10652  ;;  %10664 = vpow2.f32 %v9262_v50  ;;  %v9264_v12 = vmul.f32 -1.442695, %v8537_v5  ;;  %v9263_v41 = vmul.f32 -1.442695, %v8536_v14 }
 0x657   : > { %v10655_v56 = vpop.eup %10654  ;;  %v8659_v23 = vadd.f32 1.0, %v10653_v57  ;;  %10666 = vpow2.f32 %v9261_v53  ;;  %v8485_v13 = vpop.xlane.xlu1 %8484 }
 0x658   : > { %v8483_v59 = vpop.xlane.xlu0 %8482  ;;  %v8658_v51 = vadd.f32 1.0, %v10655_v56  ;;  %10668 = vpow2.f32 %v9264_v12  ;;  %v8539_v21 = vadd.f32 %v15077_v0, %v8485_v13 }
 0x659   : > { %v8538_v20 = vadd.f32 %v15077_v0, %v8483_v59  ;;  %10670 = vrcp.f32 %v8659_v23 }
 0x65a   : > { %v10657_v60 = vpop.eup %10656  ;;  %10672 = vrcp.f32 %v8658_v51  ;;  %v9266_v9 = vmul.f32 -1.442695, %v8539_v21 }
 0x65b   : > { %v10659_v46 = vpop.eup %10658  ;;  %v8661_v24 = vadd.f32 1.0, %v10657_v60  ;;  %10674 = vpow2.f32 %v9263_v41  ;;  %v9265_v32 = vmul.f32 -1.442695, %v8538_v20  ;;  %v8489_v44 = vpop.xlane.xlu1 %8488 }
 0x65c   : > { %v8487_v26 = vpop.xlane.xlu0 %8486  ;;  %v8660_v54 = vadd.f32 1.0, %v10659_v46  ;;  %10676 = vpow2.f32 %v9266_v9  ;;  %v8541_v33 = vadd.f32 %v15077_v0, %v8489_v44 }
 0x65d   : > { %v8540_v25 = vadd.f32 %v15077_v0, %v8487_v26  ;;  %10678 = vrcp.f32 %v8661_v24 }
 0x65e   : > { %v10661_v30 = vpop.eup %10660  ;;  %10680 = vrcp.f32 %v8660_v54  ;;  %v9268_v52 = vmul.f32 -1.442695, %v8541_v33 }
 0x65f   : > { %v9267_v11 = vmul.f32 -1.442695, %v8540_v25  ;;  %v10663_v39 = vpop.eup %10662  ;;  %8753 = vst.msk [vmem:[%s15096_s14 + $0x8] sm:$0xff] %vm2239_vm3, %v10661_v30  ;;  %10682 = vpow2.f32 %v9265_v32  ;;  %v8493_v31 = vpop.xlane.xlu1 %8492 }
 0x660   : > { %v8491_v58 = vpop.xlane.xlu0 %8490  ;;  %v10665_v18 = vpop.eup %10664  ;;  %8752 = vst.msk [vmem:[%s15096_s14] sm:$0xff] %vm2239_vm3, %v10663_v39  ;;  %10684 = vpow2.f32 %v9268_v52  ;;  %v8543_v2 = vadd.f32 %v15077_v0, %v8493_v31 }
 0x661   : > { %v8542_v27 = vadd.f32 %v15077_v0, %v8491_v58  ;;  %v10667_v48 = vpop.eup %10666  ;;  %v8663_v45 = vadd.f32 1.0, %v10665_v18  ;;  %10686 = vpow2.f32 %v9267_v11 }
 0x662   : > { %v10669_v7 = vpop.eup %10668  ;;  %v8662_v8 = vadd.f32 1.0, %v10667_v48  ;;  %v9270_v1 = vmul.f32 -1.442695, %v8543_v2 }
 0x663   : > { %v10671_v49 = vpop.eup %10670  ;;  %10688 = vrcp.f32 %v8663_v45  ;;  %v8665_v38 = vadd.f32 1.0, %v10669_v7  ;;  %v9269_v61 = vmul.f32 -1.442695, %v8542_v27 }
 0x664   : > { %v10673_v55 = vpop.eup %10672  ;;  %8755 = vst.msk [vmem:[%s15096_s14 + $0x18] sm:$0xff] %vm2239_vm3, %v10671_v49  ;;  %10690 = vrcp.f32 %v8662_v8 }
 0x665   : > { %v10675_v62 = vpop.eup %10674  ;;  %8754 = vst.msk [vmem:[%s15096_s14 + $0x10] sm:$0xff] %vm2239_vm3, %v10673_v55  ;;  %10692 = vrcp.f32 %v8665_v38 }
 0x666   : > { %v10677_v40 = vpop.eup %10676  ;;  %v8664_v19 = vadd.f32 1.0, %v10675_v62  ;;  %10694 = vpow2.f32 %v9270_v1 }
 0x667   : > { %v10679_v42 = vpop.eup %10678  ;;  %v8667_v16 = vadd.f32 1.0, %v10677_v40  ;;  %10696 = vpow2.f32 %v9269_v61 }
 0x668   : > { %v10681_v47 = vpop.eup %10680  ;;  %8757 = vst.msk [vmem:[%s15096_s14 + $0x28] sm:$0xff] %vm2239_vm3, %v10679_v42  ;;  %10698 = vrcp.f32 %v8664_v19 }
 0x669   : > { %v10683_v22 = vpop.eup %10682  ;;  %8756 = vst.msk [vmem:[%s15096_s14 + $0x20] sm:$0xff] %vm2239_vm3, %v10681_v47  ;;  %10700 = vrcp.f32 %v8667_v16 }
 0x66a   : > { %v10685_v63 = vpop.eup %10684  ;;  %v8666_v28 = vadd.f32 1.0, %v10683_v22 }
 0x66b   : > { %v10687_v43 = vpop.eup %10686  ;;  %v8669_v17 = vadd.f32 1.0, %v10685_v63 }
 0x66c   : > { %10702 = vrcp.f32 %v8666_v28  ;;  %v8668_v6 = vadd.f32 1.0, %v10687_v43 }
 0x66d   : > { %v10689_v37 = vpop.eup %10688  ;;  %10704 = vrcp.f32 %v8669_v17 }
 0x66e   : > { %v10691_v35 = vpop.eup %10690  ;;  %8759 = vst.msk [vmem:[%s15096_s14 + $0x38] sm:$0xff] %vm2239_vm3, %v10689_v37  ;;  %10706 = vrcp.f32 %v8668_v6  ;;  %v8497_v3 = vpop.xlane.xlu1 %8496 }
 0x66f   : > { %v10693_v10 = vpop.eup %10692  ;;  %8758 = vst.msk [vmem:[%s15096_s14 + $0x30] sm:$0xff] %vm2239_vm3, %v10691_v35  ;;  %v8545_v4 = vadd.f32 %v15077_v0, %v8497_v3  ;;  %v8495_v29 = vpop.xlane.xlu0 %8494 }
 0x670   : > { %v10695_v50 = vpop.eup %10694  ;;  %8761 = vst.msk [vmem:[%s15096_s14 + $0x48] sm:$0xff] %vm2239_vm3, %v10693_v10  ;;  %v8544_v34 = vadd.f32 %v15077_v0, %v8495_v29 }
 0x671   : > { %v10697_v53 = vpop.eup %10696  ;;  %v8671_v36 = vadd.f32 1.0, %v10695_v50  ;;  %v9272_v15 = vmul.f32 -1.442695, %v8545_v4 }
 0x672   : > { %v10699_v5 = vpop.eup %10698  ;;  %v8670_v14 = vadd.f32 1.0, %v10697_v53  ;;  %v9271_v57 = vmul.f32 -1.442695, %v8544_v34  ;;  %v8501_v12 = vpop.xlane.xlu1 %8500 }
 0x673   : > { %v10701_v56 = vpop.eup %10700  ;;  %8760 = vst.msk [vmem:[%s15096_s14 + $0x40] sm:$0xff] %vm2239_vm3, %v10699_v5  ;;  %10708 = vrcp.f32 %v8671_v36  ;;  %v8547_v23 = vadd.f32 %v15077_v0, %v8501_v12  ;;  %v8499_v41 = vpop.xlane.xlu0 %8498 }
 0x674   : > { %8763 = vst.msk [vmem:[%s15096_s14 + $0x58] sm:$0xff] %vm2239_vm3, %v10701_v56  ;;  %10710 = vrcp.f32 %v8670_v14  ;;  %v8546_v13 = vadd.f32 %v15077_v0, %v8499_v41 }
 0x675   : > { %10712 = vpow2.f32 %v9272_v15  ;;  %v9274_v59 = vmul.f32 -1.442695, %v8547_v23 }
 0x676   : > { %v10703_v51 = vpop.eup %10702  ;;  %10714 = vpow2.f32 %v9271_v57  ;;  %v9273_v21 = vmul.f32 -1.442695, %v8546_v13  ;;  %v8505_v20 = vpop.xlane.xlu1 %8504 }
 0x677   : > { %v10705_v60 = vpop.eup %10704  ;;  %8762 = vst.msk [vmem:[%s15096_s14 + $0x50] sm:$0xff] %vm2239_vm3, %v10703_v51  ;;  %10716 = vpow2.f32 %v9274_v59  ;;  %v8549_v9 = vadd.f32 %v15077_v0, %v8505_v20  ;;  %v8503_v46 = vpop.xlane.xlu0 %8502 }
 0x678   : > { %v10707_v24 = vpop.eup %10706  ;;  %8765 = vst.msk [vmem:[%s15096_s14 + $0x68] sm:$0xff] %vm2239_vm3, %v10705_v60  ;;  %10718 = vpow2.f32 %v9273_v21  ;;  %v8548_v32 = vadd.f32 %v15077_v0, %v8503_v46 }
 0x679   : > { %8764 = vst.msk [vmem:[%s15096_s14 + $0x60] sm:$0xff] %vm2239_vm3, %v10707_v24  ;;  %v9276_v44 = vmul.f32 -1.442695, %v8549_v9 }
 0x67a   : > { %v9275_v26 = vmul.f32 -1.442695, %v8548_v32  ;;  %v8509_v54 = vpop.xlane.xlu1 %8508 }
 0x67b   : > { %10720 = vpow2.f32 %v9276_v44  ;;  %v8551_v33 = vadd.f32 %v15077_v0, %v8509_v54  ;;  %v8507_v25 = vpop.xlane.xlu0 %8506 }
 0x67c   : > { %10722 = vpow2.f32 %v9275_v26  ;;  %v8550_v30 = vadd.f32 %v15077_v0, %v8507_v25 }
 0x67d   : > { %v10709_v52 = vpop.eup %10708  ;;  %v9278_v11 = vmul.f32 -1.442695, %v8551_v33 }
 0x67e   : > { %v10711_v39 = vpop.eup %10710  ;;  %8767 = vst.msk [vmem:[%s15096_s14 + $0x78] sm:$0xff] %vm2239_vm3, %v10709_v52  ;;  %v9277_v31 = vmul.f32 -1.442695, %v8550_v30  ;;  %v8513_v58 = vpop.xlane.xlu1 %8512 }
 0x67f   : > { %v10713_v18 = vpop.eup %10712  ;;  %8766 = vst.msk [vmem:[%s15096_s14 + $0x70] sm:$0xff] %vm2239_vm3, %v10711_v39  ;;  %10724 = vpow2.f32 %v9278_v11  ;;  %v8553_v2 = vadd.f32 %v15077_v0, %v8513_v58  ;;  %v8511_v27 = vpop.xlane.xlu0 %8510 }
 0x680   : > { %v10715_v48 = vpop.eup %10714  ;;  %v8673_v45 = vadd.f32 1.0, %v10713_v18  ;;  %10726 = vpow2.f32 %v9277_v31  ;;  %v8552_v7 = vadd.f32 %v15077_v0, %v8511_v27 }
 0x681   : > { %v10717_v8 = vpop.eup %10716  ;;  %v8672_v1 = vadd.f32 1.0, %v10715_v48  ;;  %v9280_v61 = vmul.f32 -1.442695, %v8553_v2 }
 0x682   : > { %v10719_v49 = vpop.eup %10718  ;;  %10728 = vrcp.f32 %v8673_v45  ;;  %v8675_v38 = vadd.f32 1.0, %v10717_v8  ;;  %v8517_v55 = vpop.xlane.xlu1 %8516  ;;  %v9279_v40 = vmul.f32 -1.442695, %v8552_v7 }
 0x683   : > { %10730 = vrcp.f32 %v8672_v1  ;;  %v8674_v62 = vadd.f32 1.0, %v10719_v49  ;;  %v8555_v19 = vadd.f32 %v15077_v0, %v8517_v55  ;;  %v8515_v42 = vpop.xlane.xlu0 %8514 }
 0x684   : > { %10732 = vrcp.f32 %v8675_v38  ;;  %v8554_v16 = vadd.f32 %v15077_v0, %v8515_v42 }
 0x685   : > { %v10721_v47 = vpop.eup %10720  ;;  %10734 = vrcp.f32 %v8674_v62  ;;  %v9282_v28 = vmul.f32 -1.442695, %v8555_v19 }
 0x686   : > { %v10723_v22 = vpop.eup %10722  ;;  %v8677_v63 = vadd.f32 1.0, %v10721_v47  ;;  %10736 = vpow2.f32 %v9280_v61  ;;  %v8521_v43 = vpop.xlane.xlu1 %8520  ;;  %v9281_v6 = vmul.f32 -1.442695, %v8554_v16 }
 0x687   : > { %v8676_v17 = vadd.f32 1.0, %v10723_v22  ;;  %10738 = vpow2.f32 %v9279_v40  ;;  %v8557_v37 = vadd.f32 %v15077_v0, %v8521_v43  ;;  %v8519_v35 = vpop.xlane.xlu0 %8518 }
 0x688   : > { %10740 = vrcp.f32 %v8677_v63  ;;  %v8556_v3 = vadd.f32 %v15077_v0, %v8519_v35 }
 0x689   : > { %v10725_v10 = vpop.eup %10724  ;;  %10742 = vrcp.f32 %v8676_v17  ;;  %v9284_v50 = vmul.f32 -1.442695, %v8557_v37 }
 0x68a   : > { %v10727_v4 = vpop.eup %10726  ;;  %v8679_v29 = vadd.f32 1.0, %v10725_v10  ;;  %10744 = vpow2.f32 %v9282_v28  ;;  %v8525_v34 = vpop.xlane.xlu1 %8524  ;;  %v9283_v36 = vmul.f32 -1.442695, %v8556_v3 }
 0x68b   : > { %v8678_v53 = vadd.f32 1.0, %v10727_v4  ;;  %10746 = vpow2.f32 %v9281_v6  ;;  %v8559_v15 = vadd.f32 %v15077_v0, %v8525_v34  ;;  %v8523_v5 = vpop.xlane.xlu0 %8522 }
 0x68c   : > { %v10729_v14 = vpop.eup %10728  ;;  %10748 = vrcp.f32 %v8679_v29  ;;  %v8558_v57 = vadd.f32 %v15077_v0, %v8523_v5 }
 0x68d   : > { %v10731_v12 = vpop.eup %10730  ;;  %8769 = vst.msk [vmem:[%s15096_s14 + $0x88] sm:$0xff] %vm2239_vm3, %v10729_v14  ;;  %10750 = vrcp.f32 %v8678_v53  ;;  %v9286_v56 = vmul.f32 -1.442695, %v8559_v15 }
 0x68e   : > { %v10733_v23 = vpop.eup %10732  ;;  %8768 = vst.msk [vmem:[%s15096_s14 + $0x80] sm:$0xff] %vm2239_vm3, %v10731_v12  ;;  %10752 = vpow2.f32 %v9284_v50  ;;  %v9285_v41 = vmul.f32 -1.442695, %v8558_v57 }
 0x68f   : > { %v10735_v13 = vpop.eup %10734  ;;  %8771 = vst.msk [vmem:[%s15096_s14 + $0x98] sm:$0xff] %vm2239_vm3, %v10733_v23  ;;  %10754 = vpow2.f32 %v9283_v36 }
 0x690   : > { %v10737_v59 = vpop.eup %10736  ;;  %8770 = vst.msk [vmem:[%s15096_s14 + $0x90] sm:$0xff] %vm2239_vm3, %v10735_v13  ;;  %10756 = vpow2.f32 %v9286_v56 }
 0x691   : > { %v10739_v0 = vpop.eup %10738  ;;  %v8681_v51 = vadd.f32 1.0, %v10737_v59  ;;  %10758 = vpow2.f32 %v9285_v41 }
 0x692   : > { %v10741_v21 = vpop.eup %10740  ;;  %v8680_v20 = vadd.f32 1.0, %v10739_v0 }
 0x693   : > { %v10743_v60 = vpop.eup %10742  ;;  %8773 = vst.msk [vmem:[%s15096_s14 + $0xa8] sm:$0xff] %vm2239_vm3, %v10741_v21  ;;  %10760 = vrcp.f32 %v8681_v51 }
 0x694   : > { %v10745_v9 = vpop.eup %10744  ;;  %8772 = vst.msk [vmem:[%s15096_s14 + $0xa0] sm:$0xff] %vm2239_vm3, %v10743_v60  ;;  %10762 = vrcp.f32 %v8680_v20 }
 0x695   : > { %v10747_v46 = vpop.eup %10746  ;;  %v8683_v24 = vadd.f32 1.0, %v10745_v9 }
 0x696   : > { %v10749_v32 = vpop.eup %10748  ;;  %v8682_v44 = vadd.f32 1.0, %v10747_v46 }
 0x697   : > { %v10751_v26 = vpop.eup %10750  ;;  %8775 = vst.msk [vmem:[%s15096_s14 + $0xb8] sm:$0xff] %vm2239_vm3, %v10749_v32  ;;  %10764 = vrcp.f32 %v8683_v24 }
 0x698   : > { %v10753_v54 = vpop.eup %10752  ;;  %8774 = vst.msk [vmem:[%s15096_s14 + $0xb0] sm:$0xff] %vm2239_vm3, %v10751_v26  ;;  %10766 = vrcp.f32 %v8682_v44 }
 0x699   : > { %v10755_v33 = vpop.eup %10754  ;;  %v8685_v25 = vadd.f32 1.0, %v10753_v54 }
 0x69a   : > { %v10757_v30 = vpop.eup %10756  ;;  %v8684_v52 = vadd.f32 1.0, %v10755_v33 }
 0x69b   : > { %v10759_v11 = vpop.eup %10758  ;;  %10768 = vrcp.f32 %v8685_v25  ;;  %v8687_v39 = vadd.f32 1.0, %v10757_v30 }
 0x69c   : > { %10770 = vrcp.f32 %v8684_v52  ;;  %v8686_v31 = vadd.f32 1.0, %v10759_v11 }
 0x69d   : > { %v10761_v58 = vpop.eup %10760  ;;  %10772 = vrcp.f32 %v8687_v39 }
 0x69e   : > { %v10763_v18 = vpop.eup %10762  ;;  %8777 = vst.msk [vmem:[%s15096_s14 + $0xc8] sm:$0xff] %vm2239_vm3, %v10761_v58  ;;  %10774 = vrcp.f32 %v8686_v31 }
 0x69f   : > { %8776 = vst.msk [vmem:[%s15096_s14 + $0xc0] sm:$0xff] %vm2239_vm3, %v10763_v18 }
 0x6a1   : > { %v10765_v2 = vpop.eup %10764 }
 0x6a2   : > { %v10767_v27 = vpop.eup %10766  ;;  %8779 = vst.msk [vmem:[%s15096_s14 + $0xd8] sm:$0xff] %vm2239_vm3, %v10765_v2 }
 0x6a3   : > { %8778 = vst.msk [vmem:[%s15096_s14 + $0xd0] sm:$0xff] %vm2239_vm3, %v10767_v27 }
 0x6a5   : > { %v10769_v48 = vpop.eup %10768 }
 0x6a6   : > { %v10771_v45 = vpop.eup %10770  ;;  %8781 = vst.msk [vmem:[%s15096_s14 + $0xe8] sm:$0xff] %vm2239_vm3, %v10769_v48 }
 0x6a7   : > { %v10773_v7 = vpop.eup %10772  ;;  %8780 = vst.msk [vmem:[%s15096_s14 + $0xe0] sm:$0xff] %vm2239_vm3, %v10771_v45 }
 0x6a8   : > { %v10775_v8 = vpop.eup %10774  ;;  %8783 = vst.msk [vmem:[%s15096_s14 + $0xf8] sm:$0xff] %vm2239_vm3, %v10773_v7 }
 0x6a9   : > { %8782 = vst.msk [vmem:[%s15096_s14 + $0xf0] sm:$0xff] %vm2239_vm3, %v10775_v8 }
 0x6aa PF: > { %s23_s17 = sadd.s32 1, %s10806_s17  }
 0x6ab   : > { %p20_p4 = scmp.ge.s32.totalorder %s23_s17, 4  }
 0x6ad   :  { %22 = sbr.rel (!%p20_p4) target bundleno = 3 (0x3), region = 110 }

</bundles_post_ra>
